<compile_context>
chip_gen: v5e
topology: v5e:2x2
jax: 0.10.0
libtpu: 0.0.40
codegen_flags: <defaults>
</compile_context>

<pallas_src>
import math
import functools

import jax
import jax.numpy as jnp
from jax import lax
from jax.experimental import pallas as pl
from jax.experimental.pallas import tpu as pltpu

BN_EPS = 1e-5


def spatial_attention_kernel(x_ref, ste_ref, w1_ref, w2_ref, bqkv_ref,
                             wo_ref, bo_ref, out_ref, *, K, d, T, N, BB):
    """One grid step = BB batch elements, all T time steps, all K heads.

    x_ref    : [BB*T*N, D]   X rows, flattened (b, t, n)
    ste_ref  : [BB*T*N, D]   STE rows
    w1_ref   : [D, 3D]       X-half of packed (Wq|Wk|Wv), pre-transposed, BN-folded
    w2_ref   : [D, 3D]       STE-half of packed (Wq|Wk|Wv)
    bqkv_ref : [1, 3D]       packed biases, BN-folded
    wo_ref   : [D, D]        output FC weight, pre-transposed, BN-folded
    bo_ref   : [1, D]
    out_ref  : [BB*T*N, D]
    """
    D = K * d
    M = BB * T * N          # rows handled this grid step
    TB = BB * T             # independent spatial-attention problems (one per (b, t))

    # Fused Q/K/V projection over all rows; X and STE kept separate so the
    # wrapper never materializes cat(X, STE) in HBM.
    qkv = jnp.dot(x_ref[...], w1_ref[...], preferred_element_type=jnp.float32)
    qkv = qkv + jnp.dot(ste_ref[...], w2_ref[...],
                        preferred_element_type=jnp.float32)
    qkv = jnp.maximum(qkv + bqkv_ref[...], 0.0)           # conv bias + BN + ReLU
    qkv3 = qkv.reshape(TB, N, 3 * D)                      # sublane split at mult-of-8: free

    wo = wo_ref[...]                                      # [D, D]
    scale = jnp.float32(1.0 / math.sqrt(d))
    qk_dims = (((2,), (2,)), ((0,), (0,)))                # bnd,bmd -> bnm
    pv_dims = (((2,), (1,)), ((0,), (0,)))                # bnm,bmd -> bnd

    # Per-head attention, batched over all (b, t).  K is small & static.
    acc = None
    for h in range(K):
        qh = qkv3[:, :, h * d:(h + 1) * d]                        # [TB, N, d]
        kh = qkv3[:, :, D + h * d:D + (h + 1) * d]                # [TB, N, d]
        vh = qkv3[:, :, 2 * D + h * d:2 * D + (h + 1) * d]        # [TB, N, d]

        s = lax.dot_general(qh, kh, qk_dims,
                            preferred_element_type=jnp.float32) * scale   # [TB, N, N]
        s = s - jnp.max(s, axis=-1, keepdims=True)
        e = jnp.exp(s)
        # NOTE: pl.reciprocal(approx=True) would move the divide to the EUP but
        # can add ~1e-3 relative error per softmax row; kept exact so the 1e-4
        # correctness tolerance holds (now only K reciprocals per step anyway).
        p = e * pl.reciprocal(jnp.sum(e, axis=-1, keepdims=True), approx=False)

        oh = lax.dot_general(p, vh, pv_dims,
                             preferred_element_type=jnp.float32)          # [TB, N, d]
        ch = jnp.dot(oh.reshape(M, d), wo[h * d:(h + 1) * d, :],
                     preferred_element_type=jnp.float32)                  # [M, D]
        acc = ch if acc is None else acc + ch

    # Final FC bias + BN + ReLU; single contiguous block store.
    out_ref[...] = jnp.maximum(acc + bo_ref[...], 0.0)


def _pick_batch_block(B, cap=32):
    """Batches per grid step.

    v7x has 2 TensorCores/chip -> keep >= 2 parallel grid steps when possible.
    Single-TC chips (v5e / v6e) prefer one big step: grid=(B,) is just a serial
    loop paying ~0.35us/step on a ~1-2us kernel.  Cap the block so very large B
    still fits comfortably in VMEM (~100 KiB per batch element).
    """
    try:
        kind = jax.devices()[0].device_kind.lower().replace(" ", "")
    except Exception:
        kind = ""
    dual_core = ("v7" in kind) or ("7x" in kind)
    want_steps = 2 if (dual_core and B >= 2) else 1
    bb = max(1, B // want_steps)
    bb = min(bb, cap)
    while B % bb:               # ensure bb divides B
        bb -= 1
    return bb


def spatial_attention(X, STE, params, *, K, d, batch_block=None):
    B, T, N, D = X.shape
    assert D == K * d
    R = T * N
    bn_scale = 1.0 / math.sqrt(1.0 + BN_EPS)

    # Host-side (free) plumbing: flatten (b, t, n) -> rows (pure reshape, no
    # HBM copy) and fuse / pre-transpose / BN-fold the tiny weights.
    x2 = X.reshape(B * R, D)
    ste2 = STE.reshape(B * R, D)
    wqkv_t = (jnp.concatenate([params["wq"], params["wk"], params["wv"]],
                              axis=0) * bn_scale).T                        # [2D, 3D]
    w1 = wqkv_t[:D, :]                                                     # X half
    w2 = wqkv_t[D:, :]                                                     # STE half
    bqkv = jnp.concatenate([params["bq"], params["bk"], params["bv"]],
                           axis=-1) * bn_scale                             # [1, 3D]
    wo_t = (params["wo"] * bn_scale).T                                     # [D, D]
    bo = params["bo"] * bn_scale                                           # [1, D]

    bb = batch_block if batch_block is not None else _pick_batch_block(B)
    assert B % bb == 0
    num_steps = B // bb
    MB = bb * R

    kernel = functools.partial(spatial_attention_kernel,
                               K=K, d=d, T=T, N=N, BB=bb)
    rows = lambda i: (i, 0)
    full = lambda i: (0, 0)

    out = pl.pallas_call(
        kernel,
        out_shape=jax.ShapeDtypeStruct((B * R, D), jnp.float32),
        grid_spec=pltpu.PrefetchScalarGridSpec(
            num_scalar_prefetch=0,
            grid=(num_steps,),
            in_specs=[
                pl.BlockSpec((MB, D), rows),           # X rows
                pl.BlockSpec((MB, D), rows),           # STE rows
                pl.BlockSpec((D, 3 * D), full),        # W1
                pl.BlockSpec((D, 3 * D), full),        # W2
                pl.BlockSpec((1, 3 * D), full),        # bqkv
                pl.BlockSpec((D, D), full),            # Wo
                pl.BlockSpec((1, D), full),            # bo
            ],
            out_specs=pl.BlockSpec((MB, D), rows),
        ),
        compiler_params=pltpu.CompilerParams(
            dimension_semantics=("parallel",)),
    )(x2, ste2, w1, w2, bqkv, wo_t, bo)

    return out.reshape(B, T, N, D)


def reference(X, STE, params, *, K, d):
    """Pure-JAX reference mirroring the PyTorch forward (eval-mode BN, default stats)."""
    x = jnp.concatenate([X, STE], axis=-1)
    bn_scale = 1.0 / math.sqrt(1.0 + BN_EPS)

    def fc(inp, w, b):
        return jnp.maximum((inp @ w.T + b) * bn_scale, 0.0)

    q = fc(x, params["wq"], params["bq"])
    k = fc(x, params["wk"], params["bk"])
    v = fc(x, params["wv"], params["bv"])
    q = jnp.concatenate(jnp.split(q, K, axis=-1), axis=0)   # [K*B, T, N, d]
    k = jnp.concatenate(jnp.split(k, K, axis=-1), axis=0)
    v = jnp.concatenate(jnp.split(v, K, axis=-1), axis=0)
    attn = jnp.einsum("btnd,btmd->btnm", q, k) / math.sqrt(d)
    attn = jax.nn.softmax(attn, axis=-1)
    out = jnp.einsum("btnm,btmd->btnd", attn, v)
    out = jnp.concatenate(jnp.split(out, K, axis=0), axis=-1)  # [B, T, N, D]
    return fc(out, params["wo"], params["bo"])


def xavier_uniform(key, out_dim, in_dim):
    bound = math.sqrt(6.0 / (in_dim + out_dim))
    return jax.random.uniform(key, (out_dim, in_dim), jnp.float32, -bound, bound)


if __name__ == "__main__":
    B, T, N = 2, 8, 16          # batch, num_step, num_vertex
    K, d = 4, 8                 # heads, per-head dim
    D = K * d

    key = jax.random.PRNGKey(0)
    kx, kste, k1, k2, k3, k4 = jax.random.split(key, 6)

    X = jax.random.normal(kx, (B, T, N, D), jnp.float32)
    STE = jax.random.normal(kste, (B, T, N, D), jnp.float32)

    params = {
        "wq": xavier_uniform(k1, D, 2 * D), "bq": jnp.zeros((1, D), jnp.float32),
        "wk": xavier_uniform(k2, D, 2 * D), "bk": jnp.zeros((1, D), jnp.float32),
        "wv": xavier_uniform(k3, D, 2 * D), "bv": jnp.zeros((1, D), jnp.float32),
        "wo": xavier_uniform(k4, D, D),     "bo": jnp.zeros((1, D), jnp.float32),
    }

    # TODO(synk): training-mode BatchNorm (batch-stat computation + running-stat
    # updates) is not modeled; eval-mode stats are folded into the weights.
    out = spatial_attention(X, STE, params, K=K, d=d)
    out = jax.block_until_ready(out)

    ref = reference(X, STE, params, K=K, d=d)
    assert out.shape == (B, T, N, D)
    assert jnp.allclose(out, ref, rtol=1e-4, atol=1e-4), "mismatch vs reference"

    print("KERNEL_OK")
</pallas_src>

<mosaic_0001>
module attributes {stable_mosaic.version = 11 : i64} {
  func.func @spatial_attention_kernel(%arg0: i32, %arg1: memref<256x32xf32, #tpu.memory_space<vmem>>, %arg2: memref<256x32xf32, #tpu.memory_space<vmem>>, %arg3: memref<32x96xf32, #tpu.memory_space<vmem>>, %arg4: memref<32x96xf32, #tpu.memory_space<vmem>>, %arg5: memref<1x96xf32, #tpu.memory_space<vmem>>, %arg6: memref<32x32xf32, #tpu.memory_space<vmem>>, %arg7: memref<1x32xf32, #tpu.memory_space<vmem>>, %arg8: memref<256x32xf32, #tpu.memory_space<vmem>>) attributes {dimension_semantics = [#tpu.dimension_semantics<parallel>], iteration_bounds = array<i64: 1>, scalar_prefetch = 0 : i64, scratch_operands = 0 : i64, tpu.core_type = #tpu.core_type<tc>, window_params = [{transform_indices = @transform_0, window_bounds = array<i64: 256, 32>}, {transform_indices = @transform_1, window_bounds = array<i64: 256, 32>}, {pipeline_mode = #tpu.pipeline_mode<synchronous>, transform_indices = @transform_2, window_bounds = array<i64: 32, 96>}, {pipeline_mode = #tpu.pipeline_mode<synchronous>, transform_indices = @transform_3, window_bounds = array<i64: 32, 96>}, {pipeline_mode = #tpu.pipeline_mode<synchronous>, transform_indices = @transform_4, window_bounds = array<i64: 1, 96>}, {pipeline_mode = #tpu.pipeline_mode<synchronous>, transform_indices = @transform_5, window_bounds = array<i64: 32, 32>}, {pipeline_mode = #tpu.pipeline_mode<synchronous>, transform_indices = @transform_6, window_bounds = array<i64: 1, 32>}, {transform_indices = @transform_7, window_bounds = array<i64: 256, 32>}]} {
    %c0 = arith.constant 0 : index
    %c0_0 = arith.constant 0 : index
    %0 = vector.load %arg1[%c0, %c0_0] : memref<256x32xf32, #tpu.memory_space<vmem>>, vector<256x32xf32>
    %c0_1 = arith.constant 0 : index
    %c0_2 = arith.constant 0 : index
    %1 = vector.load %arg3[%c0_1, %c0_2] : memref<32x96xf32, #tpu.memory_space<vmem>>, vector<32x96xf32>
    %cst = arith.constant dense<0.000000e+00> : vector<256x96xf32>
    %2 = tpu.matmul %0, %1, %cst {dimension_numbers = #tpu.dot_dimension_numbers<[1], [0], [0], [1], [0, 0, 1, 1], [], []>} : vector<256x32xf32>, vector<32x96xf32>, vector<256x96xf32> -> vector<256x96xf32>
    %c0_3 = arith.constant 0 : index
    %c0_4 = arith.constant 0 : index
    %3 = vector.load %arg2[%c0_3, %c0_4] : memref<256x32xf32, #tpu.memory_space<vmem>>, vector<256x32xf32>
    %c0_5 = arith.constant 0 : index
    %c0_6 = arith.constant 0 : index
    %4 = vector.load %arg4[%c0_5, %c0_6] : memref<32x96xf32, #tpu.memory_space<vmem>>, vector<32x96xf32>
    %cst_7 = arith.constant dense<0.000000e+00> : vector<256x96xf32>
    %5 = tpu.matmul %3, %4, %cst_7 {dimension_numbers = #tpu.dot_dimension_numbers<[1], [0], [0], [1], [0, 0, 1, 1], [], []>} : vector<256x32xf32>, vector<32x96xf32>, vector<256x96xf32> -> vector<256x96xf32>
    %6 = arith.addf %2, %5 : vector<256x96xf32>
    %c0_8 = arith.constant 0 : index
    %c0_9 = arith.constant 0 : index
    %7 = vector.load %arg5[%c0_8, %c0_9] : memref<1x96xf32, #tpu.memory_space<vmem>>, vector<1x96xf32>
    %8 = vector.broadcast %7 : vector<1x96xf32> to vector<256x96xf32>
    %9 = arith.addf %6, %8 : vector<256x96xf32>
    %cst_10 = arith.constant 0.000000e+00 : f32
    %10 = vector.broadcast %cst_10 : f32 to vector<256x96xf32>
    %11 = arith.maximumf %9, %10 : vector<256x96xf32>
    %12 = vector.shape_cast %11 : vector<256x96xf32> to vector<16x16x96xf32>
    %c0_11 = arith.constant 0 : index
    %c0_12 = arith.constant 0 : index
    %13 = vector.load %arg6[%c0_11, %c0_12] : memref<32x32xf32, #tpu.memory_space<vmem>>, vector<32x32xf32>
    %14 = vector.extract_strided_slice %12 {offsets = [0, 0, 0], sizes = [16, 16, 8], strides = [1, 1, 1]} : vector<16x16x96xf32> to vector<16x16x8xf32>
    %15 = vector.extract_strided_slice %12 {offsets = [0, 0, 32], sizes = [16, 16, 8], strides = [1, 1, 1]} : vector<16x16x96xf32> to vector<16x16x8xf32>
    %16 = vector.extract_strided_slice %12 {offsets = [0, 0, 64], sizes = [16, 16, 8], strides = [1, 1, 1]} : vector<16x16x96xf32> to vector<16x16x8xf32>
    %cst_13 = arith.constant dense<0.000000e+00> : vector<16x16x16xf32>
    %17 = tpu.matmul %14, %15, %cst_13 {dimension_numbers = #tpu.dot_dimension_numbers<[2], [2], [1], [1], [0, 0, 0, 1, 1, 1], [0], [0]>} : vector<16x16x8xf32>, vector<16x16x8xf32>, vector<16x16x16xf32> -> vector<16x16x16xf32>
    %cst_14 = arith.constant 0.353553385 : f32
    %18 = vector.broadcast %cst_14 : f32 to vector<16x16x16xf32>
    %19 = arith.mulf %17, %18 : vector<16x16x16xf32>
    %cst_15 = arith.constant dense<0xFF800000> : vector<16x16xf32>
    %20 = vector.multi_reduction <maximumf>, %19, %cst_15 [2] : vector<16x16x16xf32> to vector<16x16xf32>
    %21 = vector.shape_cast %20 : vector<16x16xf32> to vector<16x16x1xf32>
    %22 = vector.broadcast %21 : vector<16x16x1xf32> to vector<16x16x16xf32>
    %23 = arith.subf %19, %22 : vector<16x16x16xf32>
    %24 = math.exp %23 : vector<16x16x16xf32>
    %cst_16 = arith.constant dense<0.000000e+00> : vector<16x16xf32>
    %25 = vector.multi_reduction <add>, %24, %cst_16 [2] : vector<16x16x16xf32> to vector<16x16xf32>
    %26 = vector.shape_cast %25 : vector<16x16xf32> to vector<16x16x1xf32>
    %27 = tpu.reciprocal %26 : vector<16x16x1xf32> -> vector<16x16x1xf32>
    %28 = vector.broadcast %27 : vector<16x16x1xf32> to vector<16x16x16xf32>
    %29 = arith.mulf %24, %28 : vector<16x16x16xf32>
    %cst_17 = arith.constant dense<0.000000e+00> : vector<16x16x8xf32>
    %30 = tpu.matmul %29, %16, %cst_17 {dimension_numbers = #tpu.dot_dimension_numbers<[2], [1], [1], [2], [0, 0, 0, 1, 1, 2], [0], [0]>} : vector<16x16x16xf32>, vector<16x16x8xf32>, vector<16x16x8xf32> -> vector<16x16x8xf32>
    %31 = vector.shape_cast %30 : vector<16x16x8xf32> to vector<256x8xf32>
    %32 = vector.extract_strided_slice %13 {offsets = [0, 0], sizes = [8, 32], strides = [1, 1]} : vector<32x32xf32> to vector<8x32xf32>
    %cst_18 = arith.constant dense<0.000000e+00> : vector<256x32xf32>
    %33 = tpu.matmul %31, %32, %cst_18 {dimension_numbers = #tpu.dot_dimension_numbers<[1], [0], [0], [1], [0, 0, 1, 1], [], []>} : vector<256x8xf32>, vector<8x32xf32>, vector<256x32xf32> -> vector<256x32xf32>
    %34 = vector.extract_strided_slice %12 {offsets = [0, 0, 8], sizes = [16, 16, 8], strides = [1, 1, 1]} : vector<16x16x96xf32> to vector<16x16x8xf32>
    %35 = vector.extract_strided_slice %12 {offsets = [0, 0, 40], sizes = [16, 16, 8], strides = [1, 1, 1]} : vector<16x16x96xf32> to vector<16x16x8xf32>
    %36 = vector.extract_strided_slice %12 {offsets = [0, 0, 72], sizes = [16, 16, 8], strides = [1, 1, 1]} : vector<16x16x96xf32> to vector<16x16x8xf32>
    %cst_19 = arith.constant dense<0.000000e+00> : vector<16x16x16xf32>
    %37 = tpu.matmul %34, %35, %cst_19 {dimension_numbers = #tpu.dot_dimension_numbers<[2], [2], [1], [1], [0, 0, 0, 1, 1, 1], [0], [0]>} : vector<16x16x8xf32>, vector<16x16x8xf32>, vector<16x16x16xf32> -> vector<16x16x16xf32>
    %cst_20 = arith.constant 0.353553385 : f32
    %38 = vector.broadcast %cst_20 : f32 to vector<16x16x16xf32>
    %39 = arith.mulf %37, %38 : vector<16x16x16xf32>
    %cst_21 = arith.constant dense<0xFF800000> : vector<16x16xf32>
    %40 = vector.multi_reduction <maximumf>, %39, %cst_21 [2] : vector<16x16x16xf32> to vector<16x16xf32>
    %41 = vector.shape_cast %40 : vector<16x16xf32> to vector<16x16x1xf32>
    %42 = vector.broadcast %41 : vector<16x16x1xf32> to vector<16x16x16xf32>
    %43 = arith.subf %39, %42 : vector<16x16x16xf32>
    %44 = math.exp %43 : vector<16x16x16xf32>
    %cst_22 = arith.constant dense<0.000000e+00> : vector<16x16xf32>
    %45 = vector.multi_reduction <add>, %44, %cst_22 [2] : vector<16x16x16xf32> to vector<16x16xf32>
    %46 = vector.shape_cast %45 : vector<16x16xf32> to vector<16x16x1xf32>
    %47 = tpu.reciprocal %46 : vector<16x16x1xf32> -> vector<16x16x1xf32>
    %48 = vector.broadcast %47 : vector<16x16x1xf32> to vector<16x16x16xf32>
    %49 = arith.mulf %44, %48 : vector<16x16x16xf32>
    %cst_23 = arith.constant dense<0.000000e+00> : vector<16x16x8xf32>
    %50 = tpu.matmul %49, %36, %cst_23 {dimension_numbers = #tpu.dot_dimension_numbers<[2], [1], [1], [2], [0, 0, 0, 1, 1, 2], [0], [0]>} : vector<16x16x16xf32>, vector<16x16x8xf32>, vector<16x16x8xf32> -> vector<16x16x8xf32>
    %51 = vector.shape_cast %50 : vector<16x16x8xf32> to vector<256x8xf32>
    %52 = vector.extract_strided_slice %13 {offsets = [8, 0], sizes = [8, 32], strides = [1, 1]} : vector<32x32xf32> to vector<8x32xf32>
    %cst_24 = arith.constant dense<0.000000e+00> : vector<256x32xf32>
    %53 = tpu.matmul %51, %52, %cst_24 {dimension_numbers = #tpu.dot_dimension_numbers<[1], [0], [0], [1], [0, 0, 1, 1], [], []>} : vector<256x8xf32>, vector<8x32xf32>, vector<256x32xf32> -> vector<256x32xf32>
    %54 = arith.addf %33, %53 : vector<256x32xf32>
    %55 = vector.extract_strided_slice %12 {offsets = [0, 0, 16], sizes = [16, 16, 8], strides = [1, 1, 1]} : vector<16x16x96xf32> to vector<16x16x8xf32>
    %56 = vector.extract_strided_slice %12 {offsets = [0, 0, 48], sizes = [16, 16, 8], strides = [1, 1, 1]} : vector<16x16x96xf32> to vector<16x16x8xf32>
    %57 = vector.extract_strided_slice %12 {offsets = [0, 0, 80], sizes = [16, 16, 8], strides = [1, 1, 1]} : vector<16x16x96xf32> to vector<16x16x8xf32>
    %cst_25 = arith.constant dense<0.000000e+00> : vector<16x16x16xf32>
    %58 = tpu.matmul %55, %56, %cst_25 {dimension_numbers = #tpu.dot_dimension_numbers<[2], [2], [1], [1], [0, 0, 0, 1, 1, 1], [0], [0]>} : vector<16x16x8xf32>, vector<16x16x8xf32>, vector<16x16x16xf32> -> vector<16x16x16xf32>
    %cst_26 = arith.constant 0.353553385 : f32
    %59 = vector.broadcast %cst_26 : f32 to vector<16x16x16xf32>
    %60 = arith.mulf %58, %59 : vector<16x16x16xf32>
    %cst_27 = arith.constant dense<0xFF800000> : vector<16x16xf32>
    %61 = vector.multi_reduction <maximumf>, %60, %cst_27 [2] : vector<16x16x16xf32> to vector<16x16xf32>
    %62 = vector.shape_cast %61 : vector<16x16xf32> to vector<16x16x1xf32>
    %63 = vector.broadcast %62 : vector<16x16x1xf32> to vector<16x16x16xf32>
    %64 = arith.subf %60, %63 : vector<16x16x16xf32>
    %65 = math.exp %64 : vector<16x16x16xf32>
    %cst_28 = arith.constant dense<0.000000e+00> : vector<16x16xf32>
    %66 = vector.multi_reduction <add>, %65, %cst_28 [2] : vector<16x16x16xf32> to vector<16x16xf32>
    %67 = vector.shape_cast %66 : vector<16x16xf32> to vector<16x16x1xf32>
    %68 = tpu.reciprocal %67 : vector<16x16x1xf32> -> vector<16x16x1xf32>
    %69 = vector.broadcast %68 : vector<16x16x1xf32> to vector<16x16x16xf32>
    %70 = arith.mulf %65, %69 : vector<16x16x16xf32>
    %cst_29 = arith.constant dense<0.000000e+00> : vector<16x16x8xf32>
    %71 = tpu.matmul %70, %57, %cst_29 {dimension_numbers = #tpu.dot_dimension_numbers<[2], [1], [1], [2], [0, 0, 0, 1, 1, 2], [0], [0]>} : vector<16x16x16xf32>, vector<16x16x8xf32>, vector<16x16x8xf32> -> vector<16x16x8xf32>
    %72 = vector.shape_cast %71 : vector<16x16x8xf32> to vector<256x8xf32>
    %73 = vector.extract_strided_slice %13 {offsets = [16, 0], sizes = [8, 32], strides = [1, 1]} : vector<32x32xf32> to vector<8x32xf32>
    %cst_30 = arith.constant dense<0.000000e+00> : vector<256x32xf32>
    %74 = tpu.matmul %72, %73, %cst_30 {dimension_numbers = #tpu.dot_dimension_numbers<[1], [0], [0], [1], [0, 0, 1, 1], [], []>} : vector<256x8xf32>, vector<8x32xf32>, vector<256x32xf32> -> vector<256x32xf32>
    %75 = arith.addf %54, %74 : vector<256x32xf32>
    %76 = vector.extract_strided_slice %12 {offsets = [0, 0, 24], sizes = [16, 16, 8], strides = [1, 1, 1]} : vector<16x16x96xf32> to vector<16x16x8xf32>
    %77 = vector.extract_strided_slice %12 {offsets = [0, 0, 56], sizes = [16, 16, 8], strides = [1, 1, 1]} : vector<16x16x96xf32> to vector<16x16x8xf32>
    %78 = vector.extract_strided_slice %12 {offsets = [0, 0, 88], sizes = [16, 16, 8], strides = [1, 1, 1]} : vector<16x16x96xf32> to vector<16x16x8xf32>
    %cst_31 = arith.constant dense<0.000000e+00> : vector<16x16x16xf32>
    %79 = tpu.matmul %76, %77, %cst_31 {dimension_numbers = #tpu.dot_dimension_numbers<[2], [2], [1], [1], [0, 0, 0, 1, 1, 1], [0], [0]>} : vector<16x16x8xf32>, vector<16x16x8xf32>, vector<16x16x16xf32> -> vector<16x16x16xf32>
    %cst_32 = arith.constant 0.353553385 : f32
    %80 = vector.broadcast %cst_32 : f32 to vector<16x16x16xf32>
    %81 = arith.mulf %79, %80 : vector<16x16x16xf32>
    %cst_33 = arith.constant dense<0xFF800000> : vector<16x16xf32>
    %82 = vector.multi_reduction <maximumf>, %81, %cst_33 [2] : vector<16x16x16xf32> to vector<16x16xf32>
    %83 = vector.shape_cast %82 : vector<16x16xf32> to vector<16x16x1xf32>
    %84 = vector.broadcast %83 : vector<16x16x1xf32> to vector<16x16x16xf32>
    %85 = arith.subf %81, %84 : vector<16x16x16xf32>
    %86 = math.exp %85 : vector<16x16x16xf32>
    %cst_34 = arith.constant dense<0.000000e+00> : vector<16x16xf32>
    %87 = vector.multi_reduction <add>, %86, %cst_34 [2] : vector<16x16x16xf32> to vector<16x16xf32>
    %88 = vector.shape_cast %87 : vector<16x16xf32> to vector<16x16x1xf32>
    %89 = tpu.reciprocal %88 : vector<16x16x1xf32> -> vector<16x16x1xf32>
    %90 = vector.broadcast %89 : vector<16x16x1xf32> to vector<16x16x16xf32>
    %91 = arith.mulf %86, %90 : vector<16x16x16xf32>
    %cst_35 = arith.constant dense<0.000000e+00> : vector<16x16x8xf32>
    %92 = tpu.matmul %91, %78, %cst_35 {dimension_numbers = #tpu.dot_dimension_numbers<[2], [1], [1], [2], [0, 0, 0, 1, 1, 2], [0], [0]>} : vector<16x16x16xf32>, vector<16x16x8xf32>, vector<16x16x8xf32> -> vector<16x16x8xf32>
    %93 = vector.shape_cast %92 : vector<16x16x8xf32> to vector<256x8xf32>
    %94 = vector.extract_strided_slice %13 {offsets = [24, 0], sizes = [8, 32], strides = [1, 1]} : vector<32x32xf32> to vector<8x32xf32>
    %cst_36 = arith.constant dense<0.000000e+00> : vector<256x32xf32>
    %95 = tpu.matmul %93, %94, %cst_36 {dimension_numbers = #tpu.dot_dimension_numbers<[1], [0], [0], [1], [0, 0, 1, 1], [], []>} : vector<256x8xf32>, vector<8x32xf32>, vector<256x32xf32> -> vector<256x32xf32>
    %96 = arith.addf %75, %95 : vector<256x32xf32>
    %c0_37 = arith.constant 0 : index
    %c0_38 = arith.constant 0 : index
    %97 = vector.load %arg7[%c0_37, %c0_38] : memref<1x32xf32, #tpu.memory_space<vmem>>, vector<1x32xf32>
    %98 = vector.broadcast %97 : vector<1x32xf32> to vector<256x32xf32>
    %99 = arith.addf %96, %98 : vector<256x32xf32>
    %cst_39 = arith.constant 0.000000e+00 : f32
    %100 = vector.broadcast %cst_39 : f32 to vector<256x32xf32>
    %101 = arith.maximumf %99, %100 : vector<256x32xf32>
    %c0_40 = arith.constant 0 : index
    %c0_41 = arith.constant 0 : index
    %102 = vector.load %arg8[%c0_40, %c0_41] : memref<256x32xf32, #tpu.memory_space<vmem>>, vector<256x32xf32>
    tpu.vector_store %arg8[%c0_40, %c0_41], %101 {strides = array<i32>} : memref<256x32xf32, #tpu.memory_space<vmem>>, vector<256x32xf32>,
    return
  }
  func.func @transform_0(%arg0: i32) -> (i32, i32) {
    %c0_i32 = arith.constant 0 : i32
    %c0_i32_0 = arith.constant 0 : i32
    return %arg0, %c0_i32 : i32, i32
  }
  func.func @transform_1(%arg0: i32) -> (i32, i32) {
    %c0_i32 = arith.constant 0 : i32
    %c0_i32_0 = arith.constant 0 : i32
    return %arg0, %c0_i32 : i32, i32
  }
  func.func @transform_2(%arg0: i32) -> (i32, i32) {
    %c0_i32 = arith.constant 0 : i32
    %c0_i32_0 = arith.constant 0 : i32
    %c0_i32_1 = arith.constant 0 : i32
    return %c0_i32, %c0_i32_0 : i32, i32
  }
  func.func @transform_3(%arg0: i32) -> (i32, i32) {
    %c0_i32 = arith.constant 0 : i32
    %c0_i32_0 = arith.constant 0 : i32
    %c0_i32_1 = arith.constant 0 : i32
    return %c0_i32, %c0_i32_0 : i32, i32
  }
  func.func @transform_4(%arg0: i32) -> (i32, i32) {
    %c0_i32 = arith.constant 0 : i32
    %c0_i32_0 = arith.constant 0 : i32
    %c0_i32_1 = arith.constant 0 : i32
    return %c0_i32, %c0_i32_0 : i32, i32
  }
  func.func @transform_5(%arg0: i32) -> (i32, i32) {
    %c0_i32 = arith.constant 0 : i32
    %c0_i32_0 = arith.constant 0 : i32
    %c0_i32_1 = arith.constant 0 : i32
    return %c0_i32, %c0_i32_0 : i32, i32
  }
  func.func @transform_6(%arg0: i32) -> (i32, i32) {
    %c0_i32 = arith.constant 0 : i32
    %c0_i32_0 = arith.constant 0 : i32
    %c0_i32_1 = arith.constant 0 : i32
    return %c0_i32, %c0_i32_0 : i32, i32
  }
  func.func @transform_7(%arg0: i32) -> (i32, i32) {
    %c0_i32 = arith.constant 0 : i32
    %c0_i32_0 = arith.constant 0 : i32
    return %arg0, %c0_i32 : i32, i32
  }
}

</mosaic_0001>

<bundles_post_ra>
// kernel: tpu_custom_call.1
= control target key start
LH: loop header
LB: loop body
LE: loop exit
PB: predicated region body
PF: predicated region fallthrough
CT: control target
= control target key end

     0   :  { %vm98_vm0 = vcmask 261120   ;;  %s10926_s12 = smov 96   ;;  %s10927_s17 = smov 88   ;;  %vm595_vm1 = vcmask 64512   ;;  %vm1214_vm2 = vcmask 130048   ;;  %s16316_s3 = inlined_call_operand.vmem [shape: f32[32,96], index: 3, kind: input, shape index: {}]   ;;  %s16317_s2 = inlined_call_operand.vmem [shape: f32[32,96], index: 2, kind: input, shape index: {}]   ;;  %s16318_s1 = inlined_call_operand.vmem [shape: f32[256,32], index: 1, kind: input, shape index: {}]   ;;  %s16319_s0 = inlined_call_operand.vmem [shape: f32[256,32], index: 0, kind: input, shape index: {}]   ;;  %s16320_s4 = inlined_call_operand.vmem [shape: f32[1,96], index: 4, kind: input, shape index: {}]   ;;  %s16321_s5 = inlined_call_operand.vmem [shape: f32[32,32], index: 5, kind: input, shape index: {}]   ;;  %s16322_s6 = inlined_call_operand.vmem [shape: f32[1,32], index: 6, kind: input, shape index: {}]   ;;  %s16323_s7 = inlined_call_operand.vmem [shape: f32[256,32], index: 7, kind: output, shape index: {}]  }
   0x1   :  { %v97_v0 = vld [vmem:[%s16316_s3 + $0x18] sm:$0xff]  ;;  %v96_v2 = vld [vmem:[%s16316_s3 + $0x10] sm:$0xff]  ;;  %v95_v4 = vld [vmem:[%s16316_s3 + $0x8] sm:$0xff]  ;;  %s10929_s27 = smov 56   ;;  %s10933_s30 = smov 72  }
   0x2   :  { %v61_v1 = vld [vmem:[%s16317_s2 + $0x18] sm:$0xff]  ;;  %207 = vmatpush.msra.mxu0 %v97_v0  ;;  %v60_v3 = vld [vmem:[%s16317_s2 + $0x10] sm:$0xff]  ;;  %v59_v5 = vld [vmem:[%s16317_s2 + $0x8] sm:$0xff]  ;;  %s10934_s8 = smov 104   ;;  %s10935_s13 = smov 40  }
   0x3   :  { %416 = vmatpush.msra.mxu1 %v61_v1  ;;  %10075 = vmatpush.msra.mxu2 %v61_v1  ;;  %v94_v6 = vld [vmem:[%s16316_s3] sm:$0xff]  ;;  %v63_v10 = vld [vmem:[%s16318_s1 + $0x8] sm:$0xff]  ;;  %v64_v12 = vld [vmem:[%s16318_s1 + $0x10] sm:$0xff]  ;;  %s10928_s3 = smov 64  }
   0x4   :  { %208 = vmatpush.msra.mxu0 %v96_v2  ;;  %v58_v7 = vld [vmem:[%s16317_s2] sm:$0xff]  ;;  %v27_v11 = vld [vmem:[%s16319_s0 + $0x8] sm:$0xff]  ;;  %v28_v13 = vld [vmem:[%s16319_s0 + $0x10] sm:$0xff] }
   0x5   :  { %417 = vmatpush.msra.mxu1 %v60_v3  ;;  %10076 = vmatpush.msra.mxu2 %v60_v3  ;;  %v62_v8 = vld [vmem:[%s16318_s1] sm:$0xff]  ;;  %v65_v14 = vld [vmem:[%s16318_s1 + $0x18] sm:$0xff]  ;;  %v67_v18 = vld [vmem:[%s16318_s1 + $0x28] sm:$0xff] }
   0x6   :  { %209 = vmatpush.msra.mxu0 %v95_v4  ;;  %v26_v9 = vld [vmem:[%s16319_s0] sm:$0xff]  ;;  %v29_v15 = vld [vmem:[%s16319_s0 + $0x18] sm:$0xff]  ;;  %v31_v19 = vld [vmem:[%s16319_s0 + $0x28] sm:$0xff] }
   0x7   :  { %418 = vmatpush.msra.mxu1 %v59_v5  ;;  %10077 = vmatpush.msra.mxu2 %v59_v5  ;;  %v66_v16 = vld [vmem:[%s16318_s1 + $0x20] sm:$0xff]  ;;  %v68_v20 = vld [vmem:[%s16318_s1 + $0x30] sm:$0xff]  ;;  %v69_v22 = vld [vmem:[%s16318_s1 + $0x38] sm:$0xff] }
   0x8   :  { %210 = vmatpush.msra.mxu0 %v94_v6  ;;  %v30_v17 = vld [vmem:[%s16319_s0 + $0x20] sm:$0xff]  ;;  %v32_v21 = vld [vmem:[%s16319_s0 + $0x30] sm:$0xff]  ;;  %v33_v23 = vld [vmem:[%s16319_s0 + $0x38] sm:$0xff] }
   0x9   :  { %419 = vmatpush.msra.mxu1 %v58_v7  ;;  %9499 = vmatmul.msk.f32.vlgmr.msra.gmra.mxu0 %vm98_vm0, %v62_v8  ;;  %v70_v24 = vld [vmem:[%s16318_s1 + $0x40] sm:$0xff]  ;;  %v71_v26 = vld [vmem:[%s16318_s1 + $0x48] sm:$0xff]  ;;  %v72_v28 = vld [vmem:[%s16318_s1 + $0x50] sm:$0xff] }
   0xa   :  { %9531 = vmatmul.msk.f32.vlgmr.msra.gmra.mxu1 %vm98_vm0, %v26_v9  ;;  %10078 = vmatpush.msra.mxu2 %v58_v7  ;;  %v34_v25 = vld [vmem:[%s16319_s0 + $0x40] sm:$0xff]  ;;  %v35_v27 = vld [vmem:[%s16319_s0 + $0x48] sm:$0xff]  ;;  %v36_v29 = vld [vmem:[%s16319_s0 + $0x50] sm:$0xff] }
   0xb   :  { %v73_v30 = vld [vmem:[%s16318_s1 + $0x58] sm:$0xff]  ;;  %v74_v32 = vld [vmem:[%s16318_s1 + $0x60] sm:$0xff]  ;;  %v75_v34 = vld [vmem:[%s16318_s1 + $0x68] sm:$0xff] }
   0xc   :  { %v37_v31 = vld [vmem:[%s16319_s0 + $0x58] sm:$0xff]  ;;  %v38_v33 = vld [vmem:[%s16319_s0 + $0x60] sm:$0xff]  ;;  %v39_v35 = vld [vmem:[%s16319_s0 + $0x68] sm:$0xff] }
   0xd   :  { %v76_v36 = vld [vmem:[%s16318_s1 + $0x70] sm:$0xff]  ;;  %v77_v38 = vld [vmem:[%s16318_s1 + $0x78] sm:$0xff]  ;;  %v11131_v40 = vld [vmem:[%s16320_s4] ss:$0 sm:$0xff]  ;;  %s10925_s4 = smov 120  }
   0xe   :  { %v40_v37 = vld [vmem:[%s16319_s0 + $0x70] sm:$0xff]  ;;  %v41_v39 = vld [vmem:[%s16319_s0 + $0x78] sm:$0xff]  ;;  %v78_v43 = vld [vmem:[%s16318_s1 + $0x80] sm:$0xff] }
   0xf   :  { %v42_v44 = vld [vmem:[%s16319_s0 + $0x80] sm:$0xff]  ;;  %v79_v50 = vld [vmem:[%s16318_s1 + $0x88] sm:$0xff]  ;;  %v80_v58 = vld [vmem:[%s16318_s1 + $0x90] sm:$0xff] }
  0x10   :  { %v43_v51 = vld [vmem:[%s16319_s0 + $0x88] sm:$0xff]  ;;  %v44_v59 = vld [vmem:[%s16319_s0 + $0x90] sm:$0xff]  ;;  %v81_v1 = vld [vmem:[%s16318_s1 + $0x98] sm:$0xff] }
  0x11   :  { %9500 = vmatmul.msk.f32.gmra.mxu0 %vm98_vm0, %v63_v10  ;;  %v45_v2 = vld [vmem:[%s16319_s0 + $0x98] sm:$0xff]  ;;  %v48_v7 = vld [vmem:[%s16319_s0 + $0xb0] sm:$0xff]  ;;  %v82_v10 = vld [vmem:[%s16318_s1 + $0xa0] sm:$0xff] }
  0x12   :  { %9532 = vmatmul.msk.f32.gmra.mxu1 %vm98_vm0, %v27_v11  ;;  %9553 = vmatmul.msk.f32.vlgmr.msra.gmra.mxu2 %vm98_vm0, %v48_v7  ;;  %v46_v11 = vld [vmem:[%s16319_s0 + $0xa0] sm:$0xff] }
  0x19   :  { %9501 = vmatmul.msk.f32.gmra.mxu0 %vm98_vm0, %v64_v12 }
  0x1a   :  { %9533 = vmatmul.msk.f32.gmra.mxu1 %vm98_vm0, %v28_v13 }
  0x21   :  { %9502 = vmatmul.msk.f32.gmra.mxu0 %vm98_vm0, %v65_v14 }
  0x22   :  { %9534 = vmatmul.msk.f32.gmra.mxu1 %vm98_vm0, %v29_v15  ;;  %v49_v15 = vld [vmem:[%s16319_s0 + $0xb8] sm:$0xff] }
  0x23   :  { %9554 = vmatmul.msk.f32.gmra.mxu2 %vm98_vm0, %v49_v15  ;;  %v91_v15 = vld [vmem:[%s16318_s1 + $0xe8] sm:$0xff] }
  0x29   :  { %9503 = vmatmul.msk.f32.gmra.mxu0 %vm98_vm0, %v66_v16 }
  0x2a   :  { %9535 = vmatmul.msk.f32.gmra.mxu1 %vm98_vm0, %v30_v17 }
  0x31   :  { %9504 = vmatmul.msk.f32.gmra.mxu0 %vm98_vm0, %v67_v18  ;;  %v83_v18 = vld [vmem:[%s16318_s1 + $0xa8] sm:$0xff] }
  0x32   :  { %9536 = vmatmul.msk.f32.gmra.mxu1 %vm98_vm0, %v31_v19  ;;  %v47_v19 = vld [vmem:[%s16319_s0 + $0xa8] sm:$0xff] }
  0x39   :  { %9505 = vmatmul.msk.f32.gmra.mxu0 %vm98_vm0, %v68_v20 }
  0x3a   :  { %9537 = vmatmul.msk.f32.gmra.mxu1 %vm98_vm0, %v32_v21 }
  0x41   :  { %9506 = vmatmul.msk.f32.gmra.mxu0 %vm98_vm0, %v69_v22 }
  0x42   :  { %9538 = vmatmul.msk.f32.gmra.mxu1 %vm98_vm0, %v33_v23  ;;  %v50_v23 = vld [vmem:[%s16319_s0 + $0xc0] sm:$0xff] }
  0x43   :  { %9555 = vmatmul.msk.f32.gmra.mxu2 %vm98_vm0, %v50_v23 }
  0x49   :  { %9507 = vmatmul.msk.f32.gmra.mxu0 %vm98_vm0, %v70_v24 }
  0x4a   :  { %9539 = vmatmul.msk.f32.gmra.mxu1 %vm98_vm0, %v34_v25  ;;  %v84_v25 = vld [vmem:[%s16318_s1 + $0xb0] sm:$0xff] }
  0x51   :  { %9508 = vmatmul.msk.f32.gmra.mxu0 %vm98_vm0, %v71_v26 }
  0x52   :  { %9540 = vmatmul.msk.f32.gmra.mxu1 %vm98_vm0, %v35_v27 }
  0x59   :  { %9509 = vmatmul.msk.f32.gmra.mxu0 %vm98_vm0, %v72_v28  ;;  %v51_v28 = vld [vmem:[%s16319_s0 + $0xc8] sm:$0xff] }
  0x5a   :  { %9541 = vmatmul.msk.f32.gmra.mxu1 %vm98_vm0, %v36_v29  ;;  %9556 = vmatmul.msk.f32.gmra.mxu2 %vm98_vm0, %v51_v28 }
  0x61   :  { %9510 = vmatmul.msk.f32.gmra.mxu0 %vm98_vm0, %v73_v30  ;;  %v85_v30 = vld [vmem:[%s16318_s1 + $0xb8] sm:$0xff] }
  0x62   :  { %9542 = vmatmul.msk.f32.gmra.mxu1 %vm98_vm0, %v37_v31 }
  0x69   :  { %9511 = vmatmul.msk.f32.gmra.mxu0 %vm98_vm0, %v74_v32 }
  0x6a   :  { %9543 = vmatmul.msk.f32.gmra.mxu1 %vm98_vm0, %v38_v33 }
  0x71   :  { %9512 = vmatmul.msk.f32.gmra.mxu0 %vm98_vm0, %v75_v34 }
  0x72   :  { %9544 = vmatmul.msk.f32.gmra.mxu1 %vm98_vm0, %v39_v35 }
  0x79   :  { %9513 = vmatmul.msk.f32.gmra.mxu0 %vm98_vm0, %v76_v36 }
  0x7a   :  { %9545 = vmatmul.msk.f32.gmra.mxu1 %vm98_vm0, %v40_v37  ;;  %v52_v37 = vld [vmem:[%s16319_s0 + $0xd0] sm:$0xff] }
  0x7b   :  { %9557 = vmatmul.msk.f32.gmra.mxu2 %vm98_vm0, %v52_v37 }
  0x81   :  { %9514 = vmatmul.msk.f32.gmra.mxu0 %vm98_vm0, %v77_v38 }
  0x82   :  { %9546 = vmatmul.msk.f32.gmra.mxu1 %vm98_vm0, %v41_v39  ;;  %v86_v39 = vld [vmem:[%s16318_s1 + $0xc0] sm:$0xff] }
  0x86   :  { %v212_v41 = vpop.f32.mrf.mxu0 }
  0x87   :  { %v421_v42 = vpop.f32.mrf.mxu1 }
  0x88   :  { %v422_v45 = vadd.f32 %v421_v42, %v212_v41 }
  0x89   :  { %9515 = vmatmul.msk.f32.gmra.mxu0 %vm98_vm0, %v78_v43 }
  0x8a   :  { %v521_v46 = vadd.f32 %v11131_v40, %v422_v45  ;;  %9547 = vmatmul.msk.f32.gmra.mxu1 %vm98_vm0, %v42_v44  ;;  %v53_v44 = vld [vmem:[%s16319_s0 + $0xd8] sm:$0xff] }
  0x8b   :  { %9558 = vmatmul.msk.f32.gmra.mxu2 %vm98_vm0, %v53_v44 }
  0x8c   :  { %v11142_v47 = vmax.f32 %v521_v46, 0.0  ;;  %v87_v46 = vld [vmem:[%s16318_s1 + $0xc8] sm:$0xff] }
  0x8e   :  { %16505 = vst [vmem:[#allocation2_spill] sm:$0xff] %v11142_v47  ;;  %2543 = vrot.lane.b32.xlu2 %v11142_v47, %s10925_s4  ;;  %591 = vrot.lane.b32.xlu0 %v11142_v47, %s10926_s12  ;;  %v215_v48 = vpop.f32.mrf.mxu0 }
  0x8f   :  { %v424_v49 = vpop.f32.mrf.mxu1 }
  0x90   :  { %v425_v52 = vadd.f32 %v424_v49, %v215_v48 }
  0x91   :  { %9516 = vmatmul.msk.f32.gmra.mxu0 %vm98_vm0, %v79_v50 }
  0x92   :  { %v522_v53 = vadd.f32 %v11131_v40, %v425_v52  ;;  %9548 = vmatmul.msk.f32.gmra.mxu1 %vm98_vm0, %v43_v51  ;;  %v54_v52 = vld [vmem:[%s16319_s0 + $0xe0] sm:$0xff] }
  0x93   :  { %9559 = vmatmul.msk.f32.gmra.mxu2 %vm98_vm0, %v54_v52 }
  0x94   :  { %v11157_v54 = vmax.f32 %v522_v53, 0.0 }
  0x96   :  { %16506 = vst [vmem:[#allocation3_spill] sm:$0xff] %v11157_v54  ;;  %2545 = vrot.lane.b32.xlu1 %v11157_v54, %s10925_s4  ;;  %2547 = vrot.lane.b32.xlu0 %v11142_v47, %s10927_s17  ;;  %v10091_v55 = vpack.i.bf16 %v11157_v54, %v11142_v47  ;;  %v218_v56 = vpop.f32.mrf.mxu0 }
  0x97   :  { %v427_v57 = vpop.f32.mrf.mxu1 }
  0x98   :  { %v428_v60 = vadd.f32 %v427_v57, %v218_v56  ;;  %10092 = vrot.lane.b32.xlu2 %v10091_v55, %s10928_s3  ;;  %v88_v55 = vld [vmem:[%s16318_s1 + $0xd0] sm:$0xff] }
  0x99   :  { %9517 = vmatmul.msk.f32.gmra.mxu0 %vm98_vm0, %v80_v58 }
  0x9a   :  { %v523_v61 = vadd.f32 %v11131_v40, %v428_v60  ;;  %9549 = vmatmul.msk.f32.gmra.mxu1 %vm98_vm0, %v44_v59  ;;  %v55_v60 = vld [vmem:[%s16319_s0 + $0xe8] sm:$0xff] }
  0x9b   :  { %9560 = vmatmul.msk.f32.gmra.mxu2 %vm98_vm0, %v55_v60 }
  0x9c   :  { %v11175_v62 = vmax.f32 %v523_v61, 0.0  ;;  %v89_v61 = vld [vmem:[%s16318_s1 + $0xd8] sm:$0xff] }
  0x9e   :  { %629 = vrot.lane.b32.xlu1 %v11175_v62, %s10926_s12  ;;  %593 = vrot.lane.b32.xlu0 %v11157_v54, %s10926_s12  ;;  %v221_v63 = vpop.f32.mrf.mxu0 }
  0x9f   :  { %v430_v0 = vpop.f32.mrf.mxu1 }
  0xa0   :  { %v431_v3 = vadd.f32 %v430_v0, %v221_v63  ;;  %2549 = vrot.lane.b32.xlu2 %v11157_v54, %s10927_s17 }
  0xa1   :  { %9518 = vmatmul.msk.f32.gmra.mxu0 %vm98_vm0, %v81_v1 }
  0xa2   :  { %v524_v4 = vadd.f32 %v11131_v40, %v431_v3  ;;  %9550 = vmatmul.msk.f32.gmra.mxu1 %vm98_vm0, %v45_v2 }
  0xa4   :  { %v11192_v5 = vmax.f32 %v524_v4, 0.0  ;;  %v56_v4 = vld [vmem:[%s16319_s0 + $0xf0] sm:$0xff] }
  0xa5   :  { %9561 = vmatmul.msk.f32.gmra.mxu2 %vm98_vm0, %v56_v4 }
  0xa6   :  { %16507 = vst [vmem:[#allocation4_spill] sm:$0xff] %v11192_v5  ;;  %2582 = vrot.lane.b32.xlu1 %v11175_v62, %s10925_s4  ;;  %v10096_v6 = vpack.i.bf16 %v11192_v5, %v11175_v62  ;;  %v224_v8 = vpop.f32.mrf.mxu0 }
  0xa7   :  { %v433_v9 = vpop.f32.mrf.mxu1 }
  0xa8   :  { %2586 = vrot.lane.b32.xlu2 %v11175_v62, %s10927_s17  ;;  %10097 = vrot.lane.b32.xlu0 %v10096_v6, %s10928_s3  ;;  %v434_v12 = vadd.f32 %v433_v9, %v224_v8  ;;  %v90_v6 = vld [vmem:[%s16318_s1 + $0xe0] sm:$0xff] }
  0xa9   :  { %9519 = vmatmul.msk.f32.gmra.mxu0 %vm98_vm0, %v82_v10 }
  0xaa   :  { %v525_v13 = vadd.f32 %v11131_v40, %v434_v12  ;;  %9551 = vmatmul.msk.f32.gmra.mxu1 %vm98_vm0, %v46_v11 }
  0xac   :  { %v11214_v14 = vmax.f32 %v525_v13, 0.0  ;;  %v57_v13 = vld [vmem:[%s16319_s0 + $0xf8] sm:$0xff] }
  0xad   :  { %9562 = vmatmul.msk.f32.gmra.mxu2 %vm98_vm0, %v57_v13 }
  0xae   :  { %16508 = vst [vmem:[#allocation5_spill] sm:$0xff] %v11214_v14  ;;  %631 = vrot.lane.b32.xlu1 %v11192_v5, %s10926_s12  ;;  %v227_v16 = vpop.f32.mrf.mxu0 }
  0xaf   :  { %v436_v17 = vpop.f32.mrf.mxu1 }
  0xb0   :  { %666 = vrot.lane.b32.xlu2 %v11214_v14, %s10926_s12  ;;  %2584 = vrot.lane.b32.xlu0 %v11192_v5, %s10925_s4  ;;  %v437_v20 = vadd.f32 %v436_v17, %v227_v16 }
  0xb1   :  { %9520 = vmatmul.msk.f32.gmra.mxu0 %vm98_vm0, %v83_v18 }
  0xb2   :  { %v526_v21 = vadd.f32 %v11131_v40, %v437_v20  ;;  %9552 = vmatmul.msk.f32.gmra.mxu1 %vm98_vm0, %v47_v19 }
  0xb4   :  { %v11235_v22 = vmax.f32 %v526_v21, 0.0  ;;  %v92_v21 = vld [vmem:[%s16318_s1 + $0xf0] sm:$0xff] }
  0xb6   :  { %16509 = vst [vmem:[#allocation6_spill] sm:$0xff] %v11235_v22  ;;  %2588 = vrot.lane.b32.xlu1 %v11192_v5, %s10927_s17  ;;  %v230_v24 = vpop.f32.mrf.mxu0  ;;  %v10101_v33 = vpack.i.bf16 %v11235_v22, %v11214_v14  ;;  %v11273_v36 = vpack.i.bf16 %v11214_v14, %v11235_v22 }
  0xb7   :  { %v439_v26 = vpop.f32.mrf.mxu1 }
  0xb8   :  { %668 = vrot.lane.b32.xlu2 %v11235_v22, %s10926_s12  ;;  %2621 = vrot.lane.b32.xlu0 %v11214_v14, %s10925_s4  ;;  %v440_v27 = vadd.f32 %v439_v26, %v230_v24  ;;  %16511 = vst [vmem:[#allocation8_spill] sm:$0xff] %v11273_v36 }
  0xb9   :  { %9521 = vmatmul.msk.f32.gmra.mxu0 %vm98_vm0, %v84_v25 }
  0xba   :  { %v527_v32 = vadd.f32 %v11131_v40, %v440_v27 }
  0xbc   :  { %v11268_v35 = vmax.f32 %v527_v32, 0.0 }
  0xbe   :  { %2625 = vrot.lane.b32.xlu1 %v11214_v14, %s10927_s17  ;;  %v233_v29 = vpop.f32.mrf.mxu0  ;;  %16510 = vst [vmem:[#allocation7_spill] sm:$0xff] %v11268_v35 }
  0xbf   :  { %v442_v31 = vpop.f32.mrf.mxu1 }
  0xc0   :  { %2623 = vrot.lane.b32.xlu2 %v11235_v22, %s10925_s4  ;;  %2627 = vrot.lane.b32.xlu0 %v11235_v22, %s10927_s17  ;;  %v443_v34 = vadd.f32 %v442_v31, %v233_v29  ;;  %v93_v29 = vld [vmem:[%s16318_s1 + $0xf8] sm:$0xff]  ;;  %s10930_s1 = smov 80  }
  0xc1   :  { %9522 = vmatmul.msk.f32.gmra.mxu0 %vm98_vm0, %v85_v30 }
  0xc2   :  { %v528_v41 = vadd.f32 %v11131_v40, %v443_v34 }
  0xc4   :  { %v11288_v43 = vmax.f32 %v528_v41, 0.0 }
  0xc6   :  { %10102 = vrot.lane.b32.xlu1 %v10101_v33, %s10928_s3  ;;  %v236_v38 = vpop.f32.mrf.mxu0  ;;  %16512 = vst [vmem:[#allocation9_spill] sm:$0xff] %v11288_v43  ;;  %v10111_v51 = vpack.i.bf16 %v11288_v43, %v11268_v35  ;;  %v11326_v59 = vpack.i.bf16 %v11268_v35, %v11288_v43 }
  0xc7   :  { %v445_v42 = vpop.f32.mrf.mxu1 }
  0xc8   :  { %10107 = vrot.lane.b32.xlu2 %v11273_v36, %s10929_s27  ;;  %703 = vrot.lane.b32.xlu0 %v11268_v35, %s10926_s12  ;;  %v446_v48 = vadd.f32 %v445_v42, %v236_v38  ;;  %16514 = vst [vmem:[#allocation11_spill] sm:$0xff] %v11326_v59 }
  0xc9   :  { %9523 = vmatmul.msk.f32.gmra.mxu0 %vm98_vm0, %v86_v39 }
  0xca   :  { %v529_v50 = vadd.f32 %v11131_v40, %v446_v48 }
  0xcc   :  { %v11319_v56 = vmax.f32 %v529_v50, 0.0 }
  0xce   :  { %705 = vrot.lane.b32.xlu1 %v11288_v43, %s10926_s12  ;;  %v239_v45 = vpop.f32.mrf.mxu0  ;;  %16513 = vst [vmem:[#allocation10_spill] sm:$0xff] %v11319_v56 }
  0xcf   :  { %v448_v49 = vpop.f32.mrf.mxu1 }
  0xd0   :  { %2660 = vrot.lane.b32.xlu2 %v11268_v35, %s10925_s4  ;;  %2664 = vrot.lane.b32.xlu0 %v11268_v35, %s10927_s17  ;;  %v449_v57 = vadd.f32 %v448_v49, %v239_v45 }
  0xd1   :  { %9524 = vmatmul.msk.f32.gmra.mxu0 %vm98_vm0, %v87_v46 }
  0xd2   :  { %v530_v63 = vadd.f32 %v11131_v40, %v449_v57 }
  0xd4   :  { %v11341_v2 = vmax.f32 %v530_v63, 0.0 }
  0xd6   :  { %2662 = vrot.lane.b32.xlu1 %v11288_v43, %s10925_s4  ;;  %v242_v53 = vpop.f32.mrf.mxu0  ;;  %16515 = vst [vmem:[#allocation12_spill] sm:$0xff] %v11341_v2  ;;  %v10121_v12 = vpack.i.bf16 %v11341_v2, %v11319_v56 }
  0xd7   :  { %v451_v58 = vpop.f32.mrf.mxu1 }
  0xd8   :  { %2666 = vrot.lane.b32.xlu2 %v11288_v43, %s10927_s17  ;;  %10112 = vrot.lane.b32.xlu0 %v10111_v51, %s10928_s3  ;;  %v452_v1 = vadd.f32 %v451_v58, %v242_v53 }
  0xd9   :  { %9525 = vmatmul.msk.f32.gmra.mxu0 %vm98_vm0, %v88_v55 }
  0xda   :  { %v531_v3 = vadd.f32 %v11131_v40, %v452_v1 }
  0xdc   :  { %v11357_v8 = vmax.f32 %v531_v3, 0.0 }
  0xde   :  { %2699 = vrot.lane.b32.xlu1 %v11319_v56, %s10925_s4  ;;  %v245_v0 = vpop.f32.mrf.mxu0  ;;  %16516 = vst [vmem:[#allocation13_spill] sm:$0xff] %v11357_v8 }
  0xdf   :  { %v454_v7 = vpop.f32.mrf.mxu1 }
  0xe0   :  { %740 = vrot.lane.b32.xlu2 %v11319_v56, %s10926_s12  ;;  %10117 = vrot.lane.b32.xlu0 %v11326_v59, %s10929_s27  ;;  %v455_v11 = vadd.f32 %v454_v7, %v245_v0 }
  0xe1   :  { %9526 = vmatmul.msk.f32.gmra.mxu0 %vm98_vm0, %v89_v61 }
  0xe2   :  { %v532_v17 = vadd.f32 %v11131_v40, %v455_v11 }
  0xe4   :  { %v11378_v20 = vmax.f32 %v532_v17, 0.0 }
  0xe6   :  { %2705 = vrot.lane.b32.xlu1 %v11341_v2, %s10927_s17  ;;  %v248_v10 = vpop.f32.mrf.mxu0  ;;  %16517 = vst [vmem:[#allocation14_spill] sm:$0xff] %v11378_v20  ;;  %v10126_v25 = vpack.i.bf16 %v11378_v20, %v11357_v8 }
  0xe7   :  { %v457_v16 = vpop.f32.mrf.mxu1 }
  0xe8   :  { %2703 = vrot.lane.b32.xlu2 %v11319_v56, %s10927_s17  ;;  %742 = vrot.lane.b32.xlu0 %v11341_v2, %s10926_s12  ;;  %v2544_v9 = vpop.permute.xlu2 %2543  ;;  %v458_v27 = vadd.f32 %v457_v16, %v248_v10 }
  0xe9   :  { %9527 = vmatmul.msk.f32.gmra.mxu0 %vm98_vm0, %v90_v6 }
  0xea   :  { %v533_v32 = vadd.f32 %v11131_v40, %v458_v27 }
  0xec   :  { %v11408_v38 = vmax.f32 %v533_v32, 0.0 }
  0xee   :  { %777 = vrot.lane.b32.xlu1 %v11357_v8, %s10926_s12  ;;  %v251_v19 = vpop.f32.mrf.mxu0  ;;  %16519 = vst [vmem:[#allocation16_spill] sm:$0xff] %v11408_v38 }
  0xef   :  { %v460_v24 = vpop.f32.mrf.mxu1 }
  0xf0   :  { %10122 = vrot.lane.b32.xlu2 %v10121_v12, %s10928_s3  ;;  %2701 = vrot.lane.b32.xlu0 %v11341_v2, %s10925_s4  ;;  %v461_v26 = vadd.f32 %v460_v24, %v251_v19 }
  0xf1   :  { %9528 = vmatmul.msk.f32.gmra.mxu0 %vm98_vm0, %v91_v15 }
  0xf2   :  { %v11375_v18 = vpop.permute.xlu2 %10092  ;;  %v534_v30 = vadd.f32 %v11131_v40, %v461_v26 }
  0xf4   :  { %v11406_v34 = vmax.f32 %v534_v30, 0.0 }
  0xf6   :  { %2742 = vrot.lane.b32.xlu1 %v11357_v8, %s10927_s17  ;;  %v254_v28 = vpop.f32.mrf.mxu0  ;;  %16518 = vst [vmem:[#allocation15_spill] sm:$0xff] %v11406_v34  ;;  %v11429_v53 = vpack.i.bf16 %v11408_v38, %v11406_v34  ;;  %v10131_v57 = vpack.i.bf16 %v11406_v34, %v11408_v38 }
  0xf7   :  { %v463_v37 = vpop.f32.mrf.mxu1 }
  0xf8   :  { %779 = vrot.lane.b32.xlu2 %v11378_v20, %s10926_s12  ;;  %2738 = vrot.lane.b32.xlu0 %v11357_v8, %s10925_s4  ;;  %v464_v45 = vadd.f32 %v463_v37, %v254_v28  ;;  %16520 = vst [vmem:[#allocation17_spill] sm:$0xff] %v11429_v53 }
  0xf9   :  { %9529 = vmatmul.msk.f32.gmra.mxu0 %vm98_vm0, %v92_v21 }
  0xfa   :  { %v2550_v23 = vpop.permute.xlu2 %2549  ;;  %v535_v50 = vadd.f32 %v11131_v40, %v464_v45 }
  0xfb   :  { %9659 = vmatpush.xpose.msk.msrb.mxu0 %vm595_vm1, %v2550_v23 }
  0xfc   :  { %v11432_v55 = vmax.f32 %v535_v50, 0.0 }
  0xfe   :  { %10127 = vrot.lane.b32.xlu1 %v10126_v25, %s10928_s3  ;;  %v257_v42 = vpop.f32.mrf.mxu0  ;;  %16521 = vst [vmem:[#allocation18_spill] sm:$0xff] %v11432_v55 }
  0xff   :  { %v466_v46 = vpop.f32.mrf.mxu1 }
 0x100   :  { %2740 = vrot.lane.b32.xlu2 %v11378_v20, %s10925_s4  ;;  %2744 = vrot.lane.b32.xlu0 %v11378_v20, %s10927_s17  ;;  %v592_v31 = vpop.permute.xlu0 %591  ;;  %v467_v58 = vadd.f32 %v466_v46, %v257_v42 }
 0x101   :  { %9530 = vmatmul.msk.f32.gmra.mxu0 %vm98_vm0, %v93_v29 }
 0x102   :  { %v11404_v33 = vpop.permute.xlu2 %2586  ;;  %v536_v63 = vadd.f32 %v11131_v40, %v467_v58 }
 0x104   :  { %v11450_v4 = vmax.f32 %v536_v63, 0.0 }
 0x106   :  { %816 = vrot.lane.b32.xlu1 %v11406_v34, %s10926_s12  ;;  %v260_v52 = vpop.f32.mrf.mxu0  ;;  %16523 = vst [vmem:[#allocation20_spill] sm:$0xff] %v11450_v4  ;;  %v10141_v13 = vpack.i.bf16 %v11450_v4, %v11432_v55 }
 0x107   :  { %v469_v61 = vpop.f32.mrf.mxu1 }
 0x108   :  { %v2546_v39 = vpop.permute.xlu1 %2545  ;;  %2777 = vrot.lane.b32.xlu2 %v11408_v38, %s10925_s4  ;;  %814 = vrot.lane.b32.xlu0 %v11408_v38, %s10926_s12  ;;  %v2548_v41 = vpop.permute.xlu0 %2547  ;;  %v470_v7 = vadd.f32 %v469_v61, %v260_v52 }
 0x109   :  { %9660 = vmatpush.xpose.msk.msrb.mxu0 %vm595_vm1, %v2548_v41 }
 0x10a   :  { %v667_v44 = vpop.permute.xlu2 %666  ;;  %v537_v12 = vadd.f32 %v11131_v40, %v470_v7 }
 0x10c   :  { %9661 = vmatmul.msk.f32.vlgmr.msrb.gmra.mxu0 %vm595_vm1, %v2544_v9  ;;  %v11475_v19 = vmax.f32 %v537_v12, 0.0 }
 0x10e   :  { %2779 = vrot.lane.b32.xlu1 %v11406_v34, %s10925_s4  ;;  %v263_v3 = vpop.f32.mrf.mxu0  ;;  %16525 = vst [vmem:[#allocation22_spill] sm:$0xff] %v11475_v19 }
 0x10f   :  { %v472_v11 = vpop.f32.mrf.mxu1 }
 0x110   :  { %v630_v48 = vpop.permute.xlu1 %629  ;;  %2783 = vrot.lane.b32.xlu2 %v11406_v34, %s10927_s17  ;;  %2781 = vrot.lane.b32.xlu0 %v11408_v38, %s10927_s17  ;;  %v594_v49 = vpop.permute.xlu0 %593  ;;  %v473_v15 = vadd.f32 %v472_v11, %v263_v3 }
 0x111   :  { %9563 = vmatpush.xpose.msk.msrb.mxu2 %vm595_vm1, %v594_v49  ;;  %v487_v11 = vpop.f32.mrf.mxu2 }
 0x112   :  { %v669_v51 = vpop.permute.xlu2 %668  ;;  %v538_v21 = vadd.f32 %v11131_v40, %v473_v15 }
 0x114   :  { %9662 = vmatmul.msk.f32.gmra.mxu0 %vm595_vm1, %v2546_v39  ;;  %v11486_v26 = vmax.f32 %v538_v21, 0.0 }
 0x115   :  { %9564 = vmatpush.xpose.msk.msrb.mxu2 %vm595_vm1, %v592_v31 }
 0x116   :  { %10137 = vrot.lane.b32.xlu1 %v11429_v53, %s10929_s27  ;;  %v266_v16 = vpop.f32.mrf.mxu0  ;;  %16528 = vst [vmem:[#allocation25_spill] sm:$0xff] %v11486_v26 }
 0x117   :  { %v475_v25 = vpop.f32.mrf.mxu1 }
 0x118   :  { %v2583_v60 = vpop.permute.xlu1 %2582  ;;  %851 = vrot.lane.b32.xlu2 %v11432_v55, %s10926_s12  ;;  %10132 = vrot.lane.b32.xlu0 %v10131_v57, %s10928_s3  ;;  %v476_v31 = vadd.f32 %v475_v25, %v266_v16 }
 0x119   :  { %9571 = vmatpush.xpose.msk.msra.mxu2 %vm595_vm1, %v669_v51 }
 0x11a   :  { %9565 = vmatmul.msk.f32.vlgmr.msrb.gmra.mxu2 %vm595_vm1, %v11142_v47  ;;  %v11445_v0 = vpop.permute.xlu0 %10097  ;;  %v11447_v1 = vpop.permute.xlu2 %2623  ;;  %v539_v37 = vadd.f32 %v11131_v40, %v476_v31 }
 0x11b   :  { %16522 = vst [vmem:[#allocation19_spill] sm:$0xff] %v11447_v1 }
 0x11c   :  { %v11517_v46 = vmax.f32 %v539_v37, 0.0 }
 0x11d   :  { %9572 = vmatpush.xpose.msk.msra.mxu2 %vm595_vm1, %v667_v44  ;;  %v10146_v44 = vpack.i.bf16 %v11486_v26, %v11475_v19 }
 0x11e   :  { %2816 = vrot.lane.b32.xlu1 %v11432_v55, %s10925_s4  ;;  %v269_v28 = vpop.f32.mrf.mxu0  ;;  %16532 = vst [vmem:[#allocation29_spill] sm:$0xff] %v11517_v46 }
 0x11f   :  { %v478_v32 = vpop.f32.mrf.mxu1 }
 0x120   :  { %v632_v6 = vpop.permute.xlu1 %631  ;;  %2820 = vrot.lane.b32.xlu2 %v11432_v55, %s10927_s17  ;;  %853 = vrot.lane.b32.xlu0 %v11450_v4, %s10926_s12  ;;  %v479_v45 = vadd.f32 %v478_v32, %v269_v28  ;;  %v490_v32 = vpop.f32.mrf.mxu2 }
 0x121   :  { %9567 = vmatpush.xpose.msk.msra.mxu3 %vm595_vm1, %v632_v6 }
 0x122   :  { %9566 = vmatmul.msk.f32.gmra.mxu2 %vm595_vm1, %v11157_v54  ;;  %v2585_v9 = vpop.permute.xlu0 %2584  ;;  %v11461_v10 = vpop.permute.xlu2 %10107 }
 0x123   :  { %16524 = vst [vmem:[#allocation21_spill] sm:$0xff] %v11461_v10 }
 0x125   :  { %9568 = vmatpush.xpose.msk.msra.mxu3 %vm595_vm1, %v630_v48  ;;  %v540_v48 = vadd.f32 %v11131_v40, %v479_v45 }
 0x126   :  { %2822 = vrot.lane.b32.xlu1 %v11450_v4, %s10927_s17  ;;  %v272_v42 = vpop.f32.mrf.mxu0 }
 0x127   :  { %v481_v50 = vpop.f32.mrf.mxu1  ;;  %v11528_v57 = vmax.f32 %v540_v48, 0.0 }
 0x128   :  { %9569 = vmatmul.msk.f32.vlgmr.msra.gmra.mxu3 %vm595_vm1, %v11175_v62  ;;  %v2589_v17 = vpop.permute.xlu1 %2588  ;;  %10142 = vrot.lane.b32.xlu2 %v10141_v13, %s10928_s3 }
 0x129   :  { %2818 = vrot.lane.b32.xlu0 %v11450_v4, %s10925_s4  ;;  %9663 = vmatpush.xpose.msk.msrb.mxu1 %vm595_vm1, %v2589_v17  ;;  %16534 = vst [vmem:[#allocation31_spill] sm:$0xff] %v11528_v57  ;;  %v10151_v13 = vpack.i.bf16 %v11528_v57, %v11517_v46 }
 0x12a   :  { %v11478_v23 = vpop.permute.xlu0 %2621  ;;  %v11480_v24 = vpop.permute.xlu2 %2660  ;;  %9573 = vmatmul.msk.f32.vlgmr.msra.gmra.mxu2 %vm595_vm1, %v11214_v14 }
 0x12b   :  { %16526 = vst [vmem:[#allocation23_spill] sm:$0xff] %v11478_v23 }
 0x12c   :  { %16527 = vst [vmem:[#allocation24_spill] sm:$0xff] %v11480_v24 }
 0x12d   :  { %9664 = vmatpush.xpose.msk.msrb.mxu1 %vm595_vm1, %v11404_v33 }
 0x12e   :  { %888 = vrot.lane.b32.xlu1 %v11475_v19, %s10926_s12  ;;  %v275_v58 = vpop.f32.mrf.mxu0 }
 0x12f   :  { %v484_v7 = vpop.f32.mrf.mxu1 }
 0x130   :  { %9570 = vmatmul.msk.f32.gmra.mxu3 %vm595_vm1, %v11192_v5  ;;  %v11492_v27 = vpop.permute.xlu1 %2625  ;;  %890 = vrot.lane.b32.xlu2 %v11486_v26, %s10926_s12  ;;  %v485_v15 = vadd.f32 %v484_v7, %v275_v58 }
 0x131   :  { %16529 = vst [vmem:[#allocation26_spill] sm:$0xff] %v11492_v27  ;;  %2855 = vrot.lane.b32.xlu0 %v11475_v19, %s10925_s4  ;;  %9665 = vmatmul.msk.f32.vlgmr.msrb.gmra.mxu1 %vm595_vm1, %v2583_v60  ;;  %v482_v60 = vadd.f32 %v481_v50, %v272_v42 }
 0x132   :  { %v11499_v29 = vpop.permute.xlu0 %2627  ;;  %v11501_v30 = vpop.permute.xlu2 %2666  ;;  %9574 = vmatmul.msk.f32.gmra.mxu2 %vm595_vm1, %v11235_v22  ;;  %v542_v25 = vadd.f32 %v11131_v40, %v485_v15 }
 0x133   :  { %16530 = vst [vmem:[#allocation27_spill] sm:$0xff] %v11499_v29  ;;  %v541_v63 = vadd.f32 %v11131_v40, %v482_v60  ;;  %v493_v60 = vpop.f32.mrf.mxu2 }
 0x134   :  { %16531 = vst [vmem:[#allocation28_spill] sm:$0xff] %v11501_v30  ;;  %v11563_v31 = vmax.f32 %v542_v25, 0.0 }
 0x135   :  { %v11546_v12 = vmax.f32 %v541_v63, 0.0 }
 0x136   :  { %2859 = vrot.lane.b32.xlu1 %v11475_v19, %s10927_s17  ;;  %16538 = vst [vmem:[#allocation35_spill] sm:$0xff] %v11563_v31 }
 0x137   :  { %16536 = vst [vmem:[#allocation33_spill] sm:$0xff] %v11546_v12 }
 0x138   :  { %v11507_v33 = vpop.permute.xlu1 %10102  ;;  %2857 = vrot.lane.b32.xlu2 %v11486_v26, %s10925_s4 }
 0x139   :  { %2861 = vrot.lane.b32.xlu0 %v11486_v26, %s10927_s17  ;;  %9666 = vmatmul.msk.f32.gmra.mxu1 %vm595_vm1, %v2585_v9  ;;  %v278_v9 = vpop.f32.mrf.mxu0 }
 0x13a   :  { %v704_v39 = vpop.permute.xlu0 %703  ;;  %v741_v41 = vpop.permute.xlu2 %740 }
 0x13e   :  { %10147 = vrot.lane.b32.xlu1 %v10146_v44, %s10928_s3 }
 0x140   :  { %v706_v49 = vpop.permute.xlu1 %705  ;;  %2894 = vrot.lane.b32.xlu2 %v11517_v46, %s10925_s4 }
 0x141   :  { %925 = vrot.lane.b32.xlu0 %v11517_v46, %s10926_s12  ;;  %9575 = vmatpush.xpose.msk.msrb.mxu3 %vm595_vm1, %v706_v49  ;;  %v281_v28 = vpop.f32.mrf.mxu0  ;;  %v10156_v49 = vpack.i.bf16 %v11563_v31, %v11546_v12 }
 0x142   :  { %v11526_v51 = vpop.permute.xlu0 %2664  ;;  %v2704_v52 = vpop.permute.xlu2 %2703  ;;  %v491_v48 = vadd.f32 %v490_v32, %v281_v28 }
 0x143   :  { %16533 = vst [vmem:[#allocation30_spill] sm:$0xff] %v11526_v51 }
 0x144   :  { %v544_v63 = vadd.f32 %v11131_v40, %v491_v48 }
 0x145   :  { %9576 = vmatpush.xpose.msk.msrb.mxu3 %vm595_vm1, %v704_v39  ;;  %v488_v39 = vadd.f32 %v487_v11, %v278_v9 }
 0x146   :  { %927 = vrot.lane.b32.xlu1 %v11528_v57, %s10926_s12  ;;  %v11594_v9 = vmax.f32 %v544_v63, 0.0 }
 0x147   :  { %v543_v45 = vadd.f32 %v11131_v40, %v488_v39 }
 0x148   :  { %v11533_v61 = vpop.permute.xlu1 %2662  ;;  %2900 = vrot.lane.b32.xlu2 %v11528_v57, %s10927_s17  ;;  %9577 = vmatmul.msk.f32.vlgmr.msrb.gmra.mxu3 %vm595_vm1, %v11268_v35  ;;  %16541 = vst [vmem:[#allocation38_spill] sm:$0xff] %v11594_v9 }
 0x149   :  { %16535 = vst [vmem:[#allocation32_spill] sm:$0xff] %v11533_v61  ;;  %2898 = vrot.lane.b32.xlu0 %v11517_v46, %s10927_s17  ;;  %v284_v58 = vpop.f32.mrf.mxu0 }
 0x14a   :  { %v11542_v3 = vpop.permute.xlu0 %10112  ;;  %v11544_v6 = vpop.permute.xlu2 %10122  ;;  %v494_v25 = vadd.f32 %v493_v60, %v284_v58 }
 0x14c   :  { %v545_v32 = vadd.f32 %v11131_v40, %v494_v25 }
 0x14e   :  { %2896 = vrot.lane.b32.xlu1 %v11528_v57, %s10925_s4 }
 0x150   :  { %v2700_v16 = vpop.permute.xlu1 %2699  ;;  %962 = vrot.lane.b32.xlu2 %v11546_v12, %s10926_s12  ;;  %9578 = vmatmul.msk.f32.gmra.mxu3 %vm595_vm1, %v11288_v43 }
 0x151   :  { %10152 = vrot.lane.b32.xlu0 %v10151_v13, %s10928_s3 }
 0x152   :  { %v11557_v17 = vpop.permute.xlu0 %10117  ;;  %v780_v21 = vpop.permute.xlu2 %779 }
 0x153   :  { %16537 = vst [vmem:[#allocation34_spill] sm:$0xff] %v11557_v17  ;;  %9583 = vmatpush.xpose.msk.msra.mxu3 %vm595_vm1, %v780_v21  ;;  %v496_v21 = vpop.f32.mrf.mxu2 }
 0x156   :  { %2933 = vrot.lane.b32.xlu1 %v11546_v12, %s10925_s4 }
 0x158   :  { %v2706_v37 = vpop.permute.xlu1 %2705  ;;  %2937 = vrot.lane.b32.xlu2 %v11546_v12, %s10927_s17 }
 0x159   :  { %964 = vrot.lane.b32.xlu0 %v11563_v31, %s10926_s12  ;;  %9675 = vmatpush.xpose.msk.msra.mxu0 %vm595_vm1, %v2706_v37 }
 0x15a   :  { %v743_v42 = vpop.permute.xlu0 %742  ;;  %v11570_v44 = vpop.permute.xlu2 %2740 }
 0x15b   :  { %9579 = vmatpush.xpose.msk.msrb.mxu2 %vm595_vm1, %v743_v42 }
 0x15d   :  { %9676 = vmatpush.xpose.msk.msra.mxu0 %vm595_vm1, %v2704_v52  ;;  %v11585_v52 = vmax.f32 %v543_v45, 0.0 }
 0x15e   :  { %2939 = vrot.lane.b32.xlu1 %v11563_v31, %s10927_s17 }
 0x15f   :  { %9580 = vmatpush.xpose.msk.msrb.mxu2 %vm595_vm1, %v741_v41  ;;  %16539 = vst [vmem:[#allocation36_spill] sm:$0xff] %v11585_v52  ;;  %v10161_v45 = vpack.i.bf16 %v11594_v9, %v11585_v52 }
 0x160   :  { %v778_v50 = vpop.permute.xlu1 %777  ;;  %10157 = vrot.lane.b32.xlu2 %v10156_v49, %s10928_s3  ;;  %9677 = vmatmul.msk.f32.vlgmr.msra.gmra.mxu0 %vm595_vm1, %v2700_v16  ;;  %v287_v16 = vpop.f32.mrf.mxu0 }
 0x161   :  { %2935 = vrot.lane.b32.xlu0 %v11563_v31, %s10925_s4  ;;  %9584 = vmatpush.xpose.msk.msra.mxu3 %vm595_vm1, %v778_v50  ;;  %v497_v42 = vadd.f32 %v496_v21, %v287_v16  ;;  %v499_v49 = vpop.f32.mrf.mxu2  ;;  %v11621_v50 = vmax.f32 %v545_v32, 0.0 }
 0x162   :  { %v2702_v7 = vpop.permute.xlu0 %2701  ;;  %9581 = vmatmul.msk.f32.vlgmr.msrb.gmra.mxu2 %vm595_vm1, %v11319_v56  ;;  %v11590_v41 = vpop.permute.xlu2 %2777 }
 0x163   :  { %16540 = vst [vmem:[#allocation37_spill] sm:$0xff] %v11590_v41  ;;  %v546_v58 = vadd.f32 %v11131_v40, %v497_v42 }
 0x164   :  { %9585 = vmatmul.msk.f32.vlgmr.msra.gmra.mxu3 %vm595_vm1, %v11357_v8  ;;  %16543 = vst [vmem:[#allocation40_spill] sm:$0xff] %v11621_v50 }
 0x165   :  { %v11634_v16 = vmax.f32 %v546_v58, 0.0 }
 0x166   :  { %999 = vrot.lane.b32.xlu1 %v11585_v52, %s10926_s12 }
 0x167   :  { %16545 = vst [vmem:[#allocation42_spill] sm:$0xff] %v11634_v16  ;;  %v10166_v58 = vpack.i.bf16 %v11634_v16, %v11621_v50 }
 0x168   :  { %v2743_v11 = vpop.permute.xlu1 %2742  ;;  %1001 = vrot.lane.b32.xlu2 %v11594_v9, %s10926_s12  ;;  %9678 = vmatmul.msk.f32.gmra.mxu0 %vm595_vm1, %v2702_v7  ;;  %v290_v48 = vpop.f32.mrf.mxu0 }
 0x169   :  { %2972 = vrot.lane.b32.xlu0 %v11585_v52, %s10925_s4  ;;  %v500_v21 = vadd.f32 %v499_v49, %v290_v48  ;;  %v502_v25 = vpop.f32.mrf.mxu2 }
 0x16a   :  { %v2739_v13 = vpop.permute.xlu0 %2738  ;;  %9582 = vmatmul.msk.f32.gmra.mxu2 %vm595_vm1, %v11341_v2  ;;  %v11605_v15 = vpop.permute.xlu2 %2783 }
 0x16b   :  { %16542 = vst [vmem:[#allocation39_spill] sm:$0xff] %v11605_v15  ;;  %v547_v32 = vadd.f32 %v11131_v40, %v500_v21 }
 0x16c   :  { %9586 = vmatmul.msk.f32.gmra.mxu3 %vm595_vm1, %v11378_v20 }
 0x16d   :  { %v11654_v48 = vmax.f32 %v547_v32, 0.0 }
 0x16e   :  { %2976 = vrot.lane.b32.xlu1 %v11585_v52, %s10927_s17 }
 0x16f   :  { %16548 = vst [vmem:[#allocation45_spill] sm:$0xff] %v11654_v48 }
 0x170   :  { %v11611_v28 = vpop.permute.xlu1 %10127  ;;  %2974 = vrot.lane.b32.xlu2 %v11594_v9, %s10925_s4 }
 0x171   :  { %2978 = vrot.lane.b32.xlu0 %v11594_v9, %s10927_s17 }
 0x172   :  { %v2745_v37 = vpop.permute.xlu0 %2744  ;;  %v852_v39 = vpop.permute.xlu2 %851 }
 0x173   :  { %9679 = vmatpush.xpose.msk.msra.mxu1 %vm595_vm1, %v2745_v37 }
 0x176   :  { %10162 = vrot.lane.b32.xlu1 %v10161_v45, %s10928_s3 }
 0x177   :  { %9680 = vmatpush.xpose.msk.msra.mxu1 %vm595_vm1, %v2743_v11  ;;  %v293_v11 = vpop.f32.mrf.mxu0 }
 0x178   :  { %v817_v60 = vpop.permute.xlu1 %816  ;;  %3011 = vrot.lane.b32.xlu2 %v11621_v50, %s10925_s4  ;;  %v503_v37 = vadd.f32 %v502_v25, %v293_v11  ;;  %v505_v25 = vpop.f32.mrf.mxu2 }
 0x179   :  { %1036 = vrot.lane.b32.xlu0 %v11621_v50, %s10926_s12  ;;  %9587 = vmatpush.xpose.msk.msra.mxu2 %vm595_vm1, %v817_v60 }
 0x17a   :  { %v815_v63 = vpop.permute.xlu0 %814  ;;  %v11631_v7 = vpop.permute.xlu2 %2820  ;;  %9681 = vmatmul.msk.f32.vlgmr.msra.gmra.mxu1 %vm595_vm1, %v2739_v13  ;;  %v548_v49 = vadd.f32 %v11131_v40, %v503_v37 }
 0x17b   :  { %16544 = vst [vmem:[#allocation41_spill] sm:$0xff] %v11631_v7 }
 0x17c   :  { %v11661_v60 = vmax.f32 %v548_v49, 0.0 }
 0x17d   :  { %9588 = vmatpush.xpose.msk.msra.mxu2 %vm595_vm1, %v815_v63 }
 0x17e   :  { %1038 = vrot.lane.b32.xlu1 %v11634_v16, %s10926_s12  ;;  %16549 = vst [vmem:[#allocation46_spill] sm:$0xff] %v11661_v60  ;;  %v10171_v32 = vpack.i.bf16 %v11661_v60, %v11654_v48 }
 0x17f   :  { %v296_v11 = vpop.f32.mrf.mxu0 }
 0x180   :  { %v11640_v42 = vpop.permute.xlu1 %2779  ;;  %3017 = vrot.lane.b32.xlu2 %v11634_v16, %s10927_s17  ;;  %9589 = vmatmul.msk.f32.vlgmr.msra.gmra.mxu2 %vm595_vm1, %v11408_v38  ;;  %v506_v49 = vadd.f32 %v505_v25, %v296_v11 }
 0x181   :  { %16546 = vst [vmem:[#allocation43_spill] sm:$0xff] %v11640_v42  ;;  %3015 = vrot.lane.b32.xlu0 %v11621_v50, %s10927_s17 }
 0x182   :  { %v11648_v13 = vpop.permute.xlu0 %2781  ;;  %v11650_v45 = vpop.permute.xlu2 %10142  ;;  %9682 = vmatmul.msk.f32.gmra.mxu1 %vm595_vm1, %v11570_v44  ;;  %v549_v24 = vadd.f32 %v11131_v40, %v506_v49 }
 0x183   :  { %16547 = vst [vmem:[#allocation44_spill] sm:$0xff] %v11648_v13 }
 0x184   :  { %v11693_v11 = vmax.f32 %v549_v24, 0.0 }
 0x186   :  { %3013 = vrot.lane.b32.xlu1 %v11634_v16, %s10925_s4  ;;  %16553 = vst [vmem:[#allocation50_spill] sm:$0xff] %v11693_v11 }
 0x187   :  { %v299_v61 = vpop.f32.mrf.mxu0 }
 0x188   :  { %v11663_v63 = vpop.permute.xlu1 %10137  ;;  %1073 = vrot.lane.b32.xlu2 %v11654_v48, %s10926_s12  ;;  %9590 = vmatmul.msk.f32.gmra.mxu2 %vm595_vm1, %v11406_v34 }
 0x189   :  { %16550 = vst [vmem:[#allocation47_spill] sm:$0xff] %v11663_v63  ;;  %10167 = vrot.lane.b32.xlu0 %v10166_v58, %s10928_s3 }
 0x18a   :  { %v11670_v44 = vpop.permute.xlu0 %10132  ;;  %v891_v21 = vpop.permute.xlu2 %890 }
 0x18b   :  { %9595 = vmatpush.xpose.msk.msrb.mxu2 %vm595_vm1, %v891_v21  ;;  %v508_v21 = vpop.f32.mrf.mxu2 }
 0x18c   :  { %v509_v63 = vadd.f32 %v508_v21, %v299_v61 }
 0x18e   :  { %3050 = vrot.lane.b32.xlu1 %v11654_v48, %s10925_s4  ;;  %v550_v25 = vadd.f32 %v11131_v40, %v509_v63 }
 0x18f   :  { %v302_v24 = vpop.f32.mrf.mxu0 }
 0x190   :  { %v11677_v37 = vpop.permute.xlu1 %2816  ;;  %10172 = vrot.lane.b32.xlu2 %v10171_v32, %s10928_s3  ;;  %v11700_v49 = vmax.f32 %v550_v25, 0.0 }
 0x191   :  { %16551 = vst [vmem:[#allocation48_spill] sm:$0xff] %v11677_v37  ;;  %1075 = vrot.lane.b32.xlu0 %v11661_v60, %s10926_s12 }
 0x192   :  { %v854_v58 = vpop.permute.xlu0 %853  ;;  %v2858_v17 = vpop.permute.xlu2 %2857  ;;  %16555 = vst [vmem:[#allocation52_spill] sm:$0xff] %v11700_v49 }
 0x193   :  { %9591 = vmatpush.xpose.msk.msrb.mxu3 %vm595_vm1, %v854_v58 }
 0x196   :  { %3054 = vrot.lane.b32.xlu1 %v11654_v48, %s10927_s17 }
 0x197   :  { %9592 = vmatpush.xpose.msk.msrb.mxu3 %vm595_vm1, %v852_v39  ;;  %v511_v39 = vpop.f32.mrf.mxu2  ;;  %v305_v41 = vpop.f32.mrf.mxu0 }
 0x198   :  { %v11687_v37 = vpop.permute.xlu1 %2822  ;;  %3052 = vrot.lane.b32.xlu2 %v11661_v60, %s10925_s4  ;;  %v512_v25 = vadd.f32 %v511_v39, %v302_v24  ;;  %v10176_v39 = vpack.i.bf16 %v11700_v49, %v11693_v11 }
 0x199   :  { %16552 = vst [vmem:[#allocation49_spill] sm:$0xff] %v11687_v37  ;;  %3056 = vrot.lane.b32.xlu0 %v11661_v60, %s10927_s17 }
 0x19a   :  { %v2895_v32 = vpop.permute.xlu2 %2894  ;;  %9593 = vmatmul.msk.f32.vlgmr.msrb.gmra.mxu3 %vm595_vm1, %v11432_v55 }
 0x19b   :  { %v11698_v61 = vpop.permute.xlu0 %2818 }
 0x19c   :  { %16554 = vst [vmem:[#allocation51_spill] sm:$0xff] %v11698_v61 }
 0x19e   :  { %1110 = vrot.lane.b32.xlu1 %v11693_v11, %s10926_s12 }
 0x19f   :  { %v514_v10 = vpop.f32.mrf.mxu2 }
 0x1a0   :  { %v889_v58 = vpop.permute.xlu1 %888  ;;  %1112 = vrot.lane.b32.xlu2 %v11700_v49, %s10926_s12  ;;  %v515_v1 = vadd.f32 %v514_v10, %v305_v41 }
 0x1a1   :  { %3089 = vrot.lane.b32.xlu0 %v11693_v11, %s10925_s4  ;;  %9596 = vmatpush.xpose.msk.msrb.mxu2 %vm595_vm1, %v889_v58  ;;  %v551_v58 = vadd.f32 %v11131_v40, %v512_v25 }
 0x1a2   :  { %v2901_v63 = vpop.permute.xlu2 %2900  ;;  %9594 = vmatmul.msk.f32.gmra.mxu3 %vm595_vm1, %v11450_v4  ;;  %v552_v23 = vadd.f32 %v11131_v40, %v515_v1 }
 0x1a3   :  { %v2856_v21 = vpop.permute.xlu0 %2855  ;;  %9695 = vmatpush.xpose.msk.msrb.mxu1 %vm595_vm1, %v2901_v63  ;;  %v11726_v24 = vmax.f32 %v551_v58, 0.0 }
 0x1a4   :  { %9597 = vmatmul.msk.f32.vlgmr.msrb.gmra.mxu2 %vm595_vm1, %v11475_v19  ;;  %v11740_v58 = vmax.f32 %v552_v23, 0.0 }
 0x1a5   :  { %16556 = vst [vmem:[#allocation53_spill] sm:$0xff] %v11726_v24 }
 0x1a6   :  { %3093 = vrot.lane.b32.xlu1 %v11693_v11, %s10927_s17  ;;  %16558 = vst [vmem:[#allocation55_spill] sm:$0xff] %v11740_v58  ;;  %v10181_v23 = vpack.i.bf16 %v11740_v58, %v11726_v24 }
 0x1a8   :  { %v2860_v61 = vpop.permute.xlu1 %2859  ;;  %3095 = vrot.lane.b32.xlu2 %v11700_v49, %s10927_s17 }
 0x1a9   :  { %3091 = vrot.lane.b32.xlu0 %v11700_v49, %s10925_s4 }
 0x1aa   :  { %v963_v42 = vpop.permute.xlu2 %962 }
 0x1ab   :  { %v2862_v63 = vpop.permute.xlu0 %2861 }
 0x1ac   :  { %9598 = vmatmul.msk.f32.gmra.mxu2 %vm595_vm1, %v11486_v26  ;;  %9691 = vmatpush.xpose.msk.msrb.mxu0 %vm595_vm1, %v2862_v63 }
 0x1ae   :  { %10177 = vrot.lane.b32.xlu1 %v10176_v39, %s10928_s3  ;;  %v2615_v13 = vpop.f32.mrf.mxu1 }
 0x1af   :  { %v11800_v59 = vmul.f32 0.35355338, %v2615_v13 }
 0x1b0   :  { %v11730_v25 = vpop.permute.xlu1 %10147  ;;  %3128 = vrot.lane.b32.xlu2 %v11726_v24, %s10925_s4  ;;  %9692 = vmatpush.xpose.msk.msrb.mxu0 %vm595_vm1, %v2860_v61 }
 0x1b1   :  { %1147 = vrot.lane.b32.xlu0 %v11726_v24, %s10926_s12 }
 0x1b2   :  { %v11737_v10 = vpop.permute.xlu2 %2937 }
 0x1b3   :  { %16557 = vst [vmem:[#allocation54_spill] sm:$0xff] %v11737_v10  ;;  %v926_v41 = vpop.permute.xlu0 %925  ;;  %9693 = vmatmul.msk.f32.vlgmr.msrb.gmra.mxu0 %vm595_vm1, %v2856_v21 }
 0x1b6   :  { %1149 = vrot.lane.b32.xlu1 %v11740_v58, %s10926_s12  ;;  %v2618_v51 = vpop.f32.mrf.mxu1  ;;  %s10932_s12 = smov 48  }
 0x1b8   :  { %v928_v40 = vpop.permute.xlu1 %927  ;;  %3130 = vrot.lane.b32.xlu2 %v11740_v58, %s10925_s4  ;;  %s10931_s4 = smov 112  }
 0x1b9   :  { %3132 = vrot.lane.b32.xlu0 %v11726_v24, %s10927_s17  ;;  %9599 = vmatpush.xpose.msk.msra.mxu3 %vm595_vm1, %v928_v40 }
 0x1ba   :  { %v11749_v1 = vpop.permute.xlu2 %10157 }
 0x1bb   :  { %16559 = vst [vmem:[#allocation56_spill] sm:$0xff] %v11749_v1  ;;  %v2899_v61 = vpop.permute.xlu0 %2898  ;;  %9694 = vmatmul.msk.f32.gmra.mxu0 %vm595_vm1, %v2858_v17 }
 0x1bc   :  { %9696 = vmatpush.xpose.msk.msrb.mxu1 %vm595_vm1, %v2899_v61 }
 0x1bd   :  { %9600 = vmatpush.xpose.msk.msra.mxu3 %vm595_vm1, %v926_v41 }
 0x1be   :  { %3134 = vrot.lane.b32.xlu1 %v11740_v58, %s10927_s17 }
 0x1bf   :  { %9697 = vmatmul.msk.f32.vlgmr.msrb.gmra.mxu1 %vm595_vm1, %v2895_v32 }
 0x1c0   :  { %v2897_v21 = vpop.permute.xlu1 %2896  ;;  %9601 = vmatmul.msk.f32.vlgmr.msra.gmra.mxu3 %vm595_vm1, %v11517_v46 }
 0x1c1   :  { %10182 = vrot.lane.b32.xlu0 %v10181_v23, %s10928_s3 }
 0x1c2   :  { %v1002_v63 = vpop.permute.xlu2 %1001 }
 0x1c3   :  { %v11762_v17 = vpop.permute.xlu0 %10152  ;;  %9607 = vmatpush.xpose.msk.msrb.mxu3 %vm595_vm1, %v1002_v63 }
 0x1c4   :  { %16560 = vst [vmem:[#allocation57_spill] sm:$0xff] %v11762_v17 }
 0x1c7   :  { %9698 = vmatmul.msk.f32.gmra.mxu1 %vm595_vm1, %v2897_v21  ;;  %v621_v21 = vpop.f32.mrf.mxu2 }
 0x1c8   :  { %v11766_v39 = vpop.permute.xlu1 %2933  ;;  %9602 = vmatmul.msk.f32.gmra.mxu3 %vm595_vm1, %v11528_v57 }
 0x1c9   :  { %16561 = vst [vmem:[#allocation58_spill] sm:$0xff] %v11766_v39  ;;  %v2576_v39 = vpop.f32.mrf.mxu0 }
 0x1ca   :  { %v11770_v41 = vpop.permute.xlu2 %2974  ;;  %v11796_v15 = vmul.f32 0.35355338, %v2576_v39  ;;  %v3205_v39 = vsel %vm1214_vm2, %v11800_v59, -inf }
 0x1cb   :  { %16562 = vst [vmem:[#allocation59_spill] sm:$0xff] %v11770_v41  ;;  %v965_v32 = vpop.permute.xlu0 %964 }
 0x1cc   :  { %9603 = vmatpush.xpose.msk.msra.mxu2 %vm595_vm1, %v965_v32  ;;  %v658_v32 = vpop.f32.mrf.mxu3  ;;  %v3199_v26 = vsel %vm1214_vm2, %v11796_v15, -inf }
 0x1cd   :  { %v11816_v7 = vmul.f32 0.35355338, %v658_v32 }
 0x1d0   :  { %v11773_v40 = vpop.permute.xlu1 %2939  ;;  %9604 = vmatpush.xpose.msk.msra.mxu2 %vm595_vm1, %v963_v42  ;;  %v11786_v42 = vmul.f32 0.35355338, %v621_v21 }
 0x1d1   :  { %16563 = vst [vmem:[#allocation60_spill] sm:$0xff] %v11773_v40 }
 0x1d2   :  { %v3012_v61 = vpop.permute.xlu2 %3011 }
 0x1d3   :  { %v11776_v23 = vpop.permute.xlu0 %2935  ;;  %9605 = vmatmul.msk.f32.vlgmr.msra.gmra.mxu2 %vm595_vm1, %v11546_v12 }
 0x1d4   :  { %16564 = vst [vmem:[#allocation61_spill] sm:$0xff] %v11776_v23  ;;  %v624_v23 = vpop.f32.mrf.mxu2 }
 0x1d5   :  { %v11820_v57 = vmul.f32 0.35355338, %v624_v23  ;;  %v11833_v23 = vmul.f32 0.35355338, %v2618_v51 }
 0x1d8   :  { %v1000_v63 = vpop.permute.xlu1 %999 }
 0x1d9   :  { %9608 = vmatpush.xpose.msk.msrb.mxu3 %vm595_vm1, %v1000_v63  ;;  %v1215_v63 = vsel %vm1214_vm2, %v11786_v42, -inf }
 0x1da   :  { %v3018_v10 = vpop.permute.xlu2 %3017 }
 0x1db   :  { %v11781_v41 = vpop.permute.xlu0 %2972  ;;  %9606 = vmatmul.msk.f32.gmra.mxu2 %vm595_vm1, %v11563_v31  ;;  %9707 = vmatpush.xpose.msk.msra.mxu0 %vm595_vm1, %v3018_v10  ;;  %v2579_v10 = vpop.f32.mrf.mxu0 }
 0x1dc   :  { %16565 = vst [vmem:[#allocation62_spill] sm:$0xff] %v11781_v41  ;;  %9609 = vmatmul.msk.f32.vlgmr.msrb.gmra.mxu3 %vm595_vm1, %v11585_v52  ;;  %v11804_v36 = vmul.f32 0.35355338, %v2579_v10 }
 0x1de   :  { %v3202_v13 = vsel %vm1214_vm2, %v11804_v36, -inf }
 0x1e0   :  { %v11790_v40 = vpop.permute.xlu1 %2976 }
 0x1e1   :  { %16566 = vst [vmem:[#allocation63_spill] sm:$0xff] %v11790_v40  ;;  %1216 = vmax.xlane.f32.xlu2 %v1215_v63  ;;  %v661_v40 = vpop.f32.mrf.mxu3  ;;  %v695_v63 = vpop.f32.mrf.mxu2 }
 0x1e2   :  { %v11794_v41 = vpop.permute.xlu2 %1073  ;;  %v11818_v37 = vmul.f32 0.35355338, %v661_v40  ;;  %v1218_v40 = vsel %vm1214_vm2, %v11820_v57, -inf  ;;  %v11835_v27 = vmul.f32 0.35355338, %v695_v63 }
 0x1e3   :  { %v11798_v21 = vpop.permute.xlu0 %2978 }
 0x1e4   :  { %16567 = vst [vmem:[#allocation64_spill] sm:$0xff] %v11798_v21  ;;  %9610 = vmatmul.msk.f32.gmra.mxu3 %vm595_vm1, %v11594_v9  ;;  %v1224_v30 = vsel %vm1214_vm2, %v11818_v37, -inf  ;;  %v1227_v51 = vsel %vm1214_vm2, %v11835_v27, -inf }
 0x1e8   :  { %v11808_v53 = vpop.permute.xlu1 %10162  ;;  %3200 = vmax.xlane.f32.xlu1 %v3199_v26  ;;  %v1221_v26 = vsel %vm1214_vm2, %v11816_v7, -inf }
 0x1e9   :  { %16568 = vst [vmem:[#allocation65_spill] sm:$0xff] %v11808_v53  ;;  %3206 = vmax.xlane.f32.xlu2 %v3205_v39  ;;  %v11822_v46 = vpop.f32.mrf.mxu3 }
 0x1ea   :  { %v11814_v21 = vpop.permute.xlu2 %10172 }
 0x1eb   :  { %16569 = vst [vmem:[#allocation66_spill] sm:$0xff] %v11814_v21  ;;  %3203 = vmax.xlane.f32.xlu0 %v3202_v13  ;;  %v1037_v10 = vpop.permute.xlu0 %1036  ;;  %v698_v13 = vpop.f32.mrf.mxu2 }
 0x1f0   :  { %v1039_v39 = vpop.permute.xlu1 %1038  ;;  %1222 = vmax.xlane.f32.xlu1 %v1221_v26  ;;  %v11839_v26 = vmul.f32 0.35355338, %v698_v13 }
 0x1f1   :  { %1225 = vmax.xlane.f32.xlu2 %v1224_v30  ;;  %9611 = vmatpush.xpose.msk.msrb.mxu2 %vm595_vm1, %v1039_v39  ;;  %v3208_v30 = vsel %vm1214_vm2, %v11833_v23, -inf  ;;  %v735_v63 = vpop.f32.mrf.mxu3 }
 0x1f2   :  { %v11831_v32 = vpop.permute.xlu2 %3052 }
 0x1f3   :  { %1219 = vmax.xlane.f32.xlu0 %v1218_v40  ;;  %v3016_v34 = vpop.permute.xlu0 %3015  ;;  %v769_v40 = vpop.f32.mrf.mxu2 }
 0x1f4   :  { %9708 = vmatpush.xpose.msk.msra.mxu0 %vm595_vm1, %v3016_v34  ;;  %v1230_v34 = vsel %vm1214_vm2, %v11839_v26, -inf }
 0x1f5   :  { %9612 = vmatpush.xpose.msk.msrb.mxu2 %vm595_vm1, %v1037_v10 }
 0x1f7   :  { %9709 = vmatmul.msk.f32.vlgmr.msra.gmra.mxu0 %vm595_vm1, %v3012_v61  ;;  %v11853_v61 = vmul.f32 0.35355338, %v735_v63 }
 0x1f8   :  { %v3014_v39 = vpop.permute.xlu1 %3013  ;;  %3209 = vmax.xlane.f32.xlu1 %v3208_v30  ;;  %9613 = vmatmul.msk.f32.vlgmr.msrb.gmra.mxu2 %vm595_vm1, %v11621_v50  ;;  %v11855_v30 = vmul.f32 0.35355338, %v769_v40  ;;  %v2732_v50 = vpop.f32.mrf.mxu0 }
 0x1f9   :  { %1228 = vmax.xlane.f32.xlu2 %v1227_v51  ;;  %v1236_v51 = vsel %vm1214_vm2, %v11853_v61, -inf  ;;  %v11864_v63 = vmul.f32 0.35355338, %v2732_v50  ;;  %v11876_v50 = vpack.i.bf16 %v11546_v12, %v11563_v31 }
 0x1fa   :  { %v1113_v10 = vpop.permute.xlu2 %1112 }
 0x1fb   :  { %1231 = vmax.xlane.f32.xlu0 %v1230_v34  ;;  %v11850_v13 = vpop.permute.xlu0 %10167  ;;  %9619 = vmatpush.xpose.msk.msra.mxu2 %vm595_vm1, %v1113_v10  ;;  %v1239_v34 = vsel %vm1214_vm2, %v11855_v30, -inf  ;;  %16571 = vst [vmem:[#allocation68_spill] sm:$0xff] %v11876_v50 }
 0x1fc   :  { %16570 = vst [vmem:[#allocation67_spill] sm:$0xff] %v11850_v13 }
 0x1ff   :  { %9710 = vmatmul.msk.f32.gmra.mxu0 %vm595_vm1, %v3014_v39  ;;  %v3223_v39 = vsel %vm1214_vm2, %v11864_v63, -inf }
 0x200   :  { %v3051_v29 = vpop.permute.xlu1 %3050  ;;  %9614 = vmatmul.msk.f32.gmra.mxu2 %vm595_vm1, %v11634_v16 }
 0x201   :  { %1237 = vmax.xlane.f32.xlu2 %v1236_v51  ;;  %v10095_v51 = vunpack.i.h.bf16 %v11375_v18 }
 0x203   :  { %1240 = vmax.xlane.f32.xlu0 %v1239_v34  ;;  %v1076_v10 = vpop.permute.xlu0 %1075 }
 0x204   :  { %9615 = vmatpush.xpose.msk.msra.mxu3 %vm595_vm1, %v1076_v10  ;;  %v11892_v10 = vpack.i.bf16 %v11585_v52, %v11594_v9 }
 0x206   :  { %16572 = vst [vmem:[#allocation69_spill] sm:$0xff] %v11892_v10 }
 0x208   :  { %v3055_v40 = vpop.permute.xlu1 %3054  ;;  %9616 = vmatpush.xpose.msk.msra.mxu3 %vm595_vm1, %v11794_v41  ;;  %v10094_v41 = vunpack.i.l.bf16 %v11375_v18 }
 0x209   :  { %3224 = vmax.xlane.f32.xlu2 %v3223_v39  ;;  %v11907_v39 = vpack.i.bf16 %v11432_v55, %v11450_v4 }
 0x20b   :  { %v3057_v16 = vpop.permute.xlu0 %3056  ;;  %9617 = vmatmul.msk.f32.vlgmr.msra.gmra.mxu3 %vm595_vm1, %v11654_v48  ;;  %16575 = vst [vmem:[#allocation72_spill] sm:$0xff] %v11907_v39 }
 0x20c   :  { %9711 = vmatpush.xpose.msk.msra.mxu1 %vm595_vm1, %v3057_v16  ;;  %v10105_v16 = vunpack.i.h.bf16 %v11507_v33 }
 0x210   :  { %v1111_v34 = vpop.permute.xlu1 %1110  ;;  %9712 = vmatpush.xpose.msk.msra.mxu1 %vm595_vm1, %v3055_v40  ;;  %v10104_v40 = vunpack.i.l.bf16 %v11507_v33 }
 0x211   :  { %10187 = vrot.lane.b32.xlu1 %v11876_v50, %s10929_s27  ;;  %9620 = vmatpush.xpose.msk.msra.mxu2 %vm595_vm1, %v1111_v34  ;;  %v806_v50 = vpop.f32.mrf.mxu3 }
 0x213   :  { %9618 = vmatmul.msk.f32.gmra.mxu3 %vm595_vm1, %v11661_v60  ;;  %9713 = vmatmul.msk.f32.vlgmr.msra.gmra.mxu1 %vm595_vm1, %v3051_v29  ;;  %v11899_v29 = vpop.permute.xlu0 %3089 }
 0x214   :  { %9621 = vmatmul.msk.f32.vlgmr.msra.gmra.mxu2 %vm595_vm1, %v11693_v11  ;;  %16574 = vst [vmem:[#allocation71_spill] sm:$0xff] %v11899_v29 }
 0x215   :  { %2009 = vmatpush.msrb.mxu2 %v10095_v51 }
 0x217   :  { %2010 = vmatpush.msrb.mxu2 %v10094_v41  ;;  %10202 = vrot.lane.b32.xlu0 %v11892_v10, %s10929_s27  ;;  %v10100_v41 = vunpack.i.h.bf16 %v11445_v0  ;;  %v10114_v10 = vunpack.i.l.bf16 %v11542_v3 }
 0x218   :  { %v11897_v18 = vpop.permute.xlu1 %3093 }
 0x219   :  { %2079 = vmatpush.msra.mxu2 %v10105_v16  ;;  %16573 = vst [vmem:[#allocation70_spill] sm:$0xff] %v11897_v18  ;;  %v10099_v16 = vunpack.i.l.bf16 %v11445_v0 }
 0x21b   :  { %2080 = vmatpush.msra.mxu2 %v10104_v40  ;;  %9714 = vmatmul.msk.f32.gmra.mxu1 %vm595_vm1, %v11831_v32  ;;  %v11913_v51 = vpop.permute.xlu0 %3091  ;;  %v10115_v40 = vunpack.i.h.bf16 %v11542_v3  ;;  %v772_v3 = vpop.f32.mrf.mxu2 }
 0x21c   :  { %9622 = vmatmul.msk.f32.gmra.mxu2 %vm595_vm1, %v11700_v49  ;;  %16577 = vst [vmem:[#allocation74_spill] sm:$0xff] %v11913_v51  ;;  %v11926_v51 = vpop.permute.xlu2 %3095 }
 0x21d   :  { %16578 = vst [vmem:[#allocation75_spill] sm:$0xff] %v11926_v51 }
 0x220   :  { %v11909_v33 = vpop.permute.xlu1 %10177 }
 0x221   :  { %16576 = vst [vmem:[#allocation73_spill] sm:$0xff] %v11909_v33  ;;  %10192 = vrot.lane.b32.xlu2 %v11907_v39, %s10929_s27  ;;  %v11948_v39 = vmul.f32 0.35355338, %v772_v3 }
 0x223   :  { %v1148_v32 = vpop.permute.xlu0 %1147 }
 0x224   :  { %v11940_v18 = vpop.permute.xlu2 %3128 }
 0x225   :  { %16579 = vst [vmem:[#allocation76_spill] sm:$0xff] %v11940_v18 }
 0x228   :  { %v1150_v34 = vpop.permute.xlu1 %1149 }
 0x229   :  { %9623 = vmatpush.xpose.msk.msrb.mxu3 %vm595_vm1, %v1150_v34  ;;  %v11924_v34 = vmul.f32 0.35355338, %v11822_v46 }
 0x22b   :  { %v1233_v0 = vsel %vm1214_vm2, %v11924_v34, -inf  ;;  %v11978_v4 = vpop.permute.xlu0 %3132 }
 0x22c   :  { %v11958_v18 = vpop.permute.xlu2 %3130  ;;  %16582 = vst [vmem:[#allocation79_spill] sm:$0xff] %v11978_v4 }
 0x22d   :  { %9624 = vmatpush.xpose.msk.msrb.mxu3 %vm595_vm1, %v1148_v32  ;;  %v2771_v32 = vpop.f32.mrf.mxu1  ;;  %16580 = vst [vmem:[#allocation77_spill] sm:$0xff] %v11958_v18 }
 0x230   :  { %9625 = vmatmul.msk.f32.vlgmr.msrb.gmra.mxu3 %vm595_vm1, %v11726_v24  ;;  %v11966_v60 = vpop.permute.xlu1 %3134 }
 0x231   :  { %2044 = vmatpush.msra.mxu3 %v10100_v41  ;;  %v2735_v41 = vpop.f32.mrf.mxu0  ;;  %16581 = vst [vmem:[#allocation78_spill] sm:$0xff] %v11966_v60 }
 0x233   :  { %2045 = vmatpush.msra.mxu3 %v10099_v16  ;;  %v11932_v16 = vmul.f32 0.35355338, %v2771_v32  ;;  %v11946_v32 = vpop.f32.mrf.mxu2 }
 0x235   :  { %2114 = vmatpush.msrb.mxu3 %v10115_v40  ;;  %v11934_v40 = vmul.f32 0.35355338, %v2735_v41  ;;  %v3229_v46 = vsel %vm1214_vm2, %v11932_v16, -inf }
 0x237   :  { %2115 = vmatpush.msrb.mxu3 %v10114_v10  ;;  %v809_v10 = vpop.f32.mrf.mxu3  ;;  %v3226_v29 = vsel %vm1214_vm2, %v11934_v40, -inf }
 0x238   :  { %9626 = vmatmul.msk.f32.gmra.mxu3 %vm595_vm1, %v11740_v58  ;;  %v11942_v51 = vmul.f32 0.35355338, %v809_v10  ;;  %v2774_v10 = vpop.f32.mrf.mxu1 }
 0x239   :  { %v11960_v3 = vmul.f32 0.35355338, %v2774_v10 }
 0x23a   :  { %v1248_v41 = vsel %vm1214_vm2, %v11942_v51, -inf }
 0x23b   :  { %1234 = vmax.xlane.f32.xlu1 %v1233_v0  ;;  %v11944_v0 = vmul.f32 0.35355338, %v806_v50  ;;  %v846_v52 = vpop.f32.mrf.mxu2 }
 0x23f   :  { %v880_v9 = vpop.f32.mrf.mxu3 }
 0x240   :  { %v11956_v50 = vmul.f32 0.35355338, %v880_v9  ;;  %v11970_v9 = vmul.f32 0.35355338, %v846_v52 }
 0x241   :  { %3230 = vmax.xlane.f32.xlu0 %v3229_v46  ;;  %v1245_v46 = vsel %vm1214_vm2, %v11944_v0, -inf }
 0x242   :  { %v1257_v48 = vsel %vm1214_vm2, %v11956_v50, -inf }
 0x243   :  { %3227 = vmax.xlane.f32.xlu1 %v3226_v29  ;;  %v1242_v29 = vsel %vm1214_vm2, %v11948_v39, -inf  ;;  %v917_v18 = vpop.f32.mrf.mxu2 }
 0x249   :  { %1249 = vmax.xlane.f32.xlu0 %v1248_v41  ;;  %v3232_v41 = vsel %vm1214_vm2, %v11960_v3, -inf }
 0x24a   :  { %1246 = vmax.xlane.f32.xlu2 %v1245_v46  ;;  %v2888_v46 = vpop.f32.mrf.mxu0 }
 0x24b   :  { %1243 = vmax.xlane.f32.xlu1 %v1242_v29  ;;  %v11968_v29 = vmul.f32 0.35355338, %v2888_v46 }
 0x24d   :  { %v3247_v55 = vsel %vm1214_vm2, %v11968_v29, -inf }
 0x251   :  { %1258 = vmax.xlane.f32.xlu0 %v1257_v48  ;;  %v1254_v48 = vsel %vm1214_vm2, %v11970_v9, -inf }
 0x252   :  { %3233 = vmax.xlane.f32.xlu2 %v3232_v41 }
 0x254   :  { %v1217_v12 = vpop.xlane.xlu2 %1216 }
 0x255   :  { %v1311_v10 = vsub.f32 %v11786_v42, %v1217_v12  ;;  %v11987_v42 = vpack.i.bf16 %v11693_v11, %v11700_v49 }
 0x257   :  { %v1343_v31 = vmul.f32 1.442695, %v1311_v10  ;;  %16583 = vst [vmem:[#allocation80_spill] sm:$0xff] %v11987_v42 }
 0x259   :  { %10413 = vpow2.f32 %v1343_v31  ;;  %3248 = vmax.xlane.f32.xlu0 %v3247_v55  ;;  %v920_v55 = vpop.f32.mrf.mxu2 }
 0x25a   :  { %1255 = vmax.xlane.f32.xlu2 %v1254_v48  ;;  %v11995_v48 = vpop.permute.xlu0 %10182 }
 0x25b   :  { %v3201_v41 = vpop.xlane.xlu1 %3200  ;;  %16585 = vst [vmem:[#allocation82_spill] sm:$0xff] %v11995_v48 }
 0x25c   :  { %v3295_v60 = vsub.f32 %v11796_v15, %v3201_v41  ;;  %v3207_v46 = vpop.xlane.xlu2 %3206  ;;  %v11989_v15 = vmul.f32 0.35355338, %v920_v55  ;;  %v11999_v41 = vpop.f32.mrf.mxu1 }
 0x25d   :  { %v3297_v12 = vsub.f32 %v11800_v59, %v3207_v46 }
 0x25e   :  { %v3327_v52 = vmul.f32 1.442695, %v3295_v60  ;;  %v1266_v46 = vsel %vm1214_vm2, %v11989_v15, -inf }
 0x25f   :  { %v11980_v19 = vpop.eup %10413  ;;  %v3331_v10 = vmul.f32 1.442695, %v3297_v12  ;;  %v12003_v12 = vmul.f32 0.35355338, %v917_v18 }
 0x260   :  { %10415 = vpow2.f32 %v3327_v52  ;;  %v1407_v31 = vsel %vm1214_vm2, %v11980_v19, 0.0 }
 0x261   :  { %1408 = vadd.xlane.f32.xlu0 %v1407_v31  ;;  %10417 = vpow2.f32 %v3331_v10 }
 0x263   :  { %v1223_v52 = vpop.xlane.xlu1 %1222 }
 0x264   :  { %10197 = vrot.lane.b32.xlu1 %v11987_v42, %s10929_s27  ;;  %v1226_v31 = vpop.xlane.xlu2 %1225  ;;  %v1313_v10 = vsub.f32 %v11816_v7, %v1223_v52  ;;  %v12010_v42 = vpop.xlane.xlu0 %3203 }
 0x265   :  { %v2930_v4 = vpop.f32.mrf.mxu1  ;;  %v12021_v52 = vpop.f32.mrf.mxu3 }
 0x266   :  { %v11993_v60 = vpop.eup %10415  ;;  %v1347_v49 = vmul.f32 1.442695, %v1313_v10  ;;  %v12019_v7 = vmul.f32 0.35355338, %v2930_v4 }
 0x267   :  { %16584 = vst [vmem:[#allocation81_spill] sm:$0xff] %v11993_v60  ;;  %v3391_v59 = vsel %vm1214_vm2, %v11993_v60, 0.0  ;;  %v12007_v55 = vpop.eup %10417  ;;  %v1263_v60 = vsel %vm1214_vm2, %v12003_v12, -inf }
 0x268   :  { %3392 = vadd.xlane.f32.xlu2 %v3391_v59  ;;  %16586 = vst [vmem:[#allocation83_spill] sm:$0xff] %v12007_v55  ;;  %v1314_v59 = vsub.f32 %v11818_v37, %v1226_v31  ;;  %v3397_v18 = vsel %vm1214_vm2, %v12007_v55, 0.0  ;;  %10419 = vpow2.f32 %v1347_v49  ;;  %v3256_v31 = vsel %vm1214_vm2, %v12019_v7, -inf }
 0x269   :  { %1267 = vmax.xlane.f32.xlu0 %v1266_v46  ;;  %v2891_v46 = vpop.f32.mrf.mxu0  ;;  %16587 = vst [vmem:[#allocation84_spill] sm:$0xff] %v12019_v7 }
 0x26a   :  { %v1349_v11 = vmul.f32 1.442695, %v1314_v59  ;;  %v12017_v8 = vmul.f32 0.35355338, %v2891_v46 }
 0x26b   :  { %v3210_v48 = vpop.xlane.xlu1 %3209 }
 0x26c   :  { %4951 = vrot.lane.b32.xlu1 %v11157_v54, %s10930_s1  ;;  %v3298_v37 = vsub.f32 %v11833_v23, %v3210_v48  ;;  %10421 = vpow2.f32 %v1349_v11  ;;  %v12028_v10 = vpop.xlane.xlu0 %1219  ;;  %v991_v23 = vpop.f32.mrf.mxu2 }
 0x26d   :  { %v12034_v46 = vpop.f32.mrf.mxu3 }
 0x26e   :  { %v3333_v59 = vmul.f32 1.442695, %v3298_v37  ;;  %v12042_v37 = vmul.f32 0.35355338, %v991_v23  ;;  %v12054_v23 = vmul.f32 0.35355338, %v11946_v32 }
 0x270   :  { %1264 = vmax.xlane.f32.xlu2 %v1263_v60  ;;  %v3250_v60 = vsel %vm1214_vm2, %v12017_v8, -inf  ;;  %10423 = vpow2.f32 %v3333_v59 }
 0x271   :  { %3398 = vadd.xlane.f32.xlu0 %v3397_v18  ;;  %v12030_v18 = vpop.eup %10419 }
 0x272   :  { %v12032_v4 = vpop.eup %10421  ;;  %v1413_v11 = vsel %vm1214_vm2, %v12030_v18, 0.0 }
 0x273   :  { %v1416_v49 = vsel %vm1214_vm2, %v12032_v4, 0.0 }
 0x274   :  { %v1232_v48 = vpop.xlane.xlu0 %1231 }
 0x275   :  { %v957_v59 = vpop.f32.mrf.mxu3 }
 0x276   :  { %v12049_v33 = vmul.f32 0.35355338, %v957_v59  ;;  %v12063_v59 = vpop.xlane.xlu2 %1228 }
 0x278   :  { %3251 = vmax.xlane.f32.xlu2 %v3250_v60  ;;  %v12040_v60 = vpop.eup %10423  ;;  %16589 = vst [vmem:[#allocation86_spill] sm:$0xff] %v12049_v33 }
 0x279   :  { %3257 = vmax.xlane.f32.xlu0 %v3256_v31  ;;  %16588 = vst [vmem:[#allocation85_spill] sm:$0xff] %v12040_v60  ;;  %v1316_v31 = vsub.f32 %v11839_v26, %v1232_v48  ;;  %v3400_v55 = vsel %vm1214_vm2, %v12040_v60, 0.0 }
 0x27b   :  { %v1353_v7 = vmul.f32 1.442695, %v1316_v31 }
 0x27c   :  { %v1241_v26 = vpop.xlane.xlu0 %1240 }
 0x27d   :  { %10425 = vpow2.f32 %v1353_v7  ;;  %v1319_v60 = vsub.f32 %v11855_v30, %v1241_v26  ;;  %v1028_v7 = vpop.f32.mrf.mxu3 }
 0x27e   :  { %v12069_v20 = vpop.xlane.xlu2 %1237 }
 0x280   :  { %1414 = vadd.xlane.f32.xlu2 %v1413_v11  ;;  %v1275_v11 = vsel %vm1214_vm2, %v12042_v37, -inf }
 0x281   :  { %1417 = vadd.xlane.f32.xlu0 %v1416_v49  ;;  %v1272_v49 = vsel %vm1214_vm2, %v12049_v33, -inf }
 0x283   :  { %v12056_v48 = vpop.eup %10425  ;;  %v12073_v30 = vpop.permute.xlu1 %10187 }
 0x284   :  { %v1422_v31 = vsel %vm1214_vm2, %v12056_v48, 0.0  ;;  %16591 = vst [vmem:[#allocation88_spill] sm:$0xff] %v12073_v30 }
 0x285   :  { %v1031_v35 = vpop.f32.mrf.mxu3 }
 0x286   :  { %v12098_v43 = vmul.f32 0.35355338, %v1031_v35 }
 0x288   :  { %3401 = vadd.xlane.f32.xlu2 %v3400_v55  ;;  %v1251_v55 = vsel %vm1214_vm2, %v12054_v23, -inf  ;;  %16594 = vst [vmem:[#allocation91_spill] sm:$0xff] %v12098_v43 }
 0x289   :  { %1276 = vmax.xlane.f32.xlu0 %v1275_v11  ;;  %v1359_v11 = vmul.f32 1.442695, %v1319_v60  ;;  %v3225_v60 = vpop.xlane.xlu2 %3224 }
 0x28b   :  { %10427 = vpow2.f32 %v1359_v11  ;;  %v12082_v11 = vpop.f32.mrf.mxu2 }
 0x290   :  { %1273 = vmax.xlane.f32.xlu2 %v1272_v49  ;;  %v12065_v49 = vmul.f32 0.35355338, %v1028_v7 }
 0x291   :  { %v12071_v13 = vpop.eup %10427 }
 0x292   :  { %16590 = vst [vmem:[#allocation87_spill] sm:$0xff] %v12065_v49  ;;  %v1281_v32 = vsel %vm1214_vm2, %v12065_v49, -inf  ;;  %v1431_v26 = vsel %vm1214_vm2, %v12071_v13, 0.0  ;;  %v12086_v49 = vpop.permute.xlu2 %10192 }
 0x293   :  { %16593 = vst [vmem:[#allocation90_spill] sm:$0xff] %v12086_v49  ;;  %v12092_v21 = vpop.f32.mrf.mxu2 }
 0x296   :  { %1252 = vmax.xlane.f32.xlu1 %v1251_v55  ;;  %v12077_v55 = vpop.permute.xlu0 %10202 }
 0x297   :  { %16592 = vst [vmem:[#allocation89_spill] sm:$0xff] %v12077_v55  ;;  %v3303_v55 = vsub.f32 %v11864_v63, %v3225_v60  ;;  %v12104_v63 = vpop.f32.mrf.mxu0 }
 0x298   :  { %1423 = vadd.xlane.f32.xlu2 %v1422_v31 }
 0x2a0   :  { %1282 = vmax.xlane.f32.xlu2 %v1281_v32 }
 0x2a8   :  { %1432 = vadd.xlane.f32.xlu2 %v1431_v26 }
 0x2ae   :  { %v1235_v31 = vpop.xlane.xlu1 %1234 }
 0x2af   :  { %v1317_v7 = vsub.f32 %v11924_v34, %v1235_v31  ;;  %4949 = vrot.lane.b32.xlu1 %v11142_v47, %s10930_s1 }
 0x2b1   :  { %v1355_v32 = vmul.f32 1.442695, %v1317_v7 }
 0x2b3   :  { %10429 = vpow2.f32 %v1355_v32  ;;  %v3343_v32 = vmul.f32 1.442695, %v3303_v55 }
 0x2b4   :  { %v12084_v38 = vpop.xlane.xlu0 %3230 }
 0x2b6   :  { %v3228_v30 = vpop.xlane.xlu1 %3227 }
 0x2b7   :  { %v3304_v26 = vsub.f32 %v11934_v40, %v3228_v30  ;;  %v1284_v30 = vsel %vm1214_vm2, %v12098_v43, -inf }
 0x2b9   :  { %v12089_v22 = vpop.eup %10429  ;;  %v3345_v34 = vmul.f32 1.442695, %v3304_v26  ;;  %v1068_v26 = vpop.f32.mrf.mxu2 }
 0x2ba   :  { %v1425_v31 = vsel %vm1214_vm2, %v12089_v22, 0.0  ;;  %v12112_v35 = vmul.f32 0.35355338, %v1068_v26 }
 0x2bb   :  { %10431 = vpow2.f32 %v3345_v34  ;;  %1426 = vadd.xlane.f32.xlu0 %v1425_v31 }
 0x2bc   :  { %v12096_v7 = vpop.xlane.xlu0 %1249  ;;  %10433 = vpow2.f32 %v3343_v32  ;;  %16596 = vst [vmem:[#allocation93_spill] sm:$0xff] %v12112_v35  ;;  %v1290_v53 = vsel %vm1214_vm2, %v12112_v35, -inf }
 0x2bd   :  { %v12100_v49 = vpop.xlane.xlu2 %1246 }
 0x2be   :  { %v1244_v55 = vpop.xlane.xlu1 %1243 }
 0x2bf   :  { %v1320_v32 = vsub.f32 %v11948_v39, %v1244_v55  ;;  %v3296_v39 = vsub.f32 %v11804_v36, %v12010_v42  ;;  %v1312_v36 = vsub.f32 %v11820_v57, %v12028_v10 }
 0x2c1   :  { %v12102_v40 = vpop.eup %10431  ;;  %v1361_v26 = vmul.f32 1.442695, %v1320_v32  ;;  %v12136_v32 = vmul.f32 0.35355338, %v12021_v52  ;;  %v1345_v52 = vmul.f32 1.442695, %v1312_v36 }
 0x2c2   :  { %16595 = vst [vmem:[#allocation92_spill] sm:$0xff] %v12102_v40  ;;  %v3418_v60 = vsel %vm1214_vm2, %v12102_v40, 0.0  ;;  %v12114_v31 = vpop.eup %10433 }
 0x2c3   :  { %1285 = vmax.xlane.f32.xlu0 %v1284_v30  ;;  %3419 = vadd.xlane.f32.xlu2 %v3418_v60  ;;  %16597 = vst [vmem:[#allocation94_spill] sm:$0xff] %v12114_v31  ;;  %v3415_v56 = vsel %vm1214_vm2, %v12114_v31, 0.0  ;;  %v3047_v30 = vpop.f32.mrf.mxu0  ;;  %v3083_v60 = vpop.f32.mrf.mxu1  ;;  %10435 = vpow2.f32 %v1361_v26  ;;  %v1260_v42 = vsel %vm1214_vm2, %v12136_v32, -inf }
 0x2c4   :  { %v12110_v34 = vpop.xlane.xlu0 %1258  ;;  %v12123_v17 = vmul.f32 0.35355338, %v3047_v30  ;;  %v12125_v54 = vmul.f32 0.35355338, %v3083_v60 }
 0x2c5   :  { %v3234_v33 = vpop.xlane.xlu2 %3233 }
 0x2c6   :  { %16598 = vst [vmem:[#allocation95_spill] sm:$0xff] %v12123_v17  ;;  %v3274_v55 = vsel %vm1214_vm2, %v12123_v17, -inf  ;;  %v3306_v26 = vsub.f32 %v11960_v3, %v3234_v33 }
 0x2c7   :  { %16599 = vst [vmem:[#allocation96_spill] sm:$0xff] %v12125_v54 }
 0x2c8   :  { %v3349_v57 = vmul.f32 1.442695, %v3306_v26 }
 0x2c9   :  { %v12138_v60 = vpop.eup %10435 }
 0x2cb   :  { %3416 = vadd.xlane.f32.xlu0 %v3415_v56  ;;  %1291 = vmax.xlane.f32.xlu2 %v1290_v53  ;;  %v3277_v56 = vsel %vm1214_vm2, %v12125_v54, -inf  ;;  %v3329_v53 = vmul.f32 1.442695, %v3296_v39  ;;  %v1434_v39 = vsel %vm1214_vm2, %v12138_v60, 0.0 }
 0x2cc   :  { %v12121_v40 = vpop.xlane.xlu0 %3248 }
 0x2cd   :  { %v12133_v31 = vpop.xlane.xlu2 %1255 }
 0x2d3   :  { %3275 = vmax.xlane.f32.xlu0 %v3274_v55  ;;  %3278 = vmax.xlane.f32.xlu2 %v3277_v56  ;;  %v1102_v56 = vpop.f32.mrf.mxu3 }
 0x2d4   :  { %v1409_v30 = vpop.xlane.xlu0 %1408  ;;  %v12153_v10 = vmul.f32 0.35355338, %v1102_v56 }
 0x2d5   :  { %10437 = vrcp.f32 %v1409_v30  ;;  %v1514_v33 = vand.u32 2147483648, %v1409_v30  ;;  %vm1508_vm4 = vweird.f32 %v1409_v30 }
 0x2d6   :  { %10439 = vpow2.f32 %v3329_v53 }
 0x2d7   :  { %10441 = vpow2.f32 %v1345_v52  ;;  %v1515_v26 = vor.u32 1.1754944e-38, %v1514_v33 }
 0x2d8   :  { %10443 = vpow2.f32 %v3349_v57 }
 0x2d9   :  { %1261 = vmax.xlane.f32.xlu1 %v1260_v42  ;;  %v1512_v42 = vand.u32 2147483647, %v1409_v30 }
 0x2db   :  { %v10438_v55 = vpop.eup %10437  ;;  %v12147_v17 = vpop.xlane.xlu2 %3392  ;;  %1435 = vadd.xlane.f32.xlu0 %v1434_v39  ;;  %vm1513_vm6 = vcmp.eq.f32.partialorder %v1512_v42, 8.507059e+37  ;;  %v1315_v42 = vsub.f32 %v11835_v27, %v12063_v59 }
 0x2dc   :  { %16600 = vst [vmem:[#allocation97_spill] sm:$0xff] %v12147_v17  ;;  %v1504_v54 = vmul.f32 %v10438_v55, %v1409_v30  ;;  %v12149_v53 = vpop.xlane.xlu0 %1267  ;;  %v12151_v35 = vpop.eup %10439  ;;  %vm1509_vm3 = vweird.f32 %v10438_v55  ;;  %v1293_v17 = vsel %vm1214_vm2, %v12153_v10, -inf  ;;  %v10125_v30 = vunpack.i.h.bf16 %v11544_v6 }
 0x2dd   :  { %16601 = vst [vmem:[#allocation98_spill] sm:$0xff] %v12151_v35  ;;  %v3394_v36 = vsel %vm1214_vm2, %v12151_v35, 0.0  ;;  %vm1510_vm5 = vmor %vm1508_vm4, %vm1509_vm3  ;;  %v12163_v52 = vpop.eup %10441 }
 0x2de   :  { %v1505_v43 = vsub.f32 1.0, %v1504_v54  ;;  %v1410_v33 = vsel %vm1214_vm2, %v12163_v52, 0.0 }
 0x2e0   :  { %v1506_v3 = vmul.f32 %v10438_v55, %v1505_v43 }
 0x2e1   :  { %3395 = vadd.xlane.f32.xlu1 %v3394_v36  ;;  %v12166_v36 = vpop.eup %10443 }
 0x2e2   :  { %v1507_v39 = vadd.f32 %v10438_v55, %v1506_v3  ;;  %16603 = vst [vmem:[#allocation100_spill] sm:$0xff] %v12166_v36  ;;  %v12177_v3 = vpack.i.bf16 %v11726_v24, %v11740_v58 }
 0x2e3   :  { %v12159_v56 = vpop.xlane.xlu2 %1264  ;;  %1294 = vmax.xlane.f32.xlu0 %v1293_v17  ;;  %v10124_v17 = vunpack.i.l.bf16 %v11544_v6 }
 0x2e4   :  { %v1511_v54 = vsel %vm1510_vm5, %v10438_v55, %v1507_v39  ;;  %v12161_v43 = vpop.xlane.xlu0 %3398  ;;  %v3424_v55 = vsel %vm1214_vm2, %v12166_v36, 0.0  ;;  %16604 = vst [vmem:[#allocation101_spill] sm:$0xff] %v12177_v3 }
 0x2e5   :  { %16602 = vst [vmem:[#allocation99_spill] sm:$0xff] %v12161_v43  ;;  %v1516_v1 = vsel %vm1513_vm6, %v1515_v26, %v1511_v54  ;;  %v1351_v26 = vmul.f32 1.442695, %v1315_v42 }
 0x2e6   :  { %v1951_v57 = vmul.f32 %v11980_v19, %v1516_v1  ;;  %v12182_v1 = vmul.f32 0.35355338, %v11999_v41 }
 0x2e8   :  { %9627 = vmatmul.msk.f32.vlgmr.msrb.gmra.mxu2 %vm1214_vm2, %v1951_v57  ;;  %v3253_v39 = vsel %vm1214_vm2, %v12182_v1, -inf  ;;  %v12193_v57 = vmul.f32 0.35355338, %v12034_v46  ;;  %v1318_v46 = vsub.f32 %v11853_v61, %v12069_v20 }
 0x2e9   :  { %2149 = vmatpush.msrb.mxu2 %v10125_v30  ;;  %1411 = vadd.xlane.f32.xlu1 %v1410_v33  ;;  %v12195_v30 = vpop.permute.xlu1 %10197 }
 0x2ea   :  { %16606 = vst [vmem:[#allocation103_spill] sm:$0xff] %v12195_v30  ;;  %v1269_v33 = vsel %vm1214_vm2, %v12193_v57, -inf  ;;  %v1357_v24 = vmul.f32 1.442695, %v1318_v46  ;;  %v1105_v46 = vpop.f32.mrf.mxu3 }
 0x2eb   :  { %2150 = vmatpush.msrb.mxu2 %v10124_v17  ;;  %v12179_v19 = vpop.xlane.xlu2 %3251  ;;  %3425 = vadd.xlane.f32.xlu0 %v3424_v55 }
 0x2ec   :  { %10207 = vrot.lane.b32.xlu2 %v12177_v3, %s10929_s27  ;;  %v12186_v6 = vpop.xlane.xlu0 %3257 }
 0x2ed   :  { %16605 = vst [vmem:[#allocation102_spill] sm:$0xff] %v12186_v6 }
 0x2f1   :  { %3254 = vmax.xlane.f32.xlu1 %v3253_v39 }
 0x2f3   :  { %v1415_v54 = vpop.xlane.xlu2 %1414 }
 0x2f4   :  { %10445 = vrcp.f32 %v1415_v54  ;;  %v1418_v41 = vpop.xlane.xlu0 %1417  ;;  %v1542_v3 = vand.u32 2147483648, %v1415_v54  ;;  %vm1536_vm8 = vweird.f32 %v1415_v54 }
 0x2f5   :  { %10447 = vrcp.f32 %v1418_v41  ;;  %vm1550_vm12 = vweird.f32 %v1418_v41 }
 0x2f6   :  { %10449 = vpow2.f32 %v1351_v26  ;;  %v1540_v26 = vand.u32 2147483647, %v1415_v54  ;;  %v1543_v20 = vor.u32 1.1754944e-38, %v1542_v3 }
 0x2f7   :  { %10451 = vpow2.f32 %v1357_v24  ;;  %v1139_v24 = vpop.f32.mrf.mxu2 }
 0x2f8   :  { %vm1541_vm10 = vcmp.eq.f32.partialorder %v1540_v26, 8.507059e+37 }
 0x2f9   :  { %1270 = vmax.xlane.f32.xlu1 %v1269_v33  ;;  %v12205_v33 = vpop.permute.xlu1 %4951 }
 0x2fa   :  { %v10446_v27 = vpop.eup %10445  ;;  %16607 = vst [vmem:[#allocation104_spill] sm:$0xff] %v12205_v33 }
 0x2fb   :  { %v10448_v59 = vpop.eup %10447  ;;  %v1532_v17 = vmul.f32 %v10446_v27, %v1415_v54  ;;  %vm1537_vm7 = vweird.f32 %v10446_v27  ;;  %v10130_v54 = vunpack.i.h.bf16 %v11611_v28 }
 0x2fc   :  { %v1546_v55 = vmul.f32 %v10448_v59, %v1418_v41  ;;  %v12199_v39 = vpop.eup %10449  ;;  %vm1538_vm9 = vmor %vm1536_vm8, %vm1537_vm7  ;;  %vm1551_vm11 = vweird.f32 %v10448_v59 }
 0x2fd   :  { %v1533_v42 = vsub.f32 1.0, %v1532_v17  ;;  %v1419_v30 = vsel %vm1214_vm2, %v12199_v39, 0.0  ;;  %v1322_v17 = vsub.f32 %v11942_v51, %v12096_v7  ;;  %vm1552_vm13 = vmor %vm1550_vm12, %vm1551_vm11 }
 0x2fe   :  { %v1547_v35 = vsub.f32 1.0, %v1546_v55 }
 0x2ff   :  { %v1534_v58 = vmul.f32 %v10446_v27, %v1533_v42  ;;  %v12210_v42 = vmul.f32 0.35355338, %v12082_v11  ;;  %v1365_v51 = vmul.f32 1.442695, %v1322_v17 }
 0x300   :  { %v1548_v36 = vmul.f32 %v10448_v59, %v1547_v35  ;;  %v1556_v35 = vand.u32 2147483648, %v1418_v41 }
 0x301   :  { %v1535_v43 = vadd.f32 %v10446_v27, %v1534_v58  ;;  %1420 = vadd.xlane.f32.xlu1 %v1419_v30  ;;  %v1554_v58 = vand.u32 2147483647, %v1418_v41  ;;  %v1278_v11 = vsel %vm1214_vm2, %v12210_v42, -inf  ;;  %10453 = vpow2.f32 %v1365_v51  ;;  %v12219_v30 = vpop.eup %10451 }
 0x302   :  { %v1549_v55 = vadd.f32 %v10448_v59, %v1548_v36  ;;  %v1557_v36 = vor.u32 1.1754944e-38, %v1556_v35  ;;  %v12240_v35 = vmul.f32 0.35355338, %v1139_v24 }
 0x303   :  { %v1539_v61 = vsel %vm1538_vm9, %v10446_v27, %v1535_v43  ;;  %v10129_v43 = vunpack.i.l.bf16 %v11611_v28  ;;  %vm1555_vm14 = vcmp.eq.f32.partialorder %v1554_v58, 8.507059e+37  ;;  %v1428_v28 = vsel %vm1214_vm2, %v12219_v30, 0.0  ;;  %v12246_v58 = vpop.f32.mrf.mxu3 }
 0x304   :  { %v1544_v6 = vsel %vm1541_vm10, %v1543_v20, %v1539_v61  ;;  %v1553_v7 = vsel %vm1552_vm13, %v10448_v59, %v1549_v55  ;;  %v1142_v20 = vpop.f32.mrf.mxu2  ;;  %v3305_v61 = vsub.f32 %v11932_v16, %v12084_v38  ;;  %v1299_v51 = vsel %vm1214_vm2, %v12240_v35, -inf }
 0x305   :  { %v1953_v33 = vmul.f32 %v12030_v18, %v1544_v6  ;;  %v1558_v6 = vsel %vm1555_vm14, %v1557_v36, %v1553_v7  ;;  %v1321_v16 = vsub.f32 %v11944_v0, %v12100_v49 }
 0x306   :  { %v1954_v27 = vmul.f32 %v12032_v4, %v1558_v6  ;;  %v12267_v6 = vpop.xlane.xlu0 %1276 }
 0x307   :  { %9629 = vmatmul.msk.f32.vlgmr.msra.gmra.mxu3 %vm1214_vm2, %v1953_v33  ;;  %v12225_v59 = vpop.eup %10453  ;;  %v12232_v33 = vmul.f32 0.35355338, %v12104_v63  ;;  %v12244_v63 = vmul.f32 0.35355338, %v1142_v20 }
 0x308   :  { %2184 = vmatpush.msra.mxu3 %v10130_v54  ;;  %v1440_v4 = vsel %vm1214_vm2, %v12225_v59, 0.0  ;;  %v12249_v54 = vmul.f32 0.35355338, %v12092_v21  ;;  %v1363_v21 = vmul.f32 1.442695, %v1321_v16 }
 0x309   :  { %v1253_v3 = vpop.xlane.xlu1 %1252  ;;  %1279 = vmax.xlane.f32.xlu1 %v1278_v11  ;;  %16608 = vst [vmem:[#allocation105_spill] sm:$0xff] %v12232_v33  ;;  %v1302_v38 = vsel %vm1214_vm2, %v12244_v63, -inf  ;;  %v1328_v11 = vsub.f32 %v11989_v15, %v12149_v53 }
 0x30a   :  { %v1323_v18 = vsub.f32 %v12054_v23, %v1253_v3  ;;  %2185 = vmatpush.msra.mxu3 %v10129_v43  ;;  %v1325_v23 = vsub.f32 %v11956_v50, %v12110_v34  ;;  %v3271_v50 = vsel %vm1214_vm2, %v12232_v33, -inf  ;;  %v3347_v34 = vmul.f32 1.442695, %v3305_v61 }
 0x30b   :  { %v1287_v7 = vsel %vm1214_vm2, %v12249_v54, -inf  ;;  %v1377_v0 = vmul.f32 1.442695, %v1328_v11 }
 0x30c   :  { %v1367_v41 = vmul.f32 1.442695, %v1323_v18  ;;  %v1371_v55 = vmul.f32 1.442695, %v1325_v23  ;;  %v1179_v18 = vpop.f32.mrf.mxu3  ;;  %v3086_v23 = vpop.f32.mrf.mxu1 }
 0x30d   :  { %v12269_v49 = vmul.f32 0.35355338, %v1179_v18 }
 0x30e   :  { %10455 = vpow2.f32 %v1367_v41 }
 0x30f   :  { %9630 = vmatmul.msk.f32.gmra.mxu3 %vm1214_vm2, %v1954_v27  ;;  %10457 = vpow2.f32 %v1371_v55  ;;  %v1308_v15 = vsel %vm1214_vm2, %v12269_v49, -inf }
 0x310   :  { %10459 = vpow2.f32 %v3347_v34 }
 0x311   :  { %1429 = vadd.xlane.f32.xlu1 %v1428_v28  ;;  %10461 = vpow2.f32 %v1363_v21 }
 0x312   :  { %10463 = vpow2.f32 %v1377_v0 }
 0x314   :  { %v12229_v26 = vpop.eup %10455 }
 0x315   :  { %1441 = vadd.xlane.f32.xlu2 %v1440_v4  ;;  %v1443_v17 = vsel %vm1214_vm2, %v12229_v26, 0.0  ;;  %v12259_v43 = vpop.eup %10457  ;;  %v12281_v4 = vmul.f32 0.35355338, %v3086_v23 }
 0x316   :  { %1444 = vadd.xlane.f32.xlu0 %v1443_v17  ;;  %v1449_v36 = vsel %vm1214_vm2, %v12259_v43, 0.0  ;;  %v12265_v3 = vpop.eup %10459 }
 0x317   :  { %16609 = vst [vmem:[#allocation106_spill] sm:$0xff] %v12265_v3  ;;  %v3421_v24 = vsel %vm1214_vm2, %v12265_v3, 0.0  ;;  %v12275_v53 = vpop.eup %10461 }
 0x318   :  { %v1437_v27 = vsel %vm1214_vm2, %v12275_v53, 0.0  ;;  %v12279_v28 = vpop.eup %10463  ;;  %16610 = vst [vmem:[#allocation107_spill] sm:$0xff] %v12281_v4 }
 0x319   :  { %3272 = vmax.xlane.f32.xlu1 %v3271_v50  ;;  %v1458_v17 = vsel %vm1214_vm2, %v12279_v28, 0.0  ;;  %v3280_v50 = vsel %vm1214_vm2, %v12281_v4, -inf }
 0x31d   :  { %1300 = vmax.xlane.f32.xlu2 %v1299_v51 }
 0x31e   :  { %1303 = vmax.xlane.f32.xlu0 %v1302_v38  ;;  %v12287_v38 = vpop.xlane.xlu2 %3401 }
 0x321   :  { %1288 = vmax.xlane.f32.xlu1 %v1287_v7  ;;  %v12289_v7 = vmul.f32 0.35355338, %v1105_v46  ;;  %v10144_v46 = vunpack.i.l.bf16 %v11650_v45 }
 0x323   :  { %v1296_v18 = vsel %vm1214_vm2, %v12289_v7, -inf }
 0x325   :  { %1450 = vadd.xlane.f32.xlu2 %v1449_v36 }
 0x329   :  { %3422 = vadd.xlane.f32.xlu1 %v3421_v24 }
 0x32d   :  { %1309 = vmax.xlane.f32.xlu2 %v1308_v15  ;;  %v10145_v15 = vunpack.i.h.bf16 %v11650_v45 }
 0x32e   :  { %v1427_v41 = vpop.xlane.xlu0 %1426 }
 0x32f   :  { %10465 = vrcp.f32 %v1427_v41  ;;  %v1598_v51 = vand.u32 2147483648, %v1427_v41  ;;  %v1596_v16 = vand.u32 2147483647, %v1427_v41  ;;  %vm1592_vm3 = vweird.f32 %v1427_v41 }
 0x331   :  { %1438 = vadd.xlane.f32.xlu1 %v1437_v27  ;;  %v1599_v36 = vor.u32 1.1754944e-38, %v1598_v51  ;;  %vm1597_vm5 = vcmp.eq.f32.partialorder %v1596_v16, 8.507059e+37  ;;  %v12297_v27 = vpop.permute.xlu1 %4949 }
 0x332   :  { %16611 = vst [vmem:[#allocation108_spill] sm:$0xff] %v12297_v27 }
 0x335   :  { %v10466_v20 = vpop.eup %10465  ;;  %1459 = vadd.xlane.f32.xlu2 %v1458_v17 }
 0x336   :  { %v1588_v61 = vmul.f32 %v10466_v20, %v1427_v41  ;;  %vm1593_vm15 = vweird.f32 %v10466_v20  ;;  %v12299_v41 = vpop.xlane.xlu2 %1273 }
 0x337   :  { %vm1594_vm4 = vmor %vm1592_vm3, %vm1593_vm15 }
 0x338   :  { %v1589_v55 = vsub.f32 1.0, %v1588_v61  ;;  %v12308_v61 = vpop.xlane.xlu0 %1285 }
 0x339   :  { %3281 = vmax.xlane.f32.xlu1 %v3280_v50 }
 0x33a   :  { %v1590_v34 = vmul.f32 %v10466_v20, %v1589_v55 }
 0x33c   :  { %v1591_v21 = vadd.f32 %v10466_v20, %v1590_v34 }
 0x33e   :  { %v1595_v11 = vsel %vm1594_vm4, %v10466_v20, %v1591_v21  ;;  %v12306_v20 = vpop.xlane.xlu2 %1423 }
 0x33f   :  { %v1600_v0 = vsel %vm1597_vm5, %v1599_v36, %v1595_v11  ;;  %vm1578_vm15 = vweird.f32 %v12306_v20 }
 0x340   :  { %v1957_v24 = vmul.f32 %v12089_v22, %v1600_v0  ;;  %v3312_v22 = vsub.f32 %v12017_v8, %v12179_v19  ;;  %v12318_v16 = vpop.xlane.xlu0 %3416  ;;  %v1331_v0 = vsub.f32 %v12042_v37, %v12267_v6 }
 0x341   :  { %1297 = vmax.xlane.f32.xlu1 %v1296_v18  ;;  %16613 = vst [vmem:[#allocation110_spill] sm:$0xff] %v12318_v16 }
 0x342   :  { %9633 = vmatmul.msk.f32.vlgmr.msrb.gmra.mxu3 %vm1214_vm2, %v1957_v24  ;;  %v3361_v55 = vmul.f32 1.442695, %v3312_v22 }
 0x343   :  { %2254 = vmatpush.msrb.mxu3 %v10145_v15 }
 0x345   :  { %2255 = vmatpush.msrb.mxu3 %v10144_v46 }
 0x346   :  { %v12316_v51 = vpop.xlane.xlu2 %1282 }
 0x348   :  { %v12328_v18 = vpop.xlane.xlu0 %3275 }
 0x349   :  { %16615 = vst [vmem:[#allocation112_spill] sm:$0xff] %v12328_v18 }
 0x34c   :  { %v1262_v23 = vpop.xlane.xlu1 %1261 }
 0x34d   :  { %v1326_v17 = vsub.f32 %v12136_v32, %v1262_v23  ;;  %5023 = vrot.lane.b32.xlu2 %v11214_v14, %s10931_s4 }
 0x34e   :  { %v12326_v36 = vpop.xlane.xlu2 %1432 }
 0x34f   :  { %v1373_v45 = vmul.f32 1.442695, %v1326_v17  ;;  %v1383_v17 = vmul.f32 1.442695, %v1331_v0 }
 0x350   :  { %v12336_v37 = vpop.xlane.xlu0 %1435 }
 0x351   :  { %10467 = vpow2.f32 %v1373_v45 }
 0x352   :  { %10469 = vpow2.f32 %v3361_v55 }
 0x354   :  { %v12310_v50 = vpop.xlane.xlu1 %3395 }
 0x355   :  { %16612 = vst [vmem:[#allocation109_spill] sm:$0xff] %v12310_v50 }
 0x357   :  { %v12312_v34 = vpop.eup %10467 }
 0x358   :  { %v1452_v32 = vsel %vm1214_vm2, %v12312_v34, 0.0  ;;  %v12322_v19 = vpop.eup %10469 }
 0x359   :  { %1453 = vadd.xlane.f32.xlu0 %v1452_v32  ;;  %16614 = vst [vmem:[#allocation111_spill] sm:$0xff] %v12322_v19  ;;  %v3442_v21 = vsel %vm1214_vm2, %v12322_v19, 0.0  ;;  %v12334_v32 = vpop.xlane.xlu2 %3419 }
 0x35a   :  { %4945 = vrot.lane.b32.xlu1 %v11142_v47, %s10931_s4  ;;  %16616 = vst [vmem:[#allocation113_spill] sm:$0xff] %v12334_v32 }
 0x35c   :  { %v1412_v8 = vpop.xlane.xlu1 %1411 }
 0x35d   :  { %10471 = vrcp.f32 %v1412_v8  ;;  %v1528_v23 = vand.u32 2147483648, %v1412_v8  ;;  %v1526_v45 = vand.u32 2147483647, %v1412_v8  ;;  %vm1522_vm7 = vweird.f32 %v1412_v8 }
 0x35e   :  { %10473 = vpow2.f32 %v1383_v17 }
 0x35f   :  { %vm1527_vm9 = vcmp.eq.f32.partialorder %v1526_v45, 8.507059e+37  ;;  %10475 = vrcp.f32 %v12306_v20 }
 0x361   :  { %3443 = vadd.xlane.f32.xlu0 %v3442_v21  ;;  %v1529_v21 = vor.u32 1.1754944e-38, %v1528_v23  ;;  %v1324_v23 = vsub.f32 %v11970_v9, %v12133_v31 }
 0x363   :  { %v10472_v11 = vpop.eup %10471 }
 0x364   :  { %v1518_v24 = vmul.f32 %v10472_v11, %v1412_v8  ;;  %v12332_v15 = vpop.xlane.xlu1 %3254  ;;  %vm1523_vm6 = vweird.f32 %v10472_v11  ;;  %v12342_v8 = vpop.eup %10473 }
 0x365   :  { %vm1524_vm8 = vmor %vm1522_vm7, %vm1523_vm6  ;;  %v12346_v17 = vpop.eup %10475  ;;  %vm1620_vm6 = vweird.f32 %v12326_v36 }
 0x366   :  { %v1519_v46 = vsub.f32 1.0, %v1518_v24  ;;  %v1574_v9 = vmul.f32 %v12346_v17, %v12306_v20  ;;  %vm1579_vm13 = vweird.f32 %v12346_v17 }
 0x367   :  { %vm12396_vm3 = vmor %vm1578_vm15, %vm1579_vm13 }
 0x368   :  { %v1520_v22 = vmul.f32 %v10472_v11, %v1519_v46 }
 0x36a   :  { %v1521_v55 = vadd.f32 %v10472_v11, %v1520_v22  ;;  %v12348_v22 = vpop.xlane.xlu2 %1291 }
 0x36c   :  { %v1271_v27 = vpop.xlane.xlu1 %1270  ;;  %v1525_v19 = vsel %vm1524_vm8, %v10472_v11, %v1521_v55 }
 0x36d   :  { %v1329_v6 = vsub.f32 %v12193_v57, %v1271_v27  ;;  %v1530_v24 = vsel %vm1527_vm9, %v1529_v21, %v1525_v19  ;;  %v1369_v57 = vmul.f32 1.442695, %v1324_v23  ;;  %v12355_v19 = vpop.xlane.xlu0 %1294  ;;  %v1575_v21 = vsub.f32 1.0, %v1574_v9 }
 0x36e   :  { %v1952_v0 = vmul.f32 %v12163_v52, %v1530_v24  ;;  %v1467_v52 = vsel %vm1214_vm2, %v12342_v8, 0.0  ;;  %v3311_v9 = vsub.f32 %v11968_v29, %v12121_v40 }
 0x36f   :  { %v1379_v46 = vmul.f32 1.442695, %v1329_v6 }
 0x370   :  { %9628 = vmatmul.msk.f32.gmra.mxu2 %vm1214_vm2, %v1952_v0  ;;  %v3359_v40 = vmul.f32 1.442695, %v3311_v9 }
 0x371   :  { %10477 = vpow2.f32 %v1379_v46 }
 0x372   :  { %v12367_v23 = vpop.xlane.xlu2 %3278 }
 0x374   :  { %v1421_v11 = vpop.xlane.xlu1 %1420 }
 0x375   :  { %10479 = vrcp.f32 %v1421_v11  ;;  %v1568_v33 = vand.u32 2147483647, %v1421_v11  ;;  %v12375_v32 = vpop.xlane.xlu0 %3425  ;;  %vm1564_vm11 = vweird.f32 %v1421_v11 }
 0x376   :  { %10481 = vrcp.f32 %v12326_v36  ;;  %1468 = vadd.xlane.f32.xlu2 %v1467_v52  ;;  %v1570_v52 = vand.u32 2147483648, %v1421_v11 }
 0x377   :  { %v12353_v27 = vpop.eup %10477  ;;  %10483 = vpow2.f32 %v1369_v57  ;;  %v1576_v57 = vmul.f32 %v12346_v17, %v1575_v21  ;;  %vm1569_vm14 = vcmp.eq.f32.partialorder %v1568_v33, 8.507059e+37  ;;  %v10135_v33 = vunpack.i.h.bf16 %v11670_v44 }
 0x378   :  { %v1461_v31 = vsel %vm1214_vm2, %v12353_v27, 0.0  ;;  %10485 = vrcp.f32 %v12336_v37  ;;  %v1571_v50 = vor.u32 1.1754944e-38, %v1570_v52 }
 0x379   :  { %1462 = vadd.xlane.f32.xlu0 %v1461_v31 }
 0x37b   :  { %v10480_v45 = vpop.eup %10479 }
 0x37c   :  { %v12361_v55 = vpop.eup %10481  ;;  %v1560_v6 = vmul.f32 %v10480_v45, %v1421_v11  ;;  %v12363_v24 = vpop.xlane.xlu1 %1279  ;;  %vm1565_vm10 = vweird.f32 %v10480_v45  ;;  %v1584_v11 = vand.u32 2147483648, %v12306_v20 }
 0x37d   :  { %v1616_v46 = vmul.f32 %v12361_v55, %v12326_v36  ;;  %v12370_v18 = vpop.eup %10483  ;;  %vm1566_vm12 = vmor %vm1564_vm11, %vm1565_vm10  ;;  %vm1621_vm5 = vweird.f32 %v12361_v55 }
 0x37e   :  { %v1561_v0 = vsub.f32 1.0, %v1560_v6  ;;  %v1446_v3 = vsel %vm1214_vm2, %v12370_v18, 0.0  ;;  %v12383_v29 = vpop.eup %10485  ;;  %vm12426_vm7 = vmor %vm1620_vm6, %vm1621_vm5 }
 0x37f   :  { %v1617_v16 = vsub.f32 1.0, %v1616_v46  ;;  %vm1635_vm11 = vweird.f32 %v12383_v29 }
 0x380   :  { %v1562_v31 = vmul.f32 %v10480_v45, %v1561_v0  ;;  %v1577_v0 = vadd.f32 %v12346_v17, %v1576_v57 }
 0x382   :  { %v1563_v6 = vadd.f32 %v10480_v45, %v1562_v31  ;;  %v12408_v31 = vpop.permute.xlu2 %10207 }
 0x383   :  { %16619 = vst [vmem:[#allocation114_spill] sm:$0xff] %v12408_v31 }
 0x384   :  { %v1567_v4 = vsel %vm1566_vm12, %v10480_v45, %v1563_v6  ;;  %v12380_v21 = vpop.xlane.xlu1 %1429  ;;  %1447 = vadd.xlane.f32.xlu1 %v1446_v3  ;;  %v1582_v45 = vand.u32 2147483647, %v12306_v20  ;;  %v12392_v3 = vmul.f32 0.35355338, %v12246_v58  ;;  %v10134_v58 = vunpack.i.l.bf16 %v11670_v44 }
 0x385   :  { %v1572_v46 = vsel %vm1569_vm14, %v1571_v50, %v1567_v4  ;;  %10487 = vrcp.f32 %v12380_v21  ;;  %v1618_v4 = vmul.f32 %v12361_v55, %v1617_v16  ;;  %v1630_v50 = vmul.f32 %v12383_v29, %v12336_v37 }
 0x386   :  { %v1955_v52 = vmul.f32 %v12199_v39, %v1572_v46  ;;  %v1581_v39 = vsel %vm12396_vm3, %v12346_v17, %v1577_v0  ;;  %10489 = vpow2.f32 %v3359_v40  ;;  %v1585_v20 = vor.u32 1.1754944e-38, %v1584_v11 }
 0x387   :  { %v1327_v16 = vsub.f32 %v12003_v12, %v12159_v56  ;;  %vm1583_vm4 = vcmp.eq.f32.partialorder %v1582_v45, 8.507059e+37  ;;  %v1619_v46 = vadd.f32 %v12361_v55, %v1618_v4  ;;  %v1305_v44 = vsel %vm1214_vm2, %v12392_v3, -inf }
 0x388   :  { %9631 = vmatmul.msk.f32.vlgmr.msra.gmra.mxu2 %vm1214_vm2, %v1955_v52  ;;  %v1586_v17 = vsel %vm1583_vm4, %v1585_v20, %v1581_v39  ;;  %v1631_v0 = vsub.f32 1.0, %v1630_v50  ;;  %v1626_v12 = vand.u32 2147483648, %v12326_v36  ;;  %v1624_v45 = vand.u32 2147483647, %v12326_v36 }
 0x389   :  { %2219 = vmatpush.msra.mxu2 %v10135_v33  ;;  %v12410_v9 = vpop.xlane.xlu0 %1444  ;;  %v1375_v56 = vmul.f32 1.442695, %v1327_v16  ;;  %v1956_v57 = vmul.f32 %v12056_v48, %v1586_v17  ;;  %v1623_v50 = vsel %vm12426_vm7, %v12361_v55, %v1619_v46  ;;  %v1612_v39 = vand.u32 2147483648, %v12380_v21 }
 0x38a   :  { %10491 = vrcp.f32 %v12410_v9  ;;  %v1632_v20 = vmul.f32 %v12383_v29, %v1631_v0  ;;  %v1610_v16 = vand.u32 2147483647, %v12380_v21  ;;  %vm1625_vm9 = vcmp.eq.f32.partialorder %v1624_v45, 8.507059e+37 }
 0x38b   :  { %v10488_v6 = vpop.eup %10487  ;;  %2220 = vmatpush.msra.mxu2 %v10134_v58  ;;  %10493 = vpow2.f32 %v1375_v56  ;;  %vm1606_vm10 = vweird.f32 %v12380_v21  ;;  %v1613_v0 = vor.u32 1.1754944e-38, %v1612_v39  ;;  %v1640_v45 = vand.u32 2147483648, %v12336_v37 }
 0x38c   :  { %v1602_v40 = vmul.f32 %v10488_v6, %v12380_v21  ;;  %v12420_v11 = vpop.xlane.xlu1 %3272  ;;  %1306 = vmax.xlane.f32.xlu1 %v1305_v44  ;;  %v12434_v4 = vpop.eup %10489  ;;  %vm1607_vm8 = vweird.f32 %v10488_v6  ;;  %v1627_v44 = vor.u32 1.1754944e-38, %v1626_v12  ;;  %vm1611_vm13 = vcmp.eq.f32.partialorder %v1610_v16, 8.507059e+37 }
 0x38d   :  { %4990 = vrot.lane.b32.xlu0 %v11192_v5, %s10930_s1  ;;  %v3439_v46 = vsel %vm1214_vm2, %v12434_v4, 0.0  ;;  %vm1608_vm12 = vmor %vm1606_vm10, %vm1607_vm8  ;;  %v1633_v56 = vadd.f32 %v12383_v29, %v1632_v20  ;;  %vm1634_vm14 = vweird.f32 %v12336_v37  ;;  %v1638_v39 = vand.u32 2147483647, %v12336_v37 }
 0x38e   :  { %v1603_v33 = vsub.f32 1.0, %v1602_v40  ;;  %4984 = vrot.lane.b32.xlu2 %v11175_v62, %s10931_s4  ;;  %v12443_v40 = vpop.xlane.xlu2 %1441  ;;  %v1628_v55 = vsel %vm1625_vm9, %v1627_v44, %v1623_v50  ;;  %vm1636_vm15 = vmor %vm1634_vm14, %vm1635_vm11  ;;  %v10149_v16 = vunpack.i.l.bf16 %v11730_v25  ;;  %v1641_v44 = vor.u32 1.1754944e-38, %v1640_v45 }
 0x38f   :  { %v1959_v21 = vmul.f32 %v12071_v13, %v1628_v55  ;;  %v1637_v13 = vsel %vm1636_vm15, %v12383_v29, %v1633_v56  ;;  %vm1639_vm3 = vcmp.eq.f32.partialorder %v1638_v39, 8.507059e+37  ;;  %vm1676_vm5 = vweird.f32 %v12410_v9 }
 0x390   :  { %v10492_v58 = vpop.eup %10491  ;;  %9632 = vmatmul.msk.f32.gmra.mxu2 %vm1214_vm2, %v1956_v57  ;;  %v1604_v36 = vmul.f32 %v10488_v6, %v1603_v33  ;;  %10495 = vrcp.f32 %v12443_v40 }
 0x391   :  { %v1672_v48 = vmul.f32 %v10492_v58, %v12410_v9  ;;  %vm1677_vm4 = vweird.f32 %v10492_v58 }
 0x392   :  { %v1605_v17 = vadd.f32 %v10488_v6, %v1604_v36  ;;  %v10150_v36 = vunpack.i.h.bf16 %v11730_v25  ;;  %v1680_v25 = vand.u32 2147483647, %v12410_v9  ;;  %vm1678_vm6 = vmor %vm1676_vm5, %vm1677_vm4 }
 0x393   :  { %v1673_v52 = vsub.f32 1.0, %v1672_v48  ;;  %v1642_v48 = vsel %vm1639_vm3, %v1641_v44, %v1637_v13 }
 0x394   :  { %v12450_v33 = vpop.xlane.xlu1 %1288  ;;  %3440 = vadd.xlane.f32.xlu1 %v3439_v46  ;;  %v1609_v12 = vsel %vm1608_vm12, %v10488_v6, %v1605_v17  ;;  %v12463_v6 = vpop.eup %10493  ;;  %v1682_v46 = vand.u32 2147483648, %v12410_v9  ;;  %v1960_v29 = vmul.f32 %v12138_v60, %v1642_v48  ;;  %vm1681_vm7 = vcmp.eq.f32.partialorder %v1680_v25, 8.507059e+37  ;;  %v16622_v60 = vld [vmem:[#allocation56_spill] sm:$0xff] }
 0x395   :  { %v1614_v57 = vsel %vm1611_vm13, %v1613_v0, %v1609_v12  ;;  %v1674_v20 = vmul.f32 %v10492_v58, %v1673_v52  ;;  %v1455_v37 = vsel %vm1214_vm2, %v12463_v6, 0.0  ;;  %vm1662_vm13 = vweird.f32 %v12443_v40 }
 0x396   :  { %5107 = vrot.lane.b32.xlu2 %v11341_v2, %s10930_s1  ;;  %v1958_v50 = vmul.f32 %v12219_v30, %v1614_v57  ;;  %v12469_v30 = vpop.xlane.xlu2 %1300  ;;  %v1683_v52 = vor.u32 1.1754944e-38, %v1682_v46  ;;  %v10496_v45 = vpop.eup %10495  ;;  %v1332_v57 = vsub.f32 %v12210_v42, %v12363_v24  ;;  %v16623_v42 = vld [vmem:[#allocation91_spill] sm:$0xff] }
 0x397   :  { %v1675_v17 = vadd.f32 %v10492_v58, %v1674_v20  ;;  %v1658_v39 = vmul.f32 %v10496_v45, %v12443_v40  ;;  %v1334_v24 = vsub.f32 %v16623_v42, %v12308_v61  ;;  %vm1663_vm11 = vweird.f32 %v10496_v45  ;;  %v16625_v42 = vld [vmem:[#allocation57_spill] sm:$0xff] }
 0x398   :  { %9634 = vmatmul.msk.f32.gmra.mxu3 %vm1214_vm2, %v1958_v50  ;;  %9635 = vmatmul.msk.f32.vlgmr.msrb.gmra.mxu2 %vm1214_vm2, %v1959_v21  ;;  %v10160_v50 = vunpack.i.h.bf16 %v16622_v60  ;;  %vm1664_vm14 = vmor %vm1662_vm13, %vm1663_vm11 }
 0x399   :  { %2289 = vmatpush.msrb.mxu2 %v10150_v36  ;;  %v1679_v0 = vsel %vm1678_vm6, %v10492_v58, %v1675_v17  ;;  %v10159_v58 = vunpack.i.l.bf16 %v16622_v60  ;;  %v1385_v36 = vmul.f32 1.442695, %v1332_v57  ;;  %v1659_v13 = vsub.f32 1.0, %v1658_v39 }
 0x39a   :  { %v1684_v12 = vsel %vm1681_vm7, %v1683_v52, %v1679_v0 }
 0x39b   :  { %2290 = vmatpush.msrb.mxu2 %v10149_v16  ;;  %v1963_v9 = vmul.f32 %v12229_v26, %v1684_v12  ;;  %v1660_v17 = vmul.f32 %v10496_v45, %v1659_v13 }
 0x39c   :  { %v12473_v55 = vpop.xlane.xlu1 %3422  ;;  %1456 = vadd.xlane.f32.xlu1 %v1455_v37  ;;  %v1389_v37 = vmul.f32 1.442695, %v1334_v24 }
 0x39d   :  { %v1661_v60 = vadd.f32 %v10496_v45, %v1660_v17 }
 0x39e   :  { %v12483_v21 = vpop.xlane.xlu2 %1450 }
 0x39f   :  { %v1665_v13 = vsel %vm1664_vm14, %v10496_v45, %v1661_v60  ;;  %vm1704_vm4 = vweird.f32 %v12483_v21  ;;  %v1708_v45 = vand.u32 2147483647, %v12483_v21 }
 0x3a0   :  { %9636 = vmatmul.msk.f32.gmra.mxu2 %vm1214_vm2, %v1960_v29 }
 0x3a1   :  { %vm1709_vm6 = vcmp.eq.f32.partialorder %v1708_v45, 8.507059e+37 }
 0x3a4   :  { %v1439_v56 = vpop.xlane.xlu1 %1438 }
 0x3a5   :  { %10497 = vrcp.f32 %v1439_v56  ;;  %v1654_v48 = vand.u32 2147483648, %v1439_v56  ;;  %v1652_v29 = vand.u32 2147483647, %v1439_v56  ;;  %vm1648_vm9 = vweird.f32 %v1439_v56 }
 0x3a6   :  { %10499 = vrcp.f32 %v12483_v21 }
 0x3a7   :  { %10501 = vpow2.f32 %v1385_v36  ;;  %v1655_v61 = vor.u32 1.1754944e-38, %v1654_v48  ;;  %vm1653_vm12 = vcmp.eq.f32.partialorder %v1652_v29, 8.507059e+37  ;;  %v1666_v36 = vand.u32 2147483647, %v12443_v40 }
 0x3a8   :  { %9639 = vmatmul.msk.f32.vlgmr.msra.gmra.mxu2 %vm1214_vm2, %v1963_v9  ;;  %10503 = vpow2.f32 %v1389_v37  ;;  %v16624_v9 = vld [vmem:[#allocation3_spill] sm:$0xff] }
 0x3a9   :  { %2359 = vmatpush.msra.mxu2 %v10160_v50  ;;  %vm1667_vm15 = vcmp.eq.f32.partialorder %v1666_v36, 8.507059e+37 }
 0x3ab   :  { %2360 = vmatpush.msra.mxu2 %v10159_v58  ;;  %v10498_v20 = vpop.eup %10497  ;;  %v1668_v58 = vand.u32 2147483648, %v12443_v40  ;;  %v1710_v40 = vand.u32 2147483648, %v12483_v21 }
 0x3ac   :  { %v1644_v26 = vmul.f32 %v10498_v20, %v1439_v56  ;;  %v10500_v16 = vpop.eup %10499  ;;  %vm1649_vm8 = vweird.f32 %v10498_v20 }
 0x3ad   :  { %v1700_v46 = vmul.f32 %v10500_v16, %v12483_v21  ;;  %v12494_v0 = vpop.eup %10501  ;;  %vm1650_vm10 = vmor %vm1648_vm9, %vm1649_vm8  ;;  %v1669_v37 = vor.u32 1.1754944e-38, %v1668_v58  ;;  %vm1705_vm3 = vweird.f32 %v10500_v16  ;;  %v1711_v29 = vor.u32 1.1754944e-38, %v1710_v40 }
 0x3ae   :  { %v1645_v44 = vsub.f32 1.0, %v1644_v26  ;;  %v1470_v50 = vsel %vm1214_vm2, %v12494_v0, 0.0  ;;  %v12506_v26 = vpop.eup %10503  ;;  %vm1706_vm5 = vmor %vm1704_vm4, %vm1705_vm3 }
 0x3af   :  { %v1701_v12 = vsub.f32 1.0, %v1700_v46  ;;  %v1476_v17 = vsel %vm1214_vm2, %v12506_v26, 0.0 }
 0x3b0   :  { %v1646_v25 = vmul.f32 %v10498_v20, %v1645_v44  ;;  %v10154_v44 = vunpack.i.l.bf16 %v16625_v42 }
 0x3b1   :  { %v1702_v24 = vmul.f32 %v10500_v16, %v1701_v12 }
 0x3b2   :  { %v1647_v52 = vadd.f32 %v10498_v20, %v1646_v25 }
 0x3b3   :  { %v1703_v48 = vadd.f32 %v10500_v16, %v1702_v24 }
 0x3b4   :  { %v1651_v57 = vsel %vm1650_vm10, %v10498_v20, %v1647_v52  ;;  %v10155_v20 = vunpack.i.h.bf16 %v16625_v42  ;;  %v12516_v52 = vpop.xlane.xlu0 %1303 }
 0x3b5   :  { %4947 = vrot.lane.b32.xlu1 %v16624_v9, %s10931_s4  ;;  %v1656_v39 = vsel %vm1653_vm12, %v1655_v61, %v1651_v57  ;;  %v1707_v25 = vsel %vm1706_vm5, %v10500_v16, %v1703_v48  ;;  %v16626_v57 = vld [vmem:[#allocation65_spill] sm:$0xff] }
 0x3b6   :  { %v1961_v56 = vmul.f32 %v12275_v53, %v1656_v39  ;;  %v1670_v53 = vsel %vm1667_vm15, %v1669_v37, %v1665_v13  ;;  %v1712_v61 = vsel %vm1709_vm6, %v1711_v29, %v1707_v25  ;;  %v10165_v60 = vunpack.i.h.bf16 %v16626_v57 }
 0x3b7   :  { %1471 = vadd.xlane.f32.xlu0 %v1470_v50  ;;  %v1962_v46 = vmul.f32 %v12225_v59, %v1670_v53  ;;  %v1965_v12 = vmul.f32 %v12259_v43, %v1712_v61  ;;  %v10164_v21 = vunpack.i.l.bf16 %v16626_v57  ;;  %v16627_v59 = vld [vmem:[#allocation10_spill] sm:$0xff]  ;;  %v3313_v50 = vsub.f32 %v12182_v1, %v12332_v15 }
 0x3b8   :  { %9637 = vmatmul.msk.f32.vlgmr.msra.gmra.mxu3 %vm1214_vm2, %v1961_v56  ;;  %v16628_v43 = vld [vmem:[#allocation86_spill] sm:$0xff]  ;;  %v1335_v29 = vsub.f32 %v12249_v54, %v12450_v33 }
 0x3b9   :  { %2324 = vmatpush.msra.mxu3 %v10155_v20  ;;  %v3363_v39 = vmul.f32 1.442695, %v3313_v50  ;;  %v1330_v36 = vsub.f32 %v16628_v43, %v12299_v41  ;;  %v16629_v20 = vld [vmem:[#allocation9_spill] sm:$0xff]  ;;  %v12532_v41 = vpop.xlane.xlu1 %3281 }
 0x3ba   :  { %v1391_v57 = vmul.f32 1.442695, %v1335_v29 }
 0x3bb   :  { %2325 = vmatpush.msra.mxu3 %v10154_v44  ;;  %v1381_v37 = vmul.f32 1.442695, %v1330_v36 }
 0x3bf   :  { %1477 = vadd.xlane.f32.xlu2 %v1476_v17 }
 0x3c0   :  { %9638 = vmatmul.msk.f32.gmra.mxu3 %vm1214_vm2, %v1962_v46  ;;  %v16630_v46 = vld [vmem:[#allocation7_spill] sm:$0xff] }
 0x3c8   :  { %9641 = vmatmul.msk.f32.vlgmr.msrb.gmra.mxu3 %vm1214_vm2, %v1965_v12 }
 0x3c9   :  { %2394 = vmatpush.msrb.mxu3 %v10165_v60  ;;  %v12548_v60 = vpop.xlane.xlu1 %1297 }
 0x3cb   :  { %5105 = vrot.lane.b32.xlu0 %v16627_v59, %s10930_s1  ;;  %2395 = vmatpush.msrb.mxu3 %v10164_v21 }
 0x3cc   :  { %v1454_v16 = vpop.xlane.xlu0 %1453 }
 0x3cd   :  { %10505 = vrcp.f32 %v1454_v16  ;;  %v1724_v24 = vand.u32 2147483648, %v1454_v16  ;;  %v1722_v44 = vand.u32 2147483647, %v1454_v16  ;;  %vm1718_vm8 = vweird.f32 %v1454_v16 }
 0x3ce   :  { %10507 = vpow2.f32 %v3363_v39  ;;  %v12554_v39 = vpop.xlane.xlu2 %1309 }
 0x3cf   :  { %v1725_v15 = vor.u32 1.1754944e-38, %v1724_v24  ;;  %vm1723_vm10 = vcmp.eq.f32.partialorder %v1722_v44, 8.507059e+37  ;;  %10509 = vpow2.f32 %v1381_v37 }
 0x3d0   :  { %10511 = vpow2.f32 %v1391_v57 }
 0x3d1   :  { %v12550_v21 = vpop.permute.xlu1 %4945 }
 0x3d2   :  { %16631 = vst [vmem:[#allocation56_spill] sm:$0xff] %v12550_v21  ;;  %v1339_v21 = vsub.f32 %v12240_v35, %v12469_v30 }
 0x3d3   :  { %v10506_v58 = vpop.eup %10505 }
 0x3d4   :  { %v1714_v56 = vmul.f32 %v10506_v58, %v1454_v16  ;;  %vm1719_vm7 = vweird.f32 %v10506_v58  ;;  %v12530_v1 = vpop.eup %10507  ;;  %v12544_v61 = vpop.xlane.xlu0 %3443  ;;  %v1399_v30 = vmul.f32 1.442695, %v1339_v21 }
 0x3d5   :  { %vm1720_vm9 = vmor %vm1718_vm8, %vm1719_vm7  ;;  %v3445_v17 = vsel %vm1214_vm2, %v12530_v1, 0.0  ;;  %v12540_v25 = vpop.eup %10509 }
 0x3d6   :  { %v1715_v42 = vsub.f32 1.0, %v1714_v56  ;;  %v1464_v12 = vsel %vm1214_vm2, %v12540_v25, 0.0  ;;  %v12552_v16 = vpop.eup %10511 }
 0x3d7   :  { %5068 = vrot.lane.b32.xlu2 %v16629_v20, %s10930_s1  ;;  %v1479_v33 = vsel %vm1214_vm2, %v12552_v16, 0.0 }
 0x3d8   :  { %v1716_v13 = vmul.f32 %v10506_v58, %v1715_v42 }
 0x3da   :  { %v1717_v53 = vadd.f32 %v10506_v58, %v1716_v13 }
 0x3dc   :  { %v1721_v48 = vsel %vm1720_vm9, %v10506_v58, %v1717_v53  ;;  %v1337_v58 = vsub.f32 %v12153_v10, %v12355_v19  ;;  %v16632_v19 = vld [vmem:[#allocation66_spill] sm:$0xff] }
 0x3dd   :  { %v1726_v40 = vsel %vm1723_vm10, %v1725_v15, %v1721_v48  ;;  %v12560_v15 = vpop.xlane.xlu2 %1459  ;;  %v10174_v57 = vunpack.i.l.bf16 %v16632_v19 }
 0x3de   :  { %v1966_v45 = vmul.f32 %v12312_v34, %v1726_v40  ;;  %v1395_v13 = vmul.f32 1.442695, %v1337_v58 }
 0x3df   :  { %5062 = vrot.lane.b32.xlu2 %v16630_v46, %s10931_s4  ;;  %3446 = vadd.xlane.f32.xlu1 %v3445_v17  ;;  %v10175_v17 = vunpack.i.h.bf16 %v16632_v19 }
 0x3e0   :  { %9642 = vmatmul.msk.f32.gmra.mxu3 %vm1214_vm2, %v1966_v45 }
 0x3e7   :  { %1465 = vadd.xlane.f32.xlu1 %v1464_v12  ;;  %v16633_v12 = vld [vmem:[#allocation6_spill] sm:$0xff] }
 0x3ec   :  { %v1463_v34 = vpop.xlane.xlu0 %1462 }
 0x3ed   :  { %10513 = vrcp.f32 %v1463_v34  ;;  %v1766_v43 = vand.u32 2147483648, %v1463_v34  ;;  %v1764_v24 = vand.u32 2147483647, %v1463_v34  ;;  %vm1760_vm12 = vweird.f32 %v1463_v34 }
 0x3ef   :  { %v1767_v37 = vor.u32 1.1754944e-38, %v1766_v43  ;;  %vm1765_vm14 = vcmp.eq.f32.partialorder %v1764_v24, 8.507059e+37 }
 0x3f3   :  { %v10514_v50 = vpop.eup %10513 }
 0x3f4   :  { %v1756_v54 = vmul.f32 %v10514_v50, %v1463_v34  ;;  %vm1761_vm11 = vweird.f32 %v10514_v50 }
 0x3f5   :  { %1480 = vadd.xlane.f32.xlu0 %v1479_v33  ;;  %vm1762_vm13 = vmor %vm1760_vm12, %vm1761_vm11  ;;  %vm1746_vm11 = vweird.f32 %v12560_v15 }
 0x3f6   :  { %v1757_v56 = vsub.f32 1.0, %v1756_v54 }
 0x3f7   :  { %v1448_v36 = vpop.xlane.xlu1 %1447 }
 0x3f8   :  { %v1758_v42 = vmul.f32 %v10514_v50, %v1757_v56  ;;  %10515 = vrcp.f32 %v1448_v36  ;;  %v1696_v54 = vand.u32 2147483648, %v1448_v36  ;;  %vm1690_vm3 = vweird.f32 %v1448_v36  ;;  %v12572_v56 = vpop.permute.xlu2 %5023 }
 0x3f9   :  { %10517 = vpow2.f32 %v1395_v13  ;;  %16634 = vst [vmem:[#allocation91_spill] sm:$0xff] %v12572_v56  ;;  %v16636_v56 = vld [vmem:[#allocation16_spill] sm:$0xff] }
 0x3fa   :  { %v1759_v44 = vadd.f32 %v10514_v50, %v1758_v42  ;;  %v1697_v43 = vor.u32 1.1754944e-38, %v1696_v54  ;;  %10519 = vrcp.f32 %v12560_v15 }
 0x3fc   :  { %v1763_v53 = vsel %vm1762_vm13, %v10514_v50, %v1759_v44 }
 0x3fd   :  { %v1768_v48 = vsel %vm1765_vm14, %v1767_v37, %v1763_v53 }
 0x3fe   :  { %v10516_v40 = vpop.eup %10515  ;;  %v1969_v10 = vmul.f32 %v12353_v27, %v1768_v48  ;;  %v1694_v27 = vand.u32 2147483647, %v1448_v36 }
 0x3ff   :  { %v1686_v45 = vmul.f32 %v10516_v40, %v1448_v36  ;;  %v12564_v29 = vpop.xlane.xlu1 %1306  ;;  %vm1691_vm15 = vweird.f32 %v10516_v40  ;;  %v12570_v33 = vpop.eup %10517 }
 0x400   :  { %5029 = vrot.lane.b32.xlu1 %v16633_v12, %s10930_s1  ;;  %9645 = vmatmul.msk.f32.vlgmr.msra.gmra.mxu3 %vm1214_vm2, %v1969_v10  ;;  %vm1692_vm4 = vmor %vm1690_vm3, %vm1691_vm15  ;;  %v1485_v24 = vsel %vm1214_vm2, %v12570_v33, 0.0  ;;  %vm1695_vm5 = vcmp.eq.f32.partialorder %v1694_v27, 8.507059e+37  ;;  %v10520_v37 = vpop.eup %10519  ;;  %v1469_v53 = vpop.xlane.xlu2 %1468 }
 0x401   :  { %v1687_v34 = vsub.f32 1.0, %v1686_v45  ;;  %2464 = vmatpush.msra.mxu3 %v10175_v17  ;;  %vm1747_vm8 = vweird.f32 %v10520_v37  ;;  %vm1788_vm15 = vweird.f32 %v1469_v53 }
 0x402   :  { %vm1748_vm12 = vmor %vm1746_vm11, %vm1747_vm8 }
 0x403   :  { %v1688_v50 = vmul.f32 %v10516_v40, %v1687_v34  ;;  %2465 = vmatpush.msra.mxu3 %v10174_v57 }
 0x405   :  { %v1689_v58 = vadd.f32 %v10516_v40, %v1688_v50 }
 0x407   :  { %v12574_v42 = vpop.xlane.xlu1 %3440  ;;  %v1693_v13 = vsel %vm1692_vm4, %v10516_v40, %v1689_v58  ;;  %v1742_v40 = vmul.f32 %v10520_v37, %v12560_v15 }
 0x408   :  { %1486 = vadd.xlane.f32.xlu2 %v1485_v24  ;;  %5027 = vrot.lane.b32.xlu1 %v11214_v14, %s10930_s1  ;;  %v1698_v36 = vsel %vm1695_vm5, %v1697_v43, %v1693_v13 }
 0x409   :  { %5101 = vrot.lane.b32.xlu0 %v16627_v59, %s10931_s4  ;;  %v1964_v44 = vmul.f32 %v12370_v18, %v1698_v36  ;;  %v1743_v19 = vsub.f32 1.0, %v1742_v40 }
 0x40b   :  { %9640 = vmatmul.msk.f32.gmra.mxu2 %vm1214_vm2, %v1964_v44  ;;  %v1744_v34 = vmul.f32 %v10520_v37, %v1743_v19  ;;  %v16635_v44 = vld [vmem:[#allocation87_spill] sm:$0xff] }
 0x40c   :  { %v1333_v40 = vsub.f32 %v16635_v44, %v12316_v51 }
 0x40d   :  { %v1745_v36 = vadd.f32 %v10520_v37, %v1744_v34 }
 0x40f   :  { %v1457_v48 = vpop.xlane.xlu1 %1456  ;;  %v1749_v51 = vsel %vm1748_vm12, %v10520_v37, %v1745_v36  ;;  %v1792_v37 = vand.u32 2147483647, %v1469_v53 }
 0x410   :  { %10521 = vrcp.f32 %v1457_v48  ;;  %v1738_v50 = vand.u32 2147483648, %v1457_v48  ;;  %v1736_v27 = vand.u32 2147483647, %v1457_v48  ;;  %vm1732_vm7 = vweird.f32 %v1457_v48 }
 0x411   :  { %5103 = vrot.lane.b32.xlu0 %v11341_v2, %s10931_s4  ;;  %10523 = vrcp.f32 %v1469_v53  ;;  %vm1793_vm4 = vcmp.eq.f32.partialorder %v1792_v37, 8.507059e+37 }
 0x412   :  { %v1739_v43 = vor.u32 1.1754944e-38, %v1738_v50  ;;  %vm1737_vm10 = vcmp.eq.f32.partialorder %v1736_v27, 8.507059e+37  ;;  %v16637_v50 = vld [vmem:[#allocation67_spill] sm:$0xff]  ;;  %v1387_v27 = vmul.f32 1.442695, %v1333_v40 }
 0x414   :  { %10525 = vpow2.f32 %v1387_v27 }
 0x416   :  { %v10522_v10 = vpop.eup %10521 }
 0x417   :  { %v1728_v17 = vmul.f32 %v10522_v10, %v1457_v48  ;;  %v10524_v45 = vpop.eup %10523  ;;  %vm1733_vm6 = vweird.f32 %v10522_v10 }
 0x418   :  { %v1784_v18 = vmul.f32 %v10524_v45, %v1469_v53  ;;  %vm1734_vm9 = vmor %vm1732_vm7, %vm1733_vm6  ;;  %vm1789_vm14 = vweird.f32 %v10524_v45 }
 0x419   :  { %v1729_v57 = vsub.f32 1.0, %v1728_v17  ;;  %v1752_v17 = vand.u32 2147483648, %v12560_v15  ;;  %vm1790_vm3 = vmor %vm1788_vm15, %vm1789_vm14 }
 0x41a   :  { %v1785_v24 = vsub.f32 1.0, %v1784_v18  ;;  %v10170_v18 = vunpack.i.h.bf16 %v16637_v50 }
 0x41b   :  { %v1730_v54 = vmul.f32 %v10522_v10, %v1729_v57  ;;  %v1750_v57 = vand.u32 2147483647, %v12560_v15  ;;  %v1794_v15 = vand.u32 2147483648, %v1469_v53 }
 0x41c   :  { %v1786_v34 = vmul.f32 %v10524_v45, %v1785_v24  ;;  %v1338_v24 = vsub.f32 %v12289_v7, %v12548_v60 }
 0x41d   :  { %v1731_v58 = vadd.f32 %v10522_v10, %v1730_v54  ;;  %v10169_v54 = vunpack.i.l.bf16 %v16637_v50  ;;  %vm1751_vm13 = vcmp.eq.f32.partialorder %v1750_v57, 8.507059e+37 }
 0x41f   :  { %v1735_v13 = vsel %vm1734_vm9, %v10522_v10, %v1731_v58  ;;  %v12598_v10 = vpop.permute.xlu0 %4990  ;;  %v1753_v58 = vor.u32 1.1754944e-38, %v1752_v17  ;;  %v1795_v17 = vor.u32 1.1754944e-38, %v1794_v15 }
 0x420   :  { %v1740_v19 = vsel %vm1737_vm10, %v1739_v43, %v1735_v13  ;;  %5183 = vrot.lane.b32.xlu2 %v16636_v56, %s10930_s1  ;;  %16638 = vst [vmem:[#allocation3_spill] sm:$0xff] %v12598_v10  ;;  %v1787_v43 = vadd.f32 %v10524_v45, %v1786_v34  ;;  %v16639_v13 = vld [vmem:[#allocation14_spill] sm:$0xff] }
 0x421   :  { %v1967_v48 = vmul.f32 %v12463_v6, %v1740_v19  ;;  %v1754_v6 = vsel %vm1751_vm13, %v1753_v58, %v1749_v51  ;;  %v1397_v19 = vmul.f32 1.442695, %v1338_v24 }
 0x422   :  { %v1968_v36 = vmul.f32 %v12279_v28, %v1754_v6  ;;  %v1791_v40 = vsel %vm1790_vm3, %v10524_v45, %v1787_v43  ;;  %v16640_v28 = vld [vmem:[#allocation73_spill] sm:$0xff] }
 0x423   :  { %9643 = vmatmul.msk.f32.vlgmr.msrb.gmra.mxu2 %vm1214_vm2, %v1967_v48  ;;  %v12608_v48 = vpop.eup %10525  ;;  %v1796_v57 = vsel %vm1793_vm4, %v1795_v17, %v1791_v40  ;;  %v10180_v53 = vunpack.i.h.bf16 %v16640_v28  ;;  %v10179_v45 = vunpack.i.l.bf16 %v16640_v28 }
 0x424   :  { %2429 = vmatpush.msrb.mxu2 %v10170_v18  ;;  %v1971_v7 = vmul.f32 %v12342_v8, %v1796_v57  ;;  %v1473_v60 = vsel %vm1214_vm2, %v12608_v48, 0.0 }
 0x426   :  { %2430 = vmatpush.msrb.mxu2 %v10169_v54 }
 0x428   :  { %5146 = vrot.lane.b32.xlu2 %v16639_v13, %s10930_s1 }
 0x42a   :  { %v1472_v44 = vpop.xlane.xlu0 %1471 }
 0x42b   :  { %10527 = vrcp.f32 %v1472_v44  ;;  %9644 = vmatmul.msk.f32.gmra.mxu2 %vm1214_vm2, %v1968_v36  ;;  %v1808_v51 = vand.u32 2147483648, %v1472_v44  ;;  %v1806_v27 = vand.u32 2147483647, %v1472_v44  ;;  %vm1802_vm6 = vweird.f32 %v1472_v44 }
 0x42c   :  { %10529 = vpow2.f32 %v1397_v19  ;;  %v1340_v36 = vsub.f32 %v12244_v63, %v12516_v52 }
 0x42d   :  { %v1809_v6 = vor.u32 1.1754944e-38, %v1808_v51  ;;  %vm1807_vm8 = vcmp.eq.f32.partialorder %v1806_v27, 8.507059e+37  ;;  %v16643_v51 = vld [vmem:[#allocation13_spill] sm:$0xff] }
 0x42e   :  { %v1401_v40 = vmul.f32 1.442695, %v1340_v36  ;;  %v16644_v27 = vld [vmem:[#allocation93_spill] sm:$0xff] }
 0x430   :  { %10531 = vpow2.f32 %v1401_v40  ;;  %v16645_v40 = vld [vmem:[#allocation22_spill] sm:$0xff] }
 0x431   :  { %v10528_v50 = vpop.eup %10527 }
 0x432   :  { %v1798_v18 = vmul.f32 %v10528_v50, %v1472_v44  ;;  %1474 = vadd.xlane.f32.xlu1 %v1473_v60  ;;  %vm1803_vm5 = vweird.f32 %v10528_v50  ;;  %v12616_v58 = vpop.eup %10529  ;;  %v12624_v44 = vpop.permute.xlu1 %4947 }
 0x433   :  { %9647 = vmatmul.msk.f32.vlgmr.msra.gmra.mxu2 %vm1214_vm2, %v1971_v7  ;;  %vm1804_vm7 = vmor %vm1802_vm6, %vm1803_vm5  ;;  %v1488_v43 = vsel %vm1214_vm2, %v12616_v58, 0.0  ;;  %16641 = vst [vmem:[#allocation57_spill] sm:$0xff] %v12624_v44 }
 0x434   :  { %v1799_v34 = vsub.f32 1.0, %v1798_v18  ;;  %2499 = vmatpush.msra.mxu2 %v10180_v53 }
 0x436   :  { %v1800_v54 = vmul.f32 %v10528_v50, %v1799_v34  ;;  %2500 = vmatpush.msra.mxu2 %v10179_v45  ;;  %v12628_v17 = vpop.eup %10531 }
 0x438   :  { %v1801_v8 = vadd.f32 %v10528_v50, %v1800_v54 }
 0x43a   :  { %v1805_v15 = vsel %vm1804_vm7, %v10528_v50, %v1801_v8  ;;  %v1336_v8 = vsub.f32 %v16644_v27, %v12348_v22 }
 0x43b   :  { %1489 = vadd.xlane.f32.xlu0 %v1488_v43  ;;  %v1810_v24 = vsel %vm1807_vm8, %v1809_v6, %v1805_v15 }
 0x43c   :  { %v1972_v37 = vmul.f32 %v12494_v0, %v1810_v24  ;;  %v1494_v0 = vsel %vm1214_vm2, %v12628_v17, 0.0  ;;  %v1393_v24 = vmul.f32 1.442695, %v1336_v8 }
 0x43d   :  { %v12640_v52 = vpop.permute.xlu0 %5105 }
 0x43e   :  { %9648 = vmatmul.msk.f32.gmra.mxu2 %vm1214_vm2, %v1972_v37  ;;  %16642 = vst [vmem:[#allocation65_spill] sm:$0xff] %v12640_v52  ;;  %v1341_v37 = vsub.f32 %v12392_v3, %v12564_v29 }
 0x44b   :  { %4988 = vrot.lane.b32.xlu1 %v11175_v62, %s10930_s1 }
 0x44f   :  { %5064 = vrot.lane.b32.xlu0 %v16629_v20, %s10931_s4 }
 0x451   :  { %1495 = vadd.xlane.f32.xlu2 %v1494_v0 }
 0x452   :  { %v12634_v19 = vpop.xlane.xlu1 %3446 }
 0x453   :  { %5025 = vrot.lane.b32.xlu1 %v16633_v12, %s10931_s4 }
 0x457   :  { %5179 = vrot.lane.b32.xlu0 %v16636_v56, %s10931_s4 }
 0x45a   :  { %v1466_v63 = vpop.xlane.xlu1 %1465 }
 0x45b   :  { %10533 = vrcp.f32 %v1466_v63  ;;  %v1780_v60 = vand.u32 2147483648, %v1466_v63  ;;  %v1778_v53 = vand.u32 2147483647, %v1466_v63  ;;  %vm1774_vm10 = vweird.f32 %v1466_v63 }
 0x45d   :  { %v1781_v34 = vor.u32 1.1754944e-38, %v1780_v60  ;;  %vm1779_vm12 = vcmp.eq.f32.partialorder %v1778_v53, 8.507059e+37  ;;  %v16647_v53 = vld [vmem:[#allocation20_spill] sm:$0xff] }
 0x461   :  { %v10534_v57 = vpop.eup %10533 }
 0x462   :  { %v1770_v50 = vmul.f32 %v10534_v57, %v1466_v63  ;;  %vm1775_vm9 = vweird.f32 %v10534_v57  ;;  %v1403_v63 = vmul.f32 1.442695, %v1341_v37 }
 0x463   :  { %vm1776_vm11 = vmor %vm1774_vm10, %vm1775_vm9 }
 0x464   :  { %v1771_v7 = vsub.f32 1.0, %v1770_v50 }
 0x466   :  { %v1772_v28 = vmul.f32 %v10534_v57, %v1771_v7 }
 0x468   :  { %v1481_v18 = vpop.xlane.xlu0 %1480  ;;  %v1773_v45 = vadd.f32 %v10534_v57, %v1772_v28 }
 0x469   :  { %5140 = vrot.lane.b32.xlu2 %v16643_v51, %s10931_s4  ;;  %10535 = vrcp.f32 %v1481_v18  ;;  %v1848_v22 = vand.u32 2147483647, %v1481_v18  ;;  %vm1844_vm14 = vweird.f32 %v1481_v18 }
 0x46a   :  { %v1777_v54 = vsel %vm1776_vm11, %v10534_v57, %v1773_v45  ;;  %10537 = vpow2.f32 %v1393_v24  ;;  %v1850_v57 = vand.u32 2147483648, %v1481_v18 }
 0x46b   :  { %v1782_v6 = vsel %vm1779_vm12, %v1781_v34, %v1777_v54  ;;  %10539 = vpow2.f32 %v1403_v63  ;;  %vm1849_vm3 = vcmp.eq.f32.partialorder %v1848_v22, 8.507059e+37  ;;  %v16648_v54 = vld [vmem:[#allocation27_spill] sm:$0xff] }
 0x46c   :  { %v1970_v43 = vmul.f32 %v12540_v25, %v1782_v6  ;;  %v12652_v25 = vpop.permute.xlu2 %4984  ;;  %v1851_v60 = vor.u32 1.1754944e-38, %v1850_v57  ;;  %v16650_v6 = vld [vmem:[#allocation26_spill] sm:$0xff]  ;;  %v16655_v63 = vld [vmem:[#allocation15_spill] sm:$0xff] }
 0x46d   :  { %16646 = vst [vmem:[#allocation86_spill] sm:$0xff] %v12652_v25 }
 0x46e   :  { %9646 = vmatmul.msk.f32.gmra.mxu3 %vm1214_vm2, %v1970_v43  ;;  %v16651_v43 = vld [vmem:[#allocation102_spill] sm:$0xff] }
 0x46f   :  { %v10536_v15 = vpop.eup %10535 }
 0x470   :  { %v1840_v36 = vmul.f32 %v10536_v15, %v1481_v18  ;;  %vm1845_vm13 = vweird.f32 %v10536_v15  ;;  %v12654_v3 = vpop.eup %10537 }
 0x471   :  { %5261 = vrot.lane.b32.xlu2 %v16645_v40, %s10930_s1  ;;  %vm1846_vm15 = vmor %vm1844_vm14, %vm1845_vm13  ;;  %v1482_v18 = vsel %vm1214_vm2, %v12654_v3, 0.0  ;;  %v12662_v34 = vpop.eup %10539 }
 0x472   :  { %v1841_v0 = vsub.f32 1.0, %v1840_v36  ;;  %v1497_v27 = vsel %vm1214_vm2, %v12662_v34, 0.0  ;;  %v12678_v36 = vpop.permute.xlu1 %5029 }
 0x473   :  { %16654 = vst [vmem:[#allocation67_spill] sm:$0xff] %v12678_v36  ;;  %v1342_v36 = vsub.f32 %v12269_v49, %v12554_v39  ;;  %v16683_v39 = vld [vmem:[#allocation49_spill] sm:$0xff] }
 0x474   :  { %v1842_v50 = vmul.f32 %v10536_v15, %v1841_v0  ;;  %v12668_v8 = vpop.permute.xlu2 %5107 }
 0x475   :  { %16649 = vst [vmem:[#allocation66_spill] sm:$0xff] %v12668_v8  ;;  %v16661_v8 = vld [vmem:[#allocation35_spill] sm:$0xff] }
 0x476   :  { %v1843_v7 = vadd.f32 %v10536_v15, %v1842_v50 }
 0x478   :  { %v1847_v28 = vsel %vm1846_vm15, %v10536_v15, %v1843_v7  ;;  %v16652_v15 = vld [vmem:[#allocation84_spill] sm:$0xff] }
 0x479   :  { %v1852_v29 = vsel %vm1849_vm3, %v1851_v60, %v1847_v28  ;;  %5224 = vrot.lane.b32.xlu2 %v16647_v53, %s10930_s1  ;;  %v3314_v24 = vsub.f32 %v16652_v15, %v16651_v43  ;;  %v16660_v15 = vld [vmem:[#allocation18_spill] sm:$0xff] }
 0x47a   :  { %v1975_v45 = vmul.f32 %v12552_v16, %v1852_v29  ;;  %v12688_v22 = vpop.permute.xlu1 %5027 }
 0x47b   :  { %v3365_v0 = vmul.f32 1.442695, %v3314_v24  ;;  %v12684_v57 = vpop.permute.xlu0 %5101  ;;  %16658 = vst [vmem:[#allocation27_spill] sm:$0xff] %v12688_v22 }
 0x47c   :  { %9651 = vmatmul.msk.f32.vlgmr.msrb.gmra.mxu2 %vm1214_vm2, %v1975_v45  ;;  %v12672_v16 = vpop.xlane.xlu2 %1477  ;;  %16656 = vst [vmem:[#allocation73_spill] sm:$0xff] %v12684_v57 }
 0x47d   :  { %9667 = vmatpush.xpose.msk.msrb.mxu2 %vm595_vm1, %v16648_v54  ;;  %1483 = vadd.xlane.f32.xlu1 %v1482_v18  ;;  %10541 = vpow2.f32 %v3365_v0  ;;  %vm1830_vm9 = vweird.f32 %v12672_v16 }
 0x47e   :  { %10543 = vrcp.f32 %v12672_v16 }
 0x481   :  { %9668 = vmatpush.xpose.msk.msrb.mxu2 %vm595_vm1, %v16650_v6  ;;  %1498 = vadd.xlane.f32.xlu0 %v1497_v27 }
 0x483   :  { %v12692_v7 = vpop.eup %10541  ;;  %v12703_v18 = vpop.permute.xlu0 %5103 }
 0x484   :  { %v12676_v37 = vpop.permute.xlu2 %5068  ;;  %v3448_v60 = vsel %vm1214_vm2, %v12692_v7, 0.0  ;;  %v10544_v28 = vpop.eup %10543  ;;  %16659 = vst [vmem:[#allocation26_spill] sm:$0xff] %v12703_v18 }
 0x485   :  { %16653 = vst [vmem:[#allocation87_spill] sm:$0xff] %v12676_v37  ;;  %v1826_v54 = vmul.f32 %v10544_v28, %v12672_v16  ;;  %vm1831_vm6 = vweird.f32 %v10544_v28 }
 0x486   :  { %vm1832_vm10 = vmor %vm1830_vm9, %vm1831_vm6 }
 0x487   :  { %v1827_v6 = vsub.f32 1.0, %v1826_v54 }
 0x48c   :  { %v12686_v50 = vpop.permute.xlu2 %5062 }
 0x48d   :  { %16657 = vst [vmem:[#allocation93_spill] sm:$0xff] %v12686_v50  ;;  %v1828_v50 = vmul.f32 %v10544_v28, %v1827_v6 }
 0x48f   :  { %v1829_v6 = vadd.f32 %v10544_v28, %v1828_v50 }
 0x494   :  { %v12699_v29 = vpop.xlane.xlu2 %1486 }
 0x495   :  { %5181 = vrot.lane.b32.xlu0 %v16655_v63, %s10931_s4  ;;  %vm1872_vm13 = vweird.f32 %v12699_v29 }
 0x496   :  { %4986 = vrot.lane.b32.xlu1 %v11192_v5, %s10931_s4 }
 0x49d   :  { %5142 = vrot.lane.b32.xlu0 %v16639_v13, %s10931_s4 }
 0x49e   :  { %5066 = vrot.lane.b32.xlu1 %v16630_v46, %s10930_s1 }
 0x4a2   :  { %3449 = vadd.xlane.f32.xlu2 %v3448_v60 }
 0x4a5   :  { %5257 = vrot.lane.b32.xlu0 %v16645_v40, %s10931_s4  ;;  %v1475_v45 = vpop.xlane.xlu1 %1474 }
 0x4a6   :  { %10545 = vrcp.f32 %v1475_v45  ;;  %v1822_v25 = vand.u32 2147483648, %v1475_v45  ;;  %v1820_v57 = vand.u32 2147483647, %v1475_v45  ;;  %vm1816_vm5 = vweird.f32 %v1475_v45 }
 0x4a7   :  { %10547 = vrcp.f32 %v12699_v29 }
 0x4a8   :  { %v1823_v54 = vor.u32 1.1754944e-38, %v1822_v25  ;;  %vm1821_vm8 = vcmp.eq.f32.partialorder %v1820_v57, 8.507059e+37  ;;  %v1834_v25 = vand.u32 2147483647, %v12672_v16 }
 0x4aa   :  { %vm1835_vm11 = vcmp.eq.f32.partialorder %v1834_v25, 8.507059e+37 }
 0x4ac   :  { %v10546_v27 = vpop.eup %10545 }
 0x4ad   :  { %v1812_v43 = vmul.f32 %v10546_v27, %v1475_v45  ;;  %5218 = vrot.lane.b32.xlu0 %v16660_v15, %s10931_s4  ;;  %v10548_v24 = vpop.eup %10547  ;;  %vm1817_vm4 = vweird.f32 %v10546_v27  ;;  %v16662_v45 = vld [vmem:[#allocation82_spill] sm:$0xff] }
 0x4ae   :  { %v12709_v0 = vpop.xlane.xlu0 %1489  ;;  %v1868_v18 = vmul.f32 %v10548_v24, %v12699_v29  ;;  %vm1818_vm7 = vmor %vm1816_vm5, %vm1817_vm4  ;;  %v10184_v35 = vunpack.i.l.bf16 %v16662_v45  ;;  %vm1873_vm12 = vweird.f32 %v10548_v24 }
 0x4af   :  { %v1813_v60 = vsub.f32 1.0, %v1812_v43  ;;  %10549 = vrcp.f32 %v12709_v0  ;;  %vm1874_vm14 = vmor %vm1872_vm13, %vm1873_vm12  ;;  %vm1886_vm4 = vweird.f32 %v12709_v0 }
 0x4b0   :  { %v1869_v44 = vsub.f32 1.0, %v1868_v18  ;;  %v1833_v18 = vsel %vm1832_vm10, %v10544_v28, %v1829_v6  ;;  %10551 = vpow2.f32 %v1399_v30  ;;  %v1876_v28 = vand.u32 2147483647, %v12699_v29  ;;  %v16666_v30 = vld [vmem:[#allocation96_spill] sm:$0xff] }
 0x4b1   :  { %v1814_v37 = vmul.f32 %v10546_v27, %v1813_v60  ;;  %v1836_v60 = vand.u32 2147483648, %v12672_v16 }
 0x4b2   :  { %v1870_v57 = vmul.f32 %v10548_v24, %v1869_v44  ;;  %v1878_v44 = vand.u32 2147483648, %v12699_v29  ;;  %vm1877_vm15 = vcmp.eq.f32.partialorder %v1876_v28, 8.507059e+37 }
 0x4b3   :  { %v1815_v56 = vadd.f32 %v10546_v27, %v1814_v37 }
 0x4b4   :  { %v1871_v16 = vadd.f32 %v10548_v24, %v1870_v57 }
 0x4b5   :  { %v1819_v52 = vsel %vm1818_vm7, %v10546_v27, %v1815_v56  ;;  %5341 = vrot.lane.b32.xlu0 %v16661_v8, %s10930_s1  ;;  %v10550_v43 = vpop.eup %10549  ;;  %v10185_v56 = vunpack.i.h.bf16 %v16662_v45  ;;  %v16663_v27 = vld [vmem:[#allocation33_spill] sm:$0xff] }
 0x4b6   :  { %v1824_v22 = vsel %vm1821_vm8, %v1823_v54, %v1819_v52  ;;  %v1882_v50 = vmul.f32 %v10550_v43, %v12709_v0  ;;  %v1837_v52 = vor.u32 1.1754944e-38, %v1836_v60  ;;  %v1875_v54 = vsel %vm1874_vm14, %v10548_v24, %v1871_v16 }
 0x4b7   :  { %v1973_v37 = vmul.f32 %v12608_v48, %v1824_v22  ;;  %v1879_v60 = vor.u32 1.1754944e-38, %v1878_v44  ;;  %vm1887_vm3 = vweird.f32 %v10550_v43  ;;  %v1890_v24 = vand.u32 2147483647, %v12709_v0  ;;  %v16670_v44 = vld [vmem:[#allocation45_spill] sm:$0xff] }
 0x4b8   :  { %v1838_v48 = vsel %vm1835_vm11, %v1837_v52, %v1833_v18  ;;  %v1883_v22 = vsub.f32 1.0, %v1882_v50  ;;  %vm1888_vm5 = vmor %vm1886_vm4, %vm1887_vm3  ;;  %v16664_v18 = vld [vmem:[#allocation42_spill] sm:$0xff]  ;;  %v3321_v52 = vsub.f32 %v16666_v30, %v12367_v23 }
 0x4b9   :  { %9649 = vmatmul.msk.f32.vlgmr.msrb.gmra.mxu3 %vm1214_vm2, %v1973_v37  ;;  %v1974_v21 = vmul.f32 %v12506_v26, %v1838_v48  ;;  %v12735_v37 = vpop.eup %10551  ;;  %v1880_v25 = vsel %vm1877_vm15, %v1879_v60, %v1875_v54  ;;  %vm1891_vm6 = vcmp.eq.f32.partialorder %v1890_v24, 8.507059e+37  ;;  %v16667_v48 = vld [vmem:[#allocation30_spill] sm:$0xff]  ;;  %v12776_v60 = vpack.i.bf16 %v11175_v62, %v11192_v5 }
 0x4ba   :  { %5335 = vrot.lane.b32.xlu2 %v16663_v27, %s10931_s4  ;;  %2534 = vmatpush.msrb.mxu3 %v10185_v56  ;;  %v1884_v6 = vmul.f32 %v10550_v43, %v1883_v22  ;;  %v1892_v56 = vand.u32 2147483648, %v12709_v0  ;;  %v1977_v29 = vmul.f32 %v12570_v33, %v1880_v25  ;;  %v1491_v26 = vsel %vm1214_vm2, %v12735_v37, 0.0  ;;  %v16669_v22 = vld [vmem:[#allocation46_spill] sm:$0xff] }
 0x4bb   :  { %v3379_v16 = vmul.f32 1.442695, %v3321_v52  ;;  %v12758_v28 = vpack.i.bf16 %v16670_v44, %v16669_v22  ;;  %v16680_v52 = vld [vmem:[#allocation31_spill] sm:$0xff] }
 0x4bc   :  { %2535 = vmatpush.msrb.mxu3 %v10184_v35  ;;  %v1885_v45 = vadd.f32 %v10550_v43, %v1884_v6  ;;  %v1893_v50 = vor.u32 1.1754944e-38, %v1892_v56  ;;  %v16665_v35 = vld [vmem:[#allocation28_spill] sm:$0xff] }
 0x4bd   :  { %10553 = vpow2.f32 %v3379_v16  ;;  %16671 = vst [vmem:[#allocation102_spill] sm:$0xff] %v12758_v28  ;;  %v16674_v6 = vld [vmem:[#allocation36_spill] sm:$0xff] }
 0x4be   :  { %v1889_v57 = vsel %vm1888_vm5, %v10550_v43, %v1885_v45  ;;  %v16668_v43 = vld [vmem:[#allocation40_spill] sm:$0xff]  ;;  %16675 = vst [vmem:[#allocation28_spill] sm:$0xff] %v12776_v60 }
 0x4bf   :  { %v1894_v33 = vsel %vm1891_vm6, %v1893_v50, %v1889_v57 }
 0x4c0   :  { %v1978_v0 = vmul.f32 %v12616_v58, %v1894_v33 }
 0x4c1   :  { %9650 = vmatmul.msk.f32.gmra.mxu3 %vm1214_vm2, %v1974_v21  ;;  %v12764_v21 = vpop.permute.xlu1 %4988  ;;  %v12770_v54 = vpop.permute.xlu0 %5064 }
 0x4c2   :  { %5337 = vrot.lane.b32.xlu2 %v16661_v8, %s10931_s4  ;;  %16672 = vst [vmem:[#allocation84_spill] sm:$0xff] %v12764_v21 }
 0x4c3   :  { %v12762_v23 = vpop.eup %10553  ;;  %16673 = vst [vmem:[#allocation82_spill] sm:$0xff] %v12770_v54 }
 0x4c4   :  { %v3469_v58 = vsel %vm1214_vm2, %v12762_v23, 0.0 }
 0x4c8   :  { %1492 = vadd.xlane.f32.xlu1 %v1491_v26  ;;  %v16679_v26 = vld [vmem:[#allocation29_spill] sm:$0xff] }
 0x4c9   :  { %9653 = vmatmul.msk.f32.vlgmr.msra.gmra.mxu3 %vm1214_vm2, %v1977_v29  ;;  %v12778_v25 = vpop.permute.xlu1 %5025  ;;  %v12784_v45 = vpop.permute.xlu0 %5179  ;;  %v16678_v29 = vld [vmem:[#allocation50_spill] sm:$0xff] }
 0x4ca   :  { %5419 = vrot.lane.b32.xlu2 %v16664_v18, %s10930_s1  ;;  %9671 = vmatpush.xpose.msk.msra.mxu3 %vm595_vm1, %v16665_v35  ;;  %16676 = vst [vmem:[#allocation96_spill] sm:$0xff] %v12778_v25 }
 0x4cb   :  { %16677 = vst [vmem:[#allocation30_spill] sm:$0xff] %v12784_v45 }
 0x4ce   :  { %9672 = vmatpush.xpose.msk.msra.mxu3 %vm595_vm1, %v16667_v48 }
 0x4d1   :  { %9654 = vmatmul.msk.f32.gmra.mxu3 %vm1214_vm2, %v1978_v0 }
 0x4d2   :  { %5417 = vrot.lane.b32.xlu2 %v16668_v43, %s10930_s1 }
 0x4da   :  { %10227 = vrot.lane.b32.xlu2 %v12758_v28, %s10929_s27 }
 0x4df   :  { %3470 = vadd.xlane.f32.xlu0 %v3469_v58 }
 0x4e1   :  { %5185 = vrot.lane.b32.xlu1 %v16655_v63, %s10930_s1 }
 0x4e2   :  { %5378 = vrot.lane.b32.xlu2 %v16674_v6, %s10930_s1 }
 0x4e9   :  { %10212 = vrot.lane.b32.xlu1 %v12776_v60, %s10929_s27 }
 0x4ea   :  { %5415 = vrot.lane.b32.xlu2 %v16664_v18, %s10931_s4 }
 0x4f0   :  { %v1484_v56 = vpop.xlane.xlu1 %1483 }
 0x4f1   :  { %10555 = vrcp.f32 %v1484_v56  ;;  %v1864_v30 = vand.u32 2147483648, %v1484_v56  ;;  %v1862_v48 = vand.u32 2147483647, %v1484_v56  ;;  %vm1858_vm8 = vweird.f32 %v1484_v56 }
 0x4f2   :  { %5495 = vrot.lane.b32.xlu2 %v16678_v29, %s10930_s1 }
 0x4f3   :  { %5296 = vrot.lane.b32.xlu0 %v16679_v26, %s10931_s4  ;;  %v1865_v45 = vor.u32 1.1754944e-38, %v1864_v30  ;;  %vm1863_vm10 = vcmp.eq.f32.partialorder %v1862_v48, 8.507059e+37  ;;  %v16682_v30 = vld [vmem:[#allocation38_spill] sm:$0xff] }
 0x4f4   :  { %v1499_v24 = vpop.xlane.xlu0 %1498 }
 0x4f5   :  { %10557 = vrcp.f32 %v1499_v24  ;;  %v1934_v25 = vand.u32 2147483648, %v1499_v24  ;;  %v1932_v63 = vand.u32 2147483647, %v1499_v24  ;;  %vm1928_vm12 = vweird.f32 %v1499_v24 }
 0x4f7   :  { %v10556_v57 = vpop.eup %10555  ;;  %vm1933_vm14 = vcmp.eq.f32.partialorder %v1932_v63, 8.507059e+37 }
 0x4f8   :  { %v1854_v50 = vmul.f32 %v10556_v57, %v1484_v56  ;;  %vm1859_vm7 = vweird.f32 %v10556_v57 }
 0x4f9   :  { %vm1860_vm9 = vmor %vm1858_vm8, %vm1859_vm7 }
 0x4fa   :  { %v1855_v35 = vsub.f32 1.0, %v1854_v50  ;;  %5491 = vrot.lane.b32.xlu2 %v16678_v29, %s10931_s4 }
 0x4fb   :  { %v10558_v33 = vpop.eup %10557  ;;  %5298 = vrot.lane.b32.xlu0 %v16680_v52, %s10931_s4 }
 0x4fc   :  { %v1856_v0 = vmul.f32 %v10556_v57, %v1855_v35  ;;  %v1924_v16 = vmul.f32 %v10558_v33, %v1499_v24  ;;  %vm1929_vm11 = vweird.f32 %v10558_v33  ;;  %v16681_v35 = vld [vmem:[#allocation52_spill] sm:$0xff] }
 0x4fd   :  { %vm1930_vm13 = vmor %vm1928_vm12, %vm1929_vm11 }
 0x4fe   :  { %v1925_v58 = vsub.f32 1.0, %v1924_v16  ;;  %v1857_v54 = vadd.f32 %v10556_v57, %v1856_v0  ;;  %v1935_v0 = vor.u32 1.1754944e-38, %v1934_v25  ;;  %v16688_v25 = vld [vmem:[#allocation17_spill] sm:$0xff] }
 0x500   :  { %v1926_v50 = vmul.f32 %v10558_v33, %v1925_v58  ;;  %v1861_v29 = vsel %vm1860_vm9, %v10556_v57, %v1857_v54  ;;  %v1405_v54 = vmul.f32 1.442695, %v1342_v36 }
 0x501   :  { %v1866_v21 = vsel %vm1863_vm10, %v1865_v45, %v1861_v29  ;;  %v12836_v45 = vpack.i.bf16 %v16643_v51, %v16639_v13 }
 0x502   :  { %v1927_v10 = vadd.f32 %v10558_v33, %v1926_v50  ;;  %5493 = vrot.lane.b32.xlu2 %v16681_v35, %s10931_s4  ;;  %v1976_v56 = vmul.f32 %v12654_v3, %v1866_v21  ;;  %10559 = vpow2.f32 %v1405_v54  ;;  %v16684_v3 = vld [vmem:[#allocation53_spill] sm:$0xff]  ;;  %v12828_v21 = vpop.permute.xlu2 %5183 }
 0x503   :  { %5380 = vrot.lane.b32.xlu0 %v16682_v30, %s10930_s1  ;;  %16689 = vst [vmem:[#allocation17_spill] sm:$0xff] %v12836_v45  ;;  %v16694_v50 = vld [vmem:[#allocation25_spill] sm:$0xff] }
 0x504   :  { %v1931_v48 = vsel %vm1930_vm13, %v10558_v33, %v1927_v10  ;;  %9652 = vmatmul.msk.f32.gmra.mxu2 %vm1214_vm2, %v1976_v56  ;;  %v16685_v10 = vld [vmem:[#allocation41_spill] sm:$0xff]  ;;  %v12850_v33 = vpack.i.bf16 %v16627_v59, %v11341_v2  ;;  %v12862_v56 = vpack.i.bf16 %v16668_v43, %v16664_v18 }
 0x505   :  { %v1936_v57 = vsel %vm1933_vm14, %v1935_v0, %v1931_v48  ;;  %16687 = vst [vmem:[#allocation41_spill] sm:$0xff] %v12828_v21  ;;  %v16696_v0 = vld [vmem:[#allocation8_spill] sm:$0xff] }
 0x506   :  { %v1981_v49 = vmul.f32 %v12662_v34, %v1936_v57  ;;  %v12816_v34 = vpack.i.bf16 %v11142_v47, %v16624_v9  ;;  %16692 = vst [vmem:[#allocation117_spill] sm:$0xff] %v12850_v33 }
 0x507   :  { %16695 = vst [vmem:[#allocation119_spill] sm:$0xff] %v12862_v56 }
 0x508   :  { %9657 = vmatmul.msk.f32.vlgmr.msrb.gmra.mxu3 %vm1214_vm2, %v1981_v49  ;;  %v12812_v63 = vpop.eup %10559  ;;  %16686 = vst [vmem:[#allocation49_spill] sm:$0xff] %v12816_v34  ;;  %v12838_v29 = vpop.permute.xlu1 %4986  ;;  %v16697_v49 = vld [vmem:[#allocation99_spill] sm:$0xff] }
 0x509   :  { %9687 = vmatpush.xpose.msk.msrb.mxu3 %vm595_vm1, %v16683_v39  ;;  %v1500_v36 = vsel %vm1214_vm2, %v12812_v63, 0.0  ;;  %16690 = vst [vmem:[#allocation115_spill] sm:$0xff] %v12838_v29  ;;  %vm3520_vm11 = vweird.f32 %v16697_v49 }
 0x50a   :  { %5534 = vrot.lane.b32.xlu2 %v16684_v3, %s10930_s1  ;;  %v12842_v24 = vpop.permute.xlu2 %5146 }
 0x50b   :  { %5374 = vrot.lane.b32.xlu0 %v16674_v6, %s10931_s4  ;;  %16691 = vst [vmem:[#allocation116_spill] sm:$0xff] %v12842_v24 }
 0x50d   :  { %9688 = vmatpush.xpose.msk.msrb.mxu3 %vm595_vm1, %v16685_v10 }
 0x510   :  { %v12854_v58 = vpop.permute.xlu1 %5066 }
 0x511   :  { %16693 = vst [vmem:[#allocation118_spill] sm:$0xff] %v12854_v58 }
 0x512   :  { %10232 = vrot.lane.b32.xlu2 %v12816_v34, %s10932_s12  ;;  %v1496_v16 = vpop.xlane.xlu2 %1495 }
 0x513   :  { %5497 = vrot.lane.b32.xlu0 %v16681_v35, %s10930_s1  ;;  %1501 = vadd.xlane.f32.xlu1 %v1500_v36  ;;  %10561 = vrcp.f32 %v1496_v16  ;;  %vm1914_vm7 = vweird.f32 %v1496_v16  ;;  %v16732_v35 = vld [vmem:[#allocation32_spill] sm:$0xff] }
 0x519   :  { %v10562_v54 = vpop.eup %10561 }
 0x51a   :  { %10247 = vrot.lane.b32.xlu2 %v12776_v60, %s10932_s12  ;;  %v1910_v57 = vmul.f32 %v10562_v54, %v1496_v16  ;;  %vm1915_vm5 = vweird.f32 %v10562_v54 }
 0x51b   :  { %5376 = vrot.lane.b32.xlu0 %v16682_v30, %s10931_s4  ;;  %v16698_v30 = vld [vmem:[#allocation11_spill] sm:$0xff]  ;;  %vm1916_vm8 = vmor %vm1914_vm7, %vm1915_vm5 }
 0x51c   :  { %v1911_v10 = vsub.f32 1.0, %v1910_v57 }
 0x51e   :  { %v1912_v29 = vmul.f32 %v10562_v54, %v1911_v10 }
 0x522   :  { %10262 = vrot.lane.b32.xlu2 %v16688_v25, %s10932_s12 }
 0x523   :  { %5456 = vrot.lane.b32.xlu0 %v16670_v44, %s10930_s1 }
 0x52a   :  { %10267 = vrot.lane.b32.xlu2 %v12836_v45, %s10932_s12 }
 0x52b   :  { %5454 = vrot.lane.b32.xlu0 %v16669_v22, %s10931_s4 }
 0x52c   :  { %5144 = vrot.lane.b32.xlu1 %v16643_v51, %s10930_s1 }
 0x532   :  { %10282 = vrot.lane.b32.xlu2 %v12850_v33, %s10929_s27 }
 0x533   :  { %5530 = vrot.lane.b32.xlu0 %v16684_v3, %s10931_s4  ;;  %v1920_v3 = vand.u32 2147483648, %v1496_v16 }
 0x534   :  { %5263 = vrot.lane.b32.xlu1 %v16694_v50, %s10930_s1 }
 0x53a   :  { %10297 = vrot.lane.b32.xlu2 %v12862_v56, %s10932_s12 }
 0x53b   :  { %10242 = vrot.lane.b32.xlu0 %v16696_v0, %s10932_s12  ;;  %v1493_v48 = vpop.xlane.xlu1 %1492 }
 0x53c   :  { %10563 = vrcp.f32 %v1493_v48  ;;  %10217 = vrot.lane.b32.xlu1 %v12836_v45, %s10929_s27  ;;  %v1906_v60 = vand.u32 2147483648, %v1493_v48  ;;  %v1904_v18 = vand.u32 2147483647, %v1493_v48  ;;  %vm1900_vm3 = vweird.f32 %v1493_v48 }
 0x53d   :  { %10565 = vrcp.f32 %v16697_v49 }
 0x53e   :  { %10567 = vrcp.f32 %v12287_v38  ;;  %v1907_v57 = vor.u32 1.1754944e-38, %v1906_v60  ;;  %vm1905_vm6 = vcmp.eq.f32.partialorder %v1904_v18, 8.507059e+37  ;;  %v1921_v18 = vor.u32 1.1754944e-38, %v1920_v3 }
 0x542   :  { %v10564_v39 = vpop.eup %10563 }
 0x543   :  { %v1896_v36 = vmul.f32 %v10564_v39, %v1493_v48  ;;  %10252 = vrot.lane.b32.xlu0 %v12850_v33, %s10932_s12  ;;  %v10566_v0 = vpop.eup %10565  ;;  %vm1901_vm15 = vweird.f32 %v10564_v39 }
 0x544   :  { %5222 = vrot.lane.b32.xlu1 %v16660_v15, %s10930_s1  ;;  %v3516_v45 = vmul.f32 %v10566_v0, %v16697_v49  ;;  %vm1902_vm4 = vmor %vm1900_vm3, %vm1901_vm15  ;;  %v10568_v48 = vpop.eup %10567  ;;  %vm3521_vm10 = vweird.f32 %v10566_v0  ;;  %vm3534_vm15 = vweird.f32 %v12287_v38 }
 0x545   :  { %v1897_v25 = vsub.f32 1.0, %v1896_v36  ;;  %v1913_v36 = vadd.f32 %v10562_v54, %v1912_v29  ;;  %v3530_v29 = vmul.f32 %v10568_v48, %v12287_v38  ;;  %vm3522_vm12 = vmor %vm3520_vm11, %vm3521_vm10  ;;  %vm3535_vm14 = vweird.f32 %v10568_v48 }
 0x546   :  { %vm3536_vm3 = vmor %vm3534_vm15, %vm3535_vm14  ;;  %vm3632_vm10 = vweird.f32 %v12473_v55  ;;  %vm3646_vm14 = vweird.f32 %v12375_v32 }
 0x547   :  { %v1898_v24 = vmul.f32 %v10564_v39, %v1897_v25  ;;  %v3517_v25 = vsub.f32 1.0, %v3516_v45  ;;  %v1917_v60 = vsel %vm1916_vm8, %v10562_v54, %v1913_v36  ;;  %v12898_v54 = vpop.f32.mrf.mxu2  ;;  %v3524_v36 = vand.u32 2147483647, %v16697_v49 }
 0x549   :  { %v1899_v58 = vadd.f32 %v10564_v39, %v1898_v24  ;;  %v1918_v24 = vand.u32 2147483647, %v1496_v16  ;;  %v3531_v16 = vsub.f32 1.0, %v3530_v29  ;;  %vm3525_vm13 = vcmp.eq.f32.partialorder %v3524_v36, 8.507059e+37 }
 0x54a   :  { %v3540_v29 = vand.u32 2147483648, %v12287_v38 }
 0x54b   :  { %v1903_v33 = vsel %vm1902_vm4, %v10564_v39, %v1899_v58  ;;  %10257 = vrot.lane.b32.xlu0 %v16698_v30, %s10932_s12  ;;  %v16699_v58 = vld [vmem:[#allocation39_spill] sm:$0xff]  ;;  %v3518_v30 = vmul.f32 %v10566_v0, %v3517_v25  ;;  %vm1919_vm9 = vcmp.eq.f32.partialorder %v1918_v24, 8.507059e+37  ;;  %v3532_v25 = vmul.f32 %v10568_v48, %v3531_v16 }
 0x54c   :  { %v1908_v10 = vsel %vm1905_vm6, %v1907_v57, %v1903_v33  ;;  %5259 = vrot.lane.b32.xlu1 %v16694_v50, %s10931_s4  ;;  %v12888_v33 = vpack.i.bf16 %v16645_v40, %v16694_v50  ;;  %v1922_v45 = vsel %vm1919_vm9, %v1921_v18, %v1917_v60  ;;  %v3526_v57 = vand.u32 2147483648, %v16697_v49  ;;  %v16703_v60 = vld [vmem:[#allocation72_spill] sm:$0xff] }
 0x54d   :  { %v1979_v21 = vmul.f32 %v12735_v37, %v1908_v10  ;;  %v3519_v3 = vadd.f32 %v10566_v0, %v3518_v30  ;;  %v1980_v39 = vmul.f32 %v12628_v17, %v1922_v45  ;;  %v3533_v49 = vadd.f32 %v10568_v48, %v3532_v25  ;;  %v16708_v25 = vld [vmem:[#allocation54_spill] sm:$0xff] }
 0x54e   :  { %16700 = vst [vmem:[#allocation99_spill] sm:$0xff] %v12888_v33  ;;  %v3527_v24 = vor.u32 1.1754944e-38, %v3526_v57  ;;  %v3538_v16 = vand.u32 2147483647, %v12287_v38  ;;  %v12922_v57 = vpack.i.bf16 %v16679_v26, %v16680_v52 }
 0x54f   :  { %9655 = vmatmul.msk.f32.vlgmr.msra.gmra.mxu2 %vm1214_vm2, %v1979_v21  ;;  %v16702_v21 = vld [vmem:[#allocation44_spill] sm:$0xff]  ;;  %v3523_v10 = vsel %vm3522_vm12, %v10566_v0, %v3519_v3  ;;  %v12909_v17 = vpop.f32.mrf.mxu2  ;;  %v16704_v0 = vld [vmem:[#allocation83_spill] sm:$0xff]  ;;  %v3537_v36 = vsel %vm3536_vm3, %v10568_v48, %v3533_v49 }
 0x550   :  { %9683 = vmatpush.xpose.msk.msra.mxu2 %vm595_vm1, %v16699_v58  ;;  %v3528_v58 = vsel %vm3525_vm13, %v3527_v24, %v3523_v10  ;;  %v16705_v3 = vld [vmem:[#allocation23_spill] sm:$0xff]  ;;  %16707 = vst [vmem:[#allocation39_spill] sm:$0xff] %v12922_v57  ;;  %v3541_v10 = vor.u32 1.1754944e-38, %v3540_v29  ;;  %vm3539_vm4 = vcmp.eq.f32.partialorder %v3538_v16, 8.507059e+37  ;;  %v16713_v29 = vld [vmem:[#allocation70_spill] sm:$0xff] }
 0x551   :  { %v16712_v49 = vld [vmem:[#allocation75_spill] sm:$0xff]  ;;  %v16716_v16 = vld [vmem:[#allocation58_spill] sm:$0xff] }
 0x552   :  { %v3542_v38 = vsel %vm3539_vm4, %v3541_v10, %v3537_v36 }
 0x553   :  { %10272 = vrot.lane.b32.xlu0 %v12888_v33, %s10932_s12  ;;  %v12892_v37 = vpop.permute.xlu1 %5185 }
 0x554   :  { %16701 = vst [vmem:[#allocation11_spill] sm:$0xff] %v12892_v37  ;;  %9684 = vmatpush.xpose.msk.msra.mxu2 %vm595_vm1, %v16702_v21  ;;  %5339 = vrot.lane.b32.xlu1 %v16663_v27, %s10930_s1  ;;  %v3937_v21 = vmul.f32 %v16704_v0, %v3528_v58 }
 0x557   :  { %9656 = vmatmul.msk.f32.gmra.mxu2 %vm1214_vm2, %v1980_v39  ;;  %v16706_v39 = vld [vmem:[#allocation60_spill] sm:$0xff]  ;;  %v12930_v24 = vpop.f32.mrf.mxu2 }
 0x55b   :  { %10277 = vrot.lane.b32.xlu0 %v16703_v60, %s10932_s12  ;;  %v10213_v18 = vpop.permute.xlu1 %10212  ;;  %v16709_v60 = vld [vmem:[#allocation19_spill] sm:$0xff] }
 0x55c   :  { %v10214_v30 = vunpack.i.l.bf16 %v10213_v18  ;;  %5220 = vrot.lane.b32.xlu1 %v16647_v53, %s10931_s4  ;;  %v10215_v45 = vunpack.i.h.bf16 %v10213_v18  ;;  %v16710_v18 = vld [vmem:[#allocation85_spill] sm:$0xff] }
 0x55d   :  { %v3938_v58 = vmul.f32 %v16710_v18, %v3542_v38  ;;  %v12960_v38 = vpop.permute.xlu2 %5140 }
 0x55e   :  { %4028 = vmatpush.msrb.mxu1 %v10214_v30  ;;  %v16711_v30 = vld [vmem:[#allocation37_spill] sm:$0xff]  ;;  %16718 = vst [vmem:[#allocation44_spill] sm:$0xff] %v12960_v38 }
 0x55f   :  { %9669 = vmatmul.msk.f32.vlgmr.msrb.gmra.mxu2 %vm595_vm1, %v16705_v3  ;;  %v12938_v48 = vpop.f32.mrf.mxu2 }
 0x560   :  { %9699 = vmatpush.xpose.msk.msrb.mxu2 %vm595_vm1, %v16706_v39  ;;  %4029 = vmatpush.msrb.mxu1 %v10215_v45  ;;  %v16714_v45 = vld [vmem:[#allocation43_spill] sm:$0xff] }
 0x561   :  { %9725 = vmatmul.msk.f32.vlgmr.msrb.gmra.mxu1 %vm1214_vm2, %v3937_v21  ;;  %v16715_v21 = vld [vmem:[#allocation21_spill] sm:$0xff] }
 0x562   :  { %v10109_v3 = vunpack.i.l.bf16 %v16715_v21  ;;  %v10110_v39 = vunpack.i.h.bf16 %v16715_v21  ;;  %v16721_v21 = vld [vmem:[#allocation71_spill] sm:$0xff] }
 0x563   :  { %10292 = vrot.lane.b32.xlu0 %v12922_v57, %s10932_s12 }
 0x564   :  { %9700 = vmatpush.xpose.msk.msrb.mxu2 %vm595_vm1, %v16708_v25  ;;  %10222 = vrot.lane.b32.xlu1 %v12922_v57, %s10929_s27  ;;  %v16717_v25 = vld [vmem:[#allocation61_spill] sm:$0xff] }
 0x567   :  { %9670 = vmatmul.msk.f32.gmra.mxu2 %vm595_vm1, %v16709_v60  ;;  %v12950_v0 = vpop.f32.mrf.mxu2  ;;  %v16719_v60 = vld [vmem:[#allocation107_spill] sm:$0xff] }
 0x568   :  { %v3322_v18 = vsub.f32 %v16719_v60, %v12532_v41  ;;  %v12971_v41 = vpop.permute.xlu2 %5261 }
 0x569   :  { %9726 = vmatmul.msk.f32.gmra.mxu1 %vm1214_vm2, %v3938_v58  ;;  %16722 = vst [vmem:[#allocation72_spill] sm:$0xff] %v12971_v41 }
 0x56c   :  { %5302 = vrot.lane.b32.xlu1 %v16680_v52, %s10930_s1 }
 0x56f   :  { %9685 = vmatmul.msk.f32.vlgmr.msra.gmra.mxu2 %vm595_vm1, %v16711_v30  ;;  %v12956_v36 = vpop.f32.mrf.mxu2 }
 0x570   :  { %9715 = vmatpush.xpose.msk.msra.mxu2 %vm595_vm1, %v16712_v49  ;;  %v16720_v49 = vld [vmem:[#allocation47_spill] sm:$0xff] }
 0x574   :  { %9716 = vmatpush.xpose.msk.msra.mxu2 %vm595_vm1, %v16713_v29  ;;  %5300 = vrot.lane.b32.xlu1 %v16679_v26, %s10930_s1  ;;  %v10139_v29 = vunpack.i.l.bf16 %v16720_v49 }
 0x577   :  { %9686 = vmatmul.msk.f32.gmra.mxu2 %vm595_vm1, %v16714_v45  ;;  %v12964_v30 = vpop.f32.mrf.mxu2 }
 0x57f   :  { %9701 = vmatmul.msk.f32.vlgmr.msrb.gmra.mxu2 %vm595_vm1, %v16716_v16  ;;  %v3381_v16 = vmul.f32 1.442695, %v3322_v18  ;;  %v12973_v26 = vpop.f32.mrf.mxu2  ;;  %v16723_v18 = vld [vmem:[#allocation74_spill] sm:$0xff] }
 0x580   :  { %4063 = vmatpush.msrb.mxu2 %v10109_v3  ;;  %v10140_v3 = vunpack.i.h.bf16 %v16720_v49 }
 0x582   :  { %4064 = vmatpush.msrb.mxu2 %v10110_v39 }
 0x586   :  { %v1502_v10 = vpop.xlane.xlu1 %1501 }
 0x587   :  { %10569 = vrcp.f32 %v1502_v10  ;;  %9702 = vmatmul.msk.f32.gmra.mxu2 %vm595_vm1, %v16717_v25  ;;  %v1948_v25 = vand.u32 2147483648, %v1502_v10  ;;  %v1946_v38 = vand.u32 2147483647, %v1502_v10  ;;  %vm1942_vm6 = vweird.f32 %v1502_v10 }
 0x588   :  { %10571 = vrcp.f32 %v12473_v55 }
 0x589   :  { %10573 = vpow2.f32 %v3381_v16  ;;  %vm1947_vm8 = vcmp.eq.f32.partialorder %v1946_v38, 8.507059e+37  ;;  %v12980_v16 = vpop.f32.mrf.mxu3 }
 0x58a   :  { %10575 = vrcp.f32 %v12375_v32 }
 0x58b   :  { %10577 = vrcp.f32 %v12634_v19 }
 0x58d   :  { %v10570_v58 = vpop.eup %10569 }
 0x58e   :  { %v1938_v45 = vmul.f32 %v10570_v58, %v1502_v10  ;;  %vm1943_vm5 = vweird.f32 %v10570_v58  ;;  %v12987_v10 = vpop.f32.mrf.mxu2 }
 0x58f   :  { %9717 = vmatmul.msk.f32.vlgmr.msra.gmra.mxu2 %vm595_vm1, %v16721_v21  ;;  %vm1944_vm7 = vmor %vm1942_vm6, %vm1943_vm5  ;;  %v1949_v21 = vor.u32 1.1754944e-38, %v1948_v25  ;;  %vm3744_vm5 = vweird.f32 %v12634_v19 }
 0x590   :  { %v1939_v39 = vsub.f32 1.0, %v1938_v45  ;;  %4203 = vmatpush.msra.mxu2 %v10139_v29  ;;  %v12977_v45 = vpop.permute.xlu0 %5181 }
 0x591   :  { %16724 = vst [vmem:[#allocation83_spill] sm:$0xff] %v12977_v45 }
 0x592   :  { %v1940_v57 = vmul.f32 %v10570_v58, %v1939_v39  ;;  %4204 = vmatpush.msra.mxu2 %v10140_v3  ;;  %v10572_v39 = vpop.eup %10571 }
 0x593   :  { %v12982_v41 = vpop.eup %10573  ;;  %vm3633_vm9 = vweird.f32 %v10572_v39 }
 0x594   :  { %v1941_v60 = vadd.f32 %v10570_v58, %v1940_v57  ;;  %v3628_v57 = vmul.f32 %v10572_v39, %v12473_v55  ;;  %v3472_v38 = vsel %vm1214_vm2, %v12982_v41, 0.0  ;;  %vm3634_vm11 = vmor %vm3632_vm10, %vm3633_vm9 }
 0x596   :  { %v1945_v49 = vsel %vm1944_vm7, %v10570_v58, %v1941_v60  ;;  %v12991_v58 = vpop.permute.xlu2 %5224  ;;  %v3629_v25 = vsub.f32 1.0, %v3628_v57  ;;  %v10576_v60 = vpop.eup %10575 }
 0x597   :  { %9718 = vmatmul.msk.f32.gmra.mxu2 %vm595_vm1, %v16723_v18  ;;  %v1950_v29 = vsel %vm1947_vm8, %v1949_v21, %v1945_v49  ;;  %16725 = vst [vmem:[#allocation23_spill] sm:$0xff] %v12991_v58  ;;  %v16728_v49 = vld [vmem:[#allocation24_spill] sm:$0xff]  ;;  %v12999_v18 = vpop.f32.mrf.mxu3  ;;  %v16731_v58 = vld [vmem:[#allocation63_spill] sm:$0xff]  ;;  %vm3647_vm13 = vweird.f32 %v10576_v60 }
 0x598   :  { %v1982_v3 = vmul.f32 %v12812_v63, %v1950_v29  ;;  %v12995_v21 = vpop.permute.xlu0 %5142  ;;  %v16729_v29 = vld [vmem:[#allocation64_spill] sm:$0xff]  ;;  %v3630_v45 = vmul.f32 %v10572_v39, %v3629_v25  ;;  %vm3648_vm15 = vmor %vm3646_vm14, %vm3647_vm13 }
 0x599   :  { %16727 = vst [vmem:[#allocation54_spill] sm:$0xff] %v12995_v21 }
 0x59a   :  { %9658 = vmatmul.msk.f32.gmra.mxu3 %vm1214_vm2, %v1982_v3  ;;  %v3642_v3 = vmul.f32 %v10576_v60, %v12375_v32  ;;  %v3631_v21 = vadd.f32 %v10572_v39, %v3630_v45 }
 0x59c   :  { %v3643_v57 = vsub.f32 1.0, %v3642_v3  ;;  %v3635_v27 = vsel %vm3634_vm11, %v10572_v39, %v3631_v21  ;;  %v16736_v21 = vld [vmem:[#allocation48_spill] sm:$0xff] }
 0x59e   :  { %3473 = vadd.xlane.f32.xlu1 %v3472_v38  ;;  %v12993_v63 = vpop.permute.xlu1 %5144  ;;  %v13004_v37 = vpop.xlane.xlu2 %3449 }
 0x59f   :  { %16726 = vst [vmem:[#allocation60_spill] sm:$0xff] %v12993_v63  ;;  %v13010_v63 = vpop.f32.mrf.mxu2  ;;  %v13017_v25 = vpop.f32.mrf.mxu3  ;;  %10579 = vrcp.f32 %v13004_v37  ;;  %vm3758_vm9 = vweird.f32 %v13004_v37 }
 0x5a2   :  { %9673 = vmatmul.msk.f32.vlgmr.msra.gmra.mxu3 %vm595_vm1, %v16728_v49  ;;  %v3638_v49 = vand.u32 2147483648, %v12473_v55 }
 0x5a3   :  { %9703 = vmatpush.xpose.msk.msra.mxu3 %vm595_vm1, %v16729_v29  ;;  %v3636_v29 = vand.u32 2147483647, %v12473_v55  ;;  %v3652_v55 = vand.u32 2147483648, %v12375_v32 }
 0x5a4   :  { %v3639_v45 = vor.u32 1.1754944e-38, %v3638_v49 }
 0x5a5   :  { %vm3637_vm12 = vcmp.eq.f32.partialorder %v3636_v29, 8.507059e+37  ;;  %v16737_v29 = vld [vmem:[#allocation78_spill] sm:$0xff] }
 0x5a6   :  { %v13006_v38 = vpop.permute.xlu1 %5263  ;;  %v3640_v6 = vsel %vm3637_vm12, %v3639_v45, %v3635_v27  ;;  %v13021_v8 = vpop.permute.xlu2 %5335  ;;  %v3650_v27 = vand.u32 2147483647, %v12375_v32 }
 0x5a7   :  { %16730 = vst [vmem:[#allocation19_spill] sm:$0xff] %v13006_v38  ;;  %9704 = vmatpush.xpose.msk.msra.mxu3 %vm595_vm1, %v16731_v58  ;;  %v3644_v38 = vmul.f32 %v10576_v60, %v3643_v57  ;;  %v13019_v58 = vpop.permute.xlu0 %5257  ;;  %v13026_v39 = vpop.f32.mrf.mxu2 }
 0x5a8   :  { %16733 = vst [vmem:[#allocation85_spill] sm:$0xff] %v13019_v58  ;;  %v13031_v49 = vpop.f32.mrf.mxu3  ;;  %vm3651_vm3 = vcmp.eq.f32.partialorder %v3650_v27, 8.507059e+37 }
 0x5a9   :  { %16734 = vst [vmem:[#allocation37_spill] sm:$0xff] %v13021_v8  ;;  %v3645_v40 = vadd.f32 %v10576_v60, %v3644_v38  ;;  %v3653_v38 = vor.u32 1.1754944e-38, %v3652_v55  ;;  %v16752_v8 = vld [vmem:[#allocation59_spill] sm:$0xff] }
 0x5aa   :  { %9674 = vmatmul.msk.f32.gmra.mxu3 %vm595_vm1, %v16732_v35  ;;  %v16735_v35 = vld [vmem:[#allocation106_spill] sm:$0xff] }
 0x5ab   :  { %v3945_v57 = vmul.f32 %v16735_v35, %v3640_v6 }
 0x5ae   :  { %v10218_v3 = vpop.permute.xlu1 %10217 }
 0x5af   :  { %v10219_v52 = vunpack.i.l.bf16 %v10218_v3  ;;  %v10220_v56 = vunpack.i.h.bf16 %v10218_v3  ;;  %v13036_v45 = vpop.permute.xlu0 %5218  ;;  %v16740_v3 = vld [vmem:[#allocation79_spill] sm:$0xff]  ;;  %v13044_v35 = vpop.f32.mrf.mxu2 }
 0x5b0   :  { %16738 = vst [vmem:[#allocation75_spill] sm:$0xff] %v13036_v45  ;;  %v13051_v55 = vpop.f32.mrf.mxu3 }
 0x5b1   :  { %4168 = vmatpush.msra.mxu1 %v10219_v52  ;;  %v3649_v52 = vsel %vm3648_vm15, %v10576_v60, %v3645_v40  ;;  %v16743_v40 = vld [vmem:[#allocation100_spill] sm:$0xff] }
 0x5b2   :  { %9689 = vmatmul.msk.f32.vlgmr.msrb.gmra.mxu3 %vm595_vm1, %v16736_v21  ;;  %v3654_v32 = vsel %vm3651_vm3, %v3653_v38, %v3649_v52  ;;  %v13046_v21 = vpop.permute.xlu2 %5337  ;;  %v16746_v52 = vld [vmem:[#allocation34_spill] sm:$0xff] }
 0x5b3   :  { %9719 = vmatpush.xpose.msk.msrb.mxu3 %vm595_vm1, %v16737_v29  ;;  %4169 = vmatpush.msra.mxu1 %v10220_v56  ;;  %16741 = vst [vmem:[#allocation43_spill] sm:$0xff] %v13046_v21  ;;  %v16742_v56 = vld [vmem:[#allocation51_spill] sm:$0xff]  ;;  %v3946_v60 = vmul.f32 %v16743_v40, %v3654_v32  ;;  %v10578_v29 = vpop.eup %10577  ;;  %v10119_v38 = vunpack.i.l.bf16 %v16746_v52  ;;  %v10120_v32 = vunpack.i.h.bf16 %v16746_v52 }
 0x5b4   :  { %9733 = vmatmul.msk.f32.vlgmr.msra.gmra.mxu1 %vm1214_vm2, %v3945_v57  ;;  %v3740_v40 = vmul.f32 %v10578_v29, %v12634_v19  ;;  %vm3745_vm4 = vweird.f32 %v10578_v29 }
 0x5b5   :  { %vm3746_vm6 = vmor %vm3744_vm5, %vm3745_vm4 }
 0x5b6   :  { %v13038_v6 = vpop.permute.xlu1 %5222 }
 0x5b7   :  { %16739 = vst [vmem:[#allocation70_spill] sm:$0xff] %v13038_v6  ;;  %9720 = vmatpush.xpose.msk.msrb.mxu3 %vm595_vm1, %v16740_v3  ;;  %5413 = vrot.lane.b32.xlu1 %v16668_v43, %s10931_s4  ;;  %v13059_v27 = vpop.permute.xlu0 %5341  ;;  %v13062_v3 = vpop.f32.mrf.mxu2 }
 0x5b8   :  { %16745 = vst [vmem:[#allocation58_spill] sm:$0xff] %v13059_v27  ;;  %v13071_v45 = vpop.f32.mrf.mxu3 }
 0x5b9   :  { %16747 = vst [vmem:[#allocation61_spill] sm:$0xff] %v13062_v3 }
 0x5ba   :  { %9690 = vmatmul.msk.f32.gmra.mxu3 %vm595_vm1, %v16742_v56  ;;  %v16748_v56 = vld [vmem:[#allocation62_spill] sm:$0xff] }
 0x5bc   :  { %9734 = vmatmul.msk.f32.gmra.mxu1 %vm1214_vm2, %v3946_v60  ;;  %v13069_v60 = vpop.permute.xlu2 %5419 }
 0x5bd   :  { %16749 = vst [vmem:[#allocation107_spill] sm:$0xff] %v13069_v60 }
 0x5be   :  { %v13055_v57 = vpop.permute.xlu1 %5259 }
 0x5bf   :  { %16744 = vst [vmem:[#allocation21_spill] sm:$0xff] %v13055_v57  ;;  %5458 = vrot.lane.b32.xlu1 %v16669_v22, %s10930_s1  ;;  %v3741_v22 = vsub.f32 1.0, %v3740_v40  ;;  %v13077_v21 = vpop.xlane.xlu0 %3470  ;;  %v13079_v52 = vpop.f32.mrf.mxu2  ;;  %v16755_v40 = vld [vmem:[#allocation55_spill] sm:$0xff] }
 0x5c0   :  { %16751 = vst [vmem:[#allocation71_spill] sm:$0xff] %v13079_v52  ;;  %10581 = vrcp.f32 %v13077_v21  ;;  %v13089_v58 = vpop.f32.mrf.mxu3  ;;  %vm3856_vm13 = vweird.f32 %v13077_v21 }
 0x5c2   :  { %9705 = vmatmul.msk.f32.vlgmr.msra.gmra.mxu3 %vm595_vm1, %v16748_v56  ;;  %v10580_v56 = vpop.eup %10579 }
 0x5c3   :  { %4098 = vmatpush.msra.mxu3 %v10119_v38  ;;  %v3742_v38 = vmul.f32 %v10578_v29, %v3741_v22  ;;  %v3754_v57 = vmul.f32 %v10580_v56, %v13004_v37  ;;  %v3750_v22 = vand.u32 2147483648, %v12634_v19  ;;  %vm3759_vm8 = vweird.f32 %v10580_v56 }
 0x5c4   :  { %vm3760_vm10 = vmor %vm3758_vm9, %vm3759_vm8 }
 0x5c5   :  { %4099 = vmatpush.msra.mxu3 %v10120_v32  ;;  %v13085_v32 = vpop.permute.xlu2 %5417  ;;  %v3755_v27 = vsub.f32 1.0, %v3754_v57  ;;  %v3751_v53 = vor.u32 1.1754944e-38, %v3750_v22 }
 0x5c6   :  { %v13073_v6 = vpop.permute.xlu1 %5339  ;;  %16753 = vst [vmem:[#allocation74_spill] sm:$0xff] %v13085_v32  ;;  %v3748_v32 = vand.u32 2147483647, %v12634_v19 }
 0x5c7   :  { %16750 = vst [vmem:[#allocation47_spill] sm:$0xff] %v13073_v6  ;;  %5452 = vrot.lane.b32.xlu1 %v16670_v44, %s10931_s4  ;;  %v3743_v6 = vadd.f32 %v10578_v29, %v3742_v38  ;;  %v13093_v44 = vpop.eup %10581  ;;  %v3756_v38 = vmul.f32 %v10580_v56, %v3755_v27 }
 0x5c8   :  { %v3852_v20 = vmul.f32 %v13093_v44, %v13077_v21  ;;  %vm3749_vm7 = vcmp.eq.f32.partialorder %v3748_v32, 8.507059e+37  ;;  %v13106_v19 = vpop.f32.mrf.mxu3  ;;  %v3762_v32 = vand.u32 2147483647, %v13004_v37  ;;  %vm3857_vm12 = vweird.f32 %v13093_v44 }
 0x5c9   :  { %v3747_v57 = vsel %vm3746_vm6, %v10578_v29, %v3743_v6  ;;  %v3764_v6 = vand.u32 2147483648, %v13004_v37  ;;  %vm3858_vm14 = vmor %vm3856_vm13, %vm3857_vm12 }
 0x5ca   :  { %9706 = vmatmul.msk.f32.gmra.mxu3 %vm595_vm1, %v16752_v8  ;;  %v16756_v8 = vld [vmem:[#allocation90_spill] sm:$0xff]  ;;  %v3752_v28 = vsel %vm3749_vm7, %v3751_v53, %v3747_v57  ;;  %v16760_v53 = vld [vmem:[#allocation77_spill] sm:$0xff]  ;;  %vm3763_vm11 = vcmp.eq.f32.partialorder %v3762_v32, 8.507059e+37 }
 0x5cb   :  { %v10194_v43 = vunpack.i.l.bf16 %v16756_v8  ;;  %v10195_v50 = vunpack.i.h.bf16 %v16756_v8  ;;  %v3853_v8 = vsub.f32 1.0, %v3852_v20  ;;  %v3953_v29 = vmul.f32 %v12530_v1, %v3752_v28 }
 0x5cd   :  { %v3854_v20 = vmul.f32 %v13093_v44, %v3853_v8 }
 0x5ce   :  { %v13087_v60 = vpop.permute.xlu1 %5220 }
 0x5cf   :  { %16754 = vst [vmem:[#allocation24_spill] sm:$0xff] %v13087_v60  ;;  %5536 = vrot.lane.b32.xlu1 %v16755_v40, %s10930_s1  ;;  %v16758_v60 = vld [vmem:[#allocation76_spill] sm:$0xff]  ;;  %v3855_v37 = vadd.f32 %v13093_v44, %v3854_v20 }
 0x5d0   :  { %v13120_v1 = vpop.f32.mrf.mxu3 }
 0x5d2   :  { %v13099_v31 = vpop.f32.mrf.mxu2  ;;  %9721 = vmatmul.msk.f32.vlgmr.msrb.gmra.mxu3 %vm595_vm1, %v16758_v60  ;;  %v10228_v60 = vpop.permute.xlu2 %10227 }
 0x5d3   :  { %16757 = vst [vmem:[#allocation64_spill] sm:$0xff] %v13099_v31  ;;  %4238 = vmatpush.msrb.mxu3 %v10194_v43  ;;  %v3757_v43 = vadd.f32 %v10580_v56, %v3756_v38  ;;  %v10229_v22 = vunpack.i.l.bf16 %v10228_v60  ;;  %v10230_v57 = vunpack.i.h.bf16 %v10228_v60  ;;  %v3862_v38 = vand.u32 2147483648, %v13077_v21 }
 0x5d5   :  { %4239 = vmatpush.msrb.mxu3 %v10195_v50 }
 0x5d6   :  { %v10223_v46 = vpop.permute.xlu1 %10222 }
 0x5d7   :  { %v10224_v51 = vunpack.i.l.bf16 %v10223_v46  ;;  %5532 = vrot.lane.b32.xlu1 %v16755_v40, %s10931_s4  ;;  %v10225_v27 = vunpack.i.h.bf16 %v10223_v46  ;;  %v3761_v46 = vsel %vm3760_vm10, %v10580_v56, %v3757_v43  ;;  %v3860_v56 = vand.u32 2147483647, %v13077_v21  ;;  %v16761_v21 = vld [vmem:[#allocation68_spill] sm:$0xff] }
 0x5d9   :  { %4308 = vmatpush.msrb.mxu1 %v10224_v51  ;;  %v3765_v51 = vor.u32 1.1754944e-38, %v3764_v6  ;;  %v3859_v6 = vsel %vm3858_vm14, %v13093_v44, %v3855_v37  ;;  %vm3861_vm15 = vcmp.eq.f32.partialorder %v3860_v56, 8.507059e+37 }
 0x5da   :  { %v13113_v50 = vpop.f32.mrf.mxu2  ;;  %9722 = vmatmul.msk.f32.gmra.mxu3 %vm595_vm1, %v16760_v53  ;;  %v13136_v53 = vpop.f32.mrf.mxu3 }
 0x5db   :  { %16759 = vst [vmem:[#allocation63_spill] sm:$0xff] %v13113_v50  ;;  %4309 = vmatpush.msrb.mxu1 %v10225_v27  ;;  %v3766_v28 = vsel %vm3763_vm11, %v3765_v51, %v3761_v46  ;;  %v3863_v27 = vor.u32 1.1754944e-38, %v3862_v38  ;;  %v13148_v51 = vpop.permute.xlu2 %5378 }
 0x5dc   :  { %9741 = vmatmul.msk.f32.vlgmr.msrb.gmra.mxu1 %vm1214_vm2, %v3953_v29  ;;  %v3954_v8 = vmul.f32 %v12692_v7, %v3766_v28  ;;  %16762 = vst [vmem:[#allocation32_spill] sm:$0xff] %v13148_v51  ;;  %v13152_v28 = vpop.permute.xlu0 %5296 }
 0x5dd   :  { %4448 = vmatpush.msra.mxu1 %v10229_v22  ;;  %v3864_v32 = vsel %vm3861_vm15, %v3863_v27, %v3859_v6  ;;  %16764 = vst [vmem:[#allocation106_spill] sm:$0xff] %v13152_v28 }
 0x5de   :  { %v3961_v7 = vmul.f32 %v12762_v23, %v3864_v32  ;;  %v13160_v56 = vpop.permute.xlu1 %5302 }
 0x5df   :  { %4449 = vmatpush.msra.mxu1 %v10230_v57  ;;  %10237 = vrot.lane.b32.xlu1 %v12816_v34, %s10929_s27  ;;  %v16763_v57 = vld [vmem:[#allocation69_spill] sm:$0xff]  ;;  %16767 = vst [vmem:[#allocation79_spill] sm:$0xff] %v13160_v56 }
 0x5e2   :  { %v2654_v60 = vpop.f32.mrf.mxu2  ;;  %v13146_v46 = vpop.f32.mrf.mxu3 }
 0x5e3   :  { %v13130_v43 = vmul.f32 0.35355338, %v2654_v60  ;;  %v13156_v23 = vpop.permute.xlu2 %5415 }
 0x5e4   :  { %9742 = vmatmul.msk.f32.gmra.mxu1 %vm1214_vm2, %v3954_v8  ;;  %16765 = vst [vmem:[#allocation48_spill] sm:$0xff] %v13156_v23  ;;  %v13158_v38 = vpop.permute.xlu0 %5298 }
 0x5e5   :  { %v3211_v29 = vsel %vm1214_vm2, %v13130_v43, -inf  ;;  %16766 = vst [vmem:[#allocation78_spill] sm:$0xff] %v13158_v38 }
 0x5e6   :  { %3212 = vmax.xlane.f32.xlu0 %v3211_v29  ;;  %v13168_v27 = vpop.permute.xlu1 %5300  ;;  %v585_v29 = vld [vmem:[%s16321_s5] sm:$0xff] }
 0x5e7   :  { %10287 = vrot.lane.b32.xlu1 %v16761_v21, %s10932_s12  ;;  %16771 = vst [vmem:[#allocation62_spill] sm:$0xff] %v13168_v27  ;;  %4847 = vmatpush.msrb.mxu1 %v585_v29 }
 0x5ea   :  { %v2657_v22 = vpop.f32.mrf.mxu2  ;;  %v13154_v37 = vpop.f32.mrf.mxu3 }
 0x5eb   :  { %v13141_v20 = vmul.f32 0.35355338, %v2657_v22  ;;  %v13164_v8 = vpop.permute.xlu2 %5495 }
 0x5ec   :  { %9749 = vmatmul.msk.f32.vlgmr.msra.gmra.mxu1 %vm1214_vm2, %v3961_v7  ;;  %16769 = vst [vmem:[#allocation100_spill] sm:$0xff] %v13164_v8  ;;  %v13166_v6 = vpop.permute.xlu0 %5380 }
 0x5ed   :  { %v3214_v44 = vsel %vm1214_vm2, %v13141_v20, -inf  ;;  %16770 = vst [vmem:[#allocation34_spill] sm:$0xff] %v13166_v6 }
 0x5ee   :  { %3215 = vmax.xlane.f32.xlu2 %v3214_v44 }
 0x5ef   :  { %10302 = vrot.lane.b32.xlu1 %v16763_v57, %s10932_s12 }
 0x5f2   :  { %v13162_v60 = vpop.f32.mrf.mxu3  ;;  %v2810_v56 = vpop.f32.mrf.mxu2 }
 0x5f3   :  { %16768 = vst [vmem:[#allocation51_spill] sm:$0xff] %v13162_v60  ;;  %v13175_v21 = vpop.permute.xlu2 %5491 }
 0x5f4   :  { %16773 = vst [vmem:[#allocation90_spill] sm:$0xff] %v13175_v21  ;;  %v13177_v7 = vpop.permute.xlu0 %5374 }
 0x5f5   :  { %16774 = vst [vmem:[#allocation76_spill] sm:$0xff] %v13177_v7 }
 0x5fa   :  { %v13173_v32 = vpop.f32.mrf.mxu3 }
 0x5fb   :  { %16772 = vst [vmem:[#allocation59_spill] sm:$0xff] %v13173_v32  ;;  %v13181_v57 = vpop.permute.xlu2 %5493 }
 0x5fc   :  { %16776 = vst [vmem:[#allocation68_spill] sm:$0xff] %v13181_v57  ;;  %v13183_v28 = vpop.permute.xlu0 %5497 }
 0x5fd   :  { %16777 = vst [vmem:[#allocation120_spill] sm:$0xff] %v13183_v28 }
 0x602   :  { %v13179_v44 = vpop.f32.mrf.mxu3 }
 0x603   :  { %16775 = vst [vmem:[#allocation77_spill] sm:$0xff] %v13179_v44  ;;  %v13187_v23 = vpop.permute.xlu2 %5534 }
 0x604   :  { %16779 = vst [vmem:[#allocation122_spill] sm:$0xff] %v13187_v23  ;;  %v13190_v28 = vpop.permute.xlu0 %5376 }
 0x605   :  { %16780 = vst [vmem:[#allocation123_spill] sm:$0xff] %v13190_v28 }
 0x611   :  { %v3474_v22 = vpop.xlane.xlu1 %3473 }
 0x612   :  { %10583 = vrcp.f32 %v3474_v22  ;;  %v3876_v51 = vand.u32 2147483648, %v3474_v22  ;;  %v3874_v27 = vand.u32 2147483647, %v3474_v22  ;;  %vm3870_vm4 = vweird.f32 %v3474_v22 }
 0x614   :  { %v3877_v21 = vor.u32 1.1754944e-38, %v3876_v51  ;;  %vm3875_vm6 = vcmp.eq.f32.partialorder %v3874_v27, 8.507059e+37  ;;  %v13199_v51 = vpop.permute.xlu2 %10232 }
 0x615   :  { %16782 = vst [vmem:[#allocation125_spill] sm:$0xff] %v13199_v51 }
 0x618   :  { %v10584_v34 = vpop.eup %10583 }
 0x619   :  { %v3866_v38 = vmul.f32 %v10584_v34, %v3474_v22  ;;  %vm3871_vm3 = vweird.f32 %v10584_v34 }
 0x61a   :  { %vm3872_vm5 = vmor %vm3870_vm4, %vm3871_vm3 }
 0x61b   :  { %v3867_v40 = vsub.f32 1.0, %v3866_v38 }
 0x61d   :  { %v3868_v6 = vmul.f32 %v10584_v34, %v3867_v40  ;;  %v13185_v29 = vpop.f32.mrf.mxu3 }
 0x61e   :  { %16778 = vst [vmem:[#allocation121_spill] sm:$0xff] %v13185_v29 }
 0x61f   :  { %v3869_v7 = vadd.f32 %v10584_v34, %v3868_v6  ;;  %v2813_v6 = vpop.f32.mrf.mxu2 }
 0x621   :  { %v3873_v8 = vsel %vm3872_vm5, %v10584_v34, %v3869_v7  ;;  %v13201_v34 = vmul.f32 0.35355338, %v2810_v56 }
 0x622   :  { %v3878_v57 = vsel %vm3875_vm6, %v3877_v21, %v3873_v8 }
 0x623   :  { %v3962_v44 = vmul.f32 %v12982_v41, %v3878_v57  ;;  %v13207_v57 = vpop.permute.xlu0 %5456  ;;  %v3235_v27 = vsel %vm1214_vm2, %v13201_v34, -inf }
 0x624   :  { %16783 = vst [vmem:[#allocation126_spill] sm:$0xff] %v13207_v57 }
 0x625   :  { %v2693_v38 = vpop.f32.mrf.mxu3  ;;  %9750 = vmatmul.msk.f32.gmra.mxu1 %vm1214_vm2, %v3962_v44  ;;  %v13215_v44 = vmul.f32 0.35355338, %v2813_v6 }
 0x626   :  { %v13193_v40 = vmul.f32 0.35355338, %v2693_v38  ;;  %v13217_v38 = vpop.permute.xlu2 %10247 }
 0x627   :  { %v2966_v56 = vpop.f32.mrf.mxu2  ;;  %16785 = vst [vmem:[#allocation128_spill] sm:$0xff] %v13217_v38  ;;  %v3238_v28 = vsel %vm1214_vm2, %v13215_v44, -inf }
 0x628   :  { %v3217_v22 = vsel %vm1214_vm2, %v13193_v40, -inf  ;;  %v13232_v23 = vmul.f32 0.35355338, %v2966_v56 }
 0x629   :  { %v13197_v29 = vpop.permute.xlu1 %5413  ;;  %3218 = vmax.xlane.f32.xlu1 %v3217_v22  ;;  %v16786_v22 = vld [vmem:[#allocation97_spill] sm:$0xff] }
 0x62a   :  { %16781 = vst [vmem:[#allocation124_spill] sm:$0xff] %v13197_v29  ;;  %10585 = vrcp.f32 %v16786_v22  ;;  %v3498_v31 = vand.u32 2147483648, %v16786_v22  ;;  %vm3492_vm8 = vweird.f32 %v16786_v22  ;;  %v3496_v59 = vand.u32 2147483647, %v16786_v22 }
 0x62c   :  { %vm3497_vm10 = vcmp.eq.f32.partialorder %v3496_v59, 8.507059e+37  ;;  %v16801_v59 = vld [vmem:[#allocation81_spill] sm:$0xff] }
 0x62d   :  { %v2696_v8 = vpop.f32.mrf.mxu3  ;;  %9787 = vmatmul.msk.f32.vlgmr.msrb.gmra.mxu1 %vm595_vm1, %v12898_v54 }
 0x62e   :  { %v13205_v41 = vmul.f32 0.35355338, %v2696_v8  ;;  %v13240_v51 = vpop.permute.xlu2 %10262 }
 0x630   :  { %v3220_v21 = vsel %vm1214_vm2, %v13205_v41, -inf  ;;  %v10586_v38 = vpop.eup %10585 }
 0x631   :  { %v13213_v7 = vpop.permute.xlu1 %5458  ;;  %3236 = vmax.xlane.f32.xlu1 %v3235_v27  ;;  %3221 = vmax.xlane.f32.xlu0 %v3220_v21  ;;  %v13228_v21 = vpop.permute.xlu0 %5454  ;;  %v3488_v29 = vmul.f32 %v10586_v38, %v16786_v22  ;;  %vm3493_vm7 = vweird.f32 %v10586_v38 }
 0x632   :  { %16784 = vst [vmem:[#allocation127_spill] sm:$0xff] %v13213_v7  ;;  %vm13280_vm9 = vmor %vm3492_vm8, %vm3493_vm7 }
 0x633   :  { %16787 = vst [vmem:[#allocation97_spill] sm:$0xff] %v13228_v21  ;;  %v3489_v21 = vsub.f32 1.0, %v3488_v29 }
 0x635   :  { %v2849_v54 = vpop.f32.mrf.mxu3  ;;  %9788 = vmatmul.msk.f32.gmra.mxu1 %vm595_vm1, %v12909_v17  ;;  %v2969_v17 = vpop.f32.mrf.mxu2  ;;  %v3490_v15 = vmul.f32 %v10586_v38, %v3489_v21 }
 0x636   :  { %v13222_v8 = vmul.f32 0.35355338, %v2849_v54  ;;  %v16789_v54 = vld [vmem:[#allocation109_spill] sm:$0xff] }
 0x637   :  { %10587 = vrcp.f32 %v16789_v54  ;;  %16790 = vst [vmem:[#allocation109_spill] sm:$0xff] %v13240_v51  ;;  %v16793_v51 = vld [vmem:[#allocation110_spill] sm:$0xff]  ;;  %vm3506_vm12 = vweird.f32 %v16789_v54 }
 0x638   :  { %v3241_v27 = vsel %vm1214_vm2, %v13222_v8, -inf  ;;  %10589 = vrcp.f32 %v16793_v51  ;;  %vm3604_vm3 = vweird.f32 %v16793_v51 }
 0x639   :  { %v13230_v6 = vpop.permute.xlu1 %5452  ;;  %3239 = vmax.xlane.f32.xlu0 %v3238_v28  ;;  %3242 = vmax.xlane.f32.xlu2 %v3241_v27  ;;  %v3259_v28 = vsel %vm1214_vm2, %v13232_v23, -inf }
 0x63a   :  { %16788 = vst [vmem:[#allocation129_spill] sm:$0xff] %v13230_v6 }
 0x63d   :  { %v2852_v57 = vpop.f32.mrf.mxu3  ;;  %9789 = vmatmul.msk.f32.gmra.mxu1 %vm595_vm1, %v12980_v16  ;;  %v13248_v16 = vpop.permute.xlu0 %5530 }
 0x63e   :  { %v13237_v7 = vmul.f32 0.35355338, %v2852_v57  ;;  %16792 = vst [vmem:[#allocation131_spill] sm:$0xff] %v13248_v16  ;;  %v13250_v6 = vpop.eup %10587  ;;  %v13252_v57 = vmul.f32 0.35355338, %v2969_v17  ;;  %v13265_v16 = vpop.permute.xlu2 %10267 }
 0x63f   :  { %16794 = vst [vmem:[#allocation110_spill] sm:$0xff] %v13265_v16  ;;  %v13269_v21 = vpop.eup %10589  ;;  %vm3507_vm11 = vweird.f32 %v13250_v6 }
 0x640   :  { %v3244_v56 = vsel %vm1214_vm2, %v13237_v7, -inf  ;;  %v3262_v29 = vsel %vm1214_vm2, %v13252_v57, -inf  ;;  %v3600_v22 = vmul.f32 %v13269_v21, %v16793_v51  ;;  %vm13308_vm13 = vmor %vm3506_vm12, %vm3507_vm11  ;;  %vm3605_vm15 = vweird.f32 %v13269_v21 }
 0x641   :  { %v13246_v27 = vpop.permute.xlu1 %5536  ;;  %3260 = vmax.xlane.f32.xlu2 %v3259_v28  ;;  %3245 = vmax.xlane.f32.xlu1 %v3244_v56  ;;  %v3502_v28 = vmul.f32 %v13250_v6, %v16789_v54  ;;  %v3122_v56 = vpop.f32.mrf.mxu2  ;;  %vm3606_vm4 = vmor %vm3604_vm3, %vm3605_vm15  ;;  %vm3716_vm11 = vweird.f32 %v12574_v42  ;;  %vm3730_vm15 = vweird.f32 %v12544_v61 }
 0x642   :  { %16791 = vst [vmem:[#allocation130_spill] sm:$0xff] %v13246_v27  ;;  %v13272_v14 = vmul.f32 0.35355338, %v3122_v56 }
 0x644   :  { %v3283_v12 = vsel %vm1214_vm2, %v13272_v14, -inf }
 0x645   :  { %v3005_v13 = vpop.f32.mrf.mxu3  ;;  %9790 = vmatmul.msk.f32.gmra.mxu1 %vm595_vm1, %v12999_v18  ;;  %v3491_v18 = vadd.f32 %v10586_v38, %v3490_v15  ;;  %v13276_v32 = vpop.permute.xlu0 %10242  ;;  %v3601_v15 = vsub.f32 1.0, %v3600_v22 }
 0x646   :  { %v13257_v50 = vmul.f32 0.35355338, %v3005_v13  ;;  %v3503_v13 = vsub.f32 1.0, %v3502_v28  ;;  %16796 = vst [vmem:[#allocation133_spill] sm:$0xff] %v13276_v32  ;;  %v16799_v28 = vld [vmem:[#allocation113_spill] sm:$0xff]  ;;  %v10283_v5 = vpop.permute.xlu2 %10282 }
 0x647   :  { %10591 = vrcp.f32 %v16799_v28  ;;  %v3495_v56 = vsel %vm13280_vm9, %v10586_v38, %v3491_v18  ;;  %vm3618_vm7 = vweird.f32 %v16799_v28 }
 0x648   :  { %v3265_v17 = vsel %vm1214_vm2, %v13257_v50, -inf }
 0x649   :  { %v13267_v27 = vpop.permute.xlu1 %5532  ;;  %3263 = vmax.xlane.f32.xlu1 %v3262_v29  ;;  %3266 = vmax.xlane.f32.xlu0 %v3265_v17  ;;  %v3504_v17 = vmul.f32 %v13250_v6, %v3503_v13 }
 0x64a   :  { %16795 = vst [vmem:[#allocation132_spill] sm:$0xff] %v13267_v27  ;;  %v16800_v27 = vld [vmem:[#allocation105_spill] sm:$0xff] }
 0x64b   :  { %v3319_v32 = vsub.f32 %v16800_v27, %v12420_v11  ;;  %v3512_v27 = vand.u32 2147483648, %v16789_v54 }
 0x64d   :  { %v3008_v16 = vpop.f32.mrf.mxu3  ;;  %9791 = vmatmul.msk.f32.gmra.mxu1 %vm595_vm1, %v12930_v24  ;;  %v3499_v24 = vor.u32 1.1754944e-38, %v3498_v31  ;;  %v3375_v13 = vmul.f32 1.442695, %v3319_v32  ;;  %v3505_v31 = vadd.f32 %v13250_v6, %v3504_v17  ;;  %v10592_v11 = vpop.eup %10591  ;;  %v10284_v32 = vunpack.i.l.bf16 %v10283_v5 }
 0x64e   :  { %v13285_v29 = vmul.f32 0.35355338, %v3008_v16  ;;  %v3125_v16 = vpop.f32.mrf.mxu2  ;;  %v13314_v22 = vpop.permute.xlu0 %10252  ;;  %v10285_v17 = vunpack.i.h.bf16 %v10283_v5  ;;  %v3608_v5 = vand.u32 2147483647, %v16793_v51  ;;  %vm3619_vm6 = vweird.f32 %v10592_v11 }
 0x64f   :  { %v3500_v38 = vsel %vm3497_vm10, %v3499_v24, %v3495_v56  ;;  %v13301_v47 = vmul.f32 0.35355338, %v3125_v16  ;;  %v3614_v56 = vmul.f32 %v10592_v11, %v16799_v28  ;;  %10593 = vpow2.f32 %v3375_v13  ;;  %vm3620_vm8 = vmor %vm3618_vm7, %vm3619_vm6 }
 0x650   :  { %v3268_v2 = vsel %vm1214_vm2, %v13285_v29, -inf  ;;  %v3935_v3 = vmul.f32 %v16801_v59, %v3500_v38  ;;  %vm3609_vm5 = vcmp.eq.f32.partialorder %v3608_v5, 8.507059e+37  ;;  %v16810_v5 = vld [vmem:[#allocation95_spill] sm:$0xff] }
 0x651   :  { %v10238_v60 = vpop.permute.xlu1 %10237  ;;  %3284 = vmax.xlane.f32.xlu0 %v3283_v12  ;;  %3269 = vmax.xlane.f32.xlu2 %v3268_v2  ;;  %v3510_v2 = vand.u32 2147483647, %v16789_v54  ;;  %v3513_v54 = vor.u32 1.1754944e-38, %v3512_v27  ;;  %v3286_v24 = vsel %vm1214_vm2, %v13301_v47, -inf  ;;  %v3615_v16 = vsub.f32 1.0, %v3614_v56  ;;  %v16806_v56 = vld [vmem:[#allocation80_spill] sm:$0xff] }
 0x652   :  { %v10239_v18 = vunpack.i.l.bf16 %v10238_v60  ;;  %v10240_v52 = vunpack.i.h.bf16 %v10238_v60  ;;  %v3602_v60 = vmul.f32 %v13269_v21, %v3601_v15  ;;  %v3624_v12 = vand.u32 2147483648, %v16799_v28 }
 0x653   :  { %vm3511_vm14 = vcmp.eq.f32.partialorder %v3510_v2, 8.507059e+37  ;;  %v3616_v13 = vmul.f32 %v10592_v11, %v3615_v16 }
 0x654   :  { %3993 = vmatpush.msrb.mxu0 %v10239_v18  ;;  %v3603_v38 = vadd.f32 %v13269_v21, %v3602_v60  ;;  %v3622_v60 = vand.u32 2147483647, %v16799_v28  ;;  %v13359_v28 = vpop.permute.xlu2 %10297 }
 0x655   :  { %9792 = vmatmul.msk.f32.gmra.mxu1 %vm595_vm1, %v12938_v48  ;;  %v3509_v48 = vsel %vm13308_vm13, %v13250_v6, %v3505_v31  ;;  %v13325_v18 = vpop.eup %10593  ;;  %v16804_v6 = vld [vmem:[#allocation98_spill] sm:$0xff]  ;;  %16808 = vst [vmem:[#allocation113_spill] sm:$0xff] %v13359_v28 }
 0x656   :  { %3994 = vmatpush.msrb.mxu0 %v10240_v52  ;;  %v3514_v52 = vsel %vm3511_vm14, %v3513_v54, %v3509_v48  ;;  %v3607_v31 = vsel %vm3606_vm4, %v13269_v21, %v3603_v38  ;;  %v3463_v59 = vsel %vm1214_vm2, %v13325_v18, 0.0  ;;  %v13336_v2 = vpop.permute.xlu0 %10257  ;;  %v16805_v21 = vld [vmem:[#allocation94_spill] sm:$0xff]  ;;  %v3625_v54 = vor.u32 1.1754944e-38, %v3624_v12 }
 0x657   :  { %9723 = vmatmul.msk.f32.vlgmr.msrb.gmra.mxu0 %vm1214_vm2, %v3935_v3  ;;  %v3610_v3 = vand.u32 2147483648, %v16793_v51  ;;  %v3936_v15 = vmul.f32 %v16804_v6, %v3514_v52  ;;  %vm3623_vm9 = vcmp.eq.f32.partialorder %v3622_v60, 8.507059e+37  ;;  %v16807_v52 = vld [vmem:[#allocation92_spill] sm:$0xff] }
 0x658   :  { %4133 = vmatpush.msra.mxu0 %v10284_v32 }
 0x659   :  { %3287 = vmax.xlane.f32.xlu2 %v3286_v24  ;;  %v3611_v27 = vor.u32 1.1754944e-38, %v3610_v3  ;;  %v16809_v3 = vld [vmem:[#allocation112_spill] sm:$0xff] }
 0x65a   :  { %4134 = vmatpush.msra.mxu0 %v10285_v17 }
 0x65b   :  { %v3612_v51 = vsel %vm3609_vm5, %v3611_v27, %v3607_v31 }
 0x65c   :  { %v3943_v32 = vmul.f32 %v16805_v21, %v3612_v51  ;;  %v13372_v51 = vpop.permute.xlu1 %10287 }
 0x65d   :  { %9793 = vmatmul.msk.f32.gmra.mxu1 %vm595_vm1, %v13017_v25  ;;  %v3617_v25 = vadd.f32 %v10592_v11, %v3616_v13  ;;  %16811 = vst [vmem:[#allocation105_spill] sm:$0xff] %v13372_v51 }
 0x65e   :  { %v13349_v24 = vpop.permute.xlu0 %10272 }
 0x65f   :  { %9724 = vmatmul.msk.f32.gmra.mxu0 %vm1214_vm2, %v3936_v15  ;;  %v3621_v48 = vsel %vm3620_vm8, %v10592_v11, %v3617_v25  ;;  %v3161_v11 = vpop.f32.mrf.mxu3 }
 0x660   :  { %v3626_v17 = vsel %vm3623_vm9, %v3625_v54, %v3621_v48  ;;  %v13370_v31 = vmul.f32 0.35355338, %v3161_v11  ;;  %v13391_v48 = vpop.f32.mrf.mxu1 }
 0x661   :  { %3464 = vadd.xlane.f32.xlu2 %v3463_v59  ;;  %v3944_v16 = vmul.f32 %v16807_v52, %v3626_v17  ;;  %v3216_v6 = vpop.xlane.xlu2 %3215 }
 0x662   :  { %10307 = vrot.lane.b32.xlu1 %v12888_v33, %s10929_s27  ;;  %v3300_v15 = vsub.f32 %v13141_v20, %v3216_v6  ;;  %v3289_v12 = vsel %vm1214_vm2, %v13370_v31, -inf }
 0x664   :  { %v3337_v59 = vmul.f32 1.442695, %v3300_v15  ;;  %v13389_v60 = vpop.permute.xlu1 %10302 }
 0x665   :  { %9794 = vmatmul.msk.f32.gmra.mxu1 %vm595_vm1, %v13031_v49  ;;  %10312 = vrot.lane.b32.xlu0 %v16806_v56, %s10932_s12  ;;  %16812 = vst [vmem:[#allocation81_spill] sm:$0xff] %v13389_v60 }
 0x666   :  { %v13355_v49 = vpop.permute.xlu0 %10277 }
 0x667   :  { %9731 = vmatmul.msk.f32.vlgmr.msra.gmra.mxu0 %vm1214_vm2, %v3943_v32  ;;  %v3164_v27 = vpop.f32.mrf.mxu3 }
 0x668   :  { %v13375_v25 = vmul.f32 0.35355338, %v3164_v27  ;;  %v13404_v11 = vpop.f32.mrf.mxu1 }
 0x66a   :  { %v3292_v20 = vsel %vm1214_vm2, %v13375_v25, -inf }
 0x66d   :  { %9795 = vmatmul.msk.f32.gmra.mxu1 %vm595_vm1, %v12950_v0  ;;  %v3320_v0 = vsub.f32 %v16810_v5, %v16809_v3 }
 0x66e   :  { %v13363_v38 = vpop.permute.xlu0 %10292 }
 0x66f   :  { %9732 = vmatmul.msk.f32.gmra.mxu0 %vm1214_vm2, %v3944_v16  ;;  %v3377_v13 = vmul.f32 1.442695, %v3320_v0 }
 0x671   :  { %10595 = vpow2.f32 %v3377_v13  ;;  %v13412_v13 = vpop.f32.mrf.mxu1 }
 0x672   :  { %10597 = vpow2.f32 %v3337_v59 }
 0x675   :  { %9796 = vmatmul.msk.f32.gmra.mxu1 %vm595_vm1, %v12956_v36 }
 0x676   :  { %v3213_v36 = vpop.xlane.xlu0 %3212 }
 0x677   :  { %v13383_v21 = vpop.eup %10595 }
 0x678   :  { %v13385_v32 = vpop.eup %10597 }
 0x67d   :  { %9797 = vmatmul.msk.f32.gmra.mxu1 %vm595_vm1, %v13051_v55  ;;  %v3299_v55 = vsub.f32 %v13130_v43, %v3213_v36  ;;  %v3466_v43 = vsel %vm1214_vm2, %v13383_v21, 0.0 }
 0x685   :  { %9798 = vmatmul.msk.f32.gmra.mxu1 %vm595_vm1, %v13071_v45  ;;  %v3335_v45 = vmul.f32 1.442695, %v3299_v55 }
 0x687   :  { %10599 = vpow2.f32 %v3335_v45 }
 0x68c   :  { %3290 = vmax.xlane.f32.xlu1 %v3289_v12 }
 0x68d   :  { %9799 = vmatmul.msk.f32.gmra.mxu1 %vm595_vm1, %v12964_v30  ;;  %v3406_v30 = vsel %vm1214_vm2, %v13385_v32, 0.0  ;;  %v13397_v54 = vpop.eup %10599 }
 0x68e   :  { %v3403_v17 = vsel %vm1214_vm2, %v13397_v54, 0.0 }
 0x68f   :  { %3293 = vmax.xlane.f32.xlu0 %v3292_v20 }
 0x694   :  { %3467 = vadd.xlane.f32.xlu1 %v3466_v43  ;;  %v13426_v43 = vpop.f32.mrf.mxu1 }
 0x695   :  { %9800 = vmatmul.msk.f32.gmra.mxu1 %vm595_vm1, %v12973_v26 }
 0x697   :  { %3407 = vadd.xlane.f32.xlu0 %v3406_v30 }
 0x69c   :  { %v3219_v52 = vpop.xlane.xlu1 %3218  ;;  %3404 = vadd.xlane.f32.xlu1 %v3403_v17 }
 0x69d   :  { %v3301_v16 = vsub.f32 %v13193_v40, %v3219_v52  ;;  %9801 = vmatmul.msk.f32.gmra.mxu1 %vm595_vm1, %v13089_v58 }
 0x69f   :  { %v3339_v3 = vmul.f32 1.442695, %v3301_v16 }
 0x6a1   :  { %10601 = vpow2.f32 %v3339_v3 }
 0x6a4   :  { %v3237_v26 = vpop.xlane.xlu1 %3236  ;;  %v3222_v5 = vpop.xlane.xlu0 %3221 }
 0x6a5   :  { %v3307_v0 = vsub.f32 %v13201_v34, %v3237_v26  ;;  %v3302_v6 = vsub.f32 %v13205_v41, %v3222_v5  ;;  %9802 = vmatmul.msk.f32.gmra.mxu1 %vm595_vm1, %v13106_v19 }
 0x6a7   :  { %v13410_v15 = vpop.eup %10601  ;;  %v3351_v40 = vmul.f32 1.442695, %v3307_v0  ;;  %v3341_v36 = vmul.f32 1.442695, %v3302_v6  ;;  %v13441_v0 = vpop.f32.mrf.mxu1 }
 0x6a8   :  { %v3409_v58 = vsel %vm1214_vm2, %v13410_v15, 0.0 }
 0x6a9   :  { %10603 = vpow2.f32 %v3351_v40  ;;  %3410 = vadd.xlane.f32.xlu2 %v3409_v58 }
 0x6aa   :  { %10605 = vpow2.f32 %v3341_v36 }
 0x6ac   :  { %v3240_v27 = vpop.xlane.xlu0 %3239  ;;  %v3243_v59 = vpop.xlane.xlu2 %3242 }
 0x6ad   :  { %v3308_v34 = vsub.f32 %v13215_v44, %v3240_v27  ;;  %v3309_v41 = vsub.f32 %v13222_v8, %v3243_v59  ;;  %9803 = vmatmul.msk.f32.gmra.mxu1 %vm595_vm1, %v12987_v10 }
 0x6af   :  { %v13420_v19 = vpop.eup %10603  ;;  %v3353_v55 = vmul.f32 1.442695, %v3308_v34  ;;  %v3355_v12 = vmul.f32 1.442695, %v3309_v41 }
 0x6b0   :  { %v13422_v45 = vpop.eup %10605  ;;  %v3427_v20 = vsel %vm1214_vm2, %v13420_v19, 0.0 }
 0x6b1   :  { %10607 = vpow2.f32 %v3353_v55  ;;  %3428 = vadd.xlane.f32.xlu2 %v3427_v20  ;;  %v3412_v44 = vsel %vm1214_vm2, %v13422_v45, 0.0 }
 0x6b2   :  { %10609 = vpow2.f32 %v3355_v12  ;;  %3413 = vadd.xlane.f32.xlu1 %v3412_v44 }
 0x6b3   :  { %10611 = vrcp.f32 %v12574_v42 }
 0x6b4   :  { %v3261_v8 = vpop.xlane.xlu2 %3260  ;;  %v3246_v10 = vpop.xlane.xlu1 %3245 }
 0x6b5   :  { %v3315_v30 = vsub.f32 %v13232_v23, %v3261_v8  ;;  %v3310_v17 = vsub.f32 %v13237_v7, %v3246_v10  ;;  %9804 = vmatmul.msk.f32.gmra.mxu1 %vm595_vm1, %v13010_v63 }
 0x6b7   :  { %v13434_v52 = vpop.eup %10607  ;;  %v3367_v16 = vmul.f32 1.442695, %v3315_v30  ;;  %v3357_v3 = vmul.f32 1.442695, %v3310_v17 }
 0x6b8   :  { %v13436_v26 = vpop.eup %10609  ;;  %v3430_v5 = vsel %vm1214_vm2, %v13434_v52, 0.0 }
 0x6b9   :  { %10613 = vpow2.f32 %v3367_v16  ;;  %v3433_v23 = vsel %vm1214_vm2, %v13436_v26, 0.0  ;;  %v10612_v36 = vpop.eup %10611 }
 0x6ba   :  { %10615 = vpow2.f32 %v3357_v3  ;;  %3431 = vadd.xlane.f32.xlu1 %v3430_v5  ;;  %3434 = vadd.xlane.f32.xlu0 %v3433_v23  ;;  %vm3717_vm10 = vweird.f32 %v10612_v36 }
 0x6bb   :  { %10617 = vrcp.f32 %v12544_v61  ;;  %vm3718_vm12 = vmor %vm3716_vm11, %vm3717_vm10 }
 0x6bc   :  { %v3264_v63 = vpop.xlane.xlu1 %3263  ;;  %v3267_v7 = vpop.xlane.xlu0 %3266 }
 0x6bd   :  { %v3316_v6 = vsub.f32 %v13252_v57, %v3264_v63  ;;  %v3317_v40 = vsub.f32 %v13257_v50, %v3267_v7  ;;  %9805 = vmatmul.msk.f32.gmra.mxu1 %vm595_vm1, %v13120_v1  ;;  %v3712_v50 = vmul.f32 %v10612_v36, %v12574_v42  ;;  %v13459_v1 = vpop.f32.mrf.mxu1 }
 0x6bf   :  { %v13449_v58 = vpop.eup %10613  ;;  %v3369_v27 = vmul.f32 1.442695, %v3316_v6  ;;  %v3371_v59 = vmul.f32 1.442695, %v3317_v40  ;;  %v3713_v8 = vsub.f32 1.0, %v3712_v50 }
 0x6c0   :  { %v13451_v34 = vpop.eup %10615  ;;  %v3451_v41 = vsel %vm1214_vm2, %v13449_v58, 0.0 }
 0x6c1   :  { %10619 = vpow2.f32 %v3369_v27  ;;  %v3436_v57 = vsel %vm1214_vm2, %v13451_v34, 0.0  ;;  %v10618_v44 = vpop.eup %10617  ;;  %v3722_v27 = vand.u32 2147483648, %v12574_v42 }
 0x6c2   :  { %10621 = vpow2.f32 %v3371_v59  ;;  %3437 = vadd.xlane.f32.xlu2 %v3436_v57  ;;  %3452 = vadd.xlane.f32.xlu0 %v3451_v41  ;;  %v3726_v5 = vmul.f32 %v10618_v44, %v12544_v61  ;;  %v3720_v41 = vand.u32 2147483647, %v12574_v42  ;;  %vm3731_vm14 = vweird.f32 %v10618_v44 }
 0x6c3   :  { %vm3732_vm3 = vmor %vm3730_vm15, %vm3731_vm14 }
 0x6c4   :  { %v3285_v55 = vpop.xlane.xlu0 %3284  ;;  %v3270_v12 = vpop.xlane.xlu2 %3269  ;;  %v3727_v7 = vsub.f32 1.0, %v3726_v5  ;;  %vm3721_vm13 = vcmp.eq.f32.partialorder %v3720_v41, 8.507059e+37 }
 0x6c5   :  { %v3323_v20 = vsub.f32 %v13272_v14, %v3285_v55  ;;  %9806 = vmatmul.msk.f32.gmra.mxu1 %vm595_vm1, %v13136_v53  ;;  %v3714_v14 = vmul.f32 %v10612_v36, %v3713_v8  ;;  %v13473_v23 = vpop.f32.mrf.mxu1  ;;  %v3318_v57 = vsub.f32 %v13285_v29, %v3270_v12  ;;  %v3723_v55 = vor.u32 1.1754944e-38, %v3722_v27 }
 0x6c6   :  { %v3736_v12 = vand.u32 2147483648, %v12544_v61 }
 0x6c7   :  { %v13464_v10 = vpop.eup %10619  ;;  %v3383_v30 = vmul.f32 1.442695, %v3323_v20  ;;  %v3715_v6 = vadd.f32 %v10612_v36, %v3714_v14  ;;  %v3373_v20 = vmul.f32 1.442695, %v3318_v57  ;;  %v3734_v14 = vand.u32 2147483647, %v12544_v61 }
 0x6c8   :  { %v13466_v17 = vpop.eup %10621  ;;  %v3454_v16 = vsel %vm1214_vm2, %v13464_v10, 0.0  ;;  %v16814_v61 = vld [vmem:[#allocation111_spill] sm:$0xff]  ;;  %v16818_v57 = vld [vmem:[#allocation101_spill] sm:$0xff] }
 0x6c9   :  { %10623 = vpow2.f32 %v3383_v30  ;;  %v3457_v3 = vsel %vm1214_vm2, %v13466_v17, 0.0  ;;  %v3719_v50 = vsel %vm3718_vm12, %v10612_v36, %v3715_v6  ;;  %vm3735_vm4 = vcmp.eq.f32.partialorder %v3734_v14, 8.507059e+37  ;;  %v16828_v14 = vld [vmem:[#allocation10_spill] sm:$0xff] }
 0x6ca   :  { %3455 = vadd.xlane.f32.xlu2 %v3454_v16  ;;  %3458 = vadd.xlane.f32.xlu1 %v3457_v3  ;;  %v3724_v30 = vsel %vm3721_vm13, %v3723_v55, %v3719_v50  ;;  %v16822_v50 = vld [vmem:[#allocation4_spill] sm:$0xff] }
 0x6cb   :  { %v3951_v36 = vmul.f32 %v12434_v4, %v3724_v30 }
 0x6cc   :  { %v3288_v53 = vpop.xlane.xlu2 %3287 }
 0x6cd   :  { %v3324_v63 = vsub.f32 %v13301_v47, %v3288_v53  ;;  %9807 = vmatmul.msk.f32.gmra.mxu1 %vm595_vm1, %v13026_v39  ;;  %v3728_v39 = vmul.f32 %v10618_v44, %v3727_v7  ;;  %v13486_v16 = vpop.f32.mrf.mxu1 }
 0x6cf   :  { %v13478_v40 = vpop.eup %10623  ;;  %v3385_v59 = vmul.f32 1.442695, %v3324_v63  ;;  %v3729_v42 = vadd.f32 %v10618_v44, %v3728_v39  ;;  %v3737_v63 = vor.u32 1.1754944e-38, %v3736_v12  ;;  %v16820_v39 = vld [vmem:[#allocation2_spill] sm:$0xff] }
 0x6d0   :  { %v3475_v47 = vsel %vm1214_vm2, %v13478_v40, 0.0 }
 0x6d1   :  { %10625 = vpow2.f32 %v3385_v59  ;;  %3476 = vadd.xlane.f32.xlu0 %v3475_v47  ;;  %v3733_v53 = vsel %vm3732_vm3, %v10618_v44, %v3729_v42  ;;  %v16816_v44 = vld [vmem:[#allocation61_spill] sm:$0xff]  ;;  %v16819_v47 = vld [vmem:[#allocation71_spill] sm:$0xff] }
 0x6d2   :  { %10627 = vpow2.f32 %v3373_v20  ;;  %v3738_v7 = vsel %vm3735_vm4, %v3737_v63, %v3733_v53  ;;  %v16824_v20 = vld [vmem:[#allocation51_spill] sm:$0xff] }
 0x6d3   :  { %v3952_v27 = vmul.f32 %v16814_v61, %v3738_v7  ;;  %v16830_v7 = vld [vmem:[#allocation5_spill] sm:$0xff] }
 0x6d4   :  { %v10308_v8 = vpop.permute.xlu1 %10307 }
 0x6d5   :  { %v10309_v3 = vunpack.i.l.bf16 %v10308_v8  ;;  %9808 = vmatmul.msk.f32.gmra.mxu1 %vm595_vm1, %v13044_v35  ;;  %v10310_v5 = vunpack.i.h.bf16 %v10308_v8  ;;  %v13503_v4 = vpop.f32.mrf.mxu1  ;;  %v16825_v8 = vld [vmem:[#allocation12_spill] sm:$0xff] }
 0x6d6   :  { %16813 = vst [vmem:[#allocation98_spill] sm:$0xff] %v13503_v4  ;;  %v16836_v4 = vld [vmem:[#allocation14_spill] sm:$0xff] }
 0x6d7   :  { %v13490_v29 = vpop.eup %10625  ;;  %4273 = vmatpush.msrb.mxu0 %v10309_v3 }
 0x6d8   :  { %v3478_v35 = vsel %vm1214_vm2, %v13490_v29, 0.0  ;;  %v13501_v6 = vpop.eup %10627 }
 0x6d9   :  { %4274 = vmatpush.msrb.mxu0 %v10310_v5  ;;  %3479 = vadd.xlane.f32.xlu0 %v3478_v35  ;;  %v3460_v59 = vsel %vm1214_vm2, %v13501_v6, 0.0  ;;  %v16826_v5 = vld [vmem:[#allocation6_spill] sm:$0xff] }
 0x6da   :  { %9739 = vmatmul.msk.f32.vlgmr.msrb.gmra.mxu0 %vm1214_vm2, %v3951_v36  ;;  %v16827_v36 = vld [vmem:[#allocation59_spill] sm:$0xff] }
 0x6dd   :  { %9809 = vmatmul.msk.f32.gmra.mxu1 %vm595_vm1, %v13146_v46  ;;  %v13513_v46 = vpop.f32.mrf.mxu1 }
 0x6de   :  { %16815 = vst [vmem:[#allocation94_spill] sm:$0xff] %v13513_v46 }
 0x6e1   :  { %3461 = vadd.xlane.f32.xlu0 %v3460_v59 }
 0x6e2   :  { %9740 = vmatmul.msk.f32.gmra.mxu0 %vm1214_vm2, %v3952_v27  ;;  %v16831_v27 = vld [vmem:[#allocation64_spill] sm:$0xff] }
 0x6e3   :  { %7176 = vrot.lane.b32.xlu1 %v16624_v9, %s10933_s30 }
 0x6e5   :  { %9810 = vmatmul.msk.f32.gmra.mxu1 %vm595_vm1, %v13154_v37  ;;  %v13519_v41 = vpop.f32.mrf.mxu1  ;;  %v13527_v37 = vpop.permute.xlu0 %10312 }
 0x6e6   :  { %16817 = vst [vmem:[#allocation92_spill] sm:$0xff] %v13519_v41 }
 0x6e7   :  { %16821 = vst [vmem:[#allocation112_spill] sm:$0xff] %v13527_v37 }
 0x6eb   :  { %7213 = vrot.lane.b32.xlu1 %v11175_v62, %s10933_s30 }
 0x6ed   :  { %9811 = vmatmul.msk.f32.gmra.mxu1 %vm595_vm1, %v16816_v44  ;;  %v13531_v55 = vpop.f32.mrf.mxu1 }
 0x6ee   :  { %16823 = vst [vmem:[#allocation95_spill] sm:$0xff] %v13531_v55 }
 0x6f3   :  { %10327 = vrot.lane.b32.xlu1 %v16818_v57, %s10932_s12 }
 0x6f5   :  { %9812 = vmatmul.msk.f32.gmra.mxu1 %vm595_vm1, %v16819_v47  ;;  %7170 = vrot.lane.b32.xlu0 %v16820_v39, %s10934_s8  ;;  %v13546_v35 = vpop.f32.mrf.mxu1 }
 0x6f6   :  { %16829 = vst [vmem:[#allocation111_spill] sm:$0xff] %v13546_v35 }
 0x6fb   :  { %7211 = vrot.lane.b32.xlu1 %v16822_v50, %s10934_s8 }
 0x6fd   :  { %9813 = vmatmul.msk.f32.gmra.mxu1 %vm595_vm1, %v16824_v20  ;;  %7332 = vrot.lane.b32.xlu0 %v16825_v8, %s10933_s30  ;;  %v13560_v47 = vpop.f32.mrf.mxu1 }
 0x6fe   :  { %16832 = vst [vmem:[#allocation61_spill] sm:$0xff] %v13560_v47 }
 0x6ff   :  { %v3291_v30 = vpop.xlane.xlu1 %3290 }
 0x700   :  { %v3325_v3 = vsub.f32 %v13370_v31, %v3291_v30  ;;  %v16833_v30 = vld [vmem:[#allocation18_spill] sm:$0xff] }
 0x702   :  { %v3387_v42 = vmul.f32 1.442695, %v3325_v3  ;;  %v13538_v12 = vpop.xlane.xlu0 %3293  ;;  %v13564_v3 = vpop.xlane.xlu2 %3464 }
 0x703   :  { %7254 = vrot.lane.b32.xlu1 %v16826_v5, %s10933_s30 }
 0x704   :  { %10629 = vpow2.f32 %v3387_v42  ;;  %v16834_v42 = vld [vmem:[#allocation63_spill] sm:$0xff] }
 0x705   :  { %9814 = vmatmul.msk.f32.gmra.mxu1 %vm595_vm1, %v16827_v36  ;;  %7326 = vrot.lane.b32.xlu0 %v16828_v14, %s10934_s8  ;;  %v13570_v55 = vpop.f32.mrf.mxu1 }
 0x706   :  { %16835 = vst [vmem:[#allocation71_spill] sm:$0xff] %v13570_v55 }
 0x707   :  { %v13548_v53 = vpop.xlane.xlu1 %3467 }
 0x70a   :  { %v13550_v63 = vpop.eup %10629  ;;  %v3408_v31 = vpop.xlane.xlu0 %3407 }
 0x70b   :  { %7248 = vrot.lane.b32.xlu1 %v16830_v7, %s10934_s8  ;;  %10631 = vrcp.f32 %v3408_v31  ;;  %v3481_v61 = vsel %vm1214_vm2, %v13550_v63, 0.0  ;;  %vm3562_vm10 = vweird.f32 %v3408_v31 }
 0x70c   :  { %3482 = vadd.xlane.f32.xlu2 %v3481_v61 }
 0x70d   :  { %9815 = vmatmul.msk.f32.gmra.mxu1 %vm595_vm1, %v16831_v27  ;;  %7328 = vrot.lane.b32.xlu0 %v16825_v8, %s10934_s8 }
 0x70f   :  { %v3405_v59 = vpop.xlane.xlu1 %3404 }
 0x710   :  { %10633 = vrcp.f32 %v3405_v59  ;;  %v3554_v35 = vand.u32 2147483648, %v3405_v59  ;;  %v3552_v46 = vand.u32 2147483647, %v3405_v59  ;;  %vm3548_vm6 = vweird.f32 %v3405_v59 }
 0x711   :  { %v10632_v44 = vpop.eup %10631 }
 0x712   :  { %v3558_v20 = vmul.f32 %v10632_v44, %v3408_v31  ;;  %vm3563_vm8 = vweird.f32 %v10632_v44  ;;  %vm3553_vm9 = vcmp.eq.f32.partialorder %v3552_v46, 8.507059e+37 }
 0x713   :  { %7447 = vrot.lane.b32.xlu1 %v16833_v30, %s10933_s30  ;;  %vm13580_vm11 = vmor %vm3562_vm10, %vm3563_vm8 }
 0x714   :  { %v3559_v61 = vsub.f32 1.0, %v3558_v20 }
 0x715   :  { %9816 = vmatmul.msk.f32.gmra.mxu1 %vm595_vm1, %v16834_v42  ;;  %7250 = vrot.lane.b32.xlu0 %v16826_v5, %s10934_s8  ;;  %v16837_v42 = vld [vmem:[#allocation77_spill] sm:$0xff]  ;;  %v3555_v5 = vor.u32 1.1754944e-38, %v3554_v35 }
 0x716   :  { %v10634_v36 = vpop.eup %10633  ;;  %v3560_v47 = vmul.f32 %v10632_v44, %v3559_v61 }
 0x717   :  { %v3544_v8 = vmul.f32 %v10634_v36, %v3405_v59  ;;  %vm3549_vm5 = vweird.f32 %v10634_v36  ;;  %v16838_v59 = vld [vmem:[#allocation88_spill] sm:$0xff] }
 0x718   :  { %vm3550_vm7 = vmor %vm3548_vm6, %vm3549_vm5  ;;  %v3561_v61 = vadd.f32 %v10632_v44, %v3560_v47  ;;  %v10189_v33 = vunpack.i.l.bf16 %v16838_v59  ;;  %v10190_v46 = vunpack.i.h.bf16 %v16838_v59 }
 0x719   :  { %v3545_v27 = vsub.f32 1.0, %v3544_v8  ;;  %v3568_v8 = vand.u32 2147483648, %v3408_v31 }
 0x71b   :  { %v3546_v41 = vmul.f32 %v10634_v36, %v3545_v27  ;;  %7371 = vrot.lane.b32.xlu1 %v16836_v4, %s10933_s30  ;;  %v3569_v47 = vor.u32 1.1754944e-38, %v3568_v8 }
 0x71c   :  { %v3411_v57 = vpop.xlane.xlu2 %3410 }
 0x71d   :  { %v3547_v56 = vadd.f32 %v10634_v36, %v3546_v41  ;;  %10635 = vrcp.f32 %v3411_v57  ;;  %9817 = vmatmul.msk.f32.gmra.mxu1 %vm595_vm1, %v16837_v42  ;;  %7443 = vrot.lane.b32.xlu0 %v16833_v30, %s10934_s8  ;;  %v3566_v41 = vand.u32 2147483647, %v3408_v31  ;;  %v16841_v42 = vld [vmem:[#allocation13_spill] sm:$0xff]  ;;  %v3580_v8 = vand.u32 2147483647, %v3411_v57 }
 0x71e   :  { %vm3576_vm14 = vweird.f32 %v3411_v57 }
 0x71f   :  { %v3551_v20 = vsel %vm3550_vm7, %v10634_v36, %v3547_v56  ;;  %v3565_v56 = vsel %vm13580_vm11, %v10632_v44, %v3561_v61  ;;  %v16842_v36 = vld [vmem:[#allocation102_spill] sm:$0xff]  ;;  %vm3567_vm12 = vcmp.eq.f32.partialorder %v3566_v41, 8.507059e+37  ;;  %v3582_v44 = vand.u32 2147483648, %v3411_v57  ;;  %v16846_v41 = vld [vmem:[#allocation20_spill] sm:$0xff] }
 0x720   :  { %v3556_v27 = vsel %vm3553_vm9, %v3555_v5, %v3551_v20  ;;  %v13592_v5 = vpop.f32.mrf.mxu1  ;;  %vm3581_vm3 = vcmp.eq.f32.partialorder %v3580_v8, 8.507059e+37 }
 0x721   :  { %v3939_v55 = vmul.f32 %v13397_v54, %v3556_v27  ;;  %16843 = vst [vmem:[#allocation2_spill] sm:$0xff] %v13592_v5  ;;  %v16844_v27 = vld [vmem:[#allocation121_spill] sm:$0xff] }
 0x723   :  { %v10636_v35 = vpop.eup %10635  ;;  %7369 = vrot.lane.b32.xlu1 %v16841_v42, %s10933_s30  ;;  %9727 = vmatmul.msk.f32.vlgmr.msrb.gmra.mxu2 %vm1214_vm2, %v3939_v55  ;;  %v16845_v55 = vld [vmem:[#allocation7_spill] sm:$0xff] }
 0x724   :  { %v3572_v54 = vmul.f32 %v10636_v35, %v3411_v57  ;;  %4343 = vmatpush.msrb.mxu2 %v10189_v33  ;;  %v3429_v31 = vpop.xlane.xlu2 %3428  ;;  %10317 = vrot.lane.b32.xlu2 %v16842_v36, %s10932_s12  ;;  %v3570_v33 = vsel %vm3567_vm12, %v3569_v47, %v3565_v56  ;;  %vm3577_vm13 = vweird.f32 %v10636_v35 }
 0x725   :  { %10637 = vrcp.f32 %v3429_v31  ;;  %v13594_v20 = vpop.xlane.xlu1 %3413  ;;  %9818 = vmatmul.msk.f32.gmra.mxu1 %vm595_vm1, %v16844_v27  ;;  %7287 = vrot.lane.b32.xlu0 %v16845_v55, %s10934_s8  ;;  %v3940_v59 = vmul.f32 %v13385_v32, %v3570_v33  ;;  %vm3578_vm15 = vmor %vm3576_vm14, %vm3577_vm13  ;;  %v3583_v27 = vor.u32 1.1754944e-38, %v3582_v44  ;;  %vm3660_vm5 = vweird.f32 %v3429_v31 }
 0x726   :  { %v3573_v37 = vsub.f32 1.0, %v3572_v54  ;;  %10639 = vrcp.f32 %v13594_v20  ;;  %4344 = vmatpush.msrb.mxu2 %v10190_v46  ;;  %vm3590_vm9 = vweird.f32 %v13594_v20 }
 0x728   :  { %v3574_v61 = vmul.f32 %v10636_v35, %v3573_v37 }
 0x72a   :  { %v3575_v5 = vadd.f32 %v10636_v35, %v3574_v61  ;;  %v16847_v61 = vld [vmem:[#allocation89_spill] sm:$0xff] }
 0x72b   :  { %v10638_v36 = vpop.eup %10637  ;;  %7445 = vrot.lane.b32.xlu1 %v16846_v41, %s10934_s8  ;;  %9728 = vmatmul.msk.f32.gmra.mxu2 %vm1214_vm2, %v3940_v59  ;;  %v10204_v59 = vunpack.i.l.bf16 %v16847_v61 }
 0x72c   :  { %v10640_v46 = vpop.eup %10639  ;;  %v3579_v54 = vsel %vm3578_vm15, %v10636_v35, %v3575_v5  ;;  %v3656_v56 = vmul.f32 %v10638_v36, %v3429_v31  ;;  %7174 = vrot.lane.b32.xlu2 %v16820_v39, %s10933_s30  ;;  %v3666_v35 = vand.u32 2147483648, %v3429_v31  ;;  %vm3661_vm4 = vweird.f32 %v10638_v36 }
 0x72d   :  { %v3584_v47 = vsel %vm3581_vm3, %v3583_v27, %v3579_v54  ;;  %v3586_v32 = vmul.f32 %v10640_v46, %v13594_v20  ;;  %v13608_v37 = vpop.xlane.xlu1 %3431  ;;  %v13610_v57 = vpop.xlane.xlu0 %3434  ;;  %v3664_v39 = vand.u32 2147483647, %v3429_v31  ;;  %v10205_v27 = vunpack.i.h.bf16 %v16847_v61  ;;  %vm3662_vm7 = vmor %vm3660_vm5, %vm3661_vm4 }
 0x72e   :  { %v3941_v33 = vmul.f32 %v13410_v15, %v3584_v47  ;;  %v3657_v44 = vsub.f32 1.0, %v3656_v56  ;;  %10641 = vrcp.f32 %v13608_v37  ;;  %vm3591_vm6 = vweird.f32 %v10640_v46  ;;  %v16848_v47 = vld [vmem:[#allocation9_spill] sm:$0xff] }
 0x72f   :  { %v3587_v5 = vsub.f32 1.0, %v3586_v32  ;;  %10643 = vrcp.f32 %v13610_v57  ;;  %v3667_v15 = vor.u32 1.1754944e-38, %v3666_v35  ;;  %v3596_v56 = vand.u32 2147483648, %v13594_v20  ;;  %vm13628_vm10 = vmor %vm3590_vm9, %vm3591_vm6 }
 0x730   :  { %v3658_v8 = vmul.f32 %v10638_v36, %v3657_v44  ;;  %9729 = vmatmul.msk.f32.vlgmr.msra.gmra.mxu3 %vm1214_vm2, %v3941_v33  ;;  %vm3665_vm8 = vcmp.eq.f32.partialorder %v3664_v39, 8.507059e+37  ;;  %v3594_v31 = vand.u32 2147483647, %v13594_v20  ;;  %v16851_v20 = vld [vmem:[#allocation103_spill] sm:$0xff]  ;;  %vm3688_vm14 = vweird.f32 %v13610_v57 }
 0x731   :  { %v3588_v54 = vmul.f32 %v10640_v46, %v3587_v5  ;;  %4378 = vmatpush.msra.mxu3 %v10204_v59  ;;  %v3597_v39 = vor.u32 1.1754944e-38, %v3596_v56  ;;  %v3694_v59 = vand.u32 2147483648, %v13610_v57  ;;  %v3692_v56 = vand.u32 2147483647, %v13610_v57 }
 0x732   :  { %v3659_v30 = vadd.f32 %v10638_v36, %v3658_v8  ;;  %v10199_v8 = vunpack.i.l.bf16 %v16851_v20  ;;  %vm3595_vm11 = vcmp.eq.f32.partialorder %v3594_v31, 8.507059e+37  ;;  %v3680_v31 = vand.u32 2147483648, %v13608_v37 }
 0x733   :  { %4379 = vmatpush.msra.mxu3 %v10205_v27  ;;  %7289 = vrot.lane.b32.xlu1 %v16848_v47, %s10934_s8  ;;  %v3589_v32 = vadd.f32 %v10640_v46, %v3588_v54  ;;  %v10200_v54 = vunpack.i.h.bf16 %v16851_v20  ;;  %vm3674_vm15 = vweird.f32 %v13608_v37  ;;  %vm3693_vm5 = vcmp.eq.f32.partialorder %v3692_v56, 8.507059e+37 }
 0x734   :  { %v13621_v44 = vpop.eup %10641  ;;  %v3663_v28 = vsel %vm3662_vm7, %v10638_v36, %v3659_v30  ;;  %7215 = vrot.lane.b32.xlu2 %v16822_v50, %s10933_s30 }
 0x735   :  { %v10644_v33 = vpop.eup %10643  ;;  %v3668_v61 = vsel %vm3665_vm8, %v3667_v15, %v3663_v28  ;;  %v3670_v35 = vmul.f32 %v13621_v44, %v13608_v37  ;;  %v13634_v5 = vpop.xlane.xlu2 %3437  ;;  %v3593_v28 = vsel %vm13628_vm10, %v10640_v46, %v3589_v32  ;;  %vm3675_vm13 = vweird.f32 %v13621_v44 }
 0x736   :  { %v13636_v30 = vpop.xlane.xlu0 %3452  ;;  %v3947_v36 = vmul.f32 %v13420_v19, %v3668_v61  ;;  %v3684_v50 = vmul.f32 %v10644_v33, %v13610_v57  ;;  %10645 = vrcp.f32 %v13634_v5  ;;  %v3326_v19 = vsub.f32 %v13375_v25, %v13538_v12  ;;  %vm13676_vm4 = vmor %vm3674_vm15, %vm3675_vm13 }
 0x737   :  { %v3671_v27 = vsub.f32 1.0, %v3670_v35  ;;  %10647 = vrcp.f32 %v13636_v30  ;;  %v3598_v46 = vsel %vm3595_vm11, %v3597_v39, %v3593_v28  ;;  %vm3689_vm12 = vweird.f32 %v10644_v33 }
 0x738   :  { %v3685_v15 = vsub.f32 1.0, %v3684_v50  ;;  %9735 = vmatmul.msk.f32.vlgmr.msra.gmra.mxu2 %vm1214_vm2, %v3947_v36  ;;  %v3942_v35 = vmul.f32 %v13422_v45, %v3598_v46  ;;  %v16852_v36 = vld [vmem:[#allocation25_spill] sm:$0xff]  ;;  %v16853_v50 = vld [vmem:[#allocation114_spill] sm:$0xff]  ;;  %v16854_v45 = vld [vmem:[#allocation119_spill] sm:$0xff]  ;;  %v3708_v56 = vand.u32 2147483648, %v13634_v5  ;;  %vm3702_vm9 = vweird.f32 %v13634_v5 }
 0x739   :  { %v3672_v61 = vmul.f32 %v13621_v44, %v3671_v27  ;;  %4483 = vmatpush.msra.mxu2 %v10199_v8  ;;  %v10209_v28 = vunpack.i.l.bf16 %v16853_v50  ;;  %v3678_v8 = vand.u32 2147483647, %v13608_v37  ;;  %v3389_v27 = vmul.f32 1.442695, %v3326_v19  ;;  %vm3690_vm3 = vmor %vm3688_vm14, %vm3689_vm12 }
 0x73a   :  { %v3686_v32 = vmul.f32 %v10644_v33, %v3685_v15  ;;  %9730 = vmatmul.msk.f32.gmra.mxu3 %vm1214_vm2, %v3942_v35  ;;  %v3681_v19 = vor.u32 1.1754944e-38, %v3680_v31  ;;  %v3778_v31 = vand.u32 2147483648, %v13636_v30  ;;  %vm3772_vm11 = vweird.f32 %v13636_v30 }
 0x73b   :  { %7488 = vrot.lane.b32.xlu1 %v16852_v36, %s10933_s30  ;;  %4484 = vmatpush.msra.mxu2 %v10200_v54  ;;  %v3673_v25 = vadd.f32 %v13621_v44, %v3672_v61  ;;  %v3695_v54 = vor.u32 1.1754944e-38, %v3694_v59  ;;  %vm3679_vm6 = vcmp.eq.f32.partialorder %v3678_v8, 8.507059e+37  ;;  %v3706_v8 = vand.u32 2147483647, %v13634_v5 }
 0x73c   :  { %v13658_v12 = vpop.eup %10645  ;;  %v3687_v20 = vadd.f32 %v10644_v33, %v3686_v32  ;;  %10322 = vrot.lane.b32.xlu2 %v16854_v45, %s10929_s27 }
 0x73d   :  { %v10648_v39 = vpop.eup %10647  ;;  %v3698_v15 = vmul.f32 %v13658_v12, %v13634_v5  ;;  %v13670_v61 = vpop.xlane.xlu2 %3455  ;;  %v3677_v45 = vsel %vm13676_vm4, %v13621_v44, %v3673_v25  ;;  %vm3703_vm7 = vweird.f32 %v13658_v12  ;;  %v16857_v44 = vld [vmem:[#allocation22_spill] sm:$0xff]  ;;  %v3779_v5 = vor.u32 1.1754944e-38, %v3778_v31 }
 0x73e   :  { %v13672_v57 = vpop.xlane.xlu1 %3458  ;;  %v3691_v32 = vsel %vm3690_vm3, %v10644_v33, %v3687_v20  ;;  %v3768_v37 = vmul.f32 %v10648_v39, %v13636_v30  ;;  %10649 = vrcp.f32 %v13670_v61  ;;  %vm3773_vm8 = vweird.f32 %v10648_v39  ;;  %vm13700_vm10 = vmor %vm3702_vm9, %vm3703_vm7 }
 0x73f   :  { %v3696_v59 = vsel %vm3693_vm5, %v3695_v54, %v3691_v32  ;;  %v3699_v35 = vsub.f32 1.0, %v3698_v15  ;;  %10651 = vrcp.f32 %v13672_v57  ;;  %v3776_v54 = vand.u32 2147483647, %v13636_v30  ;;  %vm3774_vm12 = vmor %vm3772_vm11, %vm3773_vm8 }
 0x740   :  { %v3949_v60 = vmul.f32 %v13436_v26, %v3696_v59  ;;  %v3769_v51 = vsub.f32 1.0, %v3768_v37  ;;  %v3682_v15 = vsel %vm3679_vm6, %v3681_v19, %v3677_v45  ;;  %10653 = vpow2.f32 %v3389_v27 }
 0x741   :  { %v3700_v33 = vmul.f32 %v13658_v12, %v3699_v35  ;;  %v3948_v26 = vmul.f32 %v13434_v52, %v3682_v15  ;;  %v10210_v45 = vunpack.i.h.bf16 %v16853_v50  ;;  %vm3777_vm13 = vcmp.eq.f32.partialorder %v3776_v54, 8.507059e+37 }
 0x742   :  { %v3770_v20 = vmul.f32 %v10648_v39, %v3769_v51  ;;  %9737 = vmatmul.msk.f32.vlgmr.msrb.gmra.mxu3 %vm1214_vm2, %v3949_v60  ;;  %v3709_v60 = vor.u32 1.1754944e-38, %v3708_v56  ;;  %vm3707_vm14 = vcmp.eq.f32.partialorder %v3706_v8, 8.507059e+37  ;;  %vm3786_vm3 = vweird.f32 %v13670_v61 }
 0x743   :  { %7486 = vrot.lane.b32.xlu1 %v16857_v44, %s10933_s30  ;;  %v3701_v25 = vadd.f32 %v13658_v12, %v3700_v33  ;;  %9736 = vmatmul.msk.f32.gmra.mxu2 %vm1214_vm2, %v3948_v26  ;;  %v3790_v54 = vand.u32 2147483647, %v13670_v61  ;;  %vm3800_vm6 = vweird.f32 %v13672_v57 }
 0x744   :  { %v13698_v46 = vpop.eup %10649  ;;  %v3771_v32 = vadd.f32 %v10648_v39, %v3770_v20  ;;  %7209 = vrot.lane.b32.xlu2 %v11175_v62, %s10934_s8  ;;  %v13708_v52 = vpop.xlane.xlu0 %3476  ;;  %4518 = vmatpush.msrb.mxu3 %v10209_v28  ;;  %v3792_v28 = vand.u32 2147483648, %v13670_v61 }
 0x745   :  { %v3782_v27 = vmul.f32 %v13698_v46, %v13670_v61  ;;  %10655 = vrcp.f32 %v13708_v52  ;;  %v10652_v30 = vpop.eup %10651  ;;  %v3705_v62 = vsel %vm13700_vm10, %v13658_v12, %v3701_v25  ;;  %vm3787_vm15 = vweird.f32 %v13698_v46 }
 0x746   :  { %v3775_v37 = vsel %vm3774_vm12, %v10648_v39, %v3771_v32  ;;  %v3796_v59 = vmul.f32 %v10652_v30, %v13672_v57  ;;  %4519 = vmatpush.msrb.mxu3 %v10210_v45  ;;  %v3710_v35 = vsel %vm3707_vm14, %v3709_v60, %v3705_v62  ;;  %v13725_v20 = vpop.eup %10653  ;;  %v3806_v12 = vand.u32 2147483648, %v13672_v57  ;;  %vm13736_vm5 = vmor %vm3786_vm3, %vm3787_vm15 }
 0x747   :  { %v3780_v50 = vsel %vm3777_vm13, %v3779_v5, %v3775_v37  ;;  %v3783_v19 = vsub.f32 1.0, %v3782_v27  ;;  %v3950_v31 = vmul.f32 %v13451_v34, %v3710_v35  ;;  %vm3801_vm4 = vweird.f32 %v10652_v30  ;;  %v16863_v37 = vld [vmem:[#allocation104_spill] sm:$0xff] }
 0x748   :  { %v3955_v33 = vmul.f32 %v13449_v58, %v3780_v50  ;;  %v3797_v56 = vsub.f32 1.0, %v3796_v59  ;;  %v3804_v25 = vand.u32 2147483647, %v13672_v57  ;;  %v16860_v58 = vld [vmem:[#allocation35_spill] sm:$0xff]  ;;  %v3793_v61 = vor.u32 1.1754944e-38, %v3792_v28  ;;  %vm3802_vm7 = vmor %vm3800_vm6, %vm3801_vm4 }
 0x749   :  { %v3784_v39 = vmul.f32 %v13698_v46, %v3783_v19  ;;  %v3807_v27 = vor.u32 1.1754944e-38, %v3806_v12  ;;  %vm3791_vm8 = vcmp.eq.f32.partialorder %v3790_v54, 8.507059e+37  ;;  %v3484_v57 = vsel %vm1214_vm2, %v13725_v20, 0.0 }
 0x74a   :  { %v3798_v26 = vmul.f32 %v10652_v30, %v3797_v56  ;;  %9738 = vmatmul.msk.f32.gmra.mxu3 %vm1214_vm2, %v3950_v31  ;;  %vm3805_vm9 = vcmp.eq.f32.partialorder %v3804_v25, 8.507059e+37  ;;  %v3890_v59 = vand.u32 2147483648, %v13708_v52  ;;  %v3888_v28 = vand.u32 2147483647, %v13708_v52 }
 0x74b   :  { %v10656_v15 = vpop.eup %10655  ;;  %7562 = vrot.lane.b32.xlu1 %v16860_v58, %s10934_s8  ;;  %v3785_v8 = vadd.f32 %v13698_v46, %v3784_v39  ;;  %9743 = vmatmul.msk.f32.vlgmr.msrb.gmra.mxu2 %vm1214_vm2, %v3955_v33  ;;  %vm3884_vm11 = vweird.f32 %v13708_v52  ;;  %v16865_v39 = vld [vmem:[#allocation31_spill] sm:$0xff] }
 0x74c   :  { %v3880_v51 = vmul.f32 %v10656_v15, %v13708_v52  ;;  %7172 = vrot.lane.b32.xlu2 %v16624_v9, %s10934_s8  ;;  %v3799_v32 = vadd.f32 %v10652_v30, %v3798_v26  ;;  %v3480_v45 = vpop.xlane.xlu0 %3479  ;;  %9819 = vmatpush.xpose.msk.msrb.mxu2 %vm595_vm1, %v16863_v37  ;;  %vm3885_vm10 = vweird.f32 %v10656_v15  ;;  %v3891_v12 = vor.u32 1.1754944e-38, %v3890_v59  ;;  %v16869_v37 = vld [vmem:[#allocation67_spill] sm:$0xff] }
 0x74d   :  { %v3789_v5 = vsel %vm13736_vm5, %v13698_v46, %v3785_v8  ;;  %10657 = vrcp.f32 %v3480_v45  ;;  %vm3886_vm12 = vmor %vm3884_vm11, %vm3885_vm10  ;;  %vm3889_vm13 = vcmp.eq.f32.partialorder %v3888_v28, 8.507059e+37  ;;  %v3904_v25 = vand.u32 2147483648, %v3480_v45  ;;  %v16870_v59 = vld [vmem:[#allocation27_spill] sm:$0xff] }
 0x74e   :  { %v3881_v60 = vsub.f32 1.0, %v3880_v51  ;;  %v3803_v9 = vsel %vm3802_vm7, %v10652_v30, %v3799_v32  ;;  %v3794_v62 = vsel %vm3791_vm8, %v3793_v61, %v3789_v5  ;;  %v16864_v30 = vld [vmem:[#allocation108_spill] sm:$0xff]  ;;  %v3902_v51 = vand.u32 2147483647, %v3480_v45 }
 0x74f   :  { %v3808_v50 = vsel %vm3805_vm9, %v3807_v27, %v3803_v9  ;;  %3485 = vadd.xlane.f32.xlu0 %v3484_v57  ;;  %v3956_v35 = vmul.f32 %v13464_v10, %v3794_v62  ;;  %vm3898_vm15 = vweird.f32 %v3480_v45  ;;  %v16868_v61 = vld [vmem:[#allocation36_spill] sm:$0xff]  ;;  %v3905_v27 = vor.u32 1.1754944e-38, %v3904_v25 }
 0x750   :  { %v3882_v19 = vmul.f32 %v10656_v15, %v3881_v60  ;;  %v3957_v46 = vmul.f32 %v13466_v17, %v3808_v50  ;;  %9820 = vmatpush.xpose.msk.msrb.mxu2 %vm595_vm1, %v16864_v30  ;;  %v16866_v17 = vld [vmem:[#allocation3_spill] sm:$0xff]  ;;  %vm3903_vm4 = vcmp.eq.f32.partialorder %v3902_v51, 8.507059e+37  ;;  %v16872_v30 = vld [vmem:[#allocation56_spill] sm:$0xff] }
 0x752   :  { %v3883_v33 = vadd.f32 %v10656_v15, %v3882_v19  ;;  %9745 = vmatmul.msk.f32.vlgmr.msra.gmra.mxu3 %vm1214_vm2, %v3957_v46 }
 0x753   :  { %7527 = vrot.lane.b32.xlu1 %v16865_v39, %s10933_s30  ;;  %v10658_v56 = vpop.eup %10657  ;;  %9744 = vmatmul.msk.f32.gmra.mxu2 %vm1214_vm2, %v3956_v35 }
 0x754   :  { %v3887_v31 = vsel %vm3886_vm12, %v10656_v15, %v3883_v33  ;;  %7330 = vrot.lane.b32.xlu2 %v16828_v14, %s10933_s30  ;;  %v3894_v10 = vmul.f32 %v10658_v56, %v3480_v45  ;;  %9823 = vmatpush.xpose.msk.msra.mxu3 %vm595_vm1, %v16866_v17  ;;  %v3462_v54 = vpop.xlane.xlu0 %3461  ;;  %vm3899_vm14 = vweird.f32 %v10658_v56  ;;  %v16867_v14 = vld [vmem:[#allocation84_spill] sm:$0xff] }
 0x755   :  { %v7177_v52 = vpop.permute.xlu1 %7176  ;;  %v3892_v26 = vsel %vm3889_vm13, %v3891_v12, %v3887_v31  ;;  %10659 = vrcp.f32 %v3462_v54  ;;  %vm3900_vm3 = vmor %vm3898_vm15, %vm3899_vm14  ;;  %v3820_v57 = vand.u32 2147483648, %v3462_v54  ;;  %v3818_v19 = vand.u32 2147483647, %v3462_v54  ;;  %v16871_v33 = vld [vmem:[#allocation40_spill] sm:$0xff]  ;;  %v16876_v31 = vld [vmem:[#allocation33_spill] sm:$0xff] }
 0x756   :  { %9947 = vmatpush.xpose.msk.msra.mxu1 %vm595_vm1, %v7177_v52  ;;  %v3895_v15 = vsub.f32 1.0, %v3894_v10  ;;  %v3963_v8 = vmul.f32 %v13478_v40, %v3892_v26  ;;  %vm3814_vm6 = vweird.f32 %v3462_v54  ;;  %v16879_v10 = vld [vmem:[#allocation52_spill] sm:$0xff]  ;;  %v16881_v52 = vld [vmem:[#allocation91_spill] sm:$0xff]  ;;  %vm3828_vm14 = vweird.f32 %v13564_v3 }
 0x757   :  { %v3821_v46 = vor.u32 1.1754944e-38, %v3820_v57  ;;  %vm3819_vm8 = vcmp.eq.f32.partialorder %v3818_v19, 8.507059e+37  ;;  %v16880_v17 = vld [vmem:[#allocation16_spill] sm:$0xff] }
 0x758   :  { %v3896_v34 = vmul.f32 %v10658_v56, %v3895_v15  ;;  %9824 = vmatpush.xpose.msk.msra.mxu3 %vm595_vm1, %v16867_v14  ;;  %v16886_v14 = vld [vmem:[#allocation15_spill] sm:$0xff] }
 0x75a   :  { %v3897_v32 = vadd.f32 %v10658_v56, %v3896_v34  ;;  %v16885_v34 = vld [vmem:[#allocation50_spill] sm:$0xff] }
 0x75b   :  { %7603 = vrot.lane.b32.xlu1 %v16868_v61, %s10933_s30  ;;  %v10660_v5 = vpop.eup %10659  ;;  %9751 = vmatmul.msk.f32.vlgmr.msra.gmra.mxu2 %vm1214_vm2, %v3963_v8  ;;  %v16884_v8 = vld [vmem:[#allocation41_spill] sm:$0xff] }
 0x75c   :  { %7252 = vrot.lane.b32.xlu2 %v16830_v7, %s10933_s30  ;;  %v3810_v60 = vmul.f32 %v10660_v5, %v3462_v54  ;;  %v3901_v40 = vsel %vm3900_vm3, %v10658_v56, %v3897_v32  ;;  %9827 = vmatpush.xpose.msk.msra.mxu2 %vm595_vm1, %v16869_v37  ;;  %vm3815_vm5 = vweird.f32 %v10660_v5  ;;  %v16874_v56 = vld [vmem:[#allocation65_spill] sm:$0xff]  ;;  %v16882_v54 = vld [vmem:[#allocation11_spill] sm:$0xff] }
 0x75d   :  { %v3906_v9 = vsel %vm3903_vm4, %v3905_v27, %v3901_v40  ;;  %vm3816_vm7 = vmor %vm3814_vm6, %vm3815_vm5  ;;  %v13811_v12 = vpop.permute.xlu1 %7213  ;;  %vm3842_vm5 = vweird.f32 %v13548_v53 }
 0x75e   :  { %v3811_v45 = vsub.f32 1.0, %v3810_v60  ;;  %v3964_v50 = vmul.f32 %v13490_v29, %v3906_v9  ;;  %16878 = vst [vmem:[#allocation4_spill] sm:$0xff] %v13811_v12 }
 0x760   :  { %v3812_v62 = vmul.f32 %v10660_v5, %v3811_v45  ;;  %9828 = vmatpush.xpose.msk.msra.mxu2 %vm595_vm1, %v16870_v59  ;;  %v16892_v59 = vld [vmem:[#allocation73_spill] sm:$0xff] }
 0x762   :  { %v3813_v7 = vadd.f32 %v10660_v5, %v3812_v62  ;;  %v16890_v62 = vld [vmem:[#allocation53_spill] sm:$0xff] }
 0x763   :  { %7523 = vrot.lane.b32.xlu1 %v16865_v39, %s10934_s8  ;;  %7566 = vrot.lane.b32.xlu0 %v16860_v58, %s10933_s30  ;;  %v16873_v39 = vld [vmem:[#allocation66_spill] sm:$0xff] }
 0x764   :  { %7449 = vrot.lane.b32.xlu2 %v16846_v41, %s10933_s30  ;;  %9752 = vmatmul.msk.f32.gmra.mxu2 %vm1214_vm2, %v3964_v50  ;;  %v3817_v29 = vsel %vm3816_vm7, %v10660_v5, %v3813_v7  ;;  %v16891_v50 = vld [vmem:[#allocation38_spill] sm:$0xff] }
 0x765   :  { %v3822_v28 = vsel %vm3819_vm8, %v3821_v46, %v3817_v29  ;;  %v13823_v25 = vpop.permute.xlu1 %10327  ;;  %v16893_v29 = vld [vmem:[#allocation19_spill] sm:$0xff] }
 0x766   :  { %v3958_v35 = vmul.f32 %v13501_v6, %v3822_v28  ;;  %v16875_v6 = vld [vmem:[#allocation45_spill] sm:$0xff]  ;;  %16883 = vst [vmem:[#allocation51_spill] sm:$0xff] %v13823_v25 }
 0x767   :  { %v7171_v26 = vpop.permute.xlu0 %7170 }
 0x768   :  { %9746 = vmatmul.msk.f32.gmra.mxu3 %vm1214_vm2, %v3958_v35 }
 0x76b   :  { %7642 = vrot.lane.b32.xlu1 %v16871_v33, %s10933_s30  ;;  %7367 = vrot.lane.b32.xlu0 %v16836_v4, %s10934_s8  ;;  %v16877_v4 = vld [vmem:[#allocation57_spill] sm:$0xff] }
 0x76c   :  { %7293 = vrot.lane.b32.xlu2 %v16848_v47, %s10933_s30  ;;  %9821 = vmatmul.msk.f32.vlgmr.msrb.gmra.mxu2 %vm595_vm1, %v16872_v30 }
 0x76d   :  { %9835 = vmatpush.xpose.msk.msrb.mxu2 %vm595_vm1, %v16873_v39  ;;  %v13840_v40 = vpop.permute.xlu1 %7211 }
 0x76e   :  { %16889 = vst [vmem:[#allocation6_spill] sm:$0xff] %v13840_v40 }
 0x76f   :  { %v13838_v27 = vpop.permute.xlu0 %7332 }
 0x770   :  { %16888 = vst [vmem:[#allocation12_spill] sm:$0xff] %v13838_v27 }
 0x771   :  { %9836 = vmatpush.xpose.msk.msrb.mxu2 %vm595_vm1, %v16874_v56 }
 0x773   :  { %7681 = vrot.lane.b32.xlu1 %v16875_v6, %s10933_s30  ;;  %7560 = vrot.lane.b32.xlu0 %v16876_v31, %s10934_s8 }
 0x774   :  { %7291 = vrot.lane.b32.xlu2 %v16845_v55, %s10933_s30  ;;  %9822 = vmatmul.msk.f32.gmra.mxu2 %vm595_vm1, %v16877_v4  ;;  %v16894_v4 = vld [vmem:[#allocation72_spill] sm:$0xff] }
 0x77b   :  { %7722 = vrot.lane.b32.xlu1 %v16879_v10, %s10933_s30  ;;  %7404 = vrot.lane.b32.xlu0 %v16880_v17, %s10934_s8 }
 0x77c   :  { %7365 = vrot.lane.b32.xlu2 %v16841_v42, %s10934_s8  ;;  %9829 = vmatmul.msk.f32.vlgmr.msra.gmra.mxu2 %vm595_vm1, %v16881_v52  ;;  %v16887_v42 = vld [vmem:[#allocation96_spill] sm:$0xff] }
 0x77d   :  { %9843 = vmatpush.xpose.msk.msra.mxu2 %vm595_vm1, %v16882_v54  ;;  %v13858_v54 = vpop.f32.mrf.mxu1 }
 0x77e   :  { %16895 = vst [vmem:[#allocation59_spill] sm:$0xff] %v13858_v54 }
 0x77f   :  { %v3483_v15 = vpop.xlane.xlu2 %3482 }
 0x780   :  { %10661 = vrcp.f32 %v3483_v15  ;;  %v3918_v37 = vand.u32 2147483648, %v3483_v15  ;;  %v3916_v57 = vand.u32 2147483647, %v3483_v15  ;;  %vm3912_vm10 = vweird.f32 %v3483_v15 }
 0x781   :  { %9844 = vmatpush.xpose.msk.msra.mxu2 %vm595_vm1, %v16884_v8  ;;  %10663 = vrcp.f32 %v13564_v3  ;;  %v13864_v8 = vpop.permute.xlu1 %7254 }
 0x782   :  { %10665 = vrcp.f32 %v13548_v53  ;;  %v3919_v46 = vor.u32 1.1754944e-38, %v3918_v37  ;;  %vm3917_vm12 = vcmp.eq.f32.partialorder %v3916_v57, 8.507059e+37  ;;  %16897 = vst [vmem:[#allocation5_spill] sm:$0xff] %v13864_v8 }
 0x783   :  { %7716 = vrot.lane.b32.xlu1 %v16885_v34, %s10934_s8  ;;  %7406 = vrot.lane.b32.xlu0 %v16886_v14, %s10934_s8 }
 0x784   :  { %7564 = vrot.lane.b32.xlu2 %v16876_v31, %s10933_s30  ;;  %9830 = vmatmul.msk.f32.gmra.mxu2 %vm595_vm1, %v16887_v42  ;;  %v16898_v42 = vld [vmem:[#allocation29_spill] sm:$0xff] }
 0x786   :  { %v10662_v51 = vpop.eup %10661 }
 0x787   :  { %v3908_v32 = vmul.f32 %v10662_v51, %v3483_v15  ;;  %v13836_v5 = vpop.permute.xlu2 %10317  ;;  %v10664_v9 = vpop.eup %10663  ;;  %vm3913_vm9 = vweird.f32 %v10662_v51 }
 0x788   :  { %v3824_v7 = vmul.f32 %v10664_v9, %v13564_v3  ;;  %vm3914_vm11 = vmor %vm3912_vm10, %vm3913_vm9  ;;  %v10666_v52 = vpop.eup %10665  ;;  %v13860_v15 = vpop.permute.xlu0 %7326  ;;  %vm3829_vm13 = vweird.f32 %v10664_v9 }
 0x789   :  { %v3909_v60 = vsub.f32 1.0, %v3908_v32  ;;  %16896 = vst [vmem:[#allocation10_spill] sm:$0xff] %v13860_v15  ;;  %vm3830_vm15 = vmor %vm3828_vm14, %vm3829_vm13  ;;  %vm3843_vm4 = vweird.f32 %v10666_v52 }
 0x78a   :  { %v3825_v56 = vsub.f32 1.0, %v3824_v7  ;;  %vm3844_vm6 = vmor %vm3842_vm5, %vm3843_vm4 }
 0x78b   :  { %v3910_v45 = vmul.f32 %v10662_v51, %v3909_v60  ;;  %7759 = vrot.lane.b32.xlu1 %v16890_v62, %s10933_s30  ;;  %7605 = vrot.lane.b32.xlu0 %v16891_v50, %s10933_s30  ;;  %v3838_v60 = vmul.f32 %v10666_v52, %v13548_v53 }
 0x78c   :  { %7410 = vrot.lane.b32.xlu2 %v16886_v14, %s10933_s30  ;;  %9837 = vmatmul.msk.f32.vlgmr.msrb.gmra.mxu2 %vm595_vm1, %v16892_v59  ;;  %v3826_v32 = vmul.f32 %v10664_v9, %v3825_v56  ;;  %v3832_v59 = vand.u32 2147483647, %v13564_v3 }
 0x78d   :  { %v3911_v19 = vadd.f32 %v10662_v51, %v3910_v45  ;;  %9851 = vmatpush.xpose.msk.msrb.mxu2 %vm595_vm1, %v16893_v29  ;;  %v3839_v57 = vsub.f32 1.0, %v3838_v60  ;;  %v586_v60 = vld [vmem:[%s16321_s5 + $0x8] sm:$0xff] }
 0x78e   :  { %v3827_v45 = vadd.f32 %v10664_v9, %v3826_v32  ;;  %vm3833_vm3 = vcmp.eq.f32.partialorder %v3832_v59, 8.507059e+37  ;;  %v3846_v32 = vand.u32 2147483647, %v13548_v53 }
 0x78f   :  { %v3915_v28 = vsel %vm3914_vm11, %v10662_v51, %v3911_v19  ;;  %v7175_v35 = vpop.permute.xlu2 %7174  ;;  %v16899_v51 = vld [vmem:[#allocation87_spill] sm:$0xff]  ;;  %v3834_v19 = vand.u32 2147483648, %v13564_v3 }
 0x790   :  { %v3920_v30 = vsel %vm3917_vm12, %v3919_v46, %v3915_v28  ;;  %9948 = vmatpush.xpose.msk.msra.mxu1 %vm595_vm1, %v7175_v35  ;;  %v13884_v7 = vpop.permute.xlu0 %7328  ;;  %v16904_v46 = vld [vmem:[#allocation30_spill] sm:$0xff]  ;;  %v3831_v29 = vsel %vm3830_vm15, %v10664_v9, %v3827_v45  ;;  %v3840_v28 = vmul.f32 %v10666_v52, %v3839_v57  ;;  %v13890_v35 = vpop.permute.xlu1 %7248  ;;  %vm3847_vm7 = vcmp.eq.f32.partialorder %v3846_v32, 8.507059e+37 }
 0x791   :  { %v3965_v39 = vmul.f32 %v13550_v63, %v3920_v30  ;;  %9852 = vmatpush.xpose.msk.msrb.mxu2 %vm595_vm1, %v16894_v4  ;;  %v16900_v63 = vld [vmem:[#allocation26_spill] sm:$0xff]  ;;  %16903 = vst [vmem:[#allocation63_spill] sm:$0xff] %v13884_v7  ;;  %v3835_v3 = vor.u32 1.1754944e-38, %v3834_v19  ;;  %v16907_v4 = vld [vmem:[#allocation47_spill] sm:$0xff] }
 0x792   :  { %16905 = vst [vmem:[#allocation14_spill] sm:$0xff] %v13890_v35  ;;  %v16906_v30 = vld [vmem:[#allocation58_spill] sm:$0xff] }
 0x793   :  { %9753 = vmatmul.msk.f32.vlgmr.msrb.gmra.mxu3 %vm1214_vm2, %v3965_v39  ;;  %9949 = vmatmul.msk.f32.vlgmr.msra.gmra.mxu1 %vm595_vm1, %v7171_v26  ;;  %v16902_v26 = vld [vmem:[#allocation118_spill] sm:$0xff]  ;;  %v3836_v56 = vsel %vm3833_vm3, %v3835_v3, %v3831_v29  ;;  %v16913_v29 = vld [vmem:[#allocation85_spill] sm:$0xff] }
 0x794   :  { %7521 = vrot.lane.b32.xlu0 %v16898_v42, %s10934_s8  ;;  %9831 = vmatpush.xpose.msk.msrb.mxu3 %vm595_vm1, %v16899_v51  ;;  %v3959_v9 = vmul.f32 %v13325_v18, %v3836_v56 }
 0x795   :  { %9838 = vmatmul.msk.f32.gmra.mxu2 %vm595_vm1, %v16900_v63  ;;  %7408 = vrot.lane.b32.xlu2 %v16880_v17, %s10933_s30  ;;  %v3841_v63 = vadd.f32 %v10666_v52, %v3840_v28 }
 0x797   :  { %v13875_v37 = vpop.permute.xlu2 %7215  ;;  %v3845_v18 = vsel %vm3844_vm6, %v10666_v52, %v3841_v63  ;;  %v16914_v52 = vld [vmem:[#allocation107_spill] sm:$0xff] }
 0x798   :  { %16901 = vst [vmem:[#allocation64_spill] sm:$0xff] %v13875_v37  ;;  %9832 = vmatpush.xpose.msk.msrb.mxu3 %vm595_vm1, %v16902_v26  ;;  %v16908_v26 = vld [vmem:[#allocation83_spill] sm:$0xff]  ;;  %v13910_v57 = vpop.permute.xlu0 %7250 }
 0x799   :  { %16909 = vst [vmem:[#allocation77_spill] sm:$0xff] %v13910_v57 }
 0x79c   :  { %7601 = vrot.lane.b32.xlu0 %v16891_v50, %s10934_s8 }
 0x79d   :  { %9845 = vmatmul.msk.f32.vlgmr.msra.gmra.mxu2 %vm595_vm1, %v16904_v46  ;;  %7482 = vrot.lane.b32.xlu2 %v16857_v44, %s10934_s8  ;;  %v3848_v44 = vand.u32 2147483648, %v13548_v53  ;;  %v13914_v53 = vpop.permute.xlu1 %7447  ;;  %v16912_v46 = vld [vmem:[#allocation42_spill] sm:$0xff] }
 0x79e   :  { %9859 = vmatpush.xpose.msk.msra.mxu2 %vm595_vm1, %v16906_v30  ;;  %16911 = vst [vmem:[#allocation13_spill] sm:$0xff] %v13914_v53  ;;  %v13928_v30 = vpop.f32.mrf.mxu1 }
 0x79f   :  { %v10323_v39 = vpop.permute.xlu2 %10322  ;;  %v3849_v45 = vor.u32 1.1754944e-38, %v3848_v44  ;;  %16915 = vst [vmem:[#allocation121_spill] sm:$0xff] %v13928_v30 }
 0x7a0   :  { %v10324_v50 = vunpack.i.l.bf16 %v10323_v39  ;;  %v10325_v51 = vunpack.i.h.bf16 %v10323_v39  ;;  %v13931_v3 = vpop.permute.xlu0 %7443 }
 0x7a1   :  { %v3850_v19 = vsel %vm3847_vm7, %v3849_v45, %v3845_v18  ;;  %16916 = vst [vmem:[#allocation89_spill] sm:$0xff] %v13931_v3  ;;  %v16927_v18 = vld [vmem:[#allocation46_spill] sm:$0xff] }
 0x7a2   :  { %9860 = vmatpush.xpose.msk.msra.mxu2 %vm595_vm1, %v16907_v4  ;;  %4413 = vmatpush.msra.mxu0 %v10324_v50  ;;  %v3996_v50 = vpop.f32.mrf.mxu0 }
 0x7a4   :  { %7638 = vrot.lane.b32.xlu0 %v16871_v33, %s10934_s8  ;;  %4414 = vmatpush.msra.mxu0 %v10325_v51 }
 0x7a5   :  { %9846 = vmatmul.msk.f32.gmra.mxu2 %vm595_vm1, %v16908_v26  ;;  %7484 = vrot.lane.b32.xlu2 %v16852_v36, %s10934_s8  ;;  %v3960_v36 = vmul.f32 %v13383_v21, %v3850_v19  ;;  %v13933_v39 = vpop.permute.xlu1 %7371  ;;  %v16918_v21 = vld [vmem:[#allocation74_spill] sm:$0xff]  ;;  %v16926_v26 = vld [vmem:[#allocation43_spill] sm:$0xff] }
 0x7a6   :  { %9747 = vmatmul.msk.f32.vlgmr.msra.gmra.mxu0 %vm1214_vm2, %v3959_v9  ;;  %v13916_v59 = vpop.f32.mrf.mxu2  ;;  %16917 = vst [vmem:[#allocation103_spill] sm:$0xff] %v13933_v39 }
 0x7a7   :  { %v13912_v33 = vpop.permute.xlu2 %7209  ;;  %4638 = vmatpush.msrb.mxu0 %v586_v60  ;;  %v16925_v60 = vld [vmem:[#allocation100_spill] sm:$0xff] }
 0x7a8   :  { %16910 = vst [vmem:[#allocation88_spill] sm:$0xff] %v13912_v33  ;;  %v7288_v51 = vpop.permute.xlu0 %7287 }
 0x7aa   :  { %v3999_v44 = vpop.f32.mrf.mxu0 }
 0x7ac   :  { %7640 = vrot.lane.b32.xlu0 %v16912_v46, %s10934_s8 }
 0x7ad   :  { %9853 = vmatmul.msk.f32.vlgmr.msrb.gmra.mxu2 %vm595_vm1, %v16913_v29  ;;  %7525 = vrot.lane.b32.xlu2 %v16898_v42, %s10933_s30  ;;  %v16919_v42 = vld [vmem:[#allocation21_spill] sm:$0xff]  ;;  %v13948_v63 = vpop.permute.xlu1 %7369 }
 0x7ae   :  { %9867 = vmatpush.xpose.msk.msrb.mxu2 %vm595_vm1, %v16914_v52  ;;  %9748 = vmatmul.msk.f32.gmra.mxu0 %vm1214_vm2, %v3960_v36  ;;  %v13943_v56 = vpop.f32.mrf.mxu2  ;;  %16921 = vst [vmem:[#allocation114_spill] sm:$0xff] %v13948_v63  ;;  %v16930_v52 = vld [vmem:[#allocation125_spill] sm:$0xff] }
 0x7af   :  { %v7173_v28 = vpop.permute.xlu2 %7172 }
 0x7b0   :  { %9950 = vmatmul.msk.f32.gmra.mxu1 %vm595_vm1, %v7173_v28  ;;  %v10234_v28 = vunpack.i.l.bf16 %v16930_v52 }
 0x7b2   :  { %9868 = vmatpush.xpose.msk.msrb.mxu2 %vm595_vm1, %v16918_v21 }
 0x7b4   :  { %7720 = vrot.lane.b32.xlu0 %v16885_v34, %s10933_s30  ;;  %v16922_v34 = vld [vmem:[#allocation37_spill] sm:$0xff] }
 0x7b5   :  { %9854 = vmatmul.msk.f32.gmra.mxu2 %vm595_vm1, %v16919_v42  ;;  %7599 = vrot.lane.b32.xlu2 %v16868_v61, %s10934_s8  ;;  %v16923_v61 = vld [vmem:[#allocation120_spill] sm:$0xff]  ;;  %v13969_v45 = vpop.permute.xlu1 %7445  ;;  %v10235_v42 = vunpack.i.h.bf16 %v16930_v52 }
 0x7b6   :  { %9755 = vmatmul.msk.f32.vlgmr.msrb.gmra.mxu0 %vm595_vm1, %v3996_v50  ;;  %16928 = vst [vmem:[#allocation104_spill] sm:$0xff] %v13969_v45  ;;  %v16931_v50 = vld [vmem:[#allocation124_spill] sm:$0xff] }
 0x7b7   :  { %v13946_v4 = vpop.permute.xlu2 %7330 }
 0x7b8   :  { %16920 = vst [vmem:[#allocation25_spill] sm:$0xff] %v13946_v4 }
 0x7bb   :  { %v13958_v9 = vpop.f32.mrf.mxu2 }
 0x7bc   :  { %7718 = vrot.lane.b32.xlu0 %v16879_v10, %s10934_s8 }
 0x7bd   :  { %9861 = vmatmul.msk.f32.vlgmr.msra.gmra.mxu2 %vm595_vm1, %v16922_v34  ;;  %7644 = vrot.lane.b32.xlu2 %v16912_v46, %s10933_s30 }
 0x7be   :  { %9875 = vmatpush.xpose.msk.msra.mxu2 %vm595_vm1, %v16923_v61  ;;  %9756 = vmatmul.msk.f32.gmra.mxu0 %vm595_vm1, %v3999_v44 }
 0x7bf   :  { %v13961_v32 = vpop.permute.xlu2 %7252 }
 0x7c0   :  { %16924 = vst [vmem:[#allocation22_spill] sm:$0xff] %v13961_v32 }
 0x7c2   :  { %9876 = vmatpush.xpose.msk.msra.mxu2 %vm595_vm1, %v16925_v60  ;;  %v3486_v10 = vpop.xlane.xlu0 %3485  ;;  %v7290_v60 = vpop.permute.xlu1 %7289 }
 0x7c3   :  { %10667 = vrcp.f32 %v3486_v10  ;;  %v3932_v44 = vand.u32 2147483648, %v3486_v10  ;;  %v3930_v61 = vand.u32 2147483647, %v3486_v10  ;;  %vm3926_vm9 = vweird.f32 %v3486_v10 }
 0x7c5   :  { %9862 = vmatmul.msk.f32.gmra.mxu2 %vm595_vm1, %v16926_v26  ;;  %7683 = vrot.lane.b32.xlu2 %v16927_v18, %s10933_s30  ;;  %vm3931_vm11 = vcmp.eq.f32.partialorder %v3930_v61, 8.507059e+37  ;;  %v16939_v61 = vld [vmem:[#allocation86_spill] sm:$0xff] }
 0x7c6   :  { %9757 = vmatmul.msk.f32.gmra.mxu0 %vm595_vm1, %v13391_v48  ;;  %v13975_v46 = vpop.f32.mrf.mxu2 }
 0x7c7   :  { %v13973_v19 = vpop.permute.xlu2 %7449 }
 0x7c8   :  { %16929 = vst [vmem:[#allocation108_spill] sm:$0xff] %v13973_v19 }
 0x7c9   :  { %v10668_v36 = vpop.eup %10667 }
 0x7ca   :  { %v3922_v29 = vmul.f32 %v10668_v36, %v3486_v10  ;;  %vm3927_vm8 = vweird.f32 %v10668_v36 }
 0x7cb   :  { %vm3928_vm10 = vmor %vm3926_vm9, %vm3927_vm8 }
 0x7cc   :  { %v3923_v21 = vsub.f32 1.0, %v3922_v29 }
 0x7cd   :  { %9869 = vmatmul.msk.f32.vlgmr.msrb.gmra.mxu2 %vm595_vm1, %v16931_v50  ;;  %7677 = vrot.lane.b32.xlu2 %v16875_v6, %s10934_s8  ;;  %v3933_v6 = vor.u32 1.1754944e-38, %v3932_v44  ;;  %v16932_v50 = vld [vmem:[#allocation48_spill] sm:$0xff]  ;;  %v14003_v44 = vpop.permute.xlu1 %7488 }
 0x7ce   :  { %6395 = vmatpush.msrb.mxu2 %v10234_v28  ;;  %9758 = vmatmul.msk.f32.gmra.mxu0 %vm595_vm1, %v13404_v11  ;;  %v3924_v48 = vmul.f32 %v10668_v36, %v3923_v21  ;;  %v13985_v26 = vpop.f32.mrf.mxu2  ;;  %16935 = vst [vmem:[#allocation84_spill] sm:$0xff] %v14003_v44 }
 0x7cf   :  { %v7294_v34 = vpop.permute.xlu2 %7293 }
 0x7d0   :  { %6396 = vmatpush.msrb.mxu2 %v10235_v42  ;;  %9959 = vmatpush.xpose.msk.msrb.mxu1 %vm595_vm1, %v7294_v34  ;;  %v3925_v29 = vadd.f32 %v10668_v36, %v3924_v48  ;;  %v16937_v48 = vld [vmem:[#allocation90_spill] sm:$0xff] }
 0x7d2   :  { %v3929_v52 = vsel %vm3928_vm10, %v10668_v36, %v3925_v29  ;;  %v14001_v36 = vpop.f32.mrf.mxu1 }
 0x7d3   :  { %v3934_v28 = vsel %vm3931_vm11, %v3933_v6, %v3929_v52  ;;  %16934 = vst [vmem:[#allocation3_spill] sm:$0xff] %v14001_v36  ;;  %v16941_v6 = vld [vmem:[#allocation116_spill] sm:$0xff]  ;;  %v16953_v36 = vld [vmem:[#allocation82_spill] sm:$0xff] }
 0x7d4   :  { %v3966_v11 = vmul.f32 %v13725_v20, %v3934_v28  ;;  %v4101_v28 = vpop.f32.mrf.mxu3 }
 0x7d5   :  { %9870 = vmatmul.msk.f32.gmra.mxu2 %vm595_vm1, %v16932_v50  ;;  %7679 = vrot.lane.b32.xlu2 %v16927_v18, %s10934_s8  ;;  %v13995_v21 = vpop.permute.xlu0 %7566  ;;  %v16936_v18 = vld [vmem:[#allocation133_spill] sm:$0xff]  ;;  %v14025_v50 = vpop.permute.xlu1 %7486 }
 0x7d6   :  { %9759 = vmatmul.msk.f32.gmra.mxu0 %vm595_vm1, %v13916_v59  ;;  %16933 = vst [vmem:[#allocation31_spill] sm:$0xff] %v13995_v21  ;;  %9754 = vmatmul.msk.f32.gmra.mxu3 %vm1214_vm2, %v3966_v11  ;;  %v13998_v42 = vpop.f32.mrf.mxu2  ;;  %v10244_v20 = vunpack.i.l.bf16 %v16936_v18  ;;  %v10245_v59 = vunpack.i.h.bf16 %v16936_v18  ;;  %v16945_v11 = vld [vmem:[#allocation68_spill] sm:$0xff] }
 0x7d7   :  { %v7292_v10 = vpop.permute.xlu2 %7291  ;;  %16943 = vst [vmem:[#allocation40_spill] sm:$0xff] %v14025_v50 }
 0x7d8   :  { %9960 = vmatpush.xpose.msk.msrb.mxu1 %vm595_vm1, %v7292_v10  ;;  %v16946_v10 = vld [vmem:[#allocation115_spill] sm:$0xff] }
 0x7da   :  { %v14022_v52 = vpop.f32.mrf.mxu1 }
 0x7db   :  { %9961 = vmatmul.msk.f32.vlgmr.msrb.gmra.mxu1 %vm595_vm1, %v7288_v51  ;;  %16942 = vst [vmem:[#allocation27_spill] sm:$0xff] %v14022_v52  ;;  %v16952_v52 = vld [vmem:[#allocation70_spill] sm:$0xff] }
 0x7dd   :  { %9877 = vmatmul.msk.f32.vlgmr.msra.gmra.mxu2 %vm595_vm1, %v16937_v48  ;;  %v14012_v34 = vpop.permute.xlu0 %7367 }
 0x7de   :  { %6465 = vmatpush.msra.mxu2 %v10244_v20  ;;  %9760 = vmatmul.msk.f32.gmra.mxu0 %vm595_vm1, %v13943_v56  ;;  %16938 = vst [vmem:[#allocation36_spill] sm:$0xff] %v14012_v34  ;;  %v14018_v51 = vpop.f32.mrf.mxu2  ;;  %v16944_v56 = vld [vmem:[#allocation60_spill] sm:$0xff]  ;;  %v10259_v34 = vunpack.i.l.bf16 %v13336_v2 }
 0x7df   :  { %9825 = vmatmul.msk.f32.vlgmr.msra.gmra.mxu3 %vm595_vm1, %v16939_v61  ;;  %v14016_v29 = vpop.permute.xlu2 %7365  ;;  %v16950_v61 = vld [vmem:[#allocation93_spill] sm:$0xff] }
 0x7e0   :  { %16940 = vst [vmem:[#allocation67_spill] sm:$0xff] %v14016_v29  ;;  %6466 = vmatpush.msra.mxu2 %v10245_v59  ;;  %9839 = vmatpush.xpose.msk.msra.mxu3 %vm595_vm1, %v16941_v6  ;;  %v14040_v59 = vpop.permute.xlu1 %7562 }
 0x7e1   :  { %16949 = vst [vmem:[#allocation65_spill] sm:$0xff] %v14040_v59 }
 0x7e2   :  { %v14054_v54 = vpop.f32.mrf.mxu1 }
 0x7e3   :  { %9962 = vmatmul.msk.f32.gmra.mxu1 %vm595_vm1, %v7290_v60  ;;  %v4104_v60 = vpop.f32.mrf.mxu3  ;;  %16954 = vst [vmem:[#allocation45_spill] sm:$0xff] %v14054_v54 }
 0x7e4   :  { %9840 = vmatpush.xpose.msk.msra.mxu3 %vm595_vm1, %v16944_v56 }
 0x7e5   :  { %9878 = vmatmul.msk.f32.gmra.mxu2 %vm595_vm1, %v16945_v11  ;;  %v14038_v48 = vpop.permute.xlu0 %7560 }
 0x7e6   :  { %9761 = vmatmul.msk.f32.gmra.mxu0 %vm595_vm1, %v4101_v28  ;;  %16948 = vst [vmem:[#allocation66_spill] sm:$0xff] %v14038_v48  ;;  %v16951_v28 = vld [vmem:[#allocation23_spill] sm:$0xff] }
 0x7e7   :  { %9826 = vmatmul.msk.f32.gmra.mxu3 %vm595_vm1, %v16946_v10  ;;  %v14034_v18 = vpop.permute.xlu2 %7564  ;;  %v14036_v20 = vpop.f32.mrf.mxu2 }
 0x7e8   :  { %16947 = vst [vmem:[#allocation56_spill] sm:$0xff] %v14034_v18  ;;  %v4136_v10 = vpop.f32.mrf.mxu0  ;;  %v7528_v30 = vpop.permute.xlu1 %7527 }
 0x7ed   :  { %v7405_v11 = vpop.permute.xlu0 %7404 }
 0x7ee   :  { %9762 = vmatmul.msk.f32.gmra.mxu0 %vm595_vm1, %v4104_v60 }
 0x7ef   :  { %9833 = vmatmul.msk.f32.vlgmr.msrb.gmra.mxu3 %vm595_vm1, %v16950_v61  ;;  %v7411_v6 = vpop.permute.xlu2 %7410  ;;  %v4978_v56 = vpop.f32.mrf.mxu2 }
 0x7f0   :  { %9847 = vmatpush.xpose.msk.msrb.mxu3 %vm595_vm1, %v16951_v28  ;;  %9971 = vmatpush.xpose.msk.msra.mxu1 %vm595_vm1, %v7411_v6  ;;  %v14056_v28 = vmul.f32 0.35355338, %v4978_v56  ;;  %v16955_v56 = vld [vmem:[#allocation44_spill] sm:$0xff] }
 0x7f2   :  { %v5601_v59 = vsel %vm1214_vm2, %v14056_v28, -inf }
 0x7f4   :  { %9848 = vmatpush.xpose.msk.msrb.mxu3 %vm595_vm1, %v16952_v52 }
 0x7f6   :  { %9763 = vmatmul.msk.f32.gmra.mxu0 %vm595_vm1, %v4136_v10  ;;  %v7407_v10 = vpop.permute.xlu0 %7406 }
 0x7f7   :  { %9834 = vmatmul.msk.f32.gmra.mxu3 %vm595_vm1, %v16953_v36  ;;  %v7409_v60 = vpop.permute.xlu2 %7408  ;;  %v4981_v61 = vpop.f32.mrf.mxu2 }
 0x7f8   :  { %9972 = vmatpush.xpose.msk.msra.mxu1 %vm595_vm1, %v7409_v60  ;;  %v14058_v6 = vmul.f32 0.35355338, %v4981_v61  ;;  %v4139_v36 = vpop.f32.mrf.mxu0  ;;  %v16957_v61 = vld [vmem:[#allocation79_spill] sm:$0xff] }
 0x7fa   :  { %v5604_v52 = vsel %vm1214_vm2, %v14058_v6, -inf }
 0x7fb   :  { %9973 = vmatmul.msk.f32.vlgmr.msra.gmra.mxu1 %vm595_vm1, %v7405_v11  ;;  %5605 = vmax.xlane.f32.xlu0 %v5604_v52  ;;  %v14075_v11 = vpop.f32.mrf.mxu1 }
 0x7fc   :  { %9983 = vmatpush.xpose.msk.msrb.mxu1 %vm595_vm1, %v7528_v30  ;;  %16958 = vst [vmem:[#allocation52_spill] sm:$0xff] %v14075_v11 }
 0x7fe   :  { %9764 = vmatmul.msk.f32.gmra.mxu0 %vm595_vm1, %v4139_v36  ;;  %5602 = vmax.xlane.f32.xlu2 %v5601_v59  ;;  %v16959_v59 = vld [vmem:[#allocation62_spill] sm:$0xff]  ;;  %v14082_v36 = vpop.permute.xlu0 %7605 }
 0x7ff   :  { %9841 = vmatmul.msk.f32.vlgmr.msra.gmra.mxu3 %vm595_vm1, %v16955_v56  ;;  %v14069_v60 = vpop.permute.xlu2 %7482  ;;  %v5056_v30 = vpop.f32.mrf.mxu2  ;;  %16960 = vst [vmem:[#allocation91_spill] sm:$0xff] %v14082_v36  ;;  %v16961_v56 = vld [vmem:[#allocation54_spill] sm:$0xff] }
 0x800   :  { %16956 = vst [vmem:[#allocation57_spill] sm:$0xff] %v14069_v60  ;;  %9855 = vmatpush.xpose.msk.msra.mxu3 %vm595_vm1, %v16957_v61  ;;  %v14073_v54 = vmul.f32 0.35355338, %v5056_v30 }
 0x802   :  { %v5613_v52 = vsel %vm1214_vm2, %v14073_v54, -inf }
 0x803   :  { %9974 = vmatmul.msk.f32.gmra.mxu1 %vm595_vm1, %v7407_v10  ;;  %5614 = vmax.xlane.f32.xlu1 %v5613_v52  ;;  %v14096_v52 = vpop.permute.xlu1 %7603 }
 0x804   :  { %9856 = vmatpush.xpose.msk.msra.mxu3 %vm595_vm1, %v16959_v59  ;;  %16963 = vst [vmem:[#allocation41_spill] sm:$0xff] %v14096_v52  ;;  %v16964_v59 = vld [vmem:[#allocation75_spill] sm:$0xff] }
 0x806   :  { %9765 = vmatmul.msk.f32.gmra.mxu0 %vm595_vm1, %v13412_v13  ;;  %v7522_v60 = vpop.permute.xlu0 %7521 }
 0x807   :  { %9842 = vmatmul.msk.f32.gmra.mxu3 %vm595_vm1, %v16961_v56  ;;  %v14088_v30 = vpop.permute.xlu2 %7484  ;;  %v5059_v61 = vpop.f32.mrf.mxu2  ;;  %v16965_v56 = vld [vmem:[#allocation34_spill] sm:$0xff] }
 0x808   :  { %16962 = vst [vmem:[#allocation11_spill] sm:$0xff] %v14088_v30  ;;  %v14090_v11 = vmul.f32 0.35355338, %v5059_v61  ;;  %v14103_v61 = vpop.f32.mrf.mxu1 }
 0x809   :  { %16966 = vst [vmem:[#allocation50_spill] sm:$0xff] %v14103_v61 }
 0x80a   :  { %v5616_v10 = vsel %vm1214_vm2, %v14090_v11, -inf }
 0x80b   :  { %5617 = vmax.xlane.f32.xlu0 %v5616_v10  ;;  %v16967_v10 = vld [vmem:[#allocation32_spill] sm:$0xff] }
 0x80e   :  { %9766 = vmatmul.msk.f32.gmra.mxu0 %vm595_vm1, %v13426_v43  ;;  %v16968_v43 = vld [vmem:[#allocation55_spill] sm:$0xff] }
 0x80f   :  { %9849 = vmatmul.msk.f32.vlgmr.msrb.gmra.mxu3 %vm595_vm1, %v16964_v59  ;;  %v7526_v13 = vpop.permute.xlu2 %7525  ;;  %v16969_v59 = vld [vmem:[#allocation24_spill] sm:$0xff] }
 0x810   :  { %9863 = vmatpush.xpose.msk.msrb.mxu3 %vm595_vm1, %v16965_v56  ;;  %9984 = vmatpush.xpose.msk.msrb.mxu1 %vm595_vm1, %v7526_v13  ;;  %v7524_v56 = vpop.permute.xlu1 %7523  ;;  %v14116_v13 = vpop.permute.xlu0 %7601 }
 0x811   :  { %16971 = vst [vmem:[#allocation53_spill] sm:$0xff] %v14116_v13  ;;  %v14118_v61 = vpop.f32.mrf.mxu1  ;;  %v16975_v13 = vld [vmem:[#allocation126_spill] sm:$0xff] }
 0x812   :  { %16972 = vst [vmem:[#allocation38_spill] sm:$0xff] %v14118_v61  ;;  %v16979_v61 = vld [vmem:[#allocation76_spill] sm:$0xff] }
 0x813   :  { %9985 = vmatmul.msk.f32.vlgmr.msrb.gmra.mxu1 %vm595_vm1, %v7522_v60  ;;  %v16973_v60 = vld [vmem:[#allocation106_spill] sm:$0xff] }
 0x814   :  { %9864 = vmatpush.xpose.msk.msrb.mxu3 %vm595_vm1, %v16967_v10  ;;  %v16974_v10 = vld [vmem:[#allocation127_spill] sm:$0xff] }
 0x816   :  { %9767 = vmatmul.msk.f32.gmra.mxu0 %vm595_vm1, %v13958_v9  ;;  %7761 = vrot.lane.b32.xlu2 %v16968_v43, %s10933_s30 }
 0x817   :  { %9850 = vmatmul.msk.f32.gmra.mxu3 %vm595_vm1, %v16969_v59  ;;  %v14114_v30 = vpop.permute.xlu2 %7599  ;;  %v4241_v59 = vpop.f32.mrf.mxu3 }
 0x818   :  { %16970 = vst [vmem:[#allocation96_spill] sm:$0xff] %v14114_v30  ;;  %v7643_v30 = vpop.permute.xlu1 %7642  ;;  %v7639_v48 = vpop.permute.xlu0 %7638 }
 0x81b   :  { %9986 = vmatmul.msk.f32.gmra.mxu1 %vm595_vm1, %v7524_v56  ;;  %v14131_v56 = vpop.f32.mrf.mxu1 }
 0x81c   :  { %16976 = vst [vmem:[#allocation73_spill] sm:$0xff] %v14131_v56  ;;  %v16984_v56 = vld [vmem:[#allocation129_spill] sm:$0xff] }
 0x81e   :  { %9768 = vmatmul.msk.f32.gmra.mxu0 %vm595_vm1, %v13975_v46  ;;  %v16977_v46 = vld [vmem:[#allocation78_spill] sm:$0xff] }
 0x81f   :  { %9857 = vmatmul.msk.f32.vlgmr.msra.gmra.mxu3 %vm595_vm1, %v16973_v60  ;;  %v7645_v9 = vpop.permute.xlu2 %7644  ;;  %v4244_v60 = vpop.f32.mrf.mxu3 }
 0x820   :  { %9871 = vmatpush.xpose.msk.msra.mxu3 %vm595_vm1, %v16974_v10  ;;  %9995 = vmatpush.xpose.msk.msra.mxu1 %vm595_vm1, %v7645_v9  ;;  %v7641_v10 = vpop.permute.xlu0 %7640 }
 0x823   :  { %v14138_v9 = vpop.f32.mrf.mxu1 }
 0x824   :  { %9872 = vmatpush.xpose.msk.msra.mxu3 %vm595_vm1, %v16975_v13  ;;  %9996 = vmatpush.xpose.msk.msra.mxu1 %vm595_vm1, %v7643_v30  ;;  %16978 = vst [vmem:[#allocation19_spill] sm:$0xff] %v14138_v9  ;;  %v16980_v30 = vld [vmem:[#allocation130_spill] sm:$0xff]  ;;  %v4276_v13 = vpop.f32.mrf.mxu0 }
 0x826   :  { %9769 = vmatmul.msk.f32.gmra.mxu0 %vm595_vm1, %v4241_v59  ;;  %v16981_v59 = vld [vmem:[#allocation122_spill] sm:$0xff] }
 0x827   :  { %9858 = vmatmul.msk.f32.gmra.mxu3 %vm595_vm1, %v16977_v46  ;;  %9997 = vmatmul.msk.f32.vlgmr.msra.gmra.mxu1 %vm595_vm1, %v7639_v48  ;;  %v16982_v48 = vld [vmem:[#allocation123_spill] sm:$0xff] }
 0x828   :  { %v14325_v15 = vpop.permute.xlu0 %7720 }
 0x829   :  { %17007 = vst [vmem:[#allocation125_spill] sm:$0xff] %v14325_v15 }
 0x82c   :  { %v4279_v46 = vpop.f32.mrf.mxu0 }
 0x82e   :  { %9770 = vmatmul.msk.f32.gmra.mxu0 %vm595_vm1, %v4244_v60  ;;  %v16983_v60 = vld [vmem:[#allocation128_spill] sm:$0xff] }
 0x82f   :  { %9865 = vmatmul.msk.f32.vlgmr.msrb.gmra.mxu3 %vm595_vm1, %v16979_v61  ;;  %9998 = vmatmul.msk.f32.gmra.mxu1 %vm595_vm1, %v7641_v10  ;;  %v10249_v9 = vunpack.i.l.bf16 %v16983_v60  ;;  %v5134_v61 = vpop.f32.mrf.mxu2  ;;  %v10250_v10 = vunpack.i.h.bf16 %v16983_v60 }
 0x830   :  { %9879 = vmatpush.xpose.msk.msrb.mxu3 %vm595_vm1, %v16980_v30  ;;  %v4381_v30 = vpop.f32.mrf.mxu3  ;;  %v14186_v45 = vmul.f32 0.35355338, %v5134_v61 }
 0x834   :  { %9880 = vmatpush.xpose.msk.msrb.mxu3 %vm595_vm1, %v16981_v59  ;;  %v4416_v60 = vpop.f32.mrf.mxu0 }
 0x836   :  { %9771 = vmatmul.msk.f32.gmra.mxu0 %vm595_vm1, %v4276_v13  ;;  %v16985_v13 = vld [vmem:[#allocation97_spill] sm:$0xff] }
 0x837   :  { %9866 = vmatmul.msk.f32.gmra.mxu3 %vm595_vm1, %v16982_v48  ;;  %v5137_v59 = vpop.f32.mrf.mxu2 }
 0x838   :  { %v4384_v48 = vpop.f32.mrf.mxu3 }
 0x83e   :  { %9772 = vmatmul.msk.f32.gmra.mxu0 %vm595_vm1, %v4279_v46  ;;  %v16986_v46 = vld [vmem:[#allocation131_spill] sm:$0xff] }
 0x83f   :  { %9873 = vmatmul.msk.f32.vlgmr.msra.gmra.mxu3 %vm595_vm1, %v16984_v56  ;;  %v10260_v56 = vunpack.i.h.bf16 %v13336_v2  ;;  %v4419_v2 = vpop.f32.mrf.mxu0 }
 0x840   :  { %6430 = vmatpush.msra.mxu3 %v10249_v9  ;;  %v14165_v9 = vpop.f32.mrf.mxu3 }
 0x842   :  { %6431 = vmatpush.msra.mxu3 %v10250_v10  ;;  %v14167_v10 = vpop.permute.xlu2 %7683 }
 0x843   :  { %16987 = vst [vmem:[#allocation72_spill] sm:$0xff] %v14167_v10 }
 0x846   :  { %9773 = vmatmul.msk.f32.gmra.mxu0 %vm595_vm1, %v13441_v0  ;;  %v5212_v0 = vpop.f32.mrf.mxu2 }
 0x847   :  { %9874 = vmatmul.msk.f32.gmra.mxu3 %vm595_vm1, %v16985_v13  ;;  %v16988_v13 = vld [vmem:[#allocation132_spill] sm:$0xff]  ;;  %v14188_v29 = vpop.f32.mrf.mxu0 }
 0x848   :  { %16991 = vst [vmem:[#allocation26_spill] sm:$0xff] %v14188_v29 }
 0x84e   :  { %9774 = vmatmul.msk.f32.gmra.mxu0 %vm595_vm1, %v13459_v1  ;;  %v5215_v52 = vpop.f32.mrf.mxu2 }
 0x84f   :  { %9881 = vmatmul.msk.f32.vlgmr.msrb.gmra.mxu3 %vm595_vm1, %v16986_v46  ;;  %v14179_v46 = vpop.permute.xlu1 %7681 }
 0x850   :  { %6500 = vmatpush.msrb.mxu3 %v10259_v34  ;;  %v14177_v34 = vpop.permute.xlu2 %7677  ;;  %16990 = vst [vmem:[#allocation87_spill] sm:$0xff] %v14179_v46 }
 0x851   :  { %16989 = vst [vmem:[#allocation29_spill] sm:$0xff] %v14177_v34 }
 0x852   :  { %6501 = vmatpush.msrb.mxu3 %v10260_v56 }
 0x856   :  { %9775 = vmatmul.msk.f32.gmra.mxu0 %vm595_vm1, %v13985_v26 }
 0x857   :  { %9882 = vmatmul.msk.f32.gmra.mxu3 %vm595_vm1, %v16988_v13  ;;  %v5290_v13 = vpop.f32.mrf.mxu2  ;;  %v14192_v34 = vpop.permute.xlu1 %7722 }
 0x858   :  { %16993 = vst [vmem:[#allocation30_spill] sm:$0xff] %v14192_v34 }
 0x859   :  { %v14173_v1 = vpop.f32.mrf.mxu3 }
 0x85e   :  { %9776 = vmatmul.msk.f32.gmra.mxu0 %vm595_vm1, %v13998_v42  ;;  %v14190_v42 = vpop.permute.xlu2 %7679 }
 0x85f   :  { %16992 = vst [vmem:[#allocation118_spill] sm:$0xff] %v14190_v42  ;;  %v5293_v61 = vpop.f32.mrf.mxu2  ;;  %v14205_v42 = vpop.f32.mrf.mxu0 }
 0x860   :  { %16994 = vst [vmem:[#allocation58_spill] sm:$0xff] %v14205_v42  ;;  %v14209_v34 = vpop.permute.xlu1 %7716 }
 0x861   :  { %16995 = vst [vmem:[#allocation47_spill] sm:$0xff] %v14209_v34 }
 0x862   :  { %v5017_v56 = vpop.f32.mrf.mxu3 }
 0x863   :  { %v14181_v36 = vmul.f32 0.35355338, %v5017_v56  ;;  %v5625_v56 = vsel %vm1214_vm2, %v14186_v45, -inf }
 0x865   :  { %v5607_v26 = vsel %vm1214_vm2, %v14181_v36, -inf }
 0x866   :  { %9777 = vmatmul.msk.f32.gmra.mxu0 %vm595_vm1, %v4381_v30  ;;  %5608 = vmax.xlane.f32.xlu2 %v5607_v26  ;;  %v14203_v26 = vmul.f32 0.35355338, %v5137_v59 }
 0x867   :  { %v14223_v50 = vpop.f32.mrf.mxu0 }
 0x868   :  { %16996 = vst [vmem:[#allocation83_spill] sm:$0xff] %v14223_v50 }
 0x86a   :  { %v5020_v10 = vpop.f32.mrf.mxu3 }
 0x86b   :  { %v14194_v46 = vmul.f32 0.35355338, %v5020_v10 }
 0x86d   :  { %v5610_v3 = vsel %vm1214_vm2, %v14194_v46, -inf }
 0x86e   :  { %9778 = vmatmul.msk.f32.gmra.mxu0 %vm595_vm1, %v4384_v48  ;;  %5626 = vmax.xlane.f32.xlu2 %v5625_v56  ;;  %v14216_v48 = vmul.f32 0.35355338, %v5212_v0  ;;  %v14218_v56 = vmul.f32 0.35355338, %v5293_v61  ;;  %v7760_v61 = vpop.permute.xlu1 %7759 }
 0x86f   :  { %5611 = vmax.xlane.f32.xlu1 %v5610_v3  ;;  %v5628_v3 = vsel %vm1214_vm2, %v14203_v26, -inf }
 0x870   :  { %v5652_v0 = vsel %vm1214_vm2, %v14218_v56, -inf }
 0x871   :  { %v14201_v30 = vpop.xlane.xlu2 %5602 }
 0x872   :  { %v5095_v29 = vpop.f32.mrf.mxu3  ;;  %v5697_v63 = vsub.f32 %v14056_v28, %v14201_v30 }
 0x873   :  { %v14207_v10 = vmul.f32 0.35355338, %v5095_v29  ;;  %v5368_v29 = vpop.f32.mrf.mxu2 }
 0x875   :  { %v5619_v57 = vsel %vm1214_vm2, %v14207_v10, -inf }
 0x876   :  { %9779 = vmatmul.msk.f32.gmra.mxu0 %vm595_vm1, %v4416_v60  ;;  %5620 = vmax.xlane.f32.xlu0 %v5619_v57  ;;  %v5637_v60 = vsel %vm1214_vm2, %v14216_v48, -inf }
 0x877   :  { %5629 = vmax.xlane.f32.xlu1 %v5628_v3  ;;  %v14235_v3 = vmul.f32 0.35355338, %v5368_v29  ;;  %v14249_v29 = vmul.f32 0.35355338, %v5290_v13 }
 0x879   :  { %v7762_v59 = vpop.permute.xlu2 %7761 }
 0x87a   :  { %v5098_v42 = vpop.f32.mrf.mxu3  ;;  %10007 = vmatpush.xpose.msk.msrb.mxu1 %vm595_vm1, %v7762_v59 }
 0x87b   :  { %v14221_v34 = vmul.f32 0.35355338, %v5098_v42  ;;  %v14233_v42 = vmul.f32 0.35355338, %v5215_v52  ;;  %v5371_v44 = vpop.f32.mrf.mxu2  ;;  %v14247_v52 = vpop.f32.mrf.mxu0 }
 0x87c   :  { %16997 = vst [vmem:[#allocation42_spill] sm:$0xff] %v14247_v52 }
 0x87d   :  { %v5622_v57 = vsel %vm1214_vm2, %v14221_v34, -inf }
 0x87e   :  { %9780 = vmatmul.msk.f32.gmra.mxu0 %vm595_vm1, %v4419_v2  ;;  %5638 = vmax.xlane.f32.xlu0 %v5637_v60  ;;  %v5640_v2 = vsel %vm1214_vm2, %v14233_v42, -inf  ;;  %v5661_v60 = vsel %vm1214_vm2, %v14235_v3, -inf }
 0x87f   :  { %5653 = vmax.xlane.f32.xlu1 %v5652_v0  ;;  %5623 = vmax.xlane.f32.xlu2 %v5622_v57  ;;  %v14251_v57 = vmul.f32 0.35355338, %v5371_v44 }
 0x880   :  { %10008 = vmatpush.xpose.msk.msrb.mxu1 %vm595_vm1, %v7760_v61 }
 0x882   :  { %v5173_v59 = vpop.f32.mrf.mxu3 }
 0x883   :  { %v14237_v50 = vmul.f32 0.35355338, %v5173_v59  ;;  %v5649_v59 = vsel %vm1214_vm2, %v14249_v29, -inf  ;;  %v14263_v44 = vpop.f32.mrf.mxu0 }
 0x884   :  { %16998 = vst [vmem:[#allocation85_spill] sm:$0xff] %v14263_v44 }
 0x885   :  { %v5631_v7 = vsel %vm1214_vm2, %v14237_v50, -inf }
 0x886   :  { %9781 = vmatmul.msk.f32.gmra.mxu0 %vm595_vm1, %v13473_v23  ;;  %5641 = vmax.xlane.f32.xlu0 %v5640_v2  ;;  %v5664_v2 = vsel %vm1214_vm2, %v14251_v57, -inf }
 0x887   :  { %5662 = vmax.xlane.f32.xlu1 %v5661_v60  ;;  %5632 = vmax.xlane.f32.xlu2 %v5631_v7  ;;  %v5446_v7 = vpop.f32.mrf.mxu2 }
 0x888   :  { %v14265_v13 = vmul.f32 0.35355338, %v5446_v7  ;;  %v14279_v7 = vpop.f32.mrf.mxu1 }
 0x889   :  { %17000 = vst [vmem:[#allocation74_spill] sm:$0xff] %v14279_v7 }
 0x88a   :  { %v5176_v0 = vpop.f32.mrf.mxu3 }
 0x88b   :  { %v14253_v61 = vmul.f32 0.35355338, %v5176_v0 }
 0x88d   :  { %v5634_v23 = vsel %vm1214_vm2, %v14253_v61, -inf }
 0x88e   :  { %9782 = vmatmul.msk.f32.gmra.mxu0 %vm595_vm1, %v13486_v16  ;;  %5650 = vmax.xlane.f32.xlu0 %v5649_v59  ;;  %v5673_v16 = vsel %vm1214_vm2, %v14265_v13, -inf }
 0x88f   :  { %5665 = vmax.xlane.f32.xlu1 %v5664_v2  ;;  %5635 = vmax.xlane.f32.xlu2 %v5634_v23  ;;  %v14275_v23 = vpop.f32.mrf.mxu0 }
 0x890   :  { %16999 = vst [vmem:[#allocation107_spill] sm:$0xff] %v14275_v23 }
 0x892   :  { %v5251_v60 = vpop.f32.mrf.mxu3 }
 0x893   :  { %v14267_v0 = vmul.f32 0.35355338, %v5251_v60  ;;  %v5449_v60 = vpop.f32.mrf.mxu2 }
 0x895   :  { %v5643_v52 = vsel %vm1214_vm2, %v14267_v0, -inf }
 0x896   :  { %9783 = vmatmul.msk.f32.gmra.mxu0 %vm595_vm1, %v14018_v51  ;;  %5644 = vmax.xlane.f32.xlu0 %v5643_v52 }
 0x897   :  { %5674 = vmax.xlane.f32.xlu1 %v5673_v16  ;;  %v14287_v52 = vpop.f32.mrf.mxu0 }
 0x898   :  { %17001 = vst [vmem:[#allocation21_spill] sm:$0xff] %v14287_v52 }
 0x89a   :  { %v5254_v59 = vpop.f32.mrf.mxu3 }
 0x89b   :  { %v14277_v2 = vmul.f32 0.35355338, %v5254_v59  ;;  %v14291_v59 = vpop.f32.mrf.mxu1  ;;  %v5524_v23 = vpop.f32.mrf.mxu2 }
 0x89c   :  { %17002 = vst [vmem:[#allocation37_spill] sm:$0xff] %v14291_v59  ;;  %v14295_v7 = vmul.f32 0.35355338, %v5524_v23  ;;  %v14313_v59 = vmul.f32 0.35355338, %v5449_v60 }
 0x89d   :  { %v5646_v44 = vsel %vm1214_vm2, %v14277_v2, -inf }
 0x89e   :  { %9784 = vmatmul.msk.f32.gmra.mxu0 %vm595_vm1, %v14036_v20  ;;  %5647 = vmax.xlane.f32.xlu0 %v5646_v44  ;;  %v5685_v44 = vsel %vm1214_vm2, %v14295_v7, -inf }
 0x89f   :  { %v14303_v52 = vpop.f32.mrf.mxu0 }
 0x8a0   :  { %17003 = vst [vmem:[#allocation120_spill] sm:$0xff] %v14303_v52 }
 0x8a2   :  { %v5329_v51 = vpop.f32.mrf.mxu3 }
 0x8a3   :  { %v14285_v35 = vmul.f32 0.35355338, %v5329_v51  ;;  %v5527_v39 = vpop.f32.mrf.mxu2 }
 0x8a4   :  { %v14341_v15 = vmul.f32 0.35355338, %v5527_v39 }
 0x8a5   :  { %v5655_v16 = vsel %vm1214_vm2, %v14285_v35, -inf }
 0x8a6   :  { %9785 = vmatmul.msk.f32.gmra.mxu0 %vm595_vm1, %v14165_v9  ;;  %5656 = vmax.xlane.f32.xlu0 %v5655_v16  ;;  %v14307_v9 = vpop.f32.mrf.mxu1  ;;  %17011 = vst [vmem:[#allocation90_spill] sm:$0xff] %v14341_v15  ;;  %v5688_v28 = vsel %vm1214_vm2, %v14341_v15, -inf }
 0x8a7   :  { %17004 = vst [vmem:[#allocation100_spill] sm:$0xff] %v14307_v9 }
 0x8aa   :  { %v5332_v18 = vpop.f32.mrf.mxu3 }
 0x8ab   :  { %v14297_v20 = vmul.f32 0.35355338, %v5332_v18 }
 0x8ad   :  { %v5658_v51 = vsel %vm1214_vm2, %v14297_v20, -inf }
 0x8ae   :  { %5686 = vmax.xlane.f32.xlu0 %v5685_v44  ;;  %5659 = vmax.xlane.f32.xlu2 %v5658_v51  ;;  %v14315_v21 = vpop.f32.mrf.mxu1  ;;  %v5676_v51 = vsel %vm1214_vm2, %v14313_v59, -inf }
 0x8af   :  { %9786 = vmatmul.msk.f32.gmra.mxu0 %vm595_vm1, %v14173_v1  ;;  %17005 = vst [vmem:[#allocation43_spill] sm:$0xff] %v14315_v21 }
 0x8b2   :  { %v5407_v23 = vpop.f32.mrf.mxu3 }
 0x8b3   :  { %v14309_v16 = vmul.f32 0.35355338, %v5407_v23 }
 0x8b5   :  { %v5667_v18 = vsel %vm1214_vm2, %v14309_v16, -inf }
 0x8b6   :  { %5668 = vmax.xlane.f32.xlu1 %v5667_v18  ;;  %v14321_v9 = vpop.f32.mrf.mxu1 }
 0x8b7   :  { %17006 = vst [vmem:[#allocation46_spill] sm:$0xff] %v14321_v9 }
 0x8ba   :  { %v5410_v44 = vpop.f32.mrf.mxu3 }
 0x8bb   :  { %v14319_v52 = vmul.f32 0.35355338, %v5410_v44 }
 0x8bd   :  { %v5670_v23 = vsel %vm1214_vm2, %v14319_v52, -inf }
 0x8be   :  { %5677 = vmax.xlane.f32.xlu1 %v5676_v51  ;;  %v14337_v9 = vpop.f32.mrf.mxu1 }
 0x8bf   :  { %17009 = vst [vmem:[#allocation48_spill] sm:$0xff] %v14337_v9  ;;  %v5615_v9 = vpop.xlane.xlu1 %5614 }
 0x8c0   :  { %v5701_v17 = vsub.f32 %v14073_v54, %v5615_v9 }
 0x8c2   :  { %v5485_v1 = vpop.f32.mrf.mxu3 }
 0x8c3   :  { %v14327_v60 = vmul.f32 0.35355338, %v5485_v1  ;;  %v14339_v1 = vpop.permute.xlu0 %7718 }
 0x8c4   :  { %17010 = vst [vmem:[#allocation133_spill] sm:$0xff] %v14339_v1 }
 0x8c5   :  { %v5679_v44 = vsel %vm1214_vm2, %v14327_v60, -inf }
 0x8c6   :  { %5671 = vmax.xlane.f32.xlu1 %v5670_v23  ;;  %v5729_v23 = vmul.f32 1.442695, %v5697_v63  ;;  %v14345_v30 = vpop.f32.mrf.mxu1 }
 0x8c7   :  { %17012 = vst [vmem:[#allocation86_spill] sm:$0xff] %v14345_v30 }
 0x8c8   :  { %10669 = vpow2.f32 %v5729_v23 }
 0x8ca   :  { %v5488_v18 = vpop.f32.mrf.mxu3 }
 0x8cb   :  { %v14329_v21 = vmul.f32 0.35355338, %v5488_v18  ;;  %v5606_v40 = vpop.xlane.xlu0 %5605 }
 0x8cc   :  { %v5698_v39 = vsub.f32 %v14058_v6, %v5606_v40 }
 0x8cd   :  { %17008 = vst [vmem:[#allocation124_spill] sm:$0xff] %v14329_v21  ;;  %v5682_v51 = vsel %vm1214_vm2, %v14329_v21, -inf }
 0x8ce   :  { %5680 = vmax.xlane.f32.xlu1 %v5679_v44  ;;  %5683 = vmax.xlane.f32.xlu0 %v5682_v51  ;;  %v14347_v19 = vpop.eup %10669  ;;  %v5731_v30 = vmul.f32 1.442695, %v5698_v39 }
 0x8cf   :  { %v5793_v23 = vsel %vm1214_vm2, %v14347_v19, 0.0 }
 0x8d2   :  { %v5563_v18 = vpop.f32.mrf.mxu3 }
 0x8d3   :  { %v5618_v33 = vpop.xlane.xlu0 %5617  ;;  %v14357_v31 = vmul.f32 0.35355338, %v5563_v18 }
 0x8d5   :  { %17014 = vst [vmem:[#allocation60_spill] sm:$0xff] %v14357_v31  ;;  %v5691_v39 = vsel %vm1214_vm2, %v14357_v31, -inf }
 0x8d6   :  { %5689 = vmax.xlane.f32.xlu1 %v5688_v28 }
 0x8d9   :  { %v5609_v53 = vpop.xlane.xlu2 %5608 }
 0x8da   :  { %v5699_v44 = vsub.f32 %v14181_v36, %v5609_v53  ;;  %v5566_v63 = vpop.f32.mrf.mxu3 }
 0x8db   :  { %v14350_v51 = vmul.f32 0.35355338, %v5566_v63 }
 0x8dc   :  { %v5733_v1 = vmul.f32 1.442695, %v5699_v44  ;;  %v14363_v44 = vpop.f32.mrf.mxu1 }
 0x8dd   :  { %17013 = vst [vmem:[#allocation116_spill] sm:$0xff] %v14350_v51  ;;  %v5694_v28 = vsel %vm1214_vm2, %v14350_v51, -inf }
 0x8de   :  { %10671 = vpow2.f32 %v5733_v1  ;;  %5794 = vadd.xlane.f32.xlu1 %v5793_v23  ;;  %5695 = vmax.xlane.f32.xlu0 %v5694_v28  ;;  %17015 = vst [vmem:[#allocation68_spill] sm:$0xff] %v14363_v44 }
 0x8df   :  { %10673 = vpow2.f32 %v5731_v30 }
 0x8e1   :  { %v5627_v53 = vpop.xlane.xlu2 %5626 }
 0x8e2   :  { %v5705_v36 = vsub.f32 %v14186_v45, %v5627_v53  ;;  %v5612_v63 = vpop.xlane.xlu1 %5611  ;;  %v5737_v45 = vmul.f32 1.442695, %v5701_v17 }
 0x8e3   :  { %v5700_v40 = vsub.f32 %v14194_v46, %v5612_v63 }
 0x8e4   :  { %v14361_v6 = vpop.eup %10671  ;;  %v5745_v1 = vmul.f32 1.442695, %v5705_v36  ;;  %v5702_v36 = vsub.f32 %v14090_v11, %v5618_v33 }
 0x8e5   :  { %v5735_v23 = vmul.f32 1.442695, %v5700_v40  ;;  %v5799_v18 = vsel %vm1214_vm2, %v14361_v6, 0.0  ;;  %v14370_v28 = vpop.eup %10673 }
 0x8e6   :  { %10675 = vpow2.f32 %v5745_v1  ;;  %5692 = vmax.xlane.f32.xlu1 %v5691_v39  ;;  %5800 = vadd.xlane.f32.xlu0 %v5799_v18  ;;  %v14383_v39 = vpop.f32.mrf.mxu1  ;;  %v5739_v33 = vmul.f32 1.442695, %v5702_v36 }
 0x8e7   :  { %10677 = vpow2.f32 %v5735_v23  ;;  %v5796_v23 = vsel %vm1214_vm2, %v14370_v28, 0.0  ;;  %17016 = vst [vmem:[#allocation115_spill] sm:$0xff] %v14383_v39 }
 0x8e8   :  { %10679 = vpow2.f32 %v5737_v45 }
 0x8e9   :  { %v5621_v46 = vpop.xlane.xlu0 %5620 }
 0x8ea   :  { %v5630_v53 = vpop.xlane.xlu1 %5629  ;;  %v5703_v30 = vsub.f32 %v14207_v10, %v5621_v46 }
 0x8eb   :  { %v5706_v54 = vsub.f32 %v14203_v26, %v5630_v53 }
 0x8ec   :  { %v14374_v9 = vpop.eup %10675  ;;  %v5741_v63 = vmul.f32 1.442695, %v5703_v30 }
 0x8ed   :  { %v14377_v40 = vpop.eup %10677  ;;  %v5747_v1 = vmul.f32 1.442695, %v5706_v54  ;;  %v5817_v17 = vsel %vm1214_vm2, %v14374_v9, 0.0 }
 0x8ee   :  { %10681 = vpow2.f32 %v5741_v63  ;;  %v5802_v26 = vsel %vm1214_vm2, %v14377_v40, 0.0  ;;  %5818 = vadd.xlane.f32.xlu0 %v5817_v17  ;;  %5797 = vadd.xlane.f32.xlu1 %v5796_v23  ;;  %v14387_v10 = vpop.eup %10679 }
 0x8ef   :  { %10683 = vpow2.f32 %v5747_v1  ;;  %5803 = vadd.xlane.f32.xlu2 %v5802_v26  ;;  %v5805_v63 = vsel %vm1214_vm2, %v14387_v10, 0.0 }
 0x8f0   :  { %10685 = vpow2.f32 %v5739_v33 }
 0x8f1   :  { %v5639_v11 = vpop.xlane.xlu0 %5638 }
 0x8f2   :  { %v5624_v18 = vpop.xlane.xlu2 %5623  ;;  %v5709_v53 = vsub.f32 %v14216_v48, %v5639_v11 }
 0x8f3   :  { %v5704_v45 = vsub.f32 %v14221_v34, %v5624_v18  ;;  %v14401_v34 = vpop.f32.mrf.mxu1 }
 0x8f4   :  { %v14390_v46 = vpop.eup %10681  ;;  %17017 = vst [vmem:[#allocation93_spill] sm:$0xff] %v14401_v34  ;;  %v5753_v17 = vmul.f32 1.442695, %v5709_v53 }
 0x8f5   :  { %v14393_v30 = vpop.eup %10683  ;;  %v5743_v54 = vmul.f32 1.442695, %v5704_v45  ;;  %v5811_v36 = vsel %vm1214_vm2, %v14390_v46, 0.0 }
 0x8f6   :  { %v5820_v1 = vsel %vm1214_vm2, %v14393_v30, 0.0  ;;  %5806 = vadd.xlane.f32.xlu1 %v5805_v63  ;;  %v14403_v23 = vpop.eup %10685 }
 0x8f7   :  { %5821 = vadd.xlane.f32.xlu0 %v5820_v1  ;;  %5812 = vadd.xlane.f32.xlu2 %v5811_v36  ;;  %10687 = vpow2.f32 %v5743_v54  ;;  %v5808_v45 = vsel %vm1214_vm2, %v14403_v23, 0.0 }
 0x8f8   :  { %10689 = vpow2.f32 %v5753_v17 }
 0x8f9   :  { %v5642_v48 = vpop.xlane.xlu0 %5641 }
 0x8fa   :  { %v5633_v26 = vpop.xlane.xlu2 %5632  ;;  %v5710_v33 = vsub.f32 %v14233_v42, %v5642_v48 }
 0x8fb   :  { %v5707_v11 = vsub.f32 %v14237_v50, %v5633_v26  ;;  %v14415_v42 = vpop.f32.mrf.mxu1  ;;  %v5654_v50 = vpop.xlane.xlu1 %5653 }
 0x8fc   :  { %v5755_v18 = vmul.f32 1.442695, %v5710_v33  ;;  %17018 = vst [vmem:[#allocation23_spill] sm:$0xff] %v14415_v42 }
 0x8fd   :  { %v14409_v63 = vpop.eup %10687  ;;  %v5749_v54 = vmul.f32 1.442695, %v5707_v11 }
 0x8fe   :  { %10691 = vpow2.f32 %v5755_v18  ;;  %5809 = vadd.xlane.f32.xlu1 %v5808_v45  ;;  %v5814_v53 = vsel %vm1214_vm2, %v14409_v63, 0.0  ;;  %v14413_v1 = vpop.eup %10689 }
 0x8ff   :  { %5815 = vadd.xlane.f32.xlu0 %v5814_v53  ;;  %10693 = vpow2.f32 %v5749_v54  ;;  %v5829_v45 = vsel %vm1214_vm2, %v14413_v1, 0.0 }
 0x901   :  { %v5651_v36 = vpop.xlane.xlu0 %5650 }
 0x902   :  { %v5636_v17 = vpop.xlane.xlu2 %5635  ;;  %v5713_v33 = vsub.f32 %v14249_v29, %v5651_v36 }
 0x903   :  { %v5708_v48 = vsub.f32 %v14253_v61, %v5636_v17  ;;  %v14427_v61 = vpop.f32.mrf.mxu1  ;;  %v5663_v29 = vpop.xlane.xlu1 %5662 }
 0x904   :  { %v14418_v26 = vpop.eup %10691  ;;  %v5761_v53 = vmul.f32 1.442695, %v5713_v33  ;;  %17019 = vst [vmem:[#allocation70_spill] sm:$0xff] %v14427_v61 }
 0x905   :  { %v5751_v18 = vmul.f32 1.442695, %v5708_v48  ;;  %v5832_v11 = vsel %vm1214_vm2, %v14418_v26, 0.0  ;;  %v14425_v34 = vpop.eup %10693 }
 0x906   :  { %5830 = vadd.xlane.f32.xlu1 %v5829_v45  ;;  %5833 = vadd.xlane.f32.xlu2 %v5832_v11  ;;  %v5823_v36 = vsel %vm1214_vm2, %v14425_v34, 0.0 }
 0x907   :  { %10695 = vpow2.f32 %v5751_v18 }
 0x908   :  { %10697 = vpow2.f32 %v5761_v53  ;;  %v5714_v53 = vsub.f32 %v14218_v56, %v5654_v50  ;;  %v5717_v56 = vsub.f32 %v14235_v3, %v5663_v29 }
 0x909   :  { %v5645_v42 = vpop.xlane.xlu0 %5644 }
 0x90a   :  { %v5711_v54 = vsub.f32 %v14267_v0, %v5645_v42 }
 0x90c   :  { %v5757_v18 = vmul.f32 1.442695, %v5711_v54  ;;  %v5666_v54 = vpop.xlane.xlu1 %5665 }
 0x90d   :  { %v14432_v17 = vpop.eup %10695 }
 0x90e   :  { %5824 = vadd.xlane.f32.xlu1 %v5823_v36  ;;  %v5826_v48 = vsel %vm1214_vm2, %v14432_v17, 0.0  ;;  %v14436_v45 = vpop.eup %10697  ;;  %10699 = vpow2.f32 %v5757_v18  ;;  %v14444_v36 = vpop.f32.mrf.mxu1 }
 0x90f   :  { %5827 = vadd.xlane.f32.xlu2 %v5826_v48  ;;  %v5841_v42 = vsel %vm1214_vm2, %v14436_v45, 0.0  ;;  %17020 = vst [vmem:[#allocation82_spill] sm:$0xff] %v14444_v36  ;;  %v5763_v48 = vmul.f32 1.442695, %v5714_v53 }
 0x911   :  { %v5648_v33 = vpop.xlane.xlu0 %5647 }
 0x912   :  { %v5712_v11 = vsub.f32 %v14277_v2, %v5648_v33  ;;  %v5769_v33 = vmul.f32 1.442695, %v5717_v56  ;;  %v5718_v56 = vsub.f32 %v14251_v57, %v5666_v54 }
 0x913   :  { %7755 = vrot.lane.b32.xlu0 %v16890_v62, %s10934_s8 }
 0x914   :  { %v5759_v0 = vmul.f32 1.442695, %v5712_v11  ;;  %v14446_v61 = vpop.eup %10699  ;;  %v5675_v11 = vpop.xlane.xlu1 %5674 }
 0x915   :  { %v5835_v2 = vsel %vm1214_vm2, %v14446_v61, 0.0 }
 0x916   :  { %10701 = vpow2.f32 %v5759_v0  ;;  %5842 = vadd.xlane.f32.xlu1 %v5841_v42  ;;  %v14455_v18 = vpop.f32.mrf.mxu1 }
 0x917   :  { %10703 = vpow2.f32 %v5763_v48  ;;  %17021 = vst [vmem:[#allocation44_spill] sm:$0xff] %v14455_v18 }
 0x918   :  { %10705 = vpow2.f32 %v5769_v33 }
 0x919   :  { %v5657_v50 = vpop.xlane.xlu0 %5656 }
 0x91a   :  { %v5715_v0 = vsub.f32 %v14285_v35, %v5657_v50  ;;  %v5771_v50 = vmul.f32 1.442695, %v5718_v56 }
 0x91c   :  { %v14448_v39 = vpop.eup %10701  ;;  %v5765_v42 = vmul.f32 1.442695, %v5715_v0 }
 0x91d   :  { %v5838_v62 = vsel %vm1214_vm2, %v14448_v39, 0.0  ;;  %v14457_v53 = vpop.eup %10703 }
 0x91e   :  { %5836 = vadd.xlane.f32.xlu1 %v5835_v2  ;;  %5839 = vadd.xlane.f32.xlu2 %v5838_v62  ;;  %v5844_v3 = vsel %vm1214_vm2, %v14457_v53, 0.0  ;;  %v14462_v29 = vpop.f32.mrf.mxu1  ;;  %v14464_v62 = vpop.eup %10705  ;;  %10707 = vpow2.f32 %v5765_v42 }
 0x91f   :  { %v5853_v35 = vsel %vm1214_vm2, %v14464_v62, 0.0  ;;  %v14537_v31 = vmul.f32 0.35355338, %v14462_v29 }
 0x921   :  { %v5687_v48 = vpop.xlane.xlu0 %5686  ;;  %v5660_v44 = vpop.xlane.xlu2 %5659  ;;  %17034 = vst [vmem:[#allocation76_spill] sm:$0xff] %v14537_v31 }
 0x922   :  { %v5725_v33 = vsub.f32 %v14295_v7, %v5687_v48  ;;  %v5716_v57 = vsub.f32 %v14297_v20, %v5660_v44  ;;  %v5721_v20 = vsub.f32 %v14265_v13, %v5675_v11 }
 0x924   :  { %v5785_v0 = vmul.f32 1.442695, %v5725_v33  ;;  %v14471_v14 = vpop.eup %10707  ;;  %v5767_v54 = vmul.f32 1.442695, %v5716_v57 }
 0x926   :  { %5845 = vadd.xlane.f32.xlu1 %v5844_v3  ;;  %v7206_v3 = vpop.f32.mrf.mxu1 }
 0x929   :  { %v5669_v2 = vpop.xlane.xlu1 %5668 }
 0x92a   :  { %v5719_v18 = vsub.f32 %v14309_v16, %v5669_v2 }
 0x92c   :  { %v5773_v36 = vmul.f32 1.442695, %v5719_v18 }
 0x92e   :  { %10709 = vpow2.f32 %v5773_v36  ;;  %5854 = vadd.xlane.f32.xlu1 %v5853_v35  ;;  %v5847_v36 = vsel %vm1214_vm2, %v14471_v14, 0.0  ;;  %v14482_v42 = vpop.f32.mrf.mxu1 }
 0x92f   :  { %10711 = vpow2.f32 %v5771_v50  ;;  %v5777_v50 = vmul.f32 1.442695, %v5721_v20 }
 0x930   :  { %10713 = vpow2.f32 %v5785_v0 }
 0x931   :  { %v5678_v58 = vpop.xlane.xlu1 %5677  ;;  %10715 = vpow2.f32 %v5767_v54 }
 0x932   :  { %v5722_v13 = vsub.f32 %v14313_v59, %v5678_v58 }
 0x934   :  { %v14473_v16 = vpop.eup %10709  ;;  %v5779_v54 = vmul.f32 1.442695, %v5722_v13 }
 0x935   :  { %17022 = vst [vmem:[#allocation79_spill] sm:$0xff] %v14473_v16  ;;  %v5859_v7 = vsel %vm1214_vm2, %v14473_v16, 0.0  ;;  %v14480_v18 = vpop.eup %10711 }
 0x936   :  { %5860 = vadd.xlane.f32.xlu2 %v5859_v7  ;;  %5848 = vadd.xlane.f32.xlu1 %v5847_v36  ;;  %v14484_v2 = vpop.eup %10713  ;;  %v5856_v33 = vsel %vm1214_vm2, %v14480_v18, 0.0  ;;  %v14494_v7 = vpop.f32.mrf.mxu1 }
 0x937   :  { %17023 = vst [vmem:[#allocation62_spill] sm:$0xff] %v14484_v2  ;;  %v5877_v35 = vsel %vm1214_vm2, %v14484_v2, 0.0  ;;  %v14492_v57 = vpop.eup %10715 }
 0x938   :  { %v5850_v36 = vsel %vm1214_vm2, %v14492_v57, 0.0 }
 0x939   :  { %v5672_v48 = vpop.xlane.xlu1 %5671 }
 0x93a   :  { %v5720_v56 = vsub.f32 %v14319_v52, %v5672_v48  ;;  %v14503_v48 = vmul.f32 0.35355338, %v7206_v3 }
 0x93c   :  { %v5775_v44 = vmul.f32 1.442695, %v5720_v56  ;;  %v7829_v59 = vsel %vm1214_vm2, %v14503_v48, -inf }
 0x93e   :  { %10717 = vpow2.f32 %v5775_v44  ;;  %5857 = vadd.xlane.f32.xlu1 %v5856_v33  ;;  %5878 = vadd.xlane.f32.xlu2 %v5877_v35  ;;  %v14511_v33 = vpop.f32.mrf.mxu1 }
 0x93f   :  { %10719 = vpow2.f32 %v5777_v50 }
 0x940   :  { %10721 = vpow2.f32 %v5779_v54 }
 0x941   :  { %v5681_v0 = vpop.xlane.xlu1 %5680  ;;  %v14505_v56 = vpop.xlane.xlu0 %5683 }
 0x942   :  { %17025 = vst [vmem:[#allocation75_spill] sm:$0xff] %v14505_v56  ;;  %v5723_v58 = vsub.f32 %v14327_v60, %v5681_v0 }
 0x944   :  { %v14496_v52 = vpop.eup %10717  ;;  %v5781_v3 = vmul.f32 1.442695, %v5723_v58 }
 0x945   :  { %17024 = vst [vmem:[#allocation54_spill] sm:$0xff] %v14496_v52  ;;  %v5862_v11 = vsel %vm1214_vm2, %v14496_v52, 0.0  ;;  %v14509_v44 = vpop.eup %10719 }
 0x946   :  { %5863 = vadd.xlane.f32.xlu0 %v5862_v11  ;;  %5851 = vadd.xlane.f32.xlu1 %v5850_v36  ;;  %17027 = vst [vmem:[#allocation32_spill] sm:$0xff] %v14509_v44  ;;  %v5865_v35 = vsel %vm1214_vm2, %v14509_v44, 0.0  ;;  %v14520_v11 = vpop.eup %10721  ;;  %v14522_v36 = vpop.f32.mrf.mxu1 }
 0x947   :  { %17029 = vst [vmem:[#allocation24_spill] sm:$0xff] %v14520_v11  ;;  %v5868_v60 = vsel %vm1214_vm2, %v14520_v11, 0.0 }
 0x948   :  { %17030 = vst [vmem:[#allocation106_spill] sm:$0xff] %v14522_v36 }
 0x949   :  { %v14507_v20 = vpop.xlane.xlu1 %5689 }
 0x94a   :  { %17026 = vst [vmem:[#allocation34_spill] sm:$0xff] %v14507_v20 }
 0x94e   :  { %7830 = vmax.xlane.f32.xlu0 %v7829_v59  ;;  %5866 = vadd.xlane.f32.xlu1 %v5865_v35 }
 0x951   :  { %v5795_v50 = vpop.xlane.xlu1 %5794  ;;  %v14518_v13 = vpop.xlane.xlu0 %5695 }
 0x952   :  { %17028 = vst [vmem:[#allocation55_spill] sm:$0xff] %v14518_v13  ;;  %10723 = vrcp.f32 %v5795_v50  ;;  %v5900_v41 = vand.u32 2147483648, %v5795_v50  ;;  %v5898_v51 = vand.u32 2147483647, %v5795_v50  ;;  %vm5894_vm13 = vweird.f32 %v5795_v50 }
 0x953   :  { %10725 = vpow2.f32 %v5781_v3  ;;  %v14532_v3 = vpop.f32.mrf.mxu1 }
 0x954   :  { %17033 = vst [vmem:[#allocation78_spill] sm:$0xff] %v14532_v3  ;;  %v5901_v4 = vor.u32 1.1754944e-38, %v5900_v41  ;;  %vm5899_vm15 = vcmp.eq.f32.partialorder %v5898_v51, 8.507059e+37  ;;  %v10254_v41 = vunpack.i.l.bf16 %v13314_v22 }
 0x956   :  { %5869 = vadd.xlane.f32.xlu1 %v5868_v60  ;;  %7757 = vrot.lane.b32.xlu2 %v16968_v43, %s10934_s8 }
 0x958   :  { %v10724_v0 = vpop.eup %10723 }
 0x959   :  { %v5890_v54 = vmul.f32 %v10724_v0, %v5795_v50  ;;  %v14528_v59 = vpop.xlane.xlu1 %5692  ;;  %v5801_v58 = vpop.xlane.xlu0 %5800  ;;  %vm5895_vm12 = vweird.f32 %v10724_v0 }
 0x95a   :  { %17031 = vst [vmem:[#allocation127_spill] sm:$0xff] %v14528_v59  ;;  %v14530_v35 = vpop.eup %10725  ;;  %10727 = vrcp.f32 %v5801_v58  ;;  %vm5896_vm14 = vmor %vm5894_vm13, %vm5895_vm12  ;;  %v5928_v29 = vand.u32 2147483648, %v5801_v58  ;;  %v5926_v51 = vand.u32 2147483647, %v5801_v58  ;;  %vm5922_vm4 = vweird.f32 %v5801_v58 }
 0x95b   :  { %17032 = vst [vmem:[#allocation126_spill] sm:$0xff] %v14530_v35  ;;  %v5891_v55 = vsub.f32 1.0, %v5890_v54  ;;  %v5871_v60 = vsel %vm1214_vm2, %v14530_v35, 0.0 }
 0x95c   :  { %vm5927_vm6 = vcmp.eq.f32.partialorder %v5926_v51, 8.507059e+37 }
 0x95d   :  { %v5892_v47 = vmul.f32 %v10724_v0, %v5891_v55 }
 0x95e   :  { %5872 = vadd.xlane.f32.xlu1 %v5871_v60  ;;  %v7557_v60 = vpop.f32.mrf.mxu1 }
 0x95f   :  { %v5893_v43 = vadd.f32 %v10724_v0, %v5892_v47  ;;  %v14578_v2 = vmul.f32 0.35355338, %v7557_v60  ;;  %v14590_v60 = vmul.f32 0.35355338, %v14482_v42 }
 0x960   :  { %v10728_v13 = vpop.eup %10727 }
 0x961   :  { %v5897_v59 = vsel %vm5896_vm14, %v10724_v0, %v5893_v43  ;;  %v5918_v54 = vmul.f32 %v10728_v13, %v5801_v58  ;;  %v14539_v32 = vpop.xlane.xlu1 %5797  ;;  %v14541_v55 = vpop.xlane.xlu0 %5818  ;;  %vm5923_vm3 = vweird.f32 %v10728_v13  ;;  %v5929_v43 = vor.u32 1.1754944e-38, %v5928_v29  ;;  %17037 = vst [vmem:[#allocation122_spill] sm:$0xff] %v14578_v2 }
 0x962   :  { %v5902_v27 = vsel %vm5899_vm15, %v5901_v4, %v5897_v59  ;;  %v14543_v8 = vpop.xlane.xlu2 %5803  ;;  %10729 = vrcp.f32 %v14539_v32  ;;  %v7826_v4 = vsel %vm1214_vm2, %v14537_v31, -inf  ;;  %v10255_v59 = vunpack.i.h.bf16 %v13314_v22  ;;  %vm5924_vm5 = vmor %vm5922_vm4, %vm5923_vm3  ;;  %17038 = vst [vmem:[#allocation123_spill] sm:$0xff] %v14590_v60 }
 0x963   :  { %v6337_v47 = vmul.f32 %v14347_v19, %v5902_v27  ;;  %v5919_v50 = vsub.f32 1.0, %v5918_v54  ;;  %10731 = vrcp.f32 %v14543_v8  ;;  %vm5908_vm9 = vweird.f32 %v14539_v32 }
 0x964   :  { %v7844_v11 = vsel %vm1214_vm2, %v14590_v60, -inf  ;;  %vm5936_vm10 = vweird.f32 %v14543_v8 }
 0x965   :  { %v5920_v0 = vmul.f32 %v10728_v13, %v5919_v50  ;;  %9883 = vmatmul.msk.f32.vlgmr.msrb.gmra.mxu2 %vm1214_vm2, %v6337_v47  ;;  %v14558_v50 = vmul.f32 0.35355338, %v14511_v33 }
 0x966   :  { %6535 = vmatpush.msrb.mxu2 %v10254_v41  ;;  %7827 = vmax.xlane.f32.xlu1 %v7826_v4  ;;  %v7671_v21 = vpop.f32.mrf.mxu1 }
 0x967   :  { %v5921_v27 = vadd.f32 %v10728_v13, %v5920_v0  ;;  %17035 = vst [vmem:[#allocation130_spill] sm:$0xff] %v14558_v50 }
 0x968   :  { %v14553_v19 = vpop.eup %10729  ;;  %6536 = vmatpush.msrb.mxu2 %v10255_v59  ;;  %v17036_v59 = vld [vmem:[#allocation110_spill] sm:$0xff] }
 0x969   :  { %v14555_v54 = vpop.eup %10731  ;;  %v5925_v47 = vsel %vm5924_vm5, %v10728_v13, %v5921_v27  ;;  %v5904_v22 = vmul.f32 %v14553_v19, %v14539_v32  ;;  %v14562_v41 = vpop.xlane.xlu1 %5806  ;;  %v10269_v13 = vunpack.i.l.bf16 %v17036_v59  ;;  %vm5909_vm7 = vweird.f32 %v14553_v19 }
 0x96a   :  { %v5930_v4 = vsel %vm5927_vm6, %v5929_v43, %v5925_v47  ;;  %v5932_v58 = vmul.f32 %v14555_v54, %v14543_v8  ;;  %10733 = vrcp.f32 %v14562_v41  ;;  %v14567_v29 = vpop.xlane.xlu2 %5812  ;;  %v14569_v0 = vpop.xlane.xlu0 %5821  ;;  %v7862_v43 = vsel %vm1214_vm2, %v14558_v50, -inf  ;;  %vm14627_vm12 = vmor %vm5908_vm9, %vm5909_vm7 }
 0x96b   :  { %v6339_v33 = vmul.f32 %v14361_v6, %v5930_v4  ;;  %v5905_v27 = vsub.f32 1.0, %v5904_v22  ;;  %10735 = vrcp.f32 %v14567_v29  ;;  %v10270_v47 = vunpack.i.h.bf16 %v17036_v59 }
 0x96c   :  { %v5933_v51 = vsub.f32 1.0, %v5932_v58  ;;  %10737 = vrcp.f32 %v14541_v55  ;;  %v7883_v59 = vsel %vm1214_vm2, %v14578_v2, -inf  ;;  %vm5937_vm8 = vweird.f32 %v14555_v54 }
 0x96d   :  { %9885 = vmatmul.msk.f32.vlgmr.msra.gmra.mxu3 %vm1214_vm2, %v6339_v33  ;;  %v5906_v22 = vmul.f32 %v14553_v19, %v5905_v27  ;;  %v14592_v33 = vmul.f32 0.35355338, %v7671_v21  ;;  %v5942_v27 = vand.u32 2147483648, %v14543_v8  ;;  %v5914_v21 = vand.u32 2147483648, %v14539_v32  ;;  %vm14639_vm14 = vmor %vm5936_vm10, %vm5937_vm8 }
 0x96e   :  { %6570 = vmatpush.msra.mxu3 %v10269_v13  ;;  %7863 = vmax.xlane.f32.xlu1 %v7862_v43  ;;  %v5934_v6 = vmul.f32 %v14555_v54, %v5933_v51  ;;  %v5940_v51 = vand.u32 2147483647, %v14543_v8  ;;  %v5912_v43 = vand.u32 2147483647, %v14539_v32  ;;  %vm5950_vm15 = vweird.f32 %v14562_v41  ;;  %v7674_v3 = vpop.f32.mrf.mxu1 }
 0x96f   :  { %17039 = vst [vmem:[#allocation128_spill] sm:$0xff] %v14592_v33  ;;  %v5907_v35 = vadd.f32 %v14553_v19, %v5906_v22  ;;  %v7898_v12 = vsel %vm1214_vm2, %v14592_v33, -inf  ;;  %v5943_v22 = vor.u32 1.1754944e-38, %v5942_v27  ;;  %vm5978_vm6 = vweird.f32 %v14567_v29 }
 0x970   :  { %v14580_v56 = vpop.eup %10733  ;;  %6571 = vmatpush.msra.mxu3 %v10270_v47  ;;  %v5935_v2 = vadd.f32 %v14555_v54, %v5934_v6  ;;  %vm14621_vm11 = vcmp.eq.f32.partialorder %v5940_v51, 8.507059e+37  ;;  %vm14631_vm13 = vcmp.eq.f32.partialorder %v5912_v43, 8.507059e+37  ;;  %v5915_v51 = vor.u32 1.1754944e-38, %v5914_v21 }
 0x971   :  { %v5946_v4 = vmul.f32 %v14580_v56, %v14562_v41  ;;  %v14587_v58 = vpop.xlane.xlu1 %5809  ;;  %v14597_v13 = vpop.eup %10735  ;;  %vm5951_vm3 = vweird.f32 %v14580_v56  ;;  %v5911_v33 = vsel %vm14627_vm12, %v14553_v19, %v5907_v35  ;;  %v5984_v19 = vand.u32 2147483648, %v14567_v29 }
 0x972   :  { %10739 = vrcp.f32 %v14587_v58  ;;  %v14602_v50 = vpop.xlane.xlu0 %5815  ;;  %v5974_v42 = vmul.f32 %v14597_v13, %v14567_v29  ;;  %v14618_v31 = vpop.eup %10737  ;;  %v5939_v60 = vsel %vm14639_vm14, %v14555_v54, %v5935_v2  ;;  %vm5979_vm4 = vweird.f32 %v14597_v13  ;;  %vm14674_vm5 = vmor %vm5950_vm15, %vm5951_vm3 }
 0x973   :  { %v5947_v47 = vsub.f32 1.0, %v5946_v4  ;;  %10741 = vrcp.f32 %v14602_v50  ;;  %v6002_v35 = vmul.f32 %v14618_v31, %v14541_v55  ;;  %v5982_v8 = vand.u32 2147483647, %v14567_v29  ;;  %vm14687_vm7 = vmor %vm5978_vm6, %vm5979_vm4 }
 0x974   :  { %v5975_v4 = vsub.f32 1.0, %v5974_v42  ;;  %10743 = vrcp.f32 %v14569_v0  ;;  %vm5964_vm12 = vweird.f32 %v14587_v58  ;;  %vm5992_vm14 = vweird.f32 %v14602_v50 }
 0x975   :  { %v5948_v52 = vmul.f32 %v14580_v56, %v5947_v47  ;;  %vm5983_vm9 = vcmp.eq.f32.partialorder %v5982_v8, 8.507059e+37  ;;  %v10279_v32 = vunpack.i.l.bf16 %v13355_v49  ;;  %vm6007_vm6 = vweird.f32 %v14618_v31 }
 0x976   :  { %7884 = vmax.xlane.f32.xlu1 %v7883_v59  ;;  %v5976_v27 = vmul.f32 %v14597_v13, %v5975_v4  ;;  %v5954_v4 = vand.u32 2147483647, %v14562_v41 }
 0x977   :  { %v5949_v43 = vadd.f32 %v14580_v56, %v5948_v52  ;;  %v5956_v52 = vand.u32 2147483648, %v14562_v41 }
 0x978   :  { %v14635_v47 = vpop.eup %10739  ;;  %v5977_v37 = vadd.f32 %v14597_v13, %v5976_v27  ;;  %v5916_v27 = vsel %vm14631_vm13, %v5915_v51, %v5911_v33  ;;  %vm5955_vm8 = vcmp.eq.f32.partialorder %v5954_v4, 8.507059e+37  ;;  %v17054_v4 = vld [vmem:[#allocation109_spill] sm:$0xff] }
 0x979   :  { %v5960_v42 = vmul.f32 %v14635_v47, %v14587_v58  ;;  %v14655_v21 = vpop.xlane.xlu1 %5830  ;;  %v14657_v15 = vpop.xlane.xlu2 %5833  ;;  %v5953_v25 = vsel %vm14674_vm5, %v14580_v56, %v5949_v43  ;;  %v6338_v29 = vmul.f32 %v14370_v28, %v5916_v27  ;;  %v5957_v36 = vor.u32 1.1754944e-38, %v5956_v52 }
 0x97a   :  { %v14659_v20 = vpop.eup %10741  ;;  %v5981_v33 = vsel %vm14687_vm7, %v14597_v13, %v5977_v37  ;;  %v5985_v56 = vor.u32 1.1754944e-38, %v5984_v19  ;;  %v14703_v28 = vmul.f32 0.35355338, %v7674_v3  ;;  %v6003_v37 = vsub.f32 1.0, %v6002_v35 }
 0x97b   :  { %v5961_v2 = vsub.f32 1.0, %v5960_v42  ;;  %v5988_v54 = vmul.f32 %v14659_v20, %v14602_v50  ;;  %v5944_v42 = vsel %vm14621_vm11, %v5943_v22, %v5939_v60  ;;  %9884 = vmatmul.msk.f32.gmra.mxu2 %vm1214_vm2, %v6338_v29  ;;  %v14701_v22 = vmul.f32 0.35355338, %v14494_v7  ;;  %v14720_v3 = vpop.eup %10743 }
 0x97c   :  { %v6340_v60 = vmul.f32 %v14377_v40, %v5944_v42  ;;  %v5958_v59 = vsel %vm5955_vm8, %v5957_v36, %v5953_v25  ;;  %v5986_v13 = vsel %vm5983_vm9, %v5985_v56, %v5981_v33  ;;  %vm5965_vm10 = vweird.f32 %v14635_v47 }
 0x97d   :  { %v5962_v16 = vmul.f32 %v14635_v47, %v5961_v2  ;;  %v5989_v44 = vsub.f32 1.0, %v5988_v54  ;;  %vm5993_vm11 = vweird.f32 %v14659_v20  ;;  %v6341_v25 = vmul.f32 %v14387_v10, %v5958_v59  ;;  %vm14723_vm13 = vmor %vm5964_vm12, %vm5965_vm10 }
 0x97e   :  { %7899 = vmax.xlane.f32.xlu1 %v7898_v12  ;;  %9886 = vmatmul.msk.f32.gmra.mxu3 %vm1214_vm2, %v6340_v60  ;;  %v5968_v7 = vand.u32 2147483647, %v14587_v58  ;;  %v6343_v51 = vmul.f32 %v14390_v46, %v5986_v13  ;;  %v5996_v10 = vand.u32 2147483647, %v14602_v50  ;;  %vm14731_vm15 = vmor %vm5992_vm14, %vm5993_vm11  ;;  %v7901_v35 = vsel %vm1214_vm2, %v14703_v28, -inf }
 0x97f   :  { %v5990_v6 = vmul.f32 %v14659_v20, %v5989_v44  ;;  %7845 = vmax.xlane.f32.xlu2 %v7844_v11  ;;  %v5963_v12 = vadd.f32 %v14635_v47, %v5962_v16  ;;  %v5970_v44 = vand.u32 2147483648, %v14587_v58  ;;  %v5998_v16 = vand.u32 2147483648, %v14602_v50 }
 0x980   :  { %v10264_v58 = vunpack.i.l.bf16 %v17054_v4  ;;  %v6004_v19 = vmul.f32 %v14618_v31, %v6003_v37  ;;  %v6016_v8 = vmul.f32 %v14720_v3, %v14569_v0  ;;  %vm5969_vm3 = vcmp.eq.f32.partialorder %v5968_v7, 8.507059e+37 }
 0x981   :  { %v14708_v40 = vpop.xlane.xlu1 %5824  ;;  %v5991_v11 = vadd.f32 %v14659_v20, %v5990_v6  ;;  %v5967_v46 = vsel %vm14723_vm13, %v14635_v47, %v5963_v12  ;;  %v5971_v2 = vor.u32 1.1754944e-38, %v5970_v44  ;;  %v5999_v47 = vor.u32 1.1754944e-38, %v5998_v16 }
 0x982   :  { %10745 = vrcp.f32 %v14708_v40  ;;  %v14718_v36 = vpop.xlane.xlu2 %5827  ;;  %v10265_v42 = vunpack.i.h.bf16 %v17054_v4  ;;  %vm5997_vm4 = vcmp.eq.f32.partialorder %v5996_v10, 8.507059e+37  ;;  %v7847_v41 = vsel %vm1214_vm2, %v14701_v22, -inf }
 0x983   :  { %10747 = vrcp.f32 %v14718_v36  ;;  %v5995_v54 = vsel %vm14731_vm15, %v14659_v20, %v5991_v11  ;;  %9887 = vmatmul.msk.f32.vlgmr.msra.gmra.mxu2 %vm1214_vm2, %v6341_v25  ;;  %v5972_v20 = vsel %vm5969_vm3, %v5971_v2, %v5967_v46  ;;  %v10280_v29 = vunpack.i.h.bf16 %v13355_v49 }
 0x984   :  { %10749 = vrcp.f32 %v14655_v21  ;;  %6605 = vmatpush.msra.mxu2 %v10264_v58  ;;  %v6000_v60 = vsel %vm5997_vm4, %v5999_v47, %v5995_v54  ;;  %v6005_v59 = vadd.f32 %v14618_v31, %v6004_v19  ;;  %vm6006_vm5 = vweird.f32 %v14541_v55 }
 0x985   :  { %v7756_v50 = vpop.permute.xlu0 %7755  ;;  %v6010_v37 = vand.u32 2147483647, %v14541_v55  ;;  %v6017_v13 = vsub.f32 1.0, %v6016_v8  ;;  %v6342_v44 = vmul.f32 %v14403_v23, %v5972_v20  ;;  %v6012_v25 = vand.u32 2147483648, %v14541_v55  ;;  %vm14773_vm7 = vmor %vm6006_vm5, %vm6007_vm6 }
 0x986   :  { %7902 = vmax.xlane.f32.xlu1 %v7901_v35  ;;  %10009 = vmatmul.msk.f32.vlgmr.msrb.gmra.mxu1 %vm595_vm1, %v7756_v50  ;;  %10751 = vrcp.f32 %v14657_v15  ;;  %v6040_v7 = vand.u32 2147483648, %v14708_v40  ;;  %v6344_v16 = vmul.f32 %v14409_v63, %v6000_v60  ;;  %v6038_v10 = vand.u32 2147483647, %v14708_v40 }
 0x987   :  { %9889 = vmatmul.msk.f32.vlgmr.msrb.gmra.mxu3 %vm1214_vm2, %v6343_v51  ;;  %7848 = vmax.xlane.f32.xlu2 %v7847_v41  ;;  %v6009_v23 = vsel %vm14773_vm7, %v14618_v31, %v6005_v59  ;;  %v6018_v55 = vmul.f32 %v14720_v3, %v6017_v13  ;;  %vm6034_vm9 = vweird.f32 %v14708_v40  ;;  %v6013_v63 = vor.u32 1.1754944e-38, %v6012_v25 }
 0x988   :  { %v10746_v27 = vpop.eup %10745  ;;  %6640 = vmatpush.msrb.mxu3 %v10279_v32  ;;  %6606 = vmatpush.msra.mxu2 %v10265_v42  ;;  %v6041_v46 = vor.u32 1.1754944e-38, %v6040_v7  ;;  %vm6011_vm11 = vcmp.eq.f32.partialorder %v6010_v37, 8.507059e+37  ;;  %vm6039_vm12 = vcmp.eq.f32.partialorder %v6038_v10, 8.507059e+37  ;;  %vm6021_vm13 = vweird.f32 %v14720_v3 }
 0x989   :  { %v6030_v33 = vmul.f32 %v10746_v27, %v14708_v40  ;;  %v14756_v56 = vpop.xlane.xlu1 %5842  ;;  %v14758_v6 = vpop.eup %10747  ;;  %vm6035_vm8 = vweird.f32 %v10746_v27  ;;  %v6014_v54 = vsel %vm6011_vm11, %v6013_v63, %v6009_v23  ;;  %v6024_v40 = vand.u32 2147483647, %v14569_v0 }
 0x98a   :  { %6641 = vmatpush.msrb.mxu3 %v10280_v29  ;;  %v6044_v12 = vmul.f32 %v14758_v6, %v14718_v36  ;;  %v14767_v11 = vpop.eup %10749  ;;  %vm6036_vm10 = vmor %vm6034_vm9, %vm6035_vm8  ;;  %v6019_v8 = vadd.f32 %v14720_v3, %v6018_v55  ;;  %vm6049_vm14 = vweird.f32 %v14758_v6  ;;  %v10274_v41 = vunpack.i.l.bf16 %v13349_v24 }
 0x98b   :  { %v6031_v49 = vsub.f32 1.0, %v6030_v33  ;;  %v6058_v58 = vmul.f32 %v14767_v11, %v14655_v21  ;;  %9888 = vmatmul.msk.f32.gmra.mxu2 %vm1214_vm2, %v6342_v44  ;;  %v6345_v29 = vmul.f32 %v14374_v9, %v6014_v54  ;;  %vm6020_vm15 = vweird.f32 %v14569_v0 }
 0x98c   :  { %v6045_v4 = vsub.f32 1.0, %v6044_v12  ;;  %v14792_v50 = vpop.eup %10751  ;;  %v6054_v33 = vand.u32 2147483648, %v14718_v36  ;;  %vm14807_vm3 = vmor %vm6020_vm15, %vm6021_vm13  ;;  %vm6048_vm4 = vweird.f32 %v14718_v36  ;;  %v10275_v37 = vunpack.i.h.bf16 %v13349_v24 }
 0x98d   :  { %v6032_v43 = vmul.f32 %v10746_v27, %v6031_v49  ;;  %v6059_v47 = vsub.f32 1.0, %v6058_v58  ;;  %v6072_v59 = vmul.f32 %v14792_v50, %v14657_v15  ;;  %v10294_v9 = vunpack.i.l.bf16 %v13363_v38  ;;  %vm14819_vm5 = vmor %vm6048_vm4, %vm6049_vm14 }
 0x98e   :  { %v6046_v35 = vmul.f32 %v14758_v6, %v6045_v4  ;;  %v6023_v49 = vsel %vm14807_vm3, %v14720_v3, %v6019_v8  ;;  %vm14828_vm6 = vcmp.eq.f32.partialorder %v6024_v40, 8.507059e+37  ;;  %vm6062_vm7 = vweird.f32 %v14655_v21 }
 0x98f   :  { %v6033_v52 = vadd.f32 %v10746_v27, %v6032_v43  ;;  %9890 = vmatmul.msk.f32.gmra.mxu3 %vm1214_vm2, %v6344_v16  ;;  %v6066_v3 = vand.u32 2147483647, %v14655_v21  ;;  %v6055_v16 = vor.u32 1.1754944e-38, %v6054_v33  ;;  %v6073_v43 = vsub.f32 1.0, %v6072_v59 }
 0x990   :  { %v6047_v20 = vadd.f32 %v14758_v6, %v6046_v35  ;;  %vm6063_vm9 = vweird.f32 %v14767_v11  ;;  %vm6076_vm3 = vweird.f32 %v14657_v15  ;;  %vm6077_vm4 = vweird.f32 %v14792_v50 }
 0x991   :  { %v6037_v19 = vsel %vm6036_vm10, %v10746_v27, %v6033_v52  ;;  %v14788_v31 = vpop.xlane.xlu1 %5836  ;;  %v14790_v2 = vpop.xlane.xlu2 %5839  ;;  %v6026_v27 = vand.u32 2147483648, %v14569_v0  ;;  %v6060_v0 = vmul.f32 %v14767_v11, %v6059_v47  ;;  %v6068_v52 = vand.u32 2147483648, %v14655_v21  ;;  %vm14858_vm11 = vmor %vm6062_vm7, %vm6063_vm9 }
 0x992   :  { %v6042_v32 = vsel %vm6039_vm12, %v6041_v46, %v6037_v19  ;;  %10753 = vrcp.f32 %v14788_v31  ;;  %v6051_v25 = vsel %vm14819_vm5, %v14758_v6, %v6047_v20  ;;  %v6096_v63 = vand.u32 2147483648, %v14788_v31 }
 0x993   :  { %10755 = vrcp.f32 %v14790_v2  ;;  %v6347_v42 = vmul.f32 %v14425_v34, %v6042_v32  ;;  %v6052_v34 = vand.u32 2147483647, %v14718_v36  ;;  %9891 = vmatmul.msk.f32.vlgmr.msrb.gmra.mxu2 %vm1214_vm2, %v6345_v29  ;;  %v10295_v36 = vunpack.i.h.bf16 %v13363_v38 }
 0x994   :  { %10757 = vrcp.f32 %v14756_v56  ;;  %v6027_v24 = vor.u32 1.1754944e-38, %v6026_v27  ;;  %6675 = vmatpush.msrb.mxu2 %v10274_v41  ;;  %v6061_v4 = vadd.f32 %v14767_v11, %v6060_v0  ;;  %v6094_v19 = vand.u32 2147483647, %v14788_v31 }
 0x995   :  { %vm6053_vm8 = vcmp.eq.f32.partialorder %v6052_v34, 8.507059e+37  ;;  %v6074_v32 = vmul.f32 %v14792_v50, %v6073_v43  ;;  %vm6090_vm12 = vweird.f32 %v14788_v31  ;;  %v6097_v21 = vor.u32 1.1754944e-38, %v6096_v63 }
 0x996   :  { %6676 = vmatpush.msrb.mxu2 %v10275_v37  ;;  %v6028_v6 = vsel %vm14828_vm6, %v6027_v24, %v6023_v49  ;;  %v6056_v55 = vsel %vm6053_vm8, %v6055_v16, %v6051_v25  ;;  %v6065_v47 = vsel %vm14858_vm11, %v14767_v11, %v6061_v4  ;;  %vm6067_vm14 = vcmp.eq.f32.partialorder %v6066_v3, 8.507059e+37  ;;  %vm14893_vm6 = vmor %vm6076_vm3, %vm6077_vm4 }
 0x997   :  { %9893 = vmatmul.msk.f32.vlgmr.msra.gmra.mxu3 %vm1214_vm2, %v6347_v42  ;;  %v6346_v54 = vmul.f32 %v14393_v30, %v6028_v6  ;;  %v6348_v8 = vmul.f32 %v14432_v17, %v6056_v55  ;;  %v6069_v30 = vor.u32 1.1754944e-38, %v6068_v52  ;;  %vm6095_vm15 = vcmp.eq.f32.partialorder %v6094_v19, 8.507059e+37 }
 0x998   :  { %v10754_v12 = vpop.eup %10753  ;;  %6710 = vmatpush.msra.mxu3 %v10294_v9  ;;  %v6075_v33 = vadd.f32 %v14792_v50, %v6074_v32  ;;  %v6080_v60 = vand.u32 2147483647, %v14657_v15  ;;  %v6082_v34 = vand.u32 2147483648, %v14657_v15  ;;  %v6110_v13 = vand.u32 2147483648, %v14790_v2 }
 0x999   :  { %v14836_v7 = vpop.eup %10755  ;;  %v6086_v38 = vmul.f32 %v10754_v12, %v14788_v31  ;;  %v14841_v51 = vpop.xlane.xlu1 %5845  ;;  %vm6091_vm10 = vweird.f32 %v10754_v12  ;;  %v6070_v29 = vsel %vm6067_vm14, %v6069_v30, %v6065_v47  ;;  %vm6104_vm7 = vweird.f32 %v14790_v2 }
 0x99a   :  { %v6100_v10 = vmul.f32 %v14836_v7, %v14790_v2  ;;  %6711 = vmatpush.msra.mxu3 %v10295_v36  ;;  %v14849_v58 = vpop.eup %10757  ;;  %10759 = vrcp.f32 %v14841_v51  ;;  %vm6092_vm13 = vmor %vm6090_vm12, %vm6091_vm10  ;;  %vm6105_vm5 = vweird.f32 %v14836_v7  ;;  %v6349_v0 = vmul.f32 %v14413_v1, %v6070_v29  ;;  %v17070_v1 = vld [vmem:[#allocation81_spill] sm:$0xff] }
 0x99b   :  { %v6087_v23 = vsub.f32 1.0, %v6086_v38  ;;  %v6114_v27 = vmul.f32 %v14849_v58, %v14756_v56  ;;  %9892 = vmatmul.msk.f32.gmra.mxu2 %vm1214_vm2, %v6346_v54  ;;  %v10304_v24 = vunpack.i.l.bf16 %v17070_v1  ;;  %vm14901_vm8 = vmor %vm6104_vm7, %vm6105_vm5  ;;  %v6079_v15 = vsel %vm14893_vm6, %v14792_v50, %v6075_v33 }
 0x99c   :  { %v6101_v46 = vsub.f32 1.0, %v6100_v10  ;;  %v6083_v38 = vor.u32 1.1754944e-38, %v6082_v34  ;;  %v10305_v43 = vunpack.i.h.bf16 %v17070_v1  ;;  %vm6081_vm9 = vcmp.eq.f32.partialorder %v6080_v60, 8.507059e+37 }
 0x99d   :  { %v6088_v35 = vmul.f32 %v10754_v12, %v6087_v23  ;;  %v6115_v59 = vsub.f32 1.0, %v6114_v27  ;;  %v6111_v10 = vor.u32 1.1754944e-38, %v6110_v13  ;;  %vm6119_vm11 = vweird.f32 %v14849_v58 }
 0x99e   :  { %v6102_v20 = vmul.f32 %v14836_v7, %v6101_v46  ;;  %v6084_v50 = vsel %vm6081_vm9, %v6083_v38, %v6079_v15  ;;  %v6124_v63 = vand.u32 2147483648, %v14756_v56  ;;  %vm6118_vm12 = vweird.f32 %v14756_v56 }
 0x99f   :  { %v6089_v42 = vadd.f32 %v10754_v12, %v6088_v35  ;;  %9894 = vmatmul.msk.f32.gmra.mxu3 %vm1214_vm2, %v6348_v8  ;;  %v6116_v25 = vmul.f32 %v14849_v58, %v6115_v59  ;;  %v6122_v46 = vand.u32 2147483647, %v14756_v56  ;;  %v6350_v19 = vmul.f32 %v14418_v26, %v6084_v50 }
 0x9a0   :  { %v14875_v11 = vpop.eup %10759  ;;  %v6103_v9 = vadd.f32 %v14836_v7, %v6102_v20  ;;  %v6125_v8 = vor.u32 1.1754944e-38, %v6124_v63  ;;  %vm6132_vm3 = vweird.f32 %v14841_v51  ;;  %v6136_v29 = vand.u32 2147483647, %v14841_v51 }
 0x9a1   :  { %v6093_v17 = vsel %vm6092_vm13, %v10754_v12, %v6089_v42  ;;  %v14873_v41 = vpop.xlane.xlu1 %5854  ;;  %v6128_v49 = vmul.f32 %v14875_v11, %v14841_v51  ;;  %v17067_v12 = vld [vmem:[#allocation105_spill] sm:$0xff]  ;;  %v6117_v52 = vadd.f32 %v14849_v58, %v6116_v25  ;;  %vm6120_vm13 = vmor %vm6118_vm12, %vm6119_vm11  ;;  %vm6123_vm14 = vcmp.eq.f32.partialorder %v6122_v46, 8.507059e+37 }
 0x9a2   :  { %v6098_v31 = vsel %vm6095_vm15, %v6097_v21, %v6093_v17  ;;  %10761 = vrcp.f32 %v14873_v41  ;;  %v10289_v36 = vunpack.i.l.bf16 %v17067_v12  ;;  %v10290_v16 = vunpack.i.h.bf16 %v17067_v12  ;;  %v17073_v21 = vld [vmem:[#allocation113_spill] sm:$0xff] }
 0x9a3   :  { %v6351_v37 = vmul.f32 %v14446_v61, %v6098_v31  ;;  %v6108_v61 = vand.u32 2147483647, %v14790_v2  ;;  %9895 = vmatmul.msk.f32.vlgmr.msra.gmra.mxu2 %vm1214_vm2, %v6349_v0  ;;  %v6107_v2 = vsel %vm14901_vm8, %v14836_v7, %v6103_v9  ;;  %v6129_v6 = vsub.f32 1.0, %v6128_v49 }
 0x9a4   :  { %6745 = vmatpush.msra.mxu2 %v10289_v36  ;;  %v6121_v32 = vsel %vm6120_vm13, %v14849_v58, %v6117_v52  ;;  %vm6133_vm15 = vweird.f32 %v14875_v11  ;;  %v6138_v58 = vand.u32 2147483648, %v14841_v51  ;;  %v10299_v20 = vunpack.i.l.bf16 %v17073_v21 }
 0x9a5   :  { %vm6109_vm10 = vcmp.eq.f32.partialorder %v6108_v61, 8.507059e+37  ;;  %v6130_v35 = vmul.f32 %v14875_v11, %v6129_v6  ;;  %v6126_v42 = vsel %vm6123_vm14, %v6125_v8, %v6121_v32  ;;  %vm14946_vm4 = vmor %vm6132_vm3, %vm6133_vm15  ;;  %vm6137_vm6 = vcmp.eq.f32.partialorder %v6136_v29, 8.507059e+37 }
 0x9a6   :  { %6746 = vmatpush.msra.mxu2 %v10290_v16  ;;  %v6112_v7 = vsel %vm6109_vm10, %v6111_v10, %v6107_v2  ;;  %v6353_v33 = vmul.f32 %v14436_v45, %v6126_v42  ;;  %v6139_v0 = vor.u32 1.1754944e-38, %v6138_v58  ;;  %v10300_v45 = vunpack.i.h.bf16 %v17073_v21 }
 0x9a7   :  { %9897 = vmatmul.msk.f32.vlgmr.msrb.gmra.mxu3 %vm1214_vm2, %v6351_v37  ;;  %v6352_v40 = vmul.f32 %v14448_v39, %v6112_v7  ;;  %v6131_v56 = vadd.f32 %v14875_v11, %v6130_v35  ;;  %v6180_v15 = vand.u32 2147483648, %v14873_v41  ;;  %vm6174_vm11 = vweird.f32 %v14873_v41 }
 0x9a8   :  { %6780 = vmatpush.msrb.mxu3 %v10304_v24  ;;  %v14919_v55 = vpop.eup %10761  ;;  %v6178_v2 = vand.u32 2147483647, %v14873_v41  ;;  %v10319_v10 = vunpack.i.l.bf16 %v13836_v5 }
 0x9a9   :  { %v14915_v4 = vpop.xlane.xlu2 %5860  ;;  %v14917_v23 = vpop.xlane.xlu1 %5848  ;;  %v6170_v54 = vmul.f32 %v14919_v55, %v14873_v41  ;;  %v6135_v59 = vsel %vm14946_vm4, %v14875_v11, %v6131_v56  ;;  %vm6175_vm8 = vweird.f32 %v14919_v55  ;;  %v6181_v41 = vor.u32 1.1754944e-38, %v6180_v15 }
 0x9aa   :  { %6781 = vmatpush.msrb.mxu3 %v10305_v43  ;;  %10763 = vrcp.f32 %v14917_v23  ;;  %v6152_v60 = vand.u32 2147483648, %v14917_v23  ;;  %v6150_v9 = vand.u32 2147483647, %v14917_v23  ;;  %vm6146_vm7 = vweird.f32 %v14917_v23  ;;  %vm6176_vm12 = vmor %vm6174_vm11, %vm6175_vm8 }
 0x9ab   :  { %9896 = vmatmul.msk.f32.gmra.mxu2 %vm1214_vm2, %v6350_v19  ;;  %v6171_v30 = vsub.f32 1.0, %v6170_v54  ;;  %v6140_v36 = vsel %vm6137_vm6, %v6139_v0, %v6135_v59  ;;  %vm6179_vm13 = vcmp.eq.f32.partialorder %v6178_v2, 8.507059e+37 }
 0x9ac   :  { %v6153_v49 = vor.u32 1.1754944e-38, %v6152_v60  ;;  %vm6151_vm10 = vcmp.eq.f32.partialorder %v6150_v9, 8.507059e+37  ;;  %v17093_v60 = vld [vmem:[#allocation78_spill] sm:$0xff] }
 0x9ad   :  { %v6172_v34 = vmul.f32 %v14919_v55, %v6171_v30  ;;  %v17089_v30 = vld [vmem:[#allocation51_spill] sm:$0xff] }
 0x9af   :  { %9898 = vmatmul.msk.f32.gmra.mxu3 %vm1214_vm2, %v6352_v40  ;;  %v6173_v1 = vadd.f32 %v14919_v55, %v6172_v34  ;;  %v587_v34 = vld [vmem:[%s16321_s5 + $0x10] sm:$0xff] }
 0x9b0   :  { %v10764_v47 = vpop.eup %10763  ;;  %7040 = vmatpush.msra.mxu0 %v587_v34 }
 0x9b1   :  { %v14937_v26 = vpop.xlane.xlu1 %5857  ;;  %v14939_v27 = vpop.xlane.xlu2 %5878  ;;  %v6142_v39 = vmul.f32 %v10764_v47, %v14917_v23  ;;  %vm6147_vm5 = vweird.f32 %v10764_v47  ;;  %v6354_v23 = vmul.f32 %v14457_v53, %v6140_v36  ;;  %v6177_v50 = vsel %vm6176_vm12, %v14919_v55, %v6173_v1 }
 0x9b2   :  { %10765 = vrcp.f32 %v14937_v26  ;;  %vm14965_vm9 = vmor %vm6146_vm7, %vm6147_vm5  ;;  %v6182_v63 = vsel %vm6179_vm13, %v6181_v41, %v6177_v50  ;;  %v6194_v19 = vand.u32 2147483648, %v14937_v26  ;;  %vm6188_vm15 = vweird.f32 %v14937_v26 }
 0x9b3   :  { %v6143_v31 = vsub.f32 1.0, %v6142_v39  ;;  %10767 = vrcp.f32 %v14915_v4  ;;  %9899 = vmatmul.msk.f32.vlgmr.msrb.gmra.mxu2 %vm1214_vm2, %v6353_v33  ;;  %v6192_v40 = vand.u32 2147483647, %v14937_v26  ;;  %v6357_v42 = vmul.f32 %v14464_v62, %v6182_v63 }
 0x9b4   :  { %6815 = vmatpush.msrb.mxu2 %v10299_v20  ;;  %v6195_v62 = vor.u32 1.1754944e-38, %v6194_v19  ;;  %v6206_v1 = vand.u32 2147483647, %v14915_v4 }
 0x9b5   :  { %v6144_v37 = vmul.f32 %v10764_v47, %v6143_v31  ;;  %vm6193_vm5 = vcmp.eq.f32.partialorder %v6192_v40, 8.507059e+37 }
 0x9b6   :  { %6816 = vmatpush.msrb.mxu2 %v10300_v45 }
 0x9b7   :  { %v6145_v13 = vadd.f32 %v10764_v47, %v6144_v37 }
 0x9b8   :  { %v14960_v51 = vpop.eup %10765 }
 0x9b9   :  { %v6184_v12 = vmul.f32 %v14960_v51, %v14937_v26  ;;  %v14971_v44 = vpop.xlane.xlu1 %5851  ;;  %v7758_v61 = vpop.permute.xlu2 %7757  ;;  %v6149_v24 = vsel %vm14965_vm9, %v10764_v47, %v6145_v13  ;;  %vm6189_vm14 = vweird.f32 %v14960_v51  ;;  %v17078_v47 = vld [vmem:[#allocation112_spill] sm:$0xff] }
 0x9ba   :  { %10769 = vrcp.f32 %v14971_v44  ;;  %v14977_v25 = vpop.xlane.xlu0 %5863  ;;  %10010 = vmatmul.msk.f32.gmra.mxu1 %vm595_vm1, %v7758_v61  ;;  %v14980_v3 = vpop.eup %10767  ;;  %v6154_v16 = vsel %vm6151_vm10, %v6153_v49, %v6149_v24  ;;  %v10314_v56 = vunpack.i.l.bf16 %v17078_v47  ;;  %vm15014_vm3 = vmor %vm6188_vm15, %vm6189_vm14  ;;  %v6166_v39 = vand.u32 2147483648, %v14971_v44 }
 0x9bb   :  { %v6185_v38 = vsub.f32 1.0, %v6184_v12  ;;  %v6355_v43 = vmul.f32 %v14471_v14, %v6154_v16  ;;  %10771 = vrcp.f32 %v14977_v25  ;;  %v6198_v52 = vmul.f32 %v14980_v3, %v14915_v4  ;;  %9900 = vmatmul.msk.f32.gmra.mxu2 %vm1214_vm2, %v6354_v23  ;;  %v15047_v49 = vpop.f32.mrf.mxu0 }
 0x9bc   :  { %v10320_v14 = vunpack.i.h.bf16 %v13836_v5  ;;  %v6164_v20 = vand.u32 2147483647, %v14971_v44  ;;  %vm6160_vm6 = vweird.f32 %v14971_v44  ;;  %v10315_v33 = vunpack.i.h.bf16 %v17078_v47  ;;  %17083 = vst [vmem:[#allocation129_spill] sm:$0xff] %v15047_v49  ;;  %v17196_v49 = vld [vmem:[#allocation102_spill] sm:$0xff] }
 0x9bd   :  { %v6186_v6 = vmul.f32 %v14960_v51, %v6185_v38  ;;  %9901 = vmatmul.msk.f32.vlgmr.msra.gmra.mxu3 %vm1214_vm2, %v6355_v43  ;;  %v6199_v35 = vsub.f32 1.0, %v6198_v52  ;;  %vm6203_vm8 = vweird.f32 %v14980_v3  ;;  %v6167_v37 = vor.u32 1.1754944e-38, %v6166_v39  ;;  %v17086_v52 = vld [vmem:[#allocation106_spill] sm:$0xff] }
 0x9be   :  { %6850 = vmatpush.msra.mxu3 %v10319_v10  ;;  %vm6165_vm9 = vcmp.eq.f32.partialorder %v6164_v20, 8.507059e+37  ;;  %v6208_v12 = vand.u32 2147483648, %v14915_v4  ;;  %vm6202_vm10 = vweird.f32 %v14915_v4  ;;  %vm6207_vm14 = vcmp.eq.f32.partialorder %v6206_v1, 8.507059e+37 }
 0x9bf   :  { %v6187_v53 = vadd.f32 %v14960_v51, %v6186_v6  ;;  %v6200_v21 = vmul.f32 %v14980_v3, %v6199_v35  ;;  %vm15059_vm11 = vmor %vm6202_vm10, %vm6203_vm8  ;;  %v6222_v19 = vand.u32 2147483648, %v14977_v25  ;;  %v10329_v39 = vunpack.i.l.bf16 %v17089_v30 }
 0x9c0   :  { %v10770_v7 = vpop.eup %10769  ;;  %6851 = vmatpush.msra.mxu3 %v10320_v14  ;;  %v6209_v10 = vor.u32 1.1754944e-38, %v6208_v12 }
 0x9c1   :  { %v6156_v55 = vmul.f32 %v10770_v7, %v14971_v44  ;;  %v15001_v46 = vpop.xlane.xlu1 %5866  ;;  %v15005_v54 = vpop.eup %10771  ;;  %vm6161_vm4 = vweird.f32 %v10770_v7  ;;  %v6201_v13 = vadd.f32 %v14980_v3, %v6200_v21 }
 0x9c2   :  { %10773 = vrcp.f32 %v15001_v46  ;;  %v7831_v5 = vpop.xlane.xlu0 %7830  ;;  %v6212_v17 = vmul.f32 %v15005_v54, %v14977_v25  ;;  %vm15030_vm7 = vmor %vm6160_vm6, %vm6161_vm4  ;;  %v6236_v24 = vand.u32 2147483648, %v15001_v46  ;;  %vm6230_vm13 = vweird.f32 %v15001_v46 }
 0x9c3   :  { %v6157_v32 = vsub.f32 1.0, %v6156_v55  ;;  %v7923_v8 = vsub.f32 %v14503_v48, %v7831_v5  ;;  %10775 = vrcp.f32 %v14939_v27  ;;  %v6191_v48 = vsel %vm15014_vm3, %v14960_v51, %v6187_v53  ;;  %9903 = vmatmul.msk.f32.vlgmr.msra.gmra.mxu2 %vm1214_vm2, %v6357_v42  ;;  %v17087_v5 = vld [vmem:[#allocation32_spill] sm:$0xff] }
 0x9c4   :  { %6885 = vmatpush.msra.mxu2 %v10314_v56  ;;  %v6196_v59 = vsel %vm6193_vm5, %v6195_v62, %v6191_v48  ;;  %v6213_v11 = vsub.f32 1.0, %v6212_v17  ;;  %v6205_v4 = vsel %vm15059_vm11, %v14980_v3, %v6201_v13  ;;  %v15076_v3 = vmul.f32 0.35355338, %v17086_v52  ;;  %v17095_v13 = vld [vmem:[#allocation34_spill] sm:$0xff] }
 0x9c5   :  { %v6158_v58 = vmul.f32 %v10770_v7, %v6157_v32  ;;  %v7956_v26 = vmul.f32 1.442695, %v7923_v8  ;;  %v6358_v44 = vmul.f32 %v14480_v18, %v6196_v59  ;;  %v6234_v18 = vand.u32 2147483647, %v15001_v46  ;;  %v17088_v8 = vld [vmem:[#allocation79_spill] sm:$0xff] }
 0x9c6   :  { %6886 = vmatpush.msra.mxu2 %v10315_v33  ;;  %v6214_v43 = vmul.f32 %v15005_v54, %v6213_v11  ;;  %v6237_v14 = vor.u32 1.1754944e-38, %v6236_v24  ;;  %v6210_v41 = vsel %vm6207_vm14, %v6209_v10, %v6205_v4  ;;  %vm6217_vm4 = vweird.f32 %v15005_v54  ;;  %v17096_v11 = vld [vmem:[#allocation90_spill] sm:$0xff] }
 0x9c7   :  { %v6159_v29 = vadd.f32 %v10770_v7, %v6158_v58  ;;  %10777 = vpow2.f32 %v7956_v26  ;;  %vm6235_vm3 = vcmp.eq.f32.partialorder %v6234_v18, 8.507059e+37  ;;  %v6359_v47 = vmul.f32 %v17088_v8, %v6210_v41  ;;  %v15092_v58 = vpop.f32.mrf.mxu0  ;;  %v17106_v8 = vld [vmem:[#allocation124_spill] sm:$0xff] }
 0x9c8   :  { %v10774_v31 = vpop.eup %10773  ;;  %v6215_v55 = vadd.f32 %v15005_v54, %v6214_v43  ;;  %vm6216_vm5 = vweird.f32 %v14977_v25  ;;  %v6220_v56 = vand.u32 2147483647, %v14977_v25  ;;  %17090 = vst [vmem:[#allocation97_spill] sm:$0xff] %v15092_v58  ;;  %v10330_v62 = vunpack.i.h.bf16 %v17089_v30  ;;  %v17099_v43 = vld [vmem:[#allocation4_spill] sm:$0xff] }
 0x9c9   :  { %v6226_v9 = vmul.f32 %v10774_v31, %v15001_v46  ;;  %v15039_v0 = vpop.xlane.xlu1 %5869  ;;  %v6163_v51 = vsel %vm15030_vm7, %v10770_v7, %v6159_v29  ;;  %v15043_v45 = vpop.eup %10775  ;;  %vm6231_vm12 = vweird.f32 %v10774_v31  ;;  %vm15094_vm6 = vmor %vm6216_vm5, %vm6217_vm4  ;;  %v7865_v25 = vsel %vm1214_vm2, %v15076_v3, -inf }
 0x9ca   :  { %10779 = vrcp.f32 %v15039_v0  ;;  %v6168_v61 = vsel %vm6165_vm9, %v6167_v37, %v6163_v51  ;;  %v6282_v6 = vmul.f32 %v15043_v45, %v14939_v27  ;;  %vm6232_vm15 = vmor %vm6230_vm13, %vm6231_vm12  ;;  %v6250_v42 = vand.u32 2147483648, %v15039_v0  ;;  %v17094_v37 = vld [vmem:[#allocation64_spill] sm:$0xff] }
 0x9cb   :  { %v6227_v36 = vsub.f32 1.0, %v6226_v9  ;;  %v6356_v15 = vmul.f32 %v14492_v57, %v6168_v61  ;;  %9904 = vmatmul.msk.f32.gmra.mxu2 %vm1214_vm2, %v6358_v44  ;;  %v6248_v21 = vand.u32 2147483647, %v15039_v0  ;;  %v6219_v20 = vsel %vm15094_vm6, %v15005_v54, %v6215_v55 }
 0x9cc   :  { %v6283_v35 = vsub.f32 1.0, %v6282_v6  ;;  %v6223_v29 = vor.u32 1.1754944e-38, %v6222_v19  ;;  %vm6244_vm8 = vweird.f32 %v15039_v0  ;;  %v15110_v59 = vmul.f32 0.35355338, %v17093_v60 }
 0x9cd   :  { %v15055_v16 = vpop.eup %10777  ;;  %v6228_v2 = vmul.f32 %v10774_v31, %v6227_v36  ;;  %9902 = vmatmul.msk.f32.gmra.mxu3 %vm1214_vm2, %v6356_v15  ;;  %vm6221_vm9 = vcmp.eq.f32.partialorder %v6220_v56, 8.507059e+37  ;;  %v6251_v34 = vor.u32 1.1754944e-38, %v6250_v42  ;;  %vm6249_vm11 = vcmp.eq.f32.partialorder %v6248_v21, 8.507059e+37  ;;  %v17097_v36 = vld [vmem:[#allocation76_spill] sm:$0xff]  ;;  %v17107_v56 = vld [vmem:[#allocation62_spill] sm:$0xff] }
 0x9ce   :  { %v8021_v57 = vsel %vm1214_vm2, %v15055_v16, 0.0  ;;  %v6284_v17 = vmul.f32 %v15043_v45, %v6283_v35  ;;  %v5726_v12 = vsub.f32 %v17096_v11, %v17095_v13  ;;  %vm6286_vm12 = vweird.f32 %v14939_v27  ;;  %v17098_v15 = vld [vmem:[#allocation24_spill] sm:$0xff] }
 0x9cf   :  { %v6229_v23 = vadd.f32 %v10774_v31, %v6228_v2  ;;  %8022 = vadd.xlane.f32.xlu2 %v8021_v57  ;;  %vm6287_vm13 = vweird.f32 %v15043_v45  ;;  %v6292_v2 = vand.u32 2147483648, %v14939_v27  ;;  %v17100_v57 = vld [vmem:[#allocation54_spill] sm:$0xff]  ;;  %v6290_v6 = vand.u32 2147483647, %v14939_v27 }
 0x9d0   :  { %v10780_v50 = vpop.eup %10779  ;;  %v6285_v1 = vadd.f32 %v15043_v45, %v6284_v17  ;;  %v7880_v27 = vsel %vm1214_vm2, %v15110_v59, -inf  ;;  %v17112_v17 = vld [vmem:[#allocation127_spill] sm:$0xff] }
 0x9d1   :  { %v6233_v7 = vsel %vm6232_vm15, %v10774_v31, %v6229_v23  ;;  %v6240_v63 = vmul.f32 %v10780_v50, %v15039_v0  ;;  %v15080_v53 = vpop.xlane.xlu1 %5872  ;;  %vm6245_vm7 = vweird.f32 %v10780_v50  ;;  %v6224_v0 = vsel %vm6221_vm9, %v6223_v29, %v6219_v20  ;;  %vm15132_vm15 = vmor %vm6286_vm12, %vm6287_vm13  ;;  %v17111_v20 = vld [vmem:[#allocation22_spill] sm:$0xff]  ;;  %v17113_v29 = vld [vmem:[#allocation60_spill] sm:$0xff] }
 0x9d2   :  { %v6238_v46 = vsel %vm6235_vm3, %v6237_v14, %v6233_v7  ;;  %10781 = vrcp.f32 %v15080_v53  ;;  %vm6246_vm10 = vmor %vm6244_vm8, %vm6245_vm7  ;;  %v6264_v18 = vand.u32 2147483648, %v15080_v53  ;;  %v6360_v10 = vmul.f32 %v17100_v57, %v6224_v0  ;;  %v15137_v14 = vpop.f32.mrf.mxu0  ;;  %v17116_v0 = vld [vmem:[#allocation55_spill] sm:$0xff] }
 0x9d3   :  { %v6361_v40 = vmul.f32 %v17087_v5, %v6238_v46  ;;  %v6241_v32 = vsub.f32 1.0, %v6240_v63  ;;  %17103 = vst [vmem:[#allocation131_spill] sm:$0xff] %v15137_v14  ;;  %v6289_v41 = vsel %vm15132_vm15, %v15043_v45, %v6285_v1  ;;  %vm6258_vm3 = vweird.f32 %v15080_v53 }
 0x9d4   :  { %v5787_v63 = vmul.f32 1.442695, %v5726_v12  ;;  %v6293_v55 = vor.u32 1.1754944e-38, %v6292_v2  ;;  %v6265_v46 = vor.u32 1.1754944e-38, %v6264_v18  ;;  %vm6291_vm5 = vcmp.eq.f32.partialorder %v6290_v6, 8.507059e+37  ;;  %v17120_v2 = vld [vmem:[#allocation8_spill] sm:$0xff] }
 0x9d5   :  { %v6242_v48 = vmul.f32 %v10780_v50, %v6241_v32  ;;  %9905 = vmatmul.msk.f32.vlgmr.msrb.gmra.mxu3 %vm1214_vm2, %v6359_v47  ;;  %9907 = vmatmul.msk.f32.vlgmr.msrb.gmra.mxu2 %vm1214_vm2, %v6361_v40  ;;  %v17104_v40 = vld [vmem:[#allocation126_spill] sm:$0xff] }
 0x9d6   :  { %6920 = vmatpush.msrb.mxu3 %v10329_v39  ;;  %9951 = vmatpush.xpose.msk.msrb.mxu2 %vm595_vm1, %v17094_v37  ;;  %v6294_v19 = vsel %vm6291_vm5, %v6293_v55, %v6289_v41  ;;  %v17108_v39 = vld [vmem:[#allocation5_spill] sm:$0xff]  ;;  %v17123_v41 = vld [vmem:[#allocation130_spill] sm:$0xff] }
 0x9d7   :  { %v6243_v31 = vadd.f32 %v10780_v50, %v6242_v48  ;;  %7866 = vmax.xlane.f32.xlu2 %v7865_v25  ;;  %v6365_v42 = vmul.f32 %v17107_v56, %v6294_v19  ;;  %v17109_v48 = vld [vmem:[#allocation12_spill] sm:$0xff] }
 0x9d8   :  { %v10782_v33 = vpop.eup %10781  ;;  %6921 = vmatpush.msrb.mxu3 %v10330_v62  ;;  %v17127_v19 = vld [vmem:[#allocation20_spill] sm:$0xff] }
 0x9d9   :  { %v6254_v54 = vmul.f32 %v10782_v33, %v15080_v53  ;;  %v7828_v9 = vpop.xlane.xlu1 %7827  ;;  %v6247_v51 = vsel %vm6246_vm10, %v10780_v50, %v6243_v31  ;;  %vm6259_vm14 = vweird.f32 %v10782_v33  ;;  %v6262_v50 = vand.u32 2147483647, %v15080_v53  ;;  %v17105_v53 = vld [vmem:[#allocation75_spill] sm:$0xff] }
 0x9da   :  { %v7922_v44 = vsub.f32 %v17097_v36, %v7828_v9  ;;  %v6252_v61 = vsel %vm6249_vm11, %v6251_v34, %v6247_v51  ;;  %9952 = vmatpush.xpose.msk.msrb.mxu2 %vm595_vm1, %v17099_v43  ;;  %vm6260_vm4 = vmor %vm6258_vm3, %vm6259_vm14  ;;  %v5724_v47 = vsub.f32 %v17106_v8, %v17105_v53  ;;  %v15160_v62 = vpop.f32.mrf.mxu0  ;;  %v5727_v31 = vsub.f32 %v17113_v29, %v17112_v17  ;;  %v17117_v51 = vld [vmem:[#allocation116_spill] sm:$0xff]  ;;  %v17132_v17 = vld [vmem:[#allocation17_spill] sm:$0xff] }
 0x9db   :  { %v6255_v24 = vsub.f32 1.0, %v6254_v54  ;;  %v6362_v38 = vmul.f32 %v17098_v15, %v6252_v61  ;;  %vm6263_vm6 = vcmp.eq.f32.partialorder %v6262_v50, 8.507059e+37  ;;  %17110 = vst [vmem:[#allocation132_spill] sm:$0xff] %v15160_v62  ;;  %v5728_v13 = vsub.f32 %v17117_v51, %v17116_v0  ;;  %v17118_v36 = vld [vmem:[#allocation28_spill] sm:$0xff] }
 0x9dc   :  { %v7954_v4 = vmul.f32 1.442695, %v7922_v44  ;;  %v5783_v26 = vmul.f32 1.442695, %v5724_v47  ;;  %v5789_v34 = vmul.f32 1.442695, %v5727_v31 }
 0x9dd   :  { %v6256_v23 = vmul.f32 %v10782_v33, %v6255_v24  ;;  %9906 = vmatmul.msk.f32.gmra.mxu3 %vm1214_vm2, %v6360_v10  ;;  %9908 = vmatmul.msk.f32.gmra.mxu2 %vm1214_vm2, %v6362_v38  ;;  %v5791_v12 = vmul.f32 1.442695, %v5728_v13 }
 0x9de   :  { %10783 = vpow2.f32 %v7954_v4 }
 0x9df   :  { %v6257_v7 = vadd.f32 %v10782_v33, %v6256_v23  ;;  %7881 = vmax.xlane.f32.xlu2 %v7880_v27  ;;  %10785 = vpow2.f32 %v5787_v63  ;;  %v17124_v63 = vld [vmem:[#allocation49_spill] sm:$0xff] }
 0x9e0   :  { %10787 = vpow2.f32 %v5783_v26 }
 0x9e1   :  { %v6261_v35 = vsel %vm6260_vm4, %v10782_v33, %v6257_v7  ;;  %v17114_v33 = vld [vmem:[#allocation25_spill] sm:$0xff]  ;;  %10789 = vpow2.f32 %v5789_v34  ;;  %v7864_v52 = vpop.xlane.xlu1 %7863 }
 0x9e2   :  { %v6266_v5 = vsel %vm6263_vm6, %v6265_v46, %v6261_v35  ;;  %v15175_v9 = vpop.f32.mrf.mxu0  ;;  %10791 = vpow2.f32 %v5791_v12  ;;  %v7934_v7 = vsub.f32 %v17123_v41, %v7864_v52  ;;  %v17126_v35 = vld [vmem:[#allocation9_spill] sm:$0xff]  ;;  %v17139_v52 = vld [vmem:[#allocation122_spill] sm:$0xff] }
 0x9e3   :  { %v6363_v45 = vmul.f32 %v17104_v40, %v6266_v5  ;;  %17115 = vst [vmem:[#allocation110_spill] sm:$0xff] %v15175_v9  ;;  %v10351_v5 = vpack.i.bf16 %v17127_v19, %v17126_v35 }
 0x9e4   :  { %v15147_v32 = vpop.eup %10783  ;;  %v7978_v46 = vmul.f32 1.442695, %v7934_v7 }
 0x9e5   :  { %v8018_v30 = vsel %vm1214_vm2, %v15147_v32, 0.0  ;;  %9909 = vmatmul.msk.f32.vlgmr.msra.gmra.mxu3 %vm1214_vm2, %v6363_v45  ;;  %9911 = vmatmul.msk.f32.vlgmr.msra.gmra.mxu2 %vm1214_vm2, %v6365_v42  ;;  %v15163_v25 = vpop.eup %10785  ;;  %v17130_v42 = vld [vmem:[#allocation123_spill] sm:$0xff] }
 0x9e6   :  { %8019 = vadd.xlane.f32.xlu0 %v8018_v30  ;;  %9955 = vmatpush.xpose.msk.msra.mxu3 %vm595_vm1, %v17108_v39  ;;  %v5880_v60 = vsel %vm1214_vm2, %v15163_v25, 0.0  ;;  %v15173_v37 = vpop.eup %10787 }
 0x9e7   :  { %9963 = vmatpush.xpose.msk.msra.mxu2 %vm595_vm1, %v17109_v48  ;;  %v5874_v11 = vsel %vm1214_vm2, %v15173_v37, 0.0  ;;  %v15183_v44 = vpop.eup %10789 }
 0x9e8   :  { %v6398_v21 = vpop.f32.mrf.mxu2  ;;  %v5883_v15 = vsel %vm1214_vm2, %v15183_v44, 0.0  ;;  %v15192_v18 = vpop.eup %10791 }
 0x9e9   :  { %9915 = vmatmul.msk.f32.vlgmr.msra.gmra.mxu0 %vm595_vm1, %v6398_v21  ;;  %v5886_v43 = vsel %vm1214_vm2, %v15192_v18, 0.0 }
 0x9ea   :  { %9956 = vmatpush.xpose.msk.msra.mxu3 %vm595_vm1, %v17111_v20  ;;  %v15185_v1 = vpop.f32.mrf.mxu0 }
 0x9eb   :  { %9964 = vmatpush.xpose.msk.msra.mxu2 %vm595_vm1, %v17114_v33  ;;  %17119 = vst [vmem:[#allocation109_spill] sm:$0xff] %v15185_v1 }
 0x9ee   :  { %5881 = vadd.xlane.f32.xlu0 %v5880_v60 }
 0x9f0   :  { %v6433_v10 = vpop.f32.mrf.mxu3 }
 0x9f2   :  { %v7846_v54 = vpop.xlane.xlu2 %7845 }
 0x9f3   :  { %v7928_v30 = vsub.f32 %v17130_v42, %v7846_v54 }
 0x9f5   :  { %v7966_v26 = vmul.f32 1.442695, %v7928_v30 }
 0x9f6   :  { %5875 = vadd.xlane.f32.xlu0 %v5874_v11 }
 0x9f7   :  { %10337 = vrot.lane.b32.xlu2 %v17118_v36, %s10935_s13 }
 0x9fa   :  { %v7849_v61 = vpop.xlane.xlu2 %7848 }
 0x9fb   :  { %v7929_v24 = vsub.f32 %v14701_v22, %v7849_v61  ;;  %v15199_v22 = vpop.f32.mrf.mxu0 }
 0x9fc   :  { %17121 = vst [vmem:[#allocation105_spill] sm:$0xff] %v15199_v22 }
 0x9fd   :  { %v7968_v38 = vmul.f32 1.442695, %v7929_v24 }
 0x9fe   :  { %5884 = vadd.xlane.f32.xlu0 %v5883_v15  ;;  %v6401_v4 = vpop.f32.mrf.mxu2  ;;  %v17136_v15 = vld [vmem:[#allocation117_spill] sm:$0xff] }
 0x9ff   :  { %10347 = vrot.lane.b32.xlu2 %v17120_v2, %s10935_s13  ;;  %10793 = vpow2.f32 %v7968_v38  ;;  %9916 = vmatmul.msk.f32.gmra.mxu0 %vm595_vm1, %v6401_v4 }
 0xa00   :  { %10795 = vpow2.f32 %v7978_v46 }
 0xa01   :  { %v6436_v50 = vpop.f32.mrf.mxu3  ;;  %10797 = vpow2.f32 %v7966_v26 }
 0xa03   :  { %v15204_v23 = vpop.f32.mrf.mxu0 }
 0xa04   :  { %17122 = vst [vmem:[#allocation81_spill] sm:$0xff] %v15204_v23 }
 0xa05   :  { %v15197_v57 = vpop.eup %10793 }
 0xa06   :  { %5887 = vadd.xlane.f32.xlu0 %v5886_v43  ;;  %v8039_v6 = vsel %vm1214_vm2, %v15197_v57, 0.0  ;;  %v6468_v27 = vpop.f32.mrf.mxu2  ;;  %v15217_v45 = vpop.eup %10795 }
 0xa07   :  { %8040 = vadd.xlane.f32.xlu1 %v8039_v6  ;;  %9917 = vmatmul.msk.f32.gmra.mxu0 %vm595_vm1, %v6433_v10  ;;  %v8054_v47 = vsel %vm1214_vm2, %v15217_v45, 0.0  ;;  %v15231_v20 = vpop.eup %10797  ;;  %v7885_v43 = vpop.xlane.xlu1 %7884  ;;  %v17138_v6 = vld [vmem:[#allocation18_spill] sm:$0xff] }
 0xa08   :  { %v8036_v60 = vsel %vm1214_vm2, %v15231_v20, 0.0  ;;  %v7941_v41 = vsub.f32 %v17139_v52, %v7885_v43 }
 0xa0a   :  { %v6503_v8 = vpop.f32.mrf.mxu3  ;;  %v7992_v35 = vmul.f32 1.442695, %v7941_v41 }
 0xa0b   :  { %v15210_v55 = vpop.f32.mrf.mxu0 }
 0xa0c   :  { %17125 = vst [vmem:[#allocation113_spill] sm:$0xff] %v15210_v55 }
 0xa0e   :  { %v6471_v40 = vpop.f32.mrf.mxu2 }
 0xa0f   :  { %9918 = vmatmul.msk.f32.gmra.mxu0 %vm595_vm1, %v6436_v50 }
 0xa12   :  { %v6506_v39 = vpop.f32.mrf.mxu3 }
 0xa13   :  { %v15219_v53 = vpop.f32.mrf.mxu0 }
 0xa14   :  { %17128 = vst [vmem:[#allocation112_spill] sm:$0xff] %v15219_v53 }
 0xa16   :  { %v6538_v48 = vpop.f32.mrf.mxu2 }
 0xa17   :  { %9919 = vmatmul.msk.f32.gmra.mxu0 %vm595_vm1, %v6468_v27 }
 0xa1a   :  { %10332 = vrot.lane.b32.xlu0 %v17124_v63, %s10935_s13  ;;  %v6573_v34 = vpop.f32.mrf.mxu3 }
 0xa1b   :  { %v15224_v56 = vpop.f32.mrf.mxu0 }
 0xa1c   :  { %17129 = vst [vmem:[#allocation106_spill] sm:$0xff] %v15224_v56 }
 0xa1e   :  { %v6541_v29 = vpop.f32.mrf.mxu2 }
 0xa1f   :  { %9920 = vmatmul.msk.f32.gmra.mxu0 %vm595_vm1, %v6471_v40 }
 0xa20   :  { %10352 = vrot.lane.b32.xlu1 %v10351_v5, %s10935_s13 }
 0xa22   :  { %v6576_v51 = vpop.f32.mrf.mxu3 }
 0xa23   :  { %v15228_v21 = vpop.f32.mrf.mxu0 }
 0xa24   :  { %17131 = vst [vmem:[#allocation32_spill] sm:$0xff] %v15228_v21 }
 0xa26   :  { %v6608_v61 = vpop.f32.mrf.mxu2 }
 0xa27   :  { %9921 = vmatmul.msk.f32.gmra.mxu0 %vm595_vm1, %v6503_v8  ;;  %v17141_v8 = vld [vmem:[#allocation15_spill] sm:$0xff] }
 0xa28   :  { %8055 = vadd.xlane.f32.xlu2 %v8054_v47  ;;  %v17142_v47 = vld [vmem:[#allocation35_spill] sm:$0xff] }
 0xa29   :  { %v10366_v42 = vpack.i.bf16 %v17142_v47, %v17141_v8 }
 0xa2b   :  { %v15237_v33 = vpop.f32.mrf.mxu0 }
 0xa2c   :  { %17133 = vst [vmem:[#allocation79_spill] sm:$0xff] %v15237_v33 }
 0xa2e   :  { %v6611_v63 = vpop.f32.mrf.mxu2 }
 0xa2f   :  { %9922 = vmatmul.msk.f32.gmra.mxu0 %vm595_vm1, %v6506_v39  ;;  %v6643_v39 = vpop.f32.mrf.mxu3 }
 0xa33   :  { %v15243_v0 = vpop.f32.mrf.mxu0 }
 0xa34   :  { %17134 = vst [vmem:[#allocation51_spill] sm:$0xff] %v15243_v0 }
 0xa37   :  { %9923 = vmatmul.msk.f32.gmra.mxu0 %vm595_vm1, %v6538_v48 }
 0xa3b   :  { %v15247_v36 = vpop.f32.mrf.mxu0 }
 0xa3c   :  { %17135 = vst [vmem:[#allocation78_spill] sm:$0xff] %v15247_v36 }
 0xa3f   :  { %9924 = vmatmul.msk.f32.gmra.mxu0 %vm595_vm1, %v6541_v29 }
 0xa40   :  { %10362 = vrot.lane.b32.xlu2 %v17132_v17, %s10935_s13 }
 0xa42   :  { %v15235_v31 = vpop.xlane.xlu2 %8022 }
 0xa43   :  { %v15265_v7 = vpop.f32.mrf.mxu0 }
 0xa44   :  { %8037 = vadd.xlane.f32.xlu0 %v8036_v60  ;;  %17140 = vst [vmem:[#allocation64_spill] sm:$0xff] %v15265_v7 }
 0xa47   :  { %9925 = vmatmul.msk.f32.gmra.mxu0 %vm595_vm1, %v6573_v34 }
 0xa4a   :  { %v7867_v54 = vpop.xlane.xlu2 %7866 }
 0xa4b   :  { %v7935_v24 = vsub.f32 %v15076_v3, %v7867_v54  ;;  %v15275_v29 = vpop.f32.mrf.mxu0 }
 0xa4c   :  { %17143 = vst [vmem:[#allocation34_spill] sm:$0xff] %v15275_v29 }
 0xa4d   :  { %v7980_v4 = vmul.f32 1.442695, %v7935_v24 }
 0xa4f   :  { %9926 = vmatmul.msk.f32.gmra.mxu0 %vm595_vm1, %v6576_v51 }
 0xa52   :  { %v7882_v13 = vpop.xlane.xlu2 %7881 }
 0xa53   :  { %v7940_v11 = vsub.f32 %v15110_v59, %v7882_v13  ;;  %v17137_v59 = vld [vmem:[#allocation7_spill] sm:$0xff]  ;;  %v15286_v41 = vpop.f32.mrf.mxu0 }
 0xa54   :  { %v10356_v50 = vpack.i.bf16 %v17138_v6, %v17137_v59  ;;  %v6646_v6 = vpop.f32.mrf.mxu3  ;;  %17145 = vst [vmem:[#allocation90_spill] sm:$0xff] %v15286_v41 }
 0xa55   :  { %v7990_v12 = vmul.f32 1.442695, %v7940_v11 }
 0xa57   :  { %10799 = vpow2.f32 %v7990_v12  ;;  %9927 = vmatmul.msk.f32.gmra.mxu0 %vm595_vm1, %v6608_v61  ;;  %v17144_v61 = vld [vmem:[#allocation99_spill] sm:$0xff] }
 0xa58   :  { %10342 = vrot.lane.b32.xlu0 %v17136_v15, %s10935_s13  ;;  %10801 = vpow2.f32 %v7980_v4 }
 0xa59   :  { %v15252_v38 = vpop.xlane.xlu0 %8019 }
 0xa5a   :  { %v15255_v2 = vpop.permute.xlu2 %10337 }
 0xa5d   :  { %v15257_v10 = vpop.eup %10799 }
 0xa5e   :  { %v8072_v3 = vsel %vm1214_vm2, %v15257_v10, 0.0  ;;  %v15268_v5 = vpop.eup %10801 }
 0xa5f   :  { %8073 = vadd.xlane.f32.xlu1 %v8072_v3  ;;  %9928 = vmatmul.msk.f32.gmra.mxu0 %vm595_vm1, %v6611_v63  ;;  %v8057_v48 = vsel %vm1214_vm2, %v15268_v5, 0.0 }
 0xa60   :  { %10357 = vrot.lane.b32.xlu0 %v10356_v50, %s10935_s13 }
 0xa61   :  { %v5882_v27 = vpop.xlane.xlu0 %5881 }
 0xa62   :  { %10803 = vrcp.f32 %v5882_v27  ;;  %v10348_v46 = vpop.permute.xlu2 %10347  ;;  %v6306_v54 = vand.u32 2147483648, %v5882_v27  ;;  %v6304_v13 = vand.u32 2147483647, %v5882_v27  ;;  %vm6300_vm8 = vweird.f32 %v5882_v27 }
 0xa63   :  { %v10349_v19 = vunpack.i.l.bf16 %v10348_v46  ;;  %v10350_v40 = vunpack.i.h.bf16 %v10348_v46  ;;  %10805 = vpow2.f32 %v7992_v35 }
 0xa64   :  { %v6307_v24 = vor.u32 1.1754944e-38, %v6306_v54  ;;  %vm6305_vm10 = vcmp.eq.f32.partialorder %v6304_v13, 8.507059e+37 }
 0xa65   :  { %8690 = vmatpush.msra.mxu1 %v10349_v19  ;;  %v17146_v19 = vld [vmem:[#allocation16_spill] sm:$0xff] }
 0xa67   :  { %8691 = vmatpush.msra.mxu1 %v10350_v40  ;;  %9929 = vmatmul.msk.f32.gmra.mxu0 %vm595_vm1, %v6643_v39  ;;  %v17147_v40 = vld [vmem:[#allocation33_spill] sm:$0xff] }
 0xa68   :  { %v10804_v30 = vpop.eup %10803  ;;  %10367 = vrot.lane.b32.xlu0 %v10366_v42, %s10935_s13  ;;  %v10371_v8 = vpack.i.bf16 %v17147_v40, %v17146_v19  ;;  %v6678_v42 = vpop.f32.mrf.mxu2  ;;  %v17153_v40 = vld [vmem:[#allocation103_spill] sm:$0xff] }
 0xa69   :  { %v6296_v26 = vmul.f32 %v10804_v30, %v5882_v27  ;;  %v5876_v17 = vpop.xlane.xlu0 %5875  ;;  %8058 = vadd.xlane.f32.xlu2 %v8057_v48  ;;  %vm6301_vm7 = vweird.f32 %v10804_v30  ;;  %v15278_v51 = vpop.eup %10805 }
 0xa6a   :  { %10807 = vrcp.f32 %v5876_v17  ;;  %vm6302_vm9 = vmor %vm6300_vm8, %vm6301_vm7  ;;  %v8075_v4 = vsel %vm1214_vm2, %v15278_v51, 0.0  ;;  %v6278_v63 = vand.u32 2147483648, %v5876_v17  ;;  %v6276_v46 = vand.u32 2147483647, %v5876_v17 }
 0xa6b   :  { %v6297_v60 = vsub.f32 1.0, %v6296_v26  ;;  %vm6272_vm12 = vweird.f32 %v5876_v17 }
 0xa6c   :  { %vm6277_vm14 = vcmp.eq.f32.partialorder %v6276_v46, 8.507059e+37 }
 0xa6d   :  { %v6298_v34 = vmul.f32 %v10804_v30, %v6297_v60 }
 0xa6f   :  { %v6299_v11 = vadd.f32 %v10804_v30, %v6298_v34  ;;  %9930 = vmatmul.msk.f32.gmra.mxu0 %vm595_vm1, %v6646_v6 }
 0xa70   :  { %v10808_v12 = vpop.eup %10807  ;;  %10377 = vrot.lane.b32.xlu0 %v17144_v61, %s10935_s13  ;;  %v15297_v61 = vpop.f32.mrf.mxu0 }
 0xa71   :  { %v6268_v15 = vmul.f32 %v10808_v12, %v5876_v17  ;;  %v5885_v43 = vpop.xlane.xlu0 %5884  ;;  %v6303_v59 = vsel %vm6302_vm9, %v10804_v30, %v6299_v11  ;;  %8076 = vadd.xlane.f32.xlu2 %v8075_v4  ;;  %vm6273_vm11 = vweird.f32 %v10808_v12  ;;  %v6279_v30 = vor.u32 1.1754944e-38, %v6278_v63  ;;  %v17148_v11 = vld [vmem:[#allocation88_spill] sm:$0xff]  ;;  %17149 = vst [vmem:[#allocation76_spill] sm:$0xff] %v15297_v61  ;;  %v6681_v6 = vpop.f32.mrf.mxu2 }
 0xa72   :  { %10809 = vrcp.f32 %v5885_v43  ;;  %v6308_v3 = vsel %vm6305_vm10, %v6307_v24, %v6303_v59  ;;  %vm6274_vm13 = vmor %vm6272_vm12, %vm6273_vm11  ;;  %v6320_v34 = vand.u32 2147483648, %v5885_v43  ;;  %v6318_v13 = vand.u32 2147483647, %v5885_v43  ;;  %v17150_v24 = vld [vmem:[#allocation108_spill] sm:$0xff] }
 0xa73   :  { %v6269_v50 = vsub.f32 1.0, %v6268_v15  ;;  %v6366_v52 = vmul.f32 %v15163_v25, %v6308_v3  ;;  %vm6314_vm3 = vweird.f32 %v5885_v43  ;;  %vm8119_vm11 = vweird.f32 %v15252_v38 }
 0xa74   :  { %v6321_v4 = vor.u32 1.1754944e-38, %v6320_v34  ;;  %vm6319_vm5 = vcmp.eq.f32.partialorder %v6318_v13, 8.507059e+37 }
 0xa75   :  { %v6270_v27 = vmul.f32 %v10808_v12, %v6269_v50  ;;  %9912 = vmatmul.msk.f32.gmra.mxu2 %vm1214_vm2, %v6366_v52 }
 0xa77   :  { %v6271_v35 = vadd.f32 %v10808_v12, %v6270_v27  ;;  %9931 = vmatmul.msk.f32.gmra.mxu0 %vm595_vm1, %v6678_v42  ;;  %v17151_v27 = vld [vmem:[#allocation13_spill] sm:$0xff]  ;;  %v6713_v42 = vpop.f32.mrf.mxu3 }
 0xa78   :  { %v10810_v47 = vpop.eup %10809  ;;  %10372 = vrot.lane.b32.xlu1 %v10371_v8, %s10935_s13  ;;  %v15310_v8 = vpop.f32.mrf.mxu0 }
 0xa79   :  { %v6310_v39 = vmul.f32 %v10810_v47, %v5885_v43  ;;  %v5888_v25 = vpop.xlane.xlu0 %5887  ;;  %v6275_v26 = vsel %vm6274_vm13, %v10808_v12, %v6271_v35  ;;  %vm6315_vm15 = vweird.f32 %v10810_v47  ;;  %v17152_v35 = vld [vmem:[#allocation6_spill] sm:$0xff]  ;;  %17154 = vst [vmem:[#allocation24_spill] sm:$0xff] %v15310_v8 }
 0xa7a   :  { %10811 = vrcp.f32 %v5888_v25  ;;  %v6280_v60 = vsel %vm6277_vm14, %v6279_v30, %v6275_v26  ;;  %vm6316_vm4 = vmor %vm6314_vm3, %vm6315_vm15  ;;  %v6334_v43 = vand.u32 2147483648, %v5888_v25  ;;  %v6332_v46 = vand.u32 2147483647, %v5888_v25 }
 0xa7b   :  { %v6311_v48 = vsub.f32 1.0, %v6310_v39  ;;  %v6364_v17 = vmul.f32 %v15173_v37, %v6280_v60  ;;  %vm6328_vm7 = vweird.f32 %v5888_v25  ;;  %v17155_v39 = vld [vmem:[#allocation114_spill] sm:$0xff]  ;;  %v7788_v60 = vpop.f32.mrf.mxu1  ;;  %10813 = vrcp.f32 %v15252_v38 }
 0xa7c   :  { %vm6333_vm9 = vcmp.eq.f32.partialorder %v6332_v46, 8.507059e+37  ;;  %v15326_v13 = vmul.f32 0.35355338, %v7788_v60  ;;  %v17175_v60 = vld [vmem:[#allocation66_spill] sm:$0xff]  ;;  %10815 = vrcp.f32 %v15235_v31  ;;  %vm8133_vm15 = vweird.f32 %v15235_v31 }
 0xa7d   :  { %v6312_v54 = vmul.f32 %v10810_v47, %v6311_v48  ;;  %9910 = vmatmul.msk.f32.gmra.mxu3 %vm1214_vm2, %v6364_v17  ;;  %9953 = vmatmul.msk.f32.vlgmr.msrb.gmra.mxu2 %vm595_vm1, %v17148_v11  ;;  %v17157_v48 = vld [vmem:[#allocation31_spill] sm:$0xff] }
 0xa7e   :  { %9975 = vmatpush.xpose.msk.msrb.mxu2 %vm595_vm1, %v17150_v24  ;;  %v17161_v11 = vld [vmem:[#allocation63_spill] sm:$0xff]  ;;  %v6748_v24 = vpop.f32.mrf.mxu2 }
 0xa7f   :  { %v6313_v12 = vadd.f32 %v10810_v47, %v6312_v54  ;;  %9932 = vmatmul.msk.f32.gmra.mxu0 %vm595_vm1, %v6681_v6  ;;  %v6716_v34 = vpop.f32.mrf.mxu3  ;;  %v17159_v54 = vld [vmem:[#allocation56_spill] sm:$0xff]  ;;  %v17165_v6 = vld [vmem:[#allocation77_spill] sm:$0xff] }
 0xa80   :  { %v10812_v15 = vpop.eup %10811  ;;  %v15321_v17 = vpop.f32.mrf.mxu0 }
 0xa81   :  { %v6317_v59 = vsel %vm6316_vm4, %v10810_v47, %v6313_v12  ;;  %v6324_v37 = vmul.f32 %v10812_v15, %v5888_v25  ;;  %vm6329_vm6 = vweird.f32 %v10812_v15  ;;  %v17156_v25 = vld [vmem:[#allocation10_spill] sm:$0xff]  ;;  %17158 = vst [vmem:[#allocation4_spill] sm:$0xff] %v15321_v17  ;;  %v17162_v12 = vld [vmem:[#allocation84_spill] sm:$0xff] }
 0xa82   :  { %v6322_v50 = vsel %vm6319_vm5, %v6321_v4, %v6317_v59  ;;  %9976 = vmatpush.xpose.msk.msrb.mxu2 %vm595_vm1, %v17151_v27  ;;  %vm6330_vm8 = vmor %vm6328_vm7, %vm6329_vm6  ;;  %v17163_v4 = vld [vmem:[#allocation40_spill] sm:$0xff] }
 0xa83   :  { %v6367_v3 = vmul.f32 %v15183_v44, %v6322_v50  ;;  %v6325_v52 = vsub.f32 1.0, %v6324_v37  ;;  %v6335_v44 = vor.u32 1.1754944e-38, %v6334_v43  ;;  %v17166_v50 = vld [vmem:[#allocation89_spill] sm:$0xff]  ;;  %v17168_v43 = vld [vmem:[#allocation87_spill] sm:$0xff] }
 0xa85   :  { %v6326_v63 = vmul.f32 %v10812_v15, %v6325_v52  ;;  %9913 = vmatmul.msk.f32.vlgmr.msrb.gmra.mxu3 %vm1214_vm2, %v6367_v3  ;;  %9954 = vmatmul.msk.f32.gmra.mxu2 %vm595_vm1, %v17152_v35  ;;  %v17167_v3 = vld [vmem:[#allocation72_spill] sm:$0xff]  ;;  %v15349_v52 = vpop.xlane.xlu1 %7899  ;;  %v17169_v35 = vld [vmem:[#allocation67_spill] sm:$0xff] }
 0xa86   :  { %9967 = vmatpush.xpose.msk.msrb.mxu3 %vm595_vm1, %v17153_v40  ;;  %v6751_v27 = vpop.f32.mrf.mxu2 }
 0xa87   :  { %v6327_v19 = vadd.f32 %v10812_v15, %v6326_v63  ;;  %9933 = vmatmul.msk.f32.gmra.mxu0 %vm595_vm1, %v6713_v42  ;;  %v6783_v42 = vpop.f32.mrf.mxu3 }
 0xa88   :  { %v15341_v37 = vpop.f32.mrf.mxu0 }
 0xa89   :  { %v6331_v47 = vsel %vm6330_vm8, %v10812_v15, %v6327_v19  ;;  %v7916_v15 = vsel %vm1214_vm2, %v15326_v13, -inf  ;;  %17164 = vst [vmem:[#allocation54_spill] sm:$0xff] %v15341_v37  ;;  %v17170_v19 = vld [vmem:[#allocation104_spill] sm:$0xff] }
 0xa8a   :  { %v6336_v30 = vsel %vm6333_vm9, %v6335_v44, %v6331_v47  ;;  %9968 = vmatpush.xpose.msk.msrb.mxu3 %vm595_vm1, %v17155_v39  ;;  %v17172_v47 = vld [vmem:[#allocation91_spill] sm:$0xff] }
 0xa8b   :  { %v6368_v26 = vmul.f32 %v15192_v18, %v6336_v30  ;;  %v17160_v18 = vld [vmem:[#allocation14_spill] sm:$0xff] }
 0xa8c   :  { %v10333_v39 = vpop.permute.xlu0 %10332 }
 0xa8d   :  { %9914 = vmatmul.msk.f32.gmra.mxu3 %vm1214_vm2, %v6368_v26  ;;  %9965 = vmatmul.msk.f32.vlgmr.msra.gmra.mxu2 %vm595_vm1, %v17156_v25  ;;  %v15362_v30 = vpop.xlane.xlu1 %7902  ;;  %v17173_v26 = vld [vmem:[#allocation41_spill] sm:$0xff]  ;;  %v10334_v25 = vunpack.i.l.bf16 %v10333_v39 }
 0xa8e   :  { %9987 = vmatpush.xpose.msk.msra.mxu2 %vm595_vm1, %v17157_v48  ;;  %v17174_v48 = vld [vmem:[#allocation36_spill] sm:$0xff] }
 0xa8f   :  { %9934 = vmatmul.msk.f32.gmra.mxu0 %vm595_vm1, %v6716_v34  ;;  %v10335_v34 = vunpack.i.h.bf16 %v10333_v39  ;;  %v17182_v39 = vld [vmem:[#allocation29_spill] sm:$0xff] }
 0xa90   :  { %v15358_v40 = vpop.f32.mrf.mxu0 }
 0xa91   :  { %17171 = vst [vmem:[#allocation126_spill] sm:$0xff] %v15358_v40 }
 0xa92   :  { %9988 = vmatpush.xpose.msk.msra.mxu2 %vm595_vm1, %v17159_v54 }
 0xa95   :  { %9957 = vmatmul.msk.f32.vlgmr.msra.gmra.mxu3 %vm595_vm1, %v17160_v18  ;;  %9966 = vmatmul.msk.f32.gmra.mxu2 %vm595_vm1, %v17161_v11  ;;  %v6786_v18 = vpop.f32.mrf.mxu3  ;;  %v15374_v11 = vpop.xlane.xlu1 %8040 }
 0xa96   :  { %9979 = vmatpush.xpose.msk.msra.mxu3 %vm595_vm1, %v17162_v12  ;;  %v10814_v12 = vpop.eup %10813 }
 0xa97   :  { %9935 = vmatmul.msk.f32.gmra.mxu0 %vm595_vm1, %v6748_v24  ;;  %v8115_v24 = vmul.f32 %v10814_v12, %v15252_v38  ;;  %vm8120_vm10 = vweird.f32 %v10814_v12 }
 0xa98   :  { %v15372_v54 = vpop.f32.mrf.mxu0  ;;  %vm8121_vm12 = vmor %vm8119_vm11, %vm8120_vm10  ;;  %vm8217_vm10 = vweird.f32 %v15374_v11 }
 0xa99   :  { %17176 = vst [vmem:[#allocation75_spill] sm:$0xff] %v15372_v54 }
 0xa9a   :  { %7917 = vmax.xlane.f32.xlu0 %v7916_v15  ;;  %9980 = vmatpush.xpose.msk.msra.mxu3 %vm595_vm1, %v17163_v4  ;;  %v17177_v15 = vld [vmem:[#allocation57_spill] sm:$0xff] }
 0xa9b   :  { %v15339_v59 = vpop.xlane.xlu2 %8055  ;;  %v17178_v4 = vld [vmem:[#allocation65_spill] sm:$0xff] }
 0xa9d   :  { %9958 = vmatmul.msk.f32.gmra.mxu3 %vm595_vm1, %v17165_v6  ;;  %9977 = vmatmul.msk.f32.vlgmr.msrb.gmra.mxu2 %vm595_vm1, %v17166_v50  ;;  %v17179_v6 = vld [vmem:[#allocation30_spill] sm:$0xff]  ;;  %v6818_v50 = vpop.f32.mrf.mxu2 }
 0xa9e   :  { %9999 = vmatpush.xpose.msk.msrb.mxu2 %vm595_vm1, %v17167_v3 }
 0xa9f   :  { %9936 = vmatmul.msk.f32.gmra.mxu0 %vm595_vm1, %v6751_v27  ;;  %v8116_v27 = vsub.f32 1.0, %v8115_v24  ;;  %v8123_v24 = vand.u32 2147483647, %v15252_v38 }
 0xaa0   :  { %v15385_v3 = vpop.f32.mrf.mxu0 }
 0xaa1   :  { %vm8124_vm13 = vcmp.eq.f32.partialorder %v8123_v24, 8.507059e+37 }
 0xaa2   :  { %10000 = vmatpush.xpose.msk.msrb.mxu2 %vm595_vm1, %v17168_v43  ;;  %v15387_v43 = vpop.permute.xlu1 %10352 }
 0xaa3   :  { %v10363_v63 = vpop.permute.xlu2 %10362 }
 0xaa4   :  { %v10364_v46 = vunpack.i.l.bf16 %v10363_v63  ;;  %v10365_v44 = vunpack.i.h.bf16 %v10363_v63 }
 0xaa5   :  { %9969 = vmatmul.msk.f32.vlgmr.msrb.gmra.mxu3 %vm595_vm1, %v17169_v35  ;;  %9978 = vmatmul.msk.f32.gmra.mxu2 %vm595_vm1, %v17170_v19  ;;  %v17180_v35 = vld [vmem:[#allocation125_spill] sm:$0xff]  ;;  %v10354_v19 = vunpack.i.l.bf16 %v15387_v43 }
 0xaa6   :  { %9991 = vmatpush.xpose.msk.msrb.mxu3 %vm595_vm1, %v17172_v47  ;;  %8795 = vmatpush.msrb.mxu1 %v10364_v46  ;;  %v10816_v46 = vpop.eup %10815  ;;  %v8117_v47 = vmul.f32 %v10814_v12, %v8116_v27  ;;  %v17183_v27 = vld [vmem:[#allocation96_spill] sm:$0xff] }
 0xaa7   :  { %9937 = vmatmul.msk.f32.gmra.mxu0 %vm595_vm1, %v6783_v42  ;;  %v17181_v42 = vld [vmem:[#allocation11_spill] sm:$0xff]  ;;  %vm8134_vm14 = vweird.f32 %v10816_v46 }
 0xaa8   :  { %8796 = vmatpush.msrb.mxu1 %v10365_v44  ;;  %v8129_v44 = vmul.f32 %v10816_v46, %v15235_v31  ;;  %vm8135_vm3 = vmor %vm8133_vm15, %vm8134_vm14  ;;  %vm8287_vm14 = vweird.f32 %v15339_v59 }
 0xaaa   :  { %9992 = vmatpush.xpose.msk.msrb.mxu3 %vm595_vm1, %v17173_v26  ;;  %v15401_v26 = vpop.f32.mrf.mxu0 }
 0xaad   :  { %9970 = vmatmul.msk.f32.gmra.mxu3 %vm595_vm1, %v17174_v48  ;;  %9989 = vmatmul.msk.f32.vlgmr.msra.gmra.mxu2 %vm595_vm1, %v17175_v60  ;;  %v8118_v48 = vadd.f32 %v10814_v12, %v8117_v47  ;;  %v6821_v60 = vpop.f32.mrf.mxu2 }
 0xaae   :  { %8620 = vmatpush.msra.mxu2 %v10334_v25  ;;  %v8130_v25 = vsub.f32 1.0, %v8129_v44 }
 0xaaf   :  { %9938 = vmatmul.msk.f32.gmra.mxu0 %vm595_vm1, %v6786_v18  ;;  %v8125_v18 = vand.u32 2147483648, %v15252_v38 }
 0xab0   :  { %8621 = vmatpush.msra.mxu2 %v10335_v34 }
 0xab1   :  { %v8126_v44 = vor.u32 1.1754944e-38, %v8125_v18 }
 0xab5   :  { %9981 = vmatmul.msk.f32.vlgmr.msra.gmra.mxu3 %vm595_vm1, %v17177_v15  ;;  %9990 = vmatmul.msk.f32.gmra.mxu2 %vm595_vm1, %v17178_v4  ;;  %v10339_v15 = vunpack.i.l.bf16 %v15255_v2  ;;  %v8131_v4 = vmul.f32 %v10816_v46, %v8130_v25 }
 0xab6   :  { %10003 = vmatpush.xpose.msk.msra.mxu3 %vm595_vm1, %v17179_v6  ;;  %v8122_v6 = vsel %vm8121_vm12, %v10814_v12, %v8118_v48  ;;  %v8139_v48 = vand.u32 2147483648, %v15235_v31 }
 0xab7   :  { %v15389_v63 = vpop.xlane.xlu0 %8037  ;;  %9939 = vmatmul.msk.f32.gmra.mxu0 %vm595_vm1, %v6818_v50  ;;  %v8127_v38 = vsel %vm8124_vm13, %v8126_v44, %v8122_v6  ;;  %v8132_v47 = vadd.f32 %v10816_v46, %v8131_v4  ;;  %v17185_v4 = vld [vmem:[#allocation53_spill] sm:$0xff] }
 0xab8   :  { %10817 = vrcp.f32 %v15389_v63  ;;  %v8562_v18 = vmul.f32 %v15147_v32, %v8127_v38  ;;  %vm8203_vm6 = vweird.f32 %v15389_v63 }
 0xab9   :  { %10819 = vrcp.f32 %v15374_v11  ;;  %v8136_v6 = vsel %vm8135_vm3, %v10816_v46, %v8132_v47 }
 0xaba   :  { %10004 = vmatpush.xpose.msk.msra.mxu3 %vm595_vm1, %v17180_v35  ;;  %v17184_v35 = vld [vmem:[#allocation118_spill] sm:$0xff]  ;;  %10821 = vrcp.f32 %v15339_v59 }
 0xabd   :  { %9982 = vmatmul.msk.f32.gmra.mxu3 %vm595_vm1, %v17181_v42  ;;  %10001 = vmatmul.msk.f32.vlgmr.msrb.gmra.mxu2 %vm595_vm1, %v17182_v39  ;;  %v6853_v42 = vpop.f32.mrf.mxu3 }
 0xabe   :  { %8725 = vmatpush.msrb.mxu2 %v10354_v19  ;;  %v15403_v34 = vpop.eup %10817  ;;  %v10340_v19 = vunpack.i.h.bf16 %v15255_v2  ;;  %v8137_v2 = vand.u32 2147483647, %v15235_v31 }
 0xabf   :  { %9940 = vmatmul.msk.f32.gmra.mxu0 %vm595_vm1, %v6821_v60  ;;  %v8199_v50 = vmul.f32 %v15403_v34, %v15389_v63  ;;  %v10820_v25 = vpop.eup %10819  ;;  %v15419_v60 = vpop.f32.mrf.mxu0  ;;  %vm8204_vm5 = vweird.f32 %v15403_v34 }
 0xac0   :  { %v8213_v24 = vmul.f32 %v10820_v25, %v15374_v11  ;;  %vm8138_vm4 = vcmp.eq.f32.partialorder %v8137_v2, 8.507059e+37  ;;  %v10822_v38 = vpop.eup %10821  ;;  %vm8205_vm7 = vmor %vm8203_vm6, %vm8204_vm5  ;;  %v17186_v2 = vld [vmem:[#allocation47_spill] sm:$0xff]  ;;  %vm8218_vm9 = vweird.f32 %v10820_v25 }
 0xac1   :  { %v8200_v12 = vsub.f32 1.0, %v8199_v50  ;;  %v8140_v50 = vor.u32 1.1754944e-38, %v8139_v48  ;;  %vm8219_vm11 = vmor %vm8217_vm10, %vm8218_vm9  ;;  %vm8288_vm13 = vweird.f32 %v10822_v38 }
 0xac2   :  { %vm8289_vm15 = vmor %vm8287_vm14, %vm8288_vm13 }
 0xac5   :  { %9993 = vmatmul.msk.f32.vlgmr.msrb.gmra.mxu3 %vm595_vm1, %v17183_v27  ;;  %10002 = vmatmul.msk.f32.gmra.mxu2 %vm595_vm1, %v17184_v35  ;;  %v8141_v27 = vsel %vm8138_vm4, %v8140_v50, %v8136_v6  ;;  %v8214_v35 = vsub.f32 1.0, %v8213_v24  ;;  %v8223_v6 = vand.u32 2147483648, %v15374_v11 }
 0xac6   :  { %8655 = vmatpush.msrb.mxu3 %v10339_v15  ;;  %v8201_v15 = vmul.f32 %v15403_v34, %v8200_v12  ;;  %v8563_v46 = vmul.f32 %v15055_v16, %v8141_v27  ;;  %v8221_v27 = vand.u32 2147483647, %v15374_v11 }
 0xac7   :  { %9941 = vmatmul.msk.f32.gmra.mxu0 %vm595_vm1, %v6853_v42  ;;  %v8207_v42 = vand.u32 2147483647, %v15389_v63  ;;  %v8215_v12 = vmul.f32 %v10820_v25, %v8214_v35 }
 0xac8   :  { %8656 = vmatpush.msrb.mxu3 %v10340_v19  ;;  %v8202_v31 = vadd.f32 %v15403_v34, %v8201_v15  ;;  %v8209_v19 = vand.u32 2147483648, %v15389_v63  ;;  %vm8222_vm12 = vcmp.eq.f32.partialorder %v8221_v27, 8.507059e+37 }
 0xac9   :  { %vm8208_vm8 = vcmp.eq.f32.partialorder %v8207_v42, 8.507059e+37  ;;  %v8216_v16 = vadd.f32 %v10820_v25, %v8215_v12 }
 0xaca   :  { %v10343_v39 = vpop.permute.xlu0 %10342  ;;  %v8206_v48 = vsel %vm8205_vm7, %v15403_v34, %v8202_v31  ;;  %v8210_v24 = vor.u32 1.1754944e-38, %v8209_v19  ;;  %v17187_v31 = vld [vmem:[#allocation133_spill] sm:$0xff] }
 0xacb   :  { %v10344_v47 = vunpack.i.l.bf16 %v10343_v39  ;;  %v10345_v15 = vunpack.i.h.bf16 %v10343_v39  ;;  %v8220_v19 = vsel %vm8219_vm11, %v10820_v25, %v8216_v16 }
 0xacc   :  { %v8211_v63 = vsel %vm8208_vm8, %v8210_v24, %v8206_v48 }
 0xacd   :  { %9994 = vmatmul.msk.f32.gmra.mxu3 %vm595_vm1, %v17185_v4  ;;  %10011 = vmatmul.msk.f32.vlgmr.msra.gmra.mxu2 %vm1214_vm2, %v8562_v18  ;;  %v8283_v18 = vmul.f32 %v10822_v38, %v15339_v59  ;;  %v8568_v35 = vmul.f32 %v15231_v20, %v8211_v63  ;;  %v8293_v20 = vand.u32 2147483648, %v15339_v59 }
 0xacf   :  { %v8284_v34 = vsub.f32 1.0, %v8283_v18 }
 0xad1   :  { %v8285_v42 = vmul.f32 %v10822_v38, %v8284_v34 }
 0xad2   :  { %v15433_v32 = vpop.permute.xlu0 %10357  ;;  %v15455_v12 = vpop.xlane.xlu1 %8073 }
 0xad3   :  { %v10359_v44 = vunpack.i.l.bf16 %v15433_v32  ;;  %vm8371_vm8 = vweird.f32 %v15455_v12  ;;  %v8375_v36 = vand.u32 2147483647, %v15455_v12 }
 0xad5   :  { %8726 = vmatpush.msrb.mxu2 %v10359_v44  ;;  %10005 = vmatmul.msk.f32.vlgmr.msra.gmra.mxu3 %vm595_vm1, %v17186_v2  ;;  %v8224_v44 = vor.u32 1.1754944e-38, %v8223_v6  ;;  %v8291_v2 = vand.u32 2147483647, %v15339_v59  ;;  %vm8376_vm14 = vcmp.eq.f32.partialorder %v8375_v36, 8.507059e+37 }
 0xad6   :  { %10012 = vmatmul.msk.f32.gmra.mxu2 %vm1214_vm2, %v8563_v46  ;;  %8760 = vmatpush.msra.mxu3 %v10344_v47  ;;  %v8286_v47 = vadd.f32 %v10822_v38, %v8285_v42 }
 0xad7   :  { %v8225_v46 = vsel %vm8222_vm12, %v8224_v44, %v8220_v19  ;;  %vm8292_vm3 = vcmp.eq.f32.partialorder %v8291_v2, 8.507059e+37 }
 0xad8   :  { %8761 = vmatpush.msra.mxu3 %v10345_v15  ;;  %v8569_v48 = vmul.f32 %v15197_v57, %v8225_v46  ;;  %v8290_v25 = vsel %vm8289_vm15, %v10822_v38, %v8286_v47  ;;  %v8294_v15 = vor.u32 1.1754944e-38, %v8293_v20  ;;  %v15469_v46 = vpop.f32.mrf.mxu0 }
 0xada   :  { %v15445_v4 = vpop.permute.xlu0 %10367  ;;  %v8295_v16 = vsel %vm8292_vm3, %v8294_v15, %v8290_v25 }
 0xadb   :  { %v10369_v50 = vunpack.i.l.bf16 %v15445_v4  ;;  %v8574_v27 = vmul.f32 %v15217_v45, %v8295_v16  ;;  %v17188_v45 = vld [vmem:[#allocation128_spill] sm:$0xff] }
 0xadc   :  { %v8059_v39 = vpop.xlane.xlu2 %8058  ;;  %v7946_v47 = vsub.f32 %v17188_v45, %v15349_v52 }
 0xadd   :  { %8830 = vmatpush.msra.mxu2 %v10369_v50  ;;  %10823 = vrcp.f32 %v8059_v39  ;;  %10006 = vmatmul.msk.f32.gmra.mxu3 %vm595_vm1, %v17187_v31  ;;  %v8307_v50 = vand.u32 2147483648, %v8059_v39  ;;  %vm8301_vm5 = vweird.f32 %v8059_v39  ;;  %v8305_v59 = vand.u32 2147483647, %v8059_v39  ;;  %v6888_v31 = vpop.f32.mrf.mxu2 }
 0xade   :  { %10017 = vmatmul.msk.f32.vlgmr.msrb.gmra.mxu2 %vm1214_vm2, %v8568_v35 }
 0xadf   :  { %v8308_v35 = vor.u32 1.1754944e-38, %v8307_v50  ;;  %vm8306_vm7 = vcmp.eq.f32.partialorder %v8305_v59, 8.507059e+37 }
 0xae3   :  { %v10824_v11 = vpop.eup %10823 }
 0xae4   :  { %v8297_v18 = vmul.f32 %v10824_v11, %v8059_v39  ;;  %vm8302_vm4 = vweird.f32 %v10824_v11  ;;  %v8002_v39 = vmul.f32 1.442695, %v7946_v47  ;;  %v15572_v17 = vpop.xlane.xlu2 %8076 }
 0xae5   :  { %vm8303_vm6 = vmor %vm8301_vm5, %vm8302_vm4  ;;  %vm8385_vm4 = vweird.f32 %v15572_v17 }
 0xae6   :  { %10018 = vmatmul.msk.f32.gmra.mxu2 %vm1214_vm2, %v8569_v48  ;;  %v8298_v24 = vsub.f32 1.0, %v8297_v18  ;;  %10825 = vpow2.f32 %v8002_v39 }
 0xae8   :  { %v8299_v63 = vmul.f32 %v10824_v11, %v8298_v24 }
 0xaea   :  { %v8300_v6 = vadd.f32 %v10824_v11, %v8299_v63  ;;  %v15462_v34 = vpop.permute.xlu1 %10372 }
 0xaeb   :  { %v10374_v57 = vunpack.i.l.bf16 %v15462_v34 }
 0xaec   :  { %v8304_v38 = vsel %vm8303_vm6, %v10824_v11, %v8300_v6  ;;  %v15476_v11 = vpop.f32.mrf.mxu0  ;;  %v15480_v18 = vpop.eup %10825 }
 0xaed   :  { %8831 = vmatpush.msra.mxu2 %v10374_v57  ;;  %v8309_v19 = vsel %vm8306_vm7, %v8308_v35, %v8304_v38  ;;  %v8090_v52 = vsel %vm1214_vm2, %v15480_v18, 0.0 }
 0xaee   :  { %10023 = vmatmul.msk.f32.vlgmr.msra.gmra.mxu2 %vm1214_vm2, %v8574_v27  ;;  %v8575_v44 = vmul.f32 %v15268_v5, %v8309_v19 }
 0xaf4   :  { %v15489_v16 = vpop.f32.mrf.mxu0 }
 0xaf5   :  { %17189 = vst [vmem:[#allocation124_spill] sm:$0xff] %v15489_v16 }
 0xaf6   :  { %10024 = vmatmul.msk.f32.gmra.mxu2 %vm1214_vm2, %v8575_v44 }
 0xaf8   :  { %v6891_v42 = vpop.f32.mrf.mxu2 }
 0xafc   :  { %v15496_v59 = vpop.f32.mrf.mxu0 }
 0xafd   :  { %17190 = vst [vmem:[#allocation62_spill] sm:$0xff] %v15496_v59 }
 0xb00   :  { %v6856_v20 = vpop.f32.mrf.mxu3  ;;  %v7242_v48 = vpop.f32.mrf.mxu2 }
 0xb01   :  { %v15473_v2 = vmul.f32 0.35355338, %v7242_v48  ;;  %9942 = vmatmul.msk.f32.gmra.mxu0 %vm595_vm1, %v6856_v20 }
 0xb03   :  { %v7832_v5 = vsel %vm1214_vm2, %v15473_v2, -inf }
 0xb04   :  { %7833 = vmax.xlane.f32.xlu2 %v7832_v5  ;;  %v15507_v39 = vpop.f32.mrf.mxu0 }
 0xb05   :  { %17191 = vst [vmem:[#allocation5_spill] sm:$0xff] %v15507_v39 }
 0xb08   :  { %v6923_v25 = vpop.f32.mrf.mxu3  ;;  %v7245_v24 = vpop.f32.mrf.mxu2 }
 0xb09   :  { %v15482_v15 = vmul.f32 0.35355338, %v7245_v24  ;;  %9943 = vmatmul.msk.f32.gmra.mxu0 %vm595_vm1, %v6888_v31 }
 0xb0b   :  { %v7835_v63 = vsel %vm1214_vm2, %v15482_v15, -inf }
 0xb0c   :  { %8091 = vadd.xlane.f32.xlu2 %v8090_v52  ;;  %7836 = vmax.xlane.f32.xlu1 %v7835_v63 }
 0xb10   :  { %v6926_v6 = vpop.f32.mrf.mxu3  ;;  %v7359_v50 = vpop.f32.mrf.mxu2 }
 0xb11   :  { %v15491_v57 = vmul.f32 0.35355338, %v7359_v50  ;;  %9944 = vmatmul.msk.f32.gmra.mxu0 %vm595_vm1, %v6891_v42 }
 0xb13   :  { %v7850_v27 = vsel %vm1214_vm2, %v15491_v57, -inf }
 0xb14   :  { %7851 = vmax.xlane.f32.xlu0 %v7850_v27 }
 0xb18   :  { %v7281_v38 = vpop.f32.mrf.mxu3  ;;  %v7362_v35 = vpop.f32.mrf.mxu2 }
 0xb19   :  { %v15498_v31 = vmul.f32 0.35355338, %v7281_v38  ;;  %v15500_v19 = vmul.f32 0.35355338, %v7362_v35  ;;  %9945 = vmatmul.msk.f32.gmra.mxu0 %vm595_vm1, %v6923_v25 }
 0xb1b   :  { %v7853_v44 = vsel %vm1214_vm2, %v15500_v19, -inf  ;;  %v7838_v42 = vsel %vm1214_vm2, %v15498_v31, -inf }
 0xb1c   :  { %7854 = vmax.xlane.f32.xlu1 %v7853_v44  ;;  %7839 = vmax.xlane.f32.xlu2 %v7838_v42 }
 0xb20   :  { %v7284_v45 = vpop.f32.mrf.mxu3  ;;  %v7476_v47 = vpop.f32.mrf.mxu2 }
 0xb21   :  { %v15509_v20 = vmul.f32 0.35355338, %v7284_v45  ;;  %v15511_v48 = vmul.f32 0.35355338, %v7476_v47  ;;  %9946 = vmatmul.msk.f32.gmra.mxu0 %vm595_vm1, %v6926_v6 }
 0xb23   :  { %v7868_v5 = vsel %vm1214_vm2, %v15511_v48, -inf  ;;  %v7841_v25 = vsel %vm1214_vm2, %v15509_v20, -inf }
 0xb24   :  { %7869 = vmax.xlane.f32.xlu1 %v7868_v5  ;;  %7842 = vmax.xlane.f32.xlu0 %v7841_v25 }
 0xb28   :  { %v7398_v24 = vpop.f32.mrf.mxu3  ;;  %v7479_v52 = vpop.f32.mrf.mxu2 }
 0xb29   :  { %v15518_v63 = vmul.f32 0.35355338, %v7398_v24  ;;  %v15520_v50 = vmul.f32 0.35355338, %v7479_v52 }
 0xb2b   :  { %v7871_v27 = vsel %vm1214_vm2, %v15520_v50, -inf  ;;  %v7856_v6 = vsel %vm1214_vm2, %v15518_v63, -inf }
 0xb2c   :  { %7872 = vmax.xlane.f32.xlu1 %v7871_v27  ;;  %7857 = vmax.xlane.f32.xlu0 %v7856_v6 }
 0xb30   :  { %v7401_v38 = vpop.f32.mrf.mxu3  ;;  %v7593_v35 = vpop.f32.mrf.mxu2 }
 0xb31   :  { %v15526_v44 = vmul.f32 0.35355338, %v7401_v38  ;;  %v15528_v42 = vmul.f32 0.35355338, %v7593_v35 }
 0xb33   :  { %v7886_v45 = vsel %vm1214_vm2, %v15528_v42, -inf  ;;  %v7859_v47 = vsel %vm1214_vm2, %v15526_v44, -inf }
 0xb34   :  { %7887 = vmax.xlane.f32.xlu0 %v7886_v45  ;;  %7860 = vmax.xlane.f32.xlu2 %v7859_v47 }
 0xb38   :  { %v7515_v5 = vpop.f32.mrf.mxu3  ;;  %v7596_v25 = vpop.f32.mrf.mxu2 }
 0xb39   :  { %v15534_v24 = vmul.f32 0.35355338, %v7515_v5  ;;  %v15536_v52 = vmul.f32 0.35355338, %v7596_v25 }
 0xb3b   :  { %v7889_v27 = vsel %vm1214_vm2, %v15536_v52, -inf  ;;  %v7874_v6 = vsel %vm1214_vm2, %v15534_v24, -inf }
 0xb3c   :  { %7890 = vmax.xlane.f32.xlu1 %v7889_v27  ;;  %7875 = vmax.xlane.f32.xlu0 %v7874_v6 }
 0xb40   :  { %v7518_v38 = vpop.f32.mrf.mxu3  ;;  %v7710_v54 = vpop.f32.mrf.mxu2 }
 0xb41   :  { %v15542_v35 = vmul.f32 0.35355338, %v7518_v38  ;;  %v15546_v47 = vmul.f32 0.35355338, %v7710_v54 }
 0xb43   :  { %v7877_v45 = vsel %vm1214_vm2, %v15542_v35, -inf  ;;  %v7904_v40 = vsel %vm1214_vm2, %v15546_v47, -inf }
 0xb44   :  { %7878 = vmax.xlane.f32.xlu1 %v7877_v45 }
 0xb48   :  { %v7632_v5 = vpop.f32.mrf.mxu3  ;;  %v7713_v6 = vpop.f32.mrf.mxu2 }
 0xb49   :  { %v15548_v25 = vmul.f32 0.35355338, %v7632_v5  ;;  %v15554_v38 = vmul.f32 0.35355338, %v7713_v6 }
 0xb4b   :  { %v7892_v27 = vsel %vm1214_vm2, %v15548_v25, -inf  ;;  %v7907_v54 = vsel %vm1214_vm2, %v15554_v38, -inf }
 0xb4c   :  { %7905 = vmax.xlane.f32.xlu1 %v7904_v40  ;;  %7893 = vmax.xlane.f32.xlu0 %v7892_v27  ;;  %v17192_v27 = vld [vmem:[#allocation69_spill] sm:$0xff] }
 0xb50   :  { %v7635_v21 = vpop.f32.mrf.mxu3 }
 0xb51   :  { %v15556_v56 = vmul.f32 0.35355338, %v7635_v21 }
 0xb53   :  { %v7895_v45 = vsel %vm1214_vm2, %v15556_v56, -inf }
 0xb54   :  { %7908 = vmax.xlane.f32.xlu1 %v7907_v54  ;;  %7896 = vmax.xlane.f32.xlu2 %v7895_v45  ;;  %v15574_v54 = vpop.permute.xlu0 %10377 }
 0xb58   :  { %v7749_v5 = vpop.f32.mrf.mxu3 }
 0xb59   :  { %v15562_v37 = vmul.f32 0.35355338, %v7749_v5 }
 0xb5b   :  { %v7910_v40 = vsel %vm1214_vm2, %v15562_v37, -inf }
 0xb5c   :  { %7911 = vmax.xlane.f32.xlu2 %v7910_v40  ;;  %v7947_v40 = vsub.f32 %v14703_v28, %v15362_v30  ;;  %v15579_v8 = vpop.xlane.xlu0 %7917 }
 0xb60   :  { %10387 = vrot.lane.b32.xlu0 %v17192_v27, %s10935_s13  ;;  %v7752_v21 = vpop.f32.mrf.mxu3  ;;  %v8004_v27 = vmul.f32 1.442695, %v7947_v40 }
 0xb61   :  { %v15568_v6 = vmul.f32 0.35355338, %v7752_v21 }
 0xb63   :  { %v7913_v53 = vsel %vm1214_vm2, %v15568_v6, -inf }
 0xb64   :  { %7914 = vmax.xlane.f32.xlu1 %v7913_v53 }
 0xb77   :  { %v7834_v45 = vpop.xlane.xlu2 %7833 }
 0xb78   :  { %v7924_v5 = vsub.f32 %v15473_v2, %v7834_v45 }
 0xb7a   :  { %v7958_v55 = vmul.f32 1.442695, %v7924_v5 }
 0xb7c   :  { %10827 = vpow2.f32 %v7958_v55 }
 0xb7d   :  { %10829 = vpow2.f32 %v8004_v27 }
 0xb7f   :  { %v7837_v21 = vpop.xlane.xlu1 %7836  ;;  %v15586_v2 = vpop.xlane.xlu2 %8091 }
 0xb80   :  { %v7925_v23 = vsub.f32 %v15482_v15, %v7837_v21 }
 0xb82   :  { %v15582_v61 = vpop.eup %10827  ;;  %v7960_v53 = vmul.f32 1.442695, %v7925_v23 }
 0xb83   :  { %v8024_v22 = vsel %vm1214_vm2, %v15582_v61, 0.0  ;;  %v15588_v30 = vpop.eup %10829 }
 0xb84   :  { %8025 = vadd.xlane.f32.xlu1 %v8024_v22  ;;  %10831 = vpow2.f32 %v7960_v53  ;;  %v8093_v15 = vsel %vm1214_vm2, %v15588_v30, 0.0 }
 0xb87   :  { %v7852_v28 = vpop.xlane.xlu0 %7851 }
 0xb88   :  { %v7930_v55 = vsub.f32 %v15491_v57, %v7852_v28 }
 0xb8a   :  { %v7970_v45 = vmul.f32 1.442695, %v7930_v55  ;;  %v15591_v5 = vpop.eup %10831 }
 0xb8b   :  { %v8027_v23 = vsel %vm1214_vm2, %v15591_v5, 0.0 }
 0xb8c   :  { %10833 = vpow2.f32 %v7970_v45  ;;  %8094 = vadd.xlane.f32.xlu1 %v8093_v15  ;;  %8028 = vadd.xlane.f32.xlu2 %v8027_v23 }
 0xb8f   :  { %v7855_v22 = vpop.xlane.xlu1 %7854  ;;  %v7840_v40 = vpop.xlane.xlu2 %7839 }
 0xb90   :  { %v7926_v27 = vsub.f32 %v15498_v31, %v7840_v40  ;;  %v7931_v57 = vsub.f32 %v15500_v19, %v7855_v22 }
 0xb92   :  { %v15598_v21 = vpop.eup %10833  ;;  %v7962_v53 = vmul.f32 1.442695, %v7926_v27  ;;  %v7972_v55 = vmul.f32 1.442695, %v7931_v57 }
 0xb93   :  { %v8042_v28 = vsel %vm1214_vm2, %v15598_v21, 0.0 }
 0xb94   :  { %8043 = vadd.xlane.f32.xlu1 %v8042_v28  ;;  %10835 = vpow2.f32 %v7962_v53 }
 0xb95   :  { %10837 = vpow2.f32 %v7972_v55 }
 0xb97   :  { %v7870_v45 = vpop.xlane.xlu1 %7869  ;;  %v7843_v41 = vpop.xlane.xlu0 %7842 }
 0xb98   :  { %v7927_v15 = vsub.f32 %v15509_v20, %v7843_v41  ;;  %v7936_v57 = vsub.f32 %v15511_v48, %v7870_v45  ;;  %v17193_v41 = vld [vmem:[#allocation39_spill] sm:$0xff] }
 0xb9a   :  { %v15603_v1 = vpop.eup %10835  ;;  %v7964_v23 = vmul.f32 1.442695, %v7927_v15  ;;  %v7982_v20 = vmul.f32 1.442695, %v7936_v57 }
 0xb9b   :  { %v8030_v31 = vsel %vm1214_vm2, %v15603_v1, 0.0  ;;  %v15609_v27 = vpop.eup %10837 }
 0xb9c   :  { %8031 = vadd.xlane.f32.xlu1 %v8030_v31  ;;  %10839 = vpow2.f32 %v7964_v23  ;;  %v8045_v28 = vsel %vm1214_vm2, %v15609_v27, 0.0 }
 0xb9f   :  { %v7873_v40 = vpop.xlane.xlu1 %7872  ;;  %v7858_v19 = vpop.xlane.xlu0 %7857 }
 0xba0   :  { %v7937_v22 = vsub.f32 %v15520_v50, %v7873_v40  ;;  %v7932_v50 = vsub.f32 %v15518_v63, %v7858_v19 }
 0xba2   :  { %v7984_v53 = vmul.f32 1.442695, %v7937_v22  ;;  %v15616_v15 = vpop.eup %10839  ;;  %v7974_v23 = vmul.f32 1.442695, %v7932_v50 }
 0xba3   :  { %v8033_v45 = vsel %vm1214_vm2, %v15616_v15, 0.0 }
 0xba4   :  { %10841 = vpow2.f32 %v7984_v53  ;;  %10382 = vrot.lane.b32.xlu2 %v17193_v41, %s10935_s13  ;;  %8046 = vadd.xlane.f32.xlu1 %v8045_v28 }
 0xba5   :  { %10843 = vpow2.f32 %v7982_v20 }
 0xba6   :  { %10845 = vpow2.f32 %v7974_v23 }
 0xba7   :  { %v7888_v55 = vpop.xlane.xlu0 %7887  ;;  %v7861_v53 = vpop.xlane.xlu2 %7860 }
 0xba8   :  { %v7933_v63 = vsub.f32 %v15526_v44, %v7861_v53 }
 0xbaa   :  { %v15618_v31 = vpop.eup %10841  ;;  %v7976_v20 = vmul.f32 1.442695, %v7933_v63 }
 0xbab   :  { %v8063_v48 = vsel %vm1214_vm2, %v15618_v31, 0.0  ;;  %v15626_v28 = vpop.eup %10843 }
 0xbac   :  { %8064 = vadd.xlane.f32.xlu0 %v8063_v48  ;;  %8034 = vadd.xlane.f32.xlu1 %v8033_v45  ;;  %v8060_v19 = vsel %vm1214_vm2, %v15626_v28, 0.0  ;;  %v15632_v45 = vpop.eup %10845 }
 0xbad   :  { %v8048_v44 = vsel %vm1214_vm2, %v15632_v45, 0.0 }
 0xbaf   :  { %v7891_v40 = vpop.xlane.xlu1 %7890  ;;  %v7876_v22 = vpop.xlane.xlu0 %7875 }
 0xbb0   :  { %v7938_v57 = vsub.f32 %v15534_v24, %v7876_v22  ;;  %v7942_v24 = vsub.f32 %v15528_v42, %v7888_v55 }
 0xbb2   :  { %v7986_v41 = vmul.f32 1.442695, %v7938_v57  ;;  %v7994_v22 = vmul.f32 1.442695, %v7942_v24 }
 0xbb4   :  { %10847 = vpow2.f32 %v7986_v41  ;;  %8061 = vadd.xlane.f32.xlu1 %v8060_v19  ;;  %v7943_v41 = vsub.f32 %v15536_v52, %v7891_v40  ;;  %v7791_v19 = vpop.f32.mrf.mxu1 }
 0xbb5   :  { %10849 = vpow2.f32 %v7976_v20  ;;  %v15653_v24 = vmul.f32 0.35355338, %v7791_v19 }
 0xbb6   :  { %v7996_v20 = vmul.f32 1.442695, %v7943_v41 }
 0xbb7   :  { %v7879_v48 = vpop.xlane.xlu1 %7878  ;;  %v7919_v40 = vsel %vm1214_vm2, %v15653_v24, -inf }
 0xbb8   :  { %v7939_v50 = vsub.f32 %v15542_v35, %v7879_v48 }
 0xbba   :  { %v7988_v29 = vmul.f32 1.442695, %v7939_v50  ;;  %v15634_v9 = vpop.eup %10847 }
 0xbbb   :  { %v8066_v23 = vsel %vm1214_vm2, %v15634_v9, 0.0  ;;  %v15641_v53 = vpop.eup %10849 }
 0xbbc   :  { %10851 = vpow2.f32 %v7988_v29  ;;  %8049 = vadd.xlane.f32.xlu1 %v8048_v44  ;;  %8067 = vadd.xlane.f32.xlu0 %v8066_v23  ;;  %v8051_v55 = vsel %vm1214_vm2, %v15641_v53, 0.0 }
 0xbbd   :  { %10853 = vpow2.f32 %v7994_v22 }
 0xbbe   :  { %10855 = vpow2.f32 %v7996_v20 }
 0xbbf   :  { %v7894_v35 = vpop.xlane.xlu0 %7893  ;;  %v7906_v63 = vpop.xlane.xlu1 %7905 }
 0xbc0   :  { %v7944_v42 = vsub.f32 %v15548_v25, %v7894_v35  ;;  %v7948_v52 = vsub.f32 %v15546_v47, %v7906_v63 }
 0xbc2   :  { %v15643_v57 = vpop.eup %10851  ;;  %v7998_v48 = vmul.f32 1.442695, %v7944_v42  ;;  %v8006_v44 = vmul.f32 1.442695, %v7948_v52 }
 0xbc3   :  { %v8069_v29 = vsel %vm1214_vm2, %v15643_v57, 0.0  ;;  %v15651_v50 = vpop.eup %10853 }
 0xbc4   :  { %8052 = vadd.xlane.f32.xlu1 %v8051_v55  ;;  %8070 = vadd.xlane.f32.xlu0 %v8069_v29  ;;  %10857 = vpow2.f32 %v7998_v48  ;;  %v8078_v25 = vsel %vm1214_vm2, %v15651_v50, 0.0  ;;  %v15660_v35 = vpop.eup %10855  ;;  %v17194_v48 = vld [vmem:[#allocation119_spill] sm:$0xff] }
 0xbc5   :  { %10859 = vpow2.f32 %v8006_v44  ;;  %v8081_v47 = vsel %vm1214_vm2, %v15660_v35, 0.0 }
 0xbc7   :  { %v7909_v23 = vpop.xlane.xlu1 %7908  ;;  %v7897_v22 = vpop.xlane.xlu2 %7896 }
 0xbc8   :  { %v7945_v29 = vsub.f32 %v15556_v56, %v7897_v22  ;;  %v7949_v56 = vsub.f32 %v15554_v38, %v7909_v23 }
 0xbca   :  { %v15662_v41 = vpop.eup %10857  ;;  %v8000_v55 = vmul.f32 1.442695, %v7945_v29 }
 0xbcb   :  { %v8084_v42 = vsel %vm1214_vm2, %v15662_v41, 0.0  ;;  %v15670_v20 = vpop.eup %10859 }
 0xbcc   :  { %8079 = vadd.xlane.f32.xlu1 %v8078_v25  ;;  %10861 = vpow2.f32 %v8000_v55  ;;  %v8096_v25 = vsel %vm1214_vm2, %v15670_v20, 0.0 }
 0xbcd   :  { %7920 = vmax.xlane.f32.xlu2 %v7919_v40  ;;  %v8008_v40 = vmul.f32 1.442695, %v7949_v56 }
 0xbd2   :  { %v15677_v44 = vpop.eup %10861 }
 0xbd3   :  { %v8087_v29 = vsel %vm1214_vm2, %v15677_v44, 0.0 }
 0xbd4   :  { %8082 = vadd.xlane.f32.xlu1 %v8081_v47  ;;  %v7912_v47 = vpop.xlane.xlu2 %7911 }
 0xbd5   :  { %8085 = vadd.xlane.f32.xlu2 %v8084_v42  ;;  %v7950_v42 = vsub.f32 %v15562_v37, %v7912_v47 }
 0xbd7   :  { %v7915_v63 = vpop.xlane.xlu1 %7914 }
 0xbd8   :  { %v7951_v19 = vsub.f32 %v15568_v6, %v7915_v63  ;;  %10392 = vrot.lane.b32.xlu0 %v17194_v48, %s10935_s13 }
 0xbda   :  { %v8012_v52 = vmul.f32 1.442695, %v7951_v19  ;;  %v8010_v19 = vmul.f32 1.442695, %v7950_v42 }
 0xbdc   :  { %10863 = vpow2.f32 %v8012_v52  ;;  %8097 = vadd.xlane.f32.xlu1 %v8096_v25  ;;  %v17195_v25 = vld [vmem:[#allocation80_spill] sm:$0xff] }
 0xbdd   :  { %10865 = vpow2.f32 %v8008_v40 }
 0xbde   :  { %10867 = vrcp.f32 %v15455_v12 }
 0xbdf   :  { %10869 = vrcp.f32 %v15572_v17 }
 0xbe2   :  { %v15679_v22 = vpop.eup %10863 }
 0xbe3   :  { %v8105_v6 = vsel %vm1214_vm2, %v15679_v22, 0.0  ;;  %v15685_v38 = vpop.eup %10865 }
 0xbe4   :  { %8106 = vadd.xlane.f32.xlu2 %v8105_v6  ;;  %8088 = vadd.xlane.f32.xlu1 %v8087_v29  ;;  %v8099_v23 = vsel %vm1214_vm2, %v15685_v38, 0.0  ;;  %v10868_v55 = vpop.eup %10867 }
 0xbe5   :  { %v8367_v63 = vmul.f32 %v10868_v55, %v15455_v12  ;;  %v15693_v56 = vpop.eup %10869  ;;  %vm8372_vm9 = vweird.f32 %v10868_v55 }
 0xbe6   :  { %v8381_v37 = vmul.f32 %v15693_v56, %v15572_v17  ;;  %vm8373_vm11 = vmor %vm8371_vm8, %vm8372_vm9  ;;  %vm8386_vm3 = vweird.f32 %v15693_v56 }
 0xbe7   :  { %v8368_v52 = vsub.f32 1.0, %v8367_v63  ;;  %vm15728_vm6 = vmor %vm8385_vm4, %vm8386_vm3 }
 0xbe9   :  { %v8369_v40 = vmul.f32 %v10868_v55, %v8368_v52  ;;  %v8377_v52 = vand.u32 2147483648, %v15455_v12 }
 0xbeb   :  { %v8370_v63 = vadd.f32 %v10868_v55, %v8369_v40  ;;  %v8378_v58 = vor.u32 1.1754944e-38, %v8377_v52 }
 0xbec   :  { %8100 = vadd.xlane.f32.xlu1 %v8099_v23 }
 0xbed   :  { %v8374_v40 = vsel %vm8373_vm11, %v10868_v55, %v8370_v63 }
 0xbf7   :  { %v8026_v48 = vpop.xlane.xlu1 %8025 }
 0xbf8   :  { %10871 = vrcp.f32 %v8026_v48  ;;  %v8153_v7 = vand.u32 2147483648, %v8026_v48  ;;  %v8151_v0 = vand.u32 2147483647, %v8026_v48  ;;  %vm8147_vm12 = vweird.f32 %v8026_v48 }
 0xbf9   :  { %10873 = vpow2.f32 %v8010_v19 }
 0xbfa   :  { %vm8152_vm15 = vcmp.eq.f32.partialorder %v8151_v0, 8.507059e+37 }
 0xbfc   :  { %10402 = vrot.lane.b32.xlu2 %v17195_v25, %s10935_s13  ;;  %v8382_v25 = vsub.f32 1.0, %v8381_v37  ;;  %v8154_v37 = vor.u32 1.1754944e-38, %v8153_v7  ;;  %v10360_v7 = vunpack.i.h.bf16 %v15433_v32 }
 0xbfe   :  { %v10872_v6 = vpop.eup %10871  ;;  %v8383_v33 = vmul.f32 %v15693_v56, %v8382_v25 }
 0xbff   :  { %v15699_v29 = vpop.eup %10873  ;;  %v8143_v23 = vmul.f32 %v10872_v6, %v8026_v48  ;;  %v15701_v47 = vpop.xlane.xlu1 %8094  ;;  %vm8148_vm10 = vweird.f32 %v10872_v6 }
 0xc00   :  { %v15704_v42 = vpop.xlane.xlu2 %8028  ;;  %v8102_v62 = vsel %vm1214_vm2, %v15699_v29, 0.0  ;;  %vm8149_vm13 = vmor %vm8147_vm12, %vm8148_vm10 }
 0xc01   :  { %v8144_v19 = vsub.f32 1.0, %v8143_v23  ;;  %10875 = vrcp.f32 %v15704_v42  ;;  %v8167_v32 = vand.u32 2147483648, %v15704_v42  ;;  %vm8161_vm7 = vweird.f32 %v15704_v42 }
 0xc02   :  { %8103 = vadd.xlane.f32.xlu0 %v8102_v62  ;;  %v8379_v62 = vsel %vm8376_vm14, %v8378_v58, %v8374_v40  ;;  %v8391_v58 = vand.u32 2147483648, %v15572_v17 }
 0xc03   :  { %v8145_v14 = vmul.f32 %v10872_v6, %v8144_v19  ;;  %v8580_v0 = vmul.f32 %v15257_v10, %v8379_v62  ;;  %v8165_v10 = vand.u32 2147483647, %v15704_v42 }
 0xc04   :  { %v8392_v25 = vor.u32 1.1754944e-38, %v8391_v58  ;;  %v15744_v58 = vpop.permute.xlu0 %10387 }
 0xc05   :  { %v8146_v23 = vadd.f32 %v10872_v6, %v8145_v14  ;;  %10397 = vrot.lane.b32.xlu1 %v17196_v49, %s10935_s13  ;;  %v10355_v14 = vunpack.i.h.bf16 %v15387_v43  ;;  %v8384_v49 = vadd.f32 %v15693_v56, %v8383_v33  ;;  %vm8166_vm10 = vcmp.eq.f32.partialorder %v8165_v10, 8.507059e+37 }
 0xc07   :  { %v10876_v39 = vpop.eup %10875  ;;  %v8150_v19 = vsel %vm8149_vm13, %v10872_v6, %v8146_v23  ;;  %v8044_v59 = vpop.xlane.xlu1 %8043  ;;  %v8168_v23 = vor.u32 1.1754944e-38, %v8167_v32  ;;  %v10370_v32 = vunpack.i.h.bf16 %v15445_v4 }
 0xc08   :  { %v8155_v16 = vsel %vm8152_vm15, %v8154_v37, %v8150_v19  ;;  %v8157_v12 = vmul.f32 %v10876_v39, %v15704_v42  ;;  %v10383_v55 = vpop.permute.xlu2 %10382  ;;  %10877 = vrcp.f32 %v8044_v59  ;;  %vm8162_vm5 = vweird.f32 %v10876_v39 }
 0xc09   :  { %v8564_v48 = vmul.f32 %v15582_v61, %v8155_v16  ;;  %v10384_v63 = vunpack.i.l.bf16 %v10383_v55  ;;  %v10385_v6 = vunpack.i.h.bf16 %v10383_v55  ;;  %v8389_v61 = vand.u32 2147483647, %v15572_v17  ;;  %vm8163_vm8 = vmor %vm8161_vm7, %vm8162_vm5 }
 0xc0a   :  { %v8158_v36 = vsub.f32 1.0, %v8157_v12  ;;  %v8388_v17 = vsel %vm15728_vm6, %v15693_v56, %v8384_v49  ;;  %v8237_v55 = vand.u32 2147483648, %v8044_v59  ;;  %vm8231_vm12 = vweird.f32 %v8044_v59 }
 0xc0b   :  { %8935 = vmatpush.msrb.mxu2 %v10384_v63  ;;  %10013 = vmatmul.msk.f32.vlgmr.msrb.gmra.mxu3 %vm1214_vm2, %v8564_v48  ;;  %vm8390_vm9 = vcmp.eq.f32.partialorder %v8389_v61, 8.507059e+37  ;;  %v8235_v48 = vand.u32 2147483647, %v8044_v59 }
 0xc0c   :  { %v8159_v43 = vmul.f32 %v10876_v39, %v8158_v36  ;;  %8865 = vmatpush.msrb.mxu3 %v10355_v14  ;;  %v8393_v12 = vsel %vm8390_vm9, %v8392_v25, %v8388_v17  ;;  %v8238_v49 = vor.u32 1.1754944e-38, %v8237_v55 }
 0xc0d   :  { %8936 = vmatpush.msrb.mxu2 %v10385_v6  ;;  %v8581_v56 = vmul.f32 %v15278_v51, %v8393_v12  ;;  %vm8236_vm14 = vcmp.eq.f32.partialorder %v8235_v48, 8.507059e+37 }
 0xc0e   :  { %v10878_v16 = vpop.eup %10877  ;;  %v8160_v52 = vadd.f32 %v10876_v39, %v8159_v43  ;;  %8866 = vmatpush.msrb.mxu3 %v10360_v7  ;;  %10029 = vmatmul.msk.f32.vlgmr.msrb.gmra.mxu2 %vm1214_vm2, %v8580_v0  ;;  %v17199_v0 = vld [vmem:[#allocation101_spill] sm:$0xff] }
 0xc0f   :  { %v8227_v40 = vmul.f32 %v10878_v16, %v8044_v59  ;;  %v8032_v37 = vpop.xlane.xlu1 %8031  ;;  %vm8232_vm11 = vweird.f32 %v10878_v16 }
 0xc10   :  { %v8164_v19 = vsel %vm8163_vm8, %v10876_v39, %v8160_v52  ;;  %10879 = vrcp.f32 %v8032_v37  ;;  %vm8233_vm13 = vmor %vm8231_vm12, %vm8232_vm11  ;;  %v8181_v43 = vand.u32 2147483648, %v8032_v37  ;;  %v8179_v10 = vand.u32 2147483647, %v8032_v37 }
 0xc11   :  { %v8228_v62 = vsub.f32 1.0, %v8227_v40  ;;  %v8169_v42 = vsel %vm8166_vm10, %v8168_v23, %v8164_v19  ;;  %v10375_v52 = vunpack.i.h.bf16 %v15462_v34  ;;  %vm8175_vm3 = vweird.f32 %v8032_v37 }
 0xc12   :  { %v8565_v63 = vmul.f32 %v15591_v5, %v8169_v42  ;;  %vm8180_vm5 = vcmp.eq.f32.partialorder %v8179_v10, 8.507059e+37  ;;  %v10379_v34 = vunpack.i.l.bf16 %v15574_v54  ;;  %v10380_v42 = vunpack.i.h.bf16 %v15574_v54 }
 0xc13   :  { %v8229_v14 = vmul.f32 %v10878_v16, %v8228_v62 }
 0xc14   :  { %10014 = vmatmul.msk.f32.gmra.mxu3 %vm1214_vm2, %v8565_v63 }
 0xc15   :  { %v8230_v7 = vadd.f32 %v10878_v16, %v8229_v14 }
 0xc16   :  { %10030 = vmatmul.msk.f32.gmra.mxu2 %vm1214_vm2, %v8581_v56  ;;  %v10880_v39 = vpop.eup %10879  ;;  %10407 = vrot.lane.b32.xlu0 %v17199_v0, %s10935_s13 }
 0xc17   :  { %v8234_v36 = vsel %vm8233_vm13, %v10878_v16, %v8230_v7  ;;  %v8171_v5 = vmul.f32 %v10880_v39, %v8032_v37  ;;  %v8047_v61 = vpop.xlane.xlu1 %8046  ;;  %vm8176_vm15 = vweird.f32 %v10880_v39  ;;  %v7952_v16 = vsub.f32 %v15326_v13, %v15579_v8 }
 0xc18   :  { %v8239_v6 = vsel %vm8236_vm14, %v8238_v49, %v8234_v36  ;;  %10881 = vrcp.f32 %v8047_v61  ;;  %vm8177_vm4 = vmor %vm8175_vm3, %vm8176_vm15  ;;  %v8251_v55 = vand.u32 2147483648, %v8047_v61  ;;  %v8249_v14 = vand.u32 2147483647, %v8047_v61 }
 0xc19   :  { %v8570_v51 = vmul.f32 %v15598_v21, %v8239_v6  ;;  %v8172_v59 = vsub.f32 1.0, %v8171_v5  ;;  %v8182_v21 = vor.u32 1.1754944e-38, %v8181_v43  ;;  %v8014_v62 = vmul.f32 1.442695, %v7952_v16 }
 0xc1a   :  { %vm8245_vm7 = vweird.f32 %v8047_v61  ;;  %v8252_v63 = vor.u32 1.1754944e-38, %v8251_v55  ;;  %vm8250_vm9 = vcmp.eq.f32.partialorder %v8249_v14, 8.507059e+37 }
 0xc1b   :  { %v8173_v33 = vmul.f32 %v10880_v39, %v8172_v59 }
 0xc1c   :  { %10019 = vmatmul.msk.f32.vlgmr.msra.gmra.mxu3 %vm1214_vm2, %v8570_v51 }
 0xc1d   :  { %v8174_v17 = vadd.f32 %v10880_v39, %v8173_v33  ;;  %8970 = vmatpush.msra.mxu3 %v10370_v32 }
 0xc1e   :  { %v10882_v25 = vpop.eup %10881 }
 0xc1f   :  { %v8178_v40 = vsel %vm8177_vm4, %v10880_v39, %v8174_v17  ;;  %v8241_v23 = vmul.f32 %v10882_v25, %v8047_v61  ;;  %8971 = vmatpush.msra.mxu3 %v10375_v52  ;;  %v8035_v4 = vpop.xlane.xlu1 %8034  ;;  %v15752_v19 = vpop.xlane.xlu0 %8064  ;;  %vm8246_vm6 = vweird.f32 %v10882_v25 }
 0xc20   :  { %v8183_v12 = vsel %vm8180_vm5, %v8182_v21, %v8178_v40  ;;  %10883 = vrcp.f32 %v8035_v4  ;;  %vm8247_vm8 = vmor %vm8245_vm7, %vm8246_vm6  ;;  %v8195_v59 = vand.u32 2147483648, %v8035_v4  ;;  %vm8189_vm11 = vweird.f32 %v8035_v4 }
 0xc21   :  { %v8566_v8 = vmul.f32 %v15603_v1, %v8183_v12  ;;  %v8242_v13 = vsub.f32 1.0, %v8241_v23  ;;  %10885 = vrcp.f32 %v15752_v19  ;;  %v8193_v32 = vand.u32 2147483647, %v8035_v4 }
 0xc22   :  { %10887 = vpow2.f32 %v8014_v62  ;;  %v8196_v40 = vor.u32 1.1754944e-38, %v8195_v59  ;;  %vm8329_vm6 = vweird.f32 %v15752_v19 }
 0xc23   :  { %v8243_v37 = vmul.f32 %v10882_v25, %v8242_v13  ;;  %10015 = vmatmul.msk.f32.vlgmr.msra.gmra.mxu1 %vm1214_vm2, %v8566_v8  ;;  %10889 = vrcp.f32 %v15586_v2  ;;  %vm8194_vm13 = vcmp.eq.f32.partialorder %v8193_v32, 8.507059e+37 }
 0xc24   :  { %8900 = vmatpush.msra.mxu1 %v10379_v34 }
 0xc25   :  { %v8244_v48 = vadd.f32 %v10882_v25, %v8243_v37 }
 0xc26   :  { %v10884_v1 = vpop.eup %10883  ;;  %8901 = vmatpush.msra.mxu1 %v10380_v42 }
 0xc27   :  { %v8185_v56 = vmul.f32 %v10884_v1, %v8035_v4  ;;  %v8062_v7 = vpop.xlane.xlu1 %8061  ;;  %v8248_v49 = vsel %vm8247_vm8, %v10882_v25, %v8244_v48  ;;  %v15760_v39 = vpop.eup %10885  ;;  %vm8190_vm10 = vweird.f32 %v10884_v1 }
 0xc28   :  { %10891 = vrcp.f32 %v8062_v7  ;;  %v8253_v54 = vsel %vm8250_vm9, %v8252_v63, %v8248_v49  ;;  %v15762_v0 = vpop.eup %10887  ;;  %v8325_v51 = vmul.f32 %v15760_v39, %v15752_v19  ;;  %vm15772_vm12 = vmor %vm8189_vm11, %vm8190_vm10  ;;  %v8319_v12 = vand.u32 2147483647, %v8062_v7 }
 0xc29   :  { %v8186_v36 = vsub.f32 1.0, %v8185_v56  ;;  %v8571_v6 = vmul.f32 %v15609_v27, %v8253_v54  ;;  %v15765_v5 = vpop.eup %10889  ;;  %v8108_v27 = vsel %vm1214_vm2, %v15762_v0, 0.0  ;;  %v8321_v8 = vand.u32 2147483648, %v8062_v7 }
 0xc2a   :  { %v8451_v10 = vmul.f32 %v15765_v5, %v15586_v2  ;;  %v8326_v52 = vsub.f32 1.0, %v8325_v51  ;;  %vm8315_vm15 = vweird.f32 %v8062_v7  ;;  %vm8330_vm3 = vweird.f32 %v15760_v39 }
 0xc2b   :  { %v8187_v61 = vmul.f32 %v10884_v1, %v8186_v36  ;;  %10020 = vmatmul.msk.f32.gmra.mxu3 %vm1214_vm2, %v8571_v6  ;;  %vm8320_vm5 = vcmp.eq.f32.partialorder %v8319_v12, 8.507059e+37  ;;  %v8335_v49 = vand.u32 2147483648, %v15752_v19  ;;  %v8333_v54 = vand.u32 2147483647, %v15752_v19  ;;  %vm15805_vm8 = vmor %vm8329_vm6, %vm8330_vm3 }
 0xc2c   :  { %v8452_v62 = vsub.f32 1.0, %v8451_v10  ;;  %v8327_v34 = vmul.f32 %v15760_v39, %v8326_v52  ;;  %vm8456_vm7 = vweird.f32 %v15765_v5  ;;  %vm8455_vm10 = vweird.f32 %v15586_v2 }
 0xc2d   :  { %v8188_v43 = vadd.f32 %v10884_v1, %v8187_v61  ;;  %v8336_v52 = vor.u32 1.1754944e-38, %v8335_v49  ;;  %vm15823_vm11 = vmor %vm8455_vm10, %vm8456_vm7 }
 0xc2e   :  { %v10892_v33 = vpop.eup %10891  ;;  %v8453_v48 = vmul.f32 %v15765_v5, %v8452_v62  ;;  %v8328_v63 = vadd.f32 %v15760_v39, %v8327_v34 }
 0xc2f   :  { %v8311_v17 = vmul.f32 %v10892_v33, %v8062_v7  ;;  %v15778_v25 = vpop.xlane.xlu1 %8049  ;;  %8109 = vadd.xlane.f32.xlu1 %v8108_v27  ;;  %v8192_v21 = vsel %vm15772_vm12, %v10884_v1, %v8188_v43  ;;  %v15783_v4 = vpop.xlane.xlu0 %8067  ;;  %vm8316_vm14 = vweird.f32 %v10892_v33  ;;  %v8322_v1 = vor.u32 1.1754944e-38, %v8321_v8 }
 0xc30   :  { %10893 = vrcp.f32 %v15778_v25  ;;  %v8197_v13 = vsel %vm8194_vm13, %v8196_v40, %v8192_v21  ;;  %vm8317_vm4 = vmor %vm8315_vm15, %vm8316_vm14  ;;  %v8454_v51 = vadd.f32 %v15765_v5, %v8453_v48  ;;  %v8265_v43 = vand.u32 2147483648, %v15778_v25 }
 0xc31   :  { %v8312_v23 = vsub.f32 1.0, %v8311_v17  ;;  %v8567_v55 = vmul.f32 %v15616_v15, %v8197_v13  ;;  %10895 = vrcp.f32 %v15783_v4  ;;  %v8263_v19 = vand.u32 2147483647, %v15778_v25 }
 0xc32   :  { %10897 = vrcp.f32 %v15701_v47  ;;  %v8332_v10 = vsel %vm15805_vm8, %v15760_v39, %v8328_v63  ;;  %v8461_v27 = vand.u32 2147483648, %v15586_v2  ;;  %v8459_v21 = vand.u32 2147483647, %v15586_v2 }
 0xc33   :  { %v8313_v37 = vmul.f32 %v10892_v33, %v8312_v23  ;;  %10016 = vmatmul.msk.f32.gmra.mxu1 %vm1214_vm2, %v8567_v55  ;;  %vm8334_vm12 = vcmp.eq.f32.partialorder %v8333_v54, 8.507059e+37  ;;  %vm8259_vm13 = vweird.f32 %v15778_v25  ;;  %v8266_v39 = vor.u32 1.1754944e-38, %v8265_v43 }
 0xc34   :  { %v8337_v12 = vsel %vm8334_vm12, %v8336_v52, %v8332_v10  ;;  %v8458_v8 = vsel %vm15823_vm11, %v15765_v5, %v8454_v51  ;;  %vm8264_vm15 = vcmp.eq.f32.partialorder %v8263_v19, 8.507059e+37  ;;  %v8462_v34 = vor.u32 1.1754944e-38, %v8461_v27 }
 0xc35   :  { %v8314_v42 = vadd.f32 %v10892_v33, %v8313_v37  ;;  %vm8460_vm3 = vcmp.eq.f32.partialorder %v8459_v21, 8.507059e+37  ;;  %v8577_v5 = vmul.f32 %v15618_v31, %v8337_v12  ;;  %v10389_v63 = vunpack.i.l.bf16 %v15744_v58 }
 0xc36   :  { %v10894_v14 = vpop.eup %10893  ;;  %v10390_v54 = vunpack.i.h.bf16 %v15744_v58  ;;  %v8475_v43 = vand.u32 2147483648, %v15701_v47  ;;  %vm8343_vm12 = vweird.f32 %v15783_v4 }
 0xc37   :  { %v8318_v56 = vsel %vm8317_vm4, %v10892_v33, %v8314_v42  ;;  %v8255_v15 = vmul.f32 %v10894_v14, %v15778_v25  ;;  %v15794_v7 = vpop.xlane.xlu1 %8052  ;;  %v15810_v32 = vpop.eup %10895  ;;  %vm8260_vm9 = vweird.f32 %v10894_v14 }
 0xc38   :  { %v8323_v36 = vsel %vm8320_vm5, %v8322_v1, %v8318_v56  ;;  %10899 = vrcp.f32 %v15794_v7  ;;  %v15819_v16 = vpop.eup %10897  ;;  %vm8261_vm14 = vmor %vm8259_vm13, %vm8260_vm9  ;;  %v8339_v62 = vmul.f32 %v15810_v32, %v15783_v4  ;;  %v8279_v51 = vand.u32 2147483648, %v15794_v7 }
 0xc39   :  { %v8576_v6 = vmul.f32 %v15626_v28, %v8323_v36  ;;  %v8256_v61 = vsub.f32 1.0, %v8255_v15  ;;  %v15813_v28 = vpop.xlane.xlu0 %8070  ;;  %v8465_v37 = vmul.f32 %v15819_v16, %v15701_v47  ;;  %vm8469_vm5 = vweird.f32 %v15701_v47 }
 0xc3a   :  { %10901 = vrcp.f32 %v15813_v28  ;;  %v8340_v56 = vsub.f32 1.0, %v8339_v62  ;;  %vm8470_vm6 = vweird.f32 %v15819_v16  ;;  %vm8344_vm7 = vweird.f32 %v15810_v32 }
 0xc3b   :  { %v8257_v33 = vmul.f32 %v10894_v14, %v8256_v61  ;;  %10025 = vmatmul.msk.f32.vlgmr.msrb.gmra.mxu3 %vm1214_vm2, %v8576_v6  ;;  %v8473_v6 = vand.u32 2147483647, %v15701_v47  ;;  %v8277_v61 = vand.u32 2147483647, %v15794_v7  ;;  %vm8273_vm8 = vweird.f32 %v15794_v7  ;;  %vm15902_vm13 = vmor %vm8343_vm12, %vm8344_vm7 }
 0xc3d   :  { %v8258_v40 = vadd.f32 %v10894_v14, %v8257_v33  ;;  %v8341_v33 = vmul.f32 %v15810_v32, %v8340_v56  ;;  %vm15882_vm10 = vcmp.eq.f32.partialorder %v8277_v61, 8.507059e+37 }
 0xc3e   :  { %v15829_v23 = vpop.eup %10899 }
 0xc3f   :  { %v8262_v2 = vsel %vm8261_vm14, %v10894_v14, %v8258_v40  ;;  %v8269_v25 = vmul.f32 %v15829_v23, %v15794_v7  ;;  %v15840_v13 = vpop.xlane.xlu1 %8079  ;;  %v8463_v14 = vsel %vm8460_vm3, %v8462_v34, %v8458_v8  ;;  %vm8274_vm4 = vweird.f32 %v15829_v23 }
 0xc40   :  { %v8267_v55 = vsel %vm8264_vm15, %v8266_v39, %v8262_v2  ;;  %10903 = vrcp.f32 %v15840_v13  ;;  %v7921_v42 = vpop.xlane.xlu2 %7920  ;;  %v15852_v36 = vpop.eup %10901  ;;  %v15857_v31 = vmul.f32 %v15480_v18, %v8463_v14  ;;  %vm15878_vm9 = vmor %vm8273_vm8, %vm8274_vm4  ;;  %v8280_v40 = vor.u32 1.1754944e-38, %v8279_v51 }
 0xc41   :  { %v8572_v48 = vmul.f32 %v15632_v45, %v8267_v55  ;;  %v8270_v1 = vsub.f32 1.0, %v8269_v25  ;;  %v7953_v49 = vsub.f32 %v15653_v24, %v7921_v42  ;;  %v8466_v45 = vsub.f32 1.0, %v8465_v37  ;;  %vm15926_vm4 = vmor %vm8469_vm5, %vm8470_vm6 }
 0xc42   :  { %v8353_v18 = vmul.f32 %v15852_v36, %v15813_v28  ;;  %v8342_v62 = vadd.f32 %v15810_v32, %v8341_v33  ;;  %v8403_v7 = vand.u32 2147483647, %v15840_v13  ;;  %v8405_v12 = vand.u32 2147483648, %v15840_v13 }
 0xc43   :  { %v8271_v15 = vmul.f32 %v15829_v23, %v8270_v1  ;;  %10021 = vmatmul.msk.f32.vlgmr.msrb.gmra.mxu1 %vm1214_vm2, %v8572_v48  ;;  %10026 = vmatmul.msk.f32.gmra.mxu3 %vm1214_vm2, %v8577_v5  ;;  %v8016_v24 = vmul.f32 1.442695, %v7953_v49  ;;  %v8467_v27 = vmul.f32 %v15819_v16, %v8466_v45  ;;  %v8349_v42 = vand.u32 2147483648, %v15783_v4 }
 0xc44   :  { %9005 = vmatpush.msrb.mxu1 %v10389_v63  ;;  %v8354_v25 = vsub.f32 1.0, %v8353_v18  ;;  %vm8399_vm14 = vweird.f32 %v15840_v13  ;;  %v8406_v49 = vor.u32 1.1754944e-38, %v8405_v12  ;;  %vm8404_vm3 = vcmp.eq.f32.partialorder %v8403_v7, 8.507059e+37 }
 0xc45   :  { %v8272_v19 = vadd.f32 %v15829_v23, %v8271_v15  ;;  %10905 = vpow2.f32 %v8016_v24  ;;  %v8468_v55 = vadd.f32 %v15819_v16, %v8467_v27  ;;  %v8346_v15 = vsel %vm15902_vm13, %v15810_v32, %v8342_v62 }
 0xc46   :  { %v10904_v59 = vpop.eup %10903  ;;  %9006 = vmatpush.msrb.mxu1 %v10390_v54  ;;  %v8350_v24 = vor.u32 1.1754944e-38, %v8349_v42  ;;  %vm8474_vm5 = vcmp.eq.f32.partialorder %v8473_v6, 8.507059e+37  ;;  %v8476_v27 = vor.u32 1.1754944e-38, %v8475_v43  ;;  %vm8358_vm6 = vweird.f32 %v15852_v36 }
 0xc47   :  { %v8395_v58 = vmul.f32 %v10904_v59, %v15840_v13  ;;  %v15870_v10 = vpop.xlane.xlu1 %8082  ;;  %v8276_v2 = vsel %vm15878_vm9, %v15829_v23, %v8272_v19  ;;  %vm8400_vm11 = vweird.f32 %v10904_v59  ;;  %v8347_v23 = vand.u32 2147483647, %v15783_v4 }
 0xc48   :  { %10907 = vrcp.f32 %v15870_v10  ;;  %v15876_v52 = vpop.xlane.xlu2 %8085  ;;  %v8281_v48 = vsel %vm15882_vm10, %v8280_v40, %v8276_v2  ;;  %vm8401_vm15 = vmor %vm8399_vm14, %vm8400_vm11  ;;  %v8355_v4 = vmul.f32 %v15852_v36, %v8354_v25  ;;  %vm8357_vm8 = vweird.f32 %v15813_v28 }
 0xc49   :  { %v8396_v39 = vsub.f32 1.0, %v8395_v58  ;;  %10909 = vrcp.f32 %v15876_v52  ;;  %v8573_v63 = vmul.f32 %v15641_v53, %v8281_v48  ;;  %vm8348_vm7 = vcmp.eq.f32.partialorder %v8347_v23, 8.507059e+37  ;;  %vm15950_vm9 = vmor %vm8357_vm8, %vm8358_vm6 }
 0xc4a   :  { %v10393_v8 = vpop.permute.xlu0 %10392  ;;  %v8472_v58 = vsel %vm15926_vm4, %v15819_v16, %v8468_v55  ;;  %v8351_v17 = vsel %vm8348_vm7, %v8350_v24, %v8346_v15  ;;  %v8356_v21 = vadd.f32 %v15852_v36, %v8355_v4  ;;  %v8361_v6 = vand.u32 2147483647, %v15813_v28 }
 0xc4b   :  { %v8397_v34 = vmul.f32 %v10904_v59, %v8396_v39  ;;  %v10394_v37 = vunpack.i.l.bf16 %v10393_v8  ;;  %v15898_v1 = vpop.eup %10905  ;;  %v10395_v54 = vunpack.i.h.bf16 %v10393_v8  ;;  %10022 = vmatmul.msk.f32.gmra.mxu1 %vm1214_vm2, %v8573_v63  ;;  %v8477_v39 = vsel %vm8474_vm5, %v8476_v27, %v8472_v58 }
 0xc4c   :  { %v8111_v45 = vsel %vm1214_vm2, %v15898_v1, 0.0  ;;  %v8578_v16 = vmul.f32 %v15634_v9, %v8351_v17  ;;  %v8419_v47 = vand.u32 2147483648, %v15870_v10  ;;  %v8417_v7 = vand.u32 2147483647, %v15870_v10 }
 0xc4d   :  { %v8398_v14 = vadd.f32 %v10904_v59, %v8397_v34  ;;  %9040 = vmatpush.msra.mxu2 %v10394_v37  ;;  %8112 = vadd.xlane.f32.xlu2 %v8111_v45  ;;  %v8587_v2 = vmul.f32 %v15588_v30, %v8477_v39  ;;  %vm8413_vm11 = vweird.f32 %v15870_v10  ;;  %vm8362_vm12 = vcmp.eq.f32.partialorder %v8361_v6, 8.507059e+37 }
 0xc4e   :  { %v10908_v56 = vpop.eup %10907  ;;  %v8420_v34 = vor.u32 1.1754944e-38, %v8419_v47  ;;  %vm8418_vm14 = vcmp.eq.f32.partialorder %v8417_v7, 8.507059e+37  ;;  %v8433_v48 = vand.u32 2147483648, %v15876_v52 }
 0xc4f   :  { %v15915_v61 = vpop.eup %10909  ;;  %v8402_v13 = vsel %vm8401_vm15, %v10904_v59, %v8398_v14  ;;  %v8409_v53 = vmul.f32 %v10908_v56, %v15870_v10  ;;  %v15920_v51 = vpop.xlane.xlu1 %8097  ;;  %9041 = vmatpush.msra.mxu2 %v10395_v54  ;;  %vm8414_vm10 = vweird.f32 %v10908_v56  ;;  %v8431_v10 = vand.u32 2147483647, %v15876_v52 }
 0xc50   :  { %v8407_v33 = vsel %vm8404_vm3, %v8406_v49, %v8402_v13  ;;  %v8423_v59 = vmul.f32 %v15915_v61, %v15876_v52  ;;  %10035 = vmatmul.msk.f32.vlgmr.msra.gmra.mxu2 %vm1214_vm2, %v15857_v31  ;;  %v8363_v31 = vand.u32 2147483648, %v15813_v28  ;;  %v8360_v28 = vsel %vm15950_vm9, %v15852_v36, %v8356_v21  ;;  %vm8415_vm13 = vmor %vm8413_vm11, %vm8414_vm10 }
 0xc51   :  { %v8582_v19 = vmul.f32 %v15651_v50, %v8407_v33  ;;  %v8410_v18 = vsub.f32 1.0, %v8409_v53  ;;  %vm8428_vm15 = vweird.f32 %v15915_v61  ;;  %vm8427_vm3 = vweird.f32 %v15876_v52 }
 0xc52   :  { %v8424_v40 = vsub.f32 1.0, %v8423_v59  ;;  %v8364_v25 = vor.u32 1.1754944e-38, %v8363_v31  ;;  %vm8429_vm4 = vmor %vm8427_vm3, %vm8428_vm15  ;;  %v8434_v15 = vor.u32 1.1754944e-38, %v8433_v48  ;;  %vm8432_vm7 = vcmp.eq.f32.partialorder %v8431_v10, 8.507059e+37 }
 0xc53   :  { %v8411_v50 = vmul.f32 %v10908_v56, %v8410_v18  ;;  %10031 = vmatmul.msk.f32.vlgmr.msra.gmra.mxu3 %vm1214_vm2, %v8582_v19  ;;  %10027 = vmatmul.msk.f32.vlgmr.msra.gmra.mxu1 %vm1214_vm2, %v8578_v16  ;;  %vm8483_vm11 = vweird.f32 %v15920_v51  ;;  %v8487_v31 = vand.u32 2147483647, %v15920_v51 }
 0xc54   :  { %v8425_v8 = vmul.f32 %v15915_v61, %v8424_v40  ;;  %v8365_v37 = vsel %vm8362_vm12, %v8364_v25, %v8360_v28  ;;  %v8489_v40 = vand.u32 2147483648, %v15920_v51 }
 0xc55   :  { %v8412_v62 = vadd.f32 %v10908_v56, %v8411_v50  ;;  %v8579_v5 = vmul.f32 %v15643_v57, %v8365_v37 }
 0xc56   :  { %v8426_v42 = vadd.f32 %v15915_v61, %v8425_v8  ;;  %v8490_v47 = vor.u32 1.1754944e-38, %v8489_v40  ;;  %v588_v8 = vld [vmem:[%s16321_s5 + $0x18] sm:$0xff] }
 0xc57   :  { %v15955_v12 = vpop.xlane.xlu2 %8106  ;;  %v8089_v9 = vpop.xlane.xlu1 %8088  ;;  %v8416_v55 = vsel %vm8415_vm13, %v10908_v56, %v8412_v62  ;;  %vm8488_vm13 = vcmp.eq.f32.partialorder %v8487_v31, 8.507059e+37 }
 0xc58   :  { %10911 = vrcp.f32 %v8089_v9  ;;  %10036 = vmatmul.msk.f32.gmra.mxu2 %vm1214_vm2, %v8587_v2  ;;  %v8421_v30 = vsel %vm8418_vm14, %v8420_v34, %v8416_v55  ;;  %v8430_v14 = vsel %vm8429_vm4, %v15915_v61, %v8426_v42  ;;  %v8447_v52 = vand.u32 2147483648, %v8089_v9 }
 0xc59   :  { %10913 = vrcp.f32 %v15920_v51  ;;  %v8583_v36 = vmul.f32 %v15660_v35, %v8421_v30  ;;  %v8435_v45 = vsel %vm8432_vm7, %v8434_v15, %v8430_v14  ;;  %v8445_v13 = vand.u32 2147483647, %v8089_v9 }
 0xc5a   :  { %v8584_v61 = vmul.f32 %v15662_v41, %v8435_v45  ;;  %vm8441_vm6 = vweird.f32 %v8089_v9  ;;  %v8448_v33 = vor.u32 1.1754944e-38, %v8447_v52  ;;  %v8529_v52 = vand.u32 2147483647, %v15955_v12 }
 0xc5b   :  { %10032 = vmatmul.msk.f32.gmra.mxu3 %vm1214_vm2, %v8583_v36  ;;  %10028 = vmatmul.msk.f32.gmra.mxu1 %vm1214_vm2, %v8579_v5  ;;  %vm8446_vm9 = vcmp.eq.f32.partialorder %v8445_v13, 8.507059e+37 }
 0xc5e   :  { %v10912_v23 = vpop.eup %10911 }
 0xc5f   :  { %v8437_v63 = vmul.f32 %v10912_v23, %v8089_v9  ;;  %v10403_v56 = vpop.permute.xlu2 %10402  ;;  %v15976_v35 = vpop.xlane.xlu1 %8100  ;;  %vm8442_vm5 = vweird.f32 %v10912_v23 }
 0xc60   :  { %v10914_v54 = vpop.eup %10913  ;;  %v10404_v4 = vunpack.i.l.bf16 %v10403_v56  ;;  %10915 = vrcp.f32 %v15976_v35  ;;  %v10405_v53 = vunpack.i.h.bf16 %v10403_v56  ;;  %vm8443_vm8 = vmor %vm8441_vm6, %vm8442_vm5  ;;  %vm8497_vm15 = vweird.f32 %v15976_v35 }
 0xc61   :  { %v8438_v49 = vsub.f32 1.0, %v8437_v63  ;;  %v8479_v32 = vmul.f32 %v10914_v54, %v15920_v51  ;;  %10917 = vrcp.f32 %v15955_v12  ;;  %vm8484_vm10 = vweird.f32 %v10914_v54 }
 0xc62   :  { %9110 = vmatpush.msra.mxu1 %v10404_v4  ;;  %vm8485_vm12 = vmor %vm8483_vm11, %vm8484_vm10  ;;  %v8503_v51 = vand.u32 2147483648, %v15976_v35  ;;  %v8501_v34 = vand.u32 2147483647, %v15976_v35  ;;  %vm8525_vm10 = vweird.f32 %v15955_v12 }
 0xc63   :  { %v8439_v57 = vmul.f32 %v10912_v23, %v8438_v49  ;;  %10033 = vmatmul.msk.f32.vlgmr.msrb.gmra.mxu1 %vm1214_vm2, %v8584_v61  ;;  %v8480_v18 = vsub.f32 1.0, %v8479_v32 }
 0xc64   :  { %9111 = vmatpush.msra.mxu1 %v10405_v53  ;;  %v8504_v48 = vor.u32 1.1754944e-38, %v8503_v51  ;;  %vm8502_vm4 = vcmp.eq.f32.partialorder %v8501_v34, 8.507059e+37 }
 0xc65   :  { %v8440_v24 = vadd.f32 %v10912_v23, %v8439_v57  ;;  %v8481_v17 = vmul.f32 %v10914_v54, %v8480_v18 }
 0xc66   :  { %v10916_v58 = vpop.eup %10915  ;;  %9265 = vmatpush.msrb.mxu1 %v588_v8 }
 0xc67   :  { %v8444_v59 = vsel %vm8443_vm8, %v10912_v23, %v8440_v24  ;;  %v8493_v21 = vmul.f32 %v10916_v58, %v15976_v35  ;;  %v8482_v41 = vadd.f32 %v10914_v54, %v8481_v17  ;;  %v10918_v6 = vpop.eup %10917  ;;  %vm8498_vm14 = vweird.f32 %v10916_v58 }
 0xc68   :  { %v8449_v19 = vsel %vm8446_vm9, %v8448_v33, %v8444_v59  ;;  %v8521_v9 = vmul.f32 %v10918_v6, %v15955_v12  ;;  %vm8499_vm3 = vmor %vm8497_vm15, %vm8498_vm14  ;;  %vm8526_vm8 = vweird.f32 %v10918_v6  ;;  %v8623_v33 = vpop.f32.mrf.mxu2 }
 0xc69   :  { %v8585_v27 = vmul.f32 %v15677_v44, %v8449_v19  ;;  %v8494_v50 = vsub.f32 1.0, %v8493_v21  ;;  %v8486_v39 = vsel %vm8485_vm12, %v10914_v54, %v8482_v41  ;;  %v8531_v54 = vand.u32 2147483648, %v15955_v12  ;;  %vm8527_vm11 = vmor %vm8525_vm10, %vm8526_vm8 }
 0xc6a   :  { %v8491_v62 = vsel %vm8488_vm13, %v8490_v47, %v8486_v39  ;;  %v8522_v55 = vsub.f32 1.0, %v8521_v9  ;;  %vm8530_vm12 = vcmp.eq.f32.partialorder %v8529_v52, 8.507059e+37 }
 0xc6b   :  { %10034 = vmatmul.msk.f32.gmra.mxu1 %vm1214_vm2, %v8585_v27  ;;  %v8495_v16 = vmul.f32 %v10916_v58, %v8494_v50  ;;  %v8588_v25 = vmul.f32 %v15670_v20, %v8491_v62  ;;  %v8532_v53 = vor.u32 1.1754944e-38, %v8531_v54 }
 0xc6c   :  { %v8523_v23 = vmul.f32 %v10918_v6, %v8522_v55 }
 0xc6d   :  { %v8496_v2 = vadd.f32 %v10916_v58, %v8495_v16 }
 0xc6e   :  { %v8524_v49 = vadd.f32 %v10918_v6, %v8523_v23 }
 0xc6f   :  { %v8500_v30 = vsel %vm8499_vm3, %v10916_v58, %v8496_v2 }
 0xc70   :  { %v8505_v5 = vsel %vm8502_vm4, %v8504_v48, %v8500_v30  ;;  %v8528_v13 = vsel %vm8527_vm11, %v10918_v6, %v8524_v49  ;;  %v16016_v30 = vpop.f32.mrf.mxu0 }
 0xc71   :  { %v8589_v56 = vmul.f32 %v15685_v38, %v8505_v5  ;;  %v8533_v32 = vsel %vm8530_vm12, %v8532_v53, %v8528_v13 }
 0xc72   :  { %v8591_v24 = vmul.f32 %v15679_v22, %v8533_v32 }
 0xc75   :  { %v8104_v44 = vpop.xlane.xlu0 %8103 }
 0xc76   :  { %10919 = vrcp.f32 %v8104_v44  ;;  %v8517_v10 = vand.u32 2147483648, %v8104_v44  ;;  %v8515_v14 = vand.u32 2147483647, %v8104_v44  ;;  %vm8511_vm5 = vweird.f32 %v8104_v44 }
 0xc77   :  { %v10398_v43 = vpop.permute.xlu1 %10397 }
 0xc78   :  { %v10399_v7 = vunpack.i.l.bf16 %v10398_v43  ;;  %v10400_v28 = vunpack.i.h.bf16 %v10398_v43  ;;  %v8518_v15 = vor.u32 1.1754944e-38, %v8517_v10  ;;  %vm8516_vm9 = vcmp.eq.f32.partialorder %v8515_v14, 8.507059e+37 }
 0xc7a   :  { %9075 = vmatpush.msrb.mxu3 %v10399_v7 }
 0xc7c   :  { %v10920_v37 = vpop.eup %10919  ;;  %9076 = vmatpush.msrb.mxu3 %v10400_v28 }
 0xc7d   :  { %v8507_v42 = vmul.f32 %v10920_v37, %v8104_v44  ;;  %10037 = vmatmul.msk.f32.vlgmr.msrb.gmra.mxu3 %vm1214_vm2, %v8588_v25  ;;  %vm8512_vm7 = vweird.f32 %v10920_v37 }
 0xc7e   :  { %10079 = vmatpush.msra.mxu3 %v588_v8  ;;  %vm8513_vm6 = vmor %vm8511_vm5, %vm8512_vm7 }
 0xc7f   :  { %v8508_v36 = vsub.f32 1.0, %v8507_v42 }
 0xc81   :  { %v8509_v20 = vmul.f32 %v10920_v37, %v8508_v36 }
 0xc83   :  { %v8510_v63 = vadd.f32 %v10920_v37, %v8509_v20 }
 0xc85   :  { %v8514_v35 = vsel %vm8513_vm6, %v10920_v37, %v8510_v63  ;;  %10038 = vmatmul.msk.f32.gmra.mxu3 %vm1214_vm2, %v8589_v56  ;;  %v16023_v63 = vpop.f32.mrf.mxu0 }
 0xc86   :  { %v8519_v45 = vsel %vm8516_vm9, %v8518_v15, %v8514_v35 }
 0xc87   :  { %v8590_v4 = vmul.f32 %v15699_v29, %v8519_v45  ;;  %v8626_v29 = vpop.f32.mrf.mxu2 }
 0xc88   :  { %v10408_v57 = vpop.permute.xlu0 %10407 }
 0xc89   :  { %v10409_v38 = vunpack.i.l.bf16 %v10408_v57  ;;  %10039 = vmatmul.msk.f32.vlgmr.msra.gmra.mxu1 %vm1214_vm2, %v8590_v4  ;;  %v10410_v61 = vunpack.i.h.bf16 %v10408_v57 }
 0xc8b   :  { %9145 = vmatpush.msrb.mxu2 %v10409_v38 }
 0xc8d   :  { %9146 = vmatpush.msrb.mxu2 %v10410_v61  ;;  %v16027_v35 = vpop.f32.mrf.mxu0 }
 0xc8e   :  { %v8658_v12 = vpop.f32.mrf.mxu3 }
 0xc8f   :  { %v8728_v43 = vpop.f32.mrf.mxu2 }
 0xc91   :  { %10040 = vmatmul.msk.f32.gmra.mxu1 %vm1214_vm2, %v8591_v24 }
 0xc95   :  { %v16031_v45 = vpop.f32.mrf.mxu0 }
 0xc97   :  { %v8661_v18 = vpop.f32.mrf.mxu3  ;;  %v8731_v2 = vpop.f32.mrf.mxu2 }
 0xc99   :  { %10043 = vmatmul.msk.f32.vlgmr.msrb.gmra.mxu1 %vm595_vm1, %v8623_v33 }
 0xc9d   :  { %v16035_v38 = vpop.f32.mrf.mxu0 }
 0xc9f   :  { %v8763_v16 = vpop.f32.mrf.mxu3  ;;  %v8833_v10 = vpop.f32.mrf.mxu2 }
 0xca0   :  { %v8693_v40 = vpop.f32.mrf.mxu1 }
 0xca1   :  { %10044 = vmatmul.msk.f32.gmra.mxu1 %vm595_vm1, %v8626_v29 }
 0xca2   :  { %v8110_v59 = vpop.xlane.xlu1 %8109 }
 0xca3   :  { %10921 = vrcp.f32 %v8110_v59  ;;  %v8545_v17 = vand.u32 2147483648, %v8110_v59  ;;  %v8543_v22 = vand.u32 2147483647, %v8110_v59  ;;  %vm8539_vm14 = vweird.f32 %v8110_v59 }
 0xca5   :  { %v8546_v50 = vor.u32 1.1754944e-38, %v8545_v17  ;;  %vm8544_vm3 = vcmp.eq.f32.partialorder %v8543_v22, 8.507059e+37  ;;  %v16041_v53 = vpop.f32.mrf.mxu0 }
 0xca7   :  { %v8836_v56 = vpop.f32.mrf.mxu2 }
 0xca9   :  { %v10922_v19 = vpop.eup %10921  ;;  %10045 = vmatmul.msk.f32.gmra.mxu1 %vm595_vm1, %v8658_v12  ;;  %v17216_v12 = vld [vmem:[#allocation26_spill] sm:$0xff] }
 0xcaa   :  { %v8535_v58 = vmul.f32 %v10922_v19, %v8110_v59  ;;  %vm8540_vm13 = vweird.f32 %v10922_v19  ;;  %v17217_v59 = vld [vmem:[#allocation98_spill] sm:$0xff] }
 0xcab   :  { %vm8541_vm15 = vmor %vm8539_vm14, %vm8540_vm13 }
 0xcac   :  { %v8536_v27 = vsub.f32 1.0, %v8535_v58  ;;  %v16055_v58 = vld [vmem:[%s16322_s6] ss:$0 sm:$0xff] }
 0xcad   :  { %v16045_v24 = vpop.f32.mrf.mxu0 }
 0xcae   :  { %v8537_v21 = vmul.f32 %v10922_v19, %v8536_v27  ;;  %v8766_v47 = vpop.f32.mrf.mxu3 }
 0xcaf   :  { %v8938_v54 = vpop.f32.mrf.mxu2 }
 0xcb0   :  { %v8538_v41 = vadd.f32 %v10922_v19, %v8537_v21  ;;  %v8696_v6 = vpop.f32.mrf.mxu1 }
 0xcb1   :  { %10046 = vmatmul.msk.f32.gmra.mxu1 %vm595_vm1, %v8661_v18 }
 0xcb2   :  { %v8542_v31 = vsel %vm8541_vm15, %v10922_v19, %v8538_v41  ;;  %v4850_v19 = vadd.f32 %v17217_v59, %v17216_v12  ;;  %v17218_v41 = vld [vmem:[#allocation58_spill] sm:$0xff] }
 0xcb3   :  { %v8547_v39 = vsel %vm8544_vm3, %v8546_v50, %v8542_v31  ;;  %v17219_v50 = vld [vmem:[#allocation94_spill] sm:$0xff] }
 0xcb4   :  { %v8592_v44 = vmul.f32 %v15762_v0, %v8547_v39  ;;  %v7138_v18 = vadd.f32 %v15385_v3, %v4850_v19  ;;  %v17231_v19 = vld [vmem:[#allocation62_spill] sm:$0xff] }
 0xcb5   :  { %v16057_v17 = vpop.f32.mrf.mxu0 }
 0xcb6   :  { %10041 = vmatmul.msk.f32.vlgmr.msrb.gmra.mxu2 %vm1214_vm2, %v8592_v44 }
 0xcb7   :  { %v8941_v52 = vpop.f32.mrf.mxu2 }
 0xcb9   :  { %10047 = vmatmul.msk.f32.gmra.mxu1 %vm595_vm1, %v8693_v40  ;;  %v4853_v40 = vadd.f32 %v17219_v50, %v17218_v41  ;;  %v17232_v50 = vld [vmem:[#allocation120_spill] sm:$0xff] }
 0xcbb   :  { %v7139_v3 = vadd.f32 %v15401_v26, %v4853_v40  ;;  %v17233_v40 = vld [vmem:[#allocation2_spill] sm:$0xff] }
 0xcbd   :  { %v16069_v44 = vpop.f32.mrf.mxu0 }
 0xcbe   :  { %v8868_v8 = vpop.f32.mrf.mxu3 }
 0xcc0   :  { %v8798_v62 = vpop.f32.mrf.mxu1  ;;  %v8113_v7 = vpop.xlane.xlu2 %8112 }
 0xcc1   :  { %10048 = vmatmul.msk.f32.gmra.mxu1 %vm595_vm1, %v8696_v6  ;;  %10923 = vrcp.f32 %v8113_v7  ;;  %v8559_v25 = vand.u32 2147483648, %v8113_v7  ;;  %v8557_v37 = vand.u32 2147483647, %v8113_v7  ;;  %vm8553_vm7 = vweird.f32 %v8113_v7 }
 0xcc3   :  { %v8560_v48 = vor.u32 1.1754944e-38, %v8559_v25  ;;  %vm8558_vm6 = vcmp.eq.f32.partialorder %v8557_v37, 8.507059e+37 }
 0xcc5   :  { %v16085_v25 = vpop.f32.mrf.mxu0 }
 0xcc6   :  { %v8871_v55 = vpop.f32.mrf.mxu3 }
 0xcc7   :  { %v10924_v9 = vpop.eup %10923 }
 0xcc8   :  { %v8549_v51 = vmul.f32 %v10924_v9, %v8113_v7  ;;  %v8801_v0 = vpop.f32.mrf.mxu1  ;;  %vm8554_vm4 = vweird.f32 %v10924_v9 }
 0xcc9   :  { %10049 = vmatmul.msk.f32.gmra.mxu1 %vm595_vm1, %v8728_v43  ;;  %vm8555_vm5 = vmor %vm8553_vm7, %vm8554_vm4  ;;  %v17221_v43 = vld [vmem:[#allocation92_spill] sm:$0xff] }
 0xcca   :  { %v8550_v28 = vsub.f32 1.0, %v8549_v51  ;;  %v17222_v51 = vld [vmem:[#allocation42_spill] sm:$0xff] }
 0xccc   :  { %v8551_v34 = vmul.f32 %v10924_v9, %v8550_v28  ;;  %v17223_v28 = vld [vmem:[#allocation95_spill] sm:$0xff] }
 0xcce   :  { %v8552_v42 = vadd.f32 %v10924_v9, %v8551_v34 }
 0xcd0   :  { %v8556_v36 = vsel %vm8555_vm5, %v10924_v9, %v8552_v42  ;;  %v8903_v23 = vpop.f32.mrf.mxu1 }
 0xcd1   :  { %10050 = vmatmul.msk.f32.gmra.mxu1 %vm595_vm1, %v8731_v2  ;;  %v8561_v5 = vsel %vm8558_vm6, %v8560_v48, %v8556_v36  ;;  %v17224_v48 = vld [vmem:[#allocation85_spill] sm:$0xff]  ;;  %v17225_v36 = vld [vmem:[#allocation111_spill] sm:$0xff] }
 0xcd2   :  { %v8593_v20 = vmul.f32 %v15898_v1, %v8561_v5 }
 0xcd3   :  { %v9043_v57 = vpop.f32.mrf.mxu2 }
 0xcd4   :  { %10042 = vmatmul.msk.f32.gmra.mxu2 %vm1214_vm2, %v8593_v20  ;;  %v16097_v20 = vpop.f32.mrf.mxu0 }
 0xcd6   :  { %v8973_v14 = vpop.f32.mrf.mxu3 }
 0xcd7   :  { %10063 = vmatmul.msk.f32.vlgmr.msra.gmra.mxu3 %vm595_vm1, %v8973_v14 }
 0xcd8   :  { %v8906_v15 = vpop.f32.mrf.mxu1 }
 0xcd9   :  { %10051 = vmatmul.msk.f32.gmra.mxu1 %vm595_vm1, %v8763_v16 }
 0xcdb   :  { %v9046_v13 = vpop.f32.mrf.mxu2 }
 0xcde   :  { %v8976_v49 = vpop.f32.mrf.mxu3 }
 0xcdf   :  { %10064 = vmatmul.msk.f32.gmra.mxu3 %vm595_vm1, %v8976_v49  ;;  %v17226_v49 = vld [vmem:[#allocation107_spill] sm:$0xff] }
 0xce0   :  { %v9008_v1 = vpop.f32.mrf.mxu1 }
 0xce1   :  { %10052 = vmatmul.msk.f32.gmra.mxu1 %vm595_vm1, %v8766_v47  ;;  %v17220_v47 = vld [vmem:[#allocation83_spill] sm:$0xff] }
 0xce7   :  { %10065 = vmatmul.msk.f32.gmra.mxu3 %vm595_vm1, %v9008_v1 }
 0xce8   :  { %v9011_v4 = vpop.f32.mrf.mxu1 }
 0xce9   :  { %10053 = vmatmul.msk.f32.gmra.mxu1 %vm595_vm1, %v8798_v62  ;;  %v4856_v62 = vadd.f32 %v17221_v43, %v17220_v47 }
 0xceb   :  { %v7140_v26 = vadd.f32 %v15419_v60, %v4856_v62  ;;  %v17235_v62 = vld [vmem:[#allocation129_spill] sm:$0xff] }
 0xcef   :  { %10066 = vmatmul.msk.f32.gmra.mxu3 %vm595_vm1, %v9011_v4  ;;  %v17228_v4 = vld [vmem:[#allocation124_spill] sm:$0xff] }
 0xcf1   :  { %10054 = vmatmul.msk.f32.gmra.mxu1 %vm595_vm1, %v8801_v0  ;;  %v4859_v0 = vadd.f32 %v17223_v28, %v17222_v51  ;;  %v17237_v28 = vld [vmem:[#allocation79_spill] sm:$0xff] }
 0xcf3   :  { %v7141_v37 = vadd.f32 %v15469_v46, %v4859_v0  ;;  %v17238_v0 = vld [vmem:[#allocation100_spill] sm:$0xff] }
 0xcf7   :  { %10067 = vmatmul.msk.f32.gmra.mxu3 %vm595_vm1, %v9043_v57 }
 0xcf9   :  { %10055 = vmatmul.msk.f32.gmra.mxu1 %vm595_vm1, %v8833_v10  ;;  %v4862_v10 = vadd.f32 %v17225_v36, %v17224_v48  ;;  %v17239_v36 = vld [vmem:[#allocation97_spill] sm:$0xff] }
 0xcff   :  { %10068 = vmatmul.msk.f32.gmra.mxu3 %vm595_vm1, %v9046_v13  ;;  %v16112_v13 = vpop.f32.mrf.mxu0 }
 0xd00   :  { %v9078_v32 = vpop.f32.mrf.mxu3 }
 0xd01   :  { %10056 = vmatmul.msk.f32.gmra.mxu1 %vm595_vm1, %v8836_v56 }
 0xd06   :  { %v9113_v61 = vpop.f32.mrf.mxu1 }
 0xd07   :  { %10069 = vmatmul.msk.f32.gmra.mxu3 %vm595_vm1, %v9078_v32 }
 0xd08   :  { %v9081_v29 = vpop.f32.mrf.mxu3 }
 0xd09   :  { %10057 = vmatmul.msk.f32.gmra.mxu1 %vm595_vm1, %v8868_v8 }
 0xd0e   :  { %v9116_v33 = vpop.f32.mrf.mxu1 }
 0xd0f   :  { %10070 = vmatmul.msk.f32.gmra.mxu3 %vm595_vm1, %v9081_v29  ;;  %v17230_v29 = vld [vmem:[#allocation71_spill] sm:$0xff] }
 0xd11   :  { %10058 = vmatmul.msk.f32.gmra.mxu1 %vm595_vm1, %v8871_v55 }
 0xd16   :  { %v9267_v27 = vpop.f32.mrf.mxu1 }
 0xd17   :  { %v9363_v21 = vadd.f32 %v9267_v27, %v7138_v18  ;;  %10071 = vmatmul.msk.f32.gmra.mxu3 %vm595_vm1, %v9113_v61 }
 0xd19   :  { %v9399_v22 = vadd.f32 %v16055_v58, %v9363_v21  ;;  %10059 = vmatmul.msk.f32.gmra.mxu1 %vm595_vm1, %v8903_v23  ;;  %v7142_v23 = vadd.f32 %v15476_v11, %v4862_v10  ;;  %v17240_v10 = vld [vmem:[#allocation121_spill] sm:$0xff] }
 0xd1b   :  { %v9431_v31 = vmax.f32 %v9399_v22, 0.0  ;;  %v7102_v22 = vpop.f32.mrf.mxu0 }
 0xd1d   :  { %9463 = vst.msk [vmem:[%s16323_s7] sm:$0xff] %vm98_vm0, %v9431_v31  ;;  %v4871_v31 = vadd.f32 %v17233_v40, %v17232_v50  ;;  %v17246_v50 = vld [vmem:[#allocation46_spill] sm:$0xff] }
 0xd1e   :  { %v9270_v39 = vpop.f32.mrf.mxu1 }
 0xd1f   :  { %v9364_v16 = vadd.f32 %v9270_v39, %v7139_v3  ;;  %10072 = vmatmul.msk.f32.gmra.mxu3 %vm595_vm1, %v9116_v33  ;;  %v17229_v33 = vld [vmem:[#allocation21_spill] sm:$0xff] }
 0xd20   :  { %v4868_v12 = vadd.f32 %v17230_v29, %v17229_v33  ;;  %v17234_v39 = vld [vmem:[#allocation5_spill] sm:$0xff] }
 0xd21   :  { %v9400_v6 = vadd.f32 %v16055_v58, %v9364_v16  ;;  %10060 = vmatmul.msk.f32.gmra.mxu1 %vm595_vm1, %v8906_v15  ;;  %v7145_v16 = vadd.f32 %v17234_v39, %v4871_v31 }
 0xd22   :  { %v7144_v18 = vadd.f32 %v17231_v19, %v4868_v12 }
 0xd23   :  { %v9432_v7 = vmax.f32 %v9400_v6, 0.0 }
 0xd25   :  { %9464 = vst.msk [vmem:[%s16323_s7 + $0x8] sm:$0xff] %vm98_vm0, %v9432_v7  ;;  %v17236_v7 = vld [vmem:[#allocation59_spill] sm:$0xff] }
 0xd26   :  { %v9273_v8 = vpop.f32.mrf.mxu1 }
 0xd27   :  { %v9365_v9 = vadd.f32 %v9273_v8, %v7140_v26  ;;  %v4874_v26 = vadd.f32 %v17236_v7, %v17235_v62  ;;  %v7105_v8 = vpop.f32.mrf.mxu0 }
 0xd29   :  { %v9401_v2 = vadd.f32 %v16055_v58, %v9365_v9  ;;  %10061 = vmatmul.msk.f32.gmra.mxu1 %vm595_vm1, %v8938_v54  ;;  %v17227_v54 = vld [vmem:[#allocation61_spill] sm:$0xff] }
 0xd2a   :  { %v4865_v1 = vadd.f32 %v17227_v54, %v17226_v49 }
 0xd2b   :  { %v9433_v34 = vmax.f32 %v9401_v2, 0.0  ;;  %v7146_v2 = vadd.f32 %v16016_v30, %v4874_v26  ;;  %v4877_v30 = vadd.f32 %v17240_v10, %v17239_v36 }
 0xd2c   :  { %v7143_v11 = vadd.f32 %v17228_v4, %v4865_v1 }
 0xd2d   :  { %9465 = vst.msk [vmem:[%s16323_s7 + $0x10] sm:$0xff] %vm98_vm0, %v9433_v34  ;;  %v4910_v34 = vadd.f32 %v17238_v0, %v17237_v28  ;;  %v17250_v28 = vld [vmem:[#allocation48_spill] sm:$0xff] }
 0xd2e   :  { %v9276_v60 = vpop.f32.mrf.mxu1 }
 0xd2f   :  { %v9366_v55 = vadd.f32 %v9276_v60, %v7141_v37  ;;  %v7158_v60 = vadd.f32 %v7102_v22, %v4910_v34 }
 0xd31   :  { %v9402_v42 = vadd.f32 %v16055_v58, %v9366_v55  ;;  %10062 = vmatmul.msk.f32.gmra.mxu1 %vm595_vm1, %v8941_v52 }
 0xd33   :  { %v9434_v5 = vmax.f32 %v9402_v42, 0.0 }
 0xd35   :  { %9466 = vst.msk [vmem:[%s16323_s7 + $0x18] sm:$0xff] %vm98_vm0, %v9434_v5 }
 0xd36   :  { %v9279_v46 = vpop.f32.mrf.mxu1 }
 0xd37   :  { %v9367_v14 = vadd.f32 %v9279_v46, %v7142_v23  ;;  %v7147_v46 = vadd.f32 %v16023_v63, %v4877_v30  ;;  %v17242_v63 = vld [vmem:[#allocation43_spill] sm:$0xff] }
 0xd39   :  { %v9403_v56 = vadd.f32 %v16055_v58, %v9367_v14  ;;  %v9148_v15 = vpop.f32.mrf.mxu2  ;;  %v7108_v14 = vpop.f32.mrf.mxu0 }
 0xd3a   :  { %10073 = vmatmul.msk.f32.gmra.mxu3 %vm595_vm1, %v9148_v15 }
 0xd3b   :  { %v9435_v52 = vmax.f32 %v9403_v56, 0.0 }
 0xd3d   :  { %9467 = vst.msk [vmem:[%s16323_s7 + $0x20] sm:$0xff] %vm98_vm0, %v9435_v52  ;;  %v17241_v52 = vld [vmem:[#allocation51_spill] sm:$0xff] }
 0xd3e   :  { %v9282_v57 = vpop.f32.mrf.mxu1  ;;  %v4913_v4 = vadd.f32 %v17242_v63, %v17241_v52 }
 0xd3f   :  { %v9368_v61 = vadd.f32 %v9282_v57, %v7143_v11  ;;  %v17243_v11 = vld [vmem:[#allocation131_spill] sm:$0xff] }
 0xd40   :  { %v17244_v57 = vld [vmem:[#allocation3_spill] sm:$0xff]  ;;  %v7159_v33 = vadd.f32 %v7105_v8, %v4913_v4 }
 0xd41   :  { %v9404_v32 = vadd.f32 %v16055_v58, %v9368_v61  ;;  %v4880_v61 = vadd.f32 %v17244_v57, %v17243_v11 }
 0xd43   :  { %v9436_v59 = vmax.f32 %v9404_v32, 0.0  ;;  %v7148_v29 = vadd.f32 %v16027_v35, %v4880_v61  ;;  %v17248_v35 = vld [vmem:[#allocation27_spill] sm:$0xff] }
 0xd45   :  { %9468 = vst.msk [vmem:[%s16323_s7 + $0x28] sm:$0xff] %vm98_vm0, %v9436_v59 }
 0xd46   :  { %v9285_v27 = vpop.f32.mrf.mxu1 }
 0xd47   :  { %v9369_v21 = vadd.f32 %v9285_v27, %v7144_v18  ;;  %v7111_v18 = vpop.f32.mrf.mxu0 }
 0xd49   :  { %v9405_v41 = vadd.f32 %v16055_v58, %v9369_v21 }
 0xd4b   :  { %v9437_v3 = vmax.f32 %v9405_v41, 0.0  ;;  %v17245_v41 = vld [vmem:[#allocation78_spill] sm:$0xff] }
 0xd4c   :  { %v4916_v40 = vadd.f32 %v17246_v50, %v17245_v41 }
 0xd4d   :  { %9469 = vst.msk [vmem:[%s16323_s7 + $0x30] sm:$0xff] %vm98_vm0, %v9437_v3  ;;  %v17247_v3 = vld [vmem:[#allocation132_spill] sm:$0xff] }
 0xd4e   :  { %v9288_v6 = vpop.f32.mrf.mxu1  ;;  %v4883_v39 = vadd.f32 %v17248_v35, %v17247_v3 }
 0xd4f   :  { %v9370_v47 = vadd.f32 %v9288_v6, %v7145_v16  ;;  %v7160_v6 = vadd.f32 %v7108_v14, %v4916_v40  ;;  %v17253_v14 = vld [vmem:[#allocation34_spill] sm:$0xff] }
 0xd51   :  { %v9406_v43 = vadd.f32 %v16055_v58, %v9370_v47  ;;  %v7149_v47 = vadd.f32 %v16031_v45, %v4883_v39  ;;  %v17252_v45 = vld [vmem:[#allocation45_spill] sm:$0xff] }
 0xd53   :  { %v9438_v9 = vmax.f32 %v9406_v43, 0.0 }
 0xd55   :  { %9470 = vst.msk [vmem:[%s16323_s7 + $0x38] sm:$0xff] %vm98_vm0, %v9438_v9  ;;  %v7114_v9 = vpop.f32.mrf.mxu0 }
 0xd56   :  { %v9291_v51 = vpop.f32.mrf.mxu1 }
 0xd57   :  { %v9371_v37 = vadd.f32 %v9291_v51, %v7146_v2  ;;  %v9151_v42 = vpop.f32.mrf.mxu2  ;;  %v17249_v51 = vld [vmem:[#allocation64_spill] sm:$0xff] }
 0xd58   :  { %10074 = vmatmul.msk.f32.gmra.mxu3 %vm595_vm1, %v9151_v42  ;;  %v4919_v0 = vadd.f32 %v17250_v28, %v17249_v51 }
 0xd59   :  { %v9407_v55 = vadd.f32 %v16055_v58, %v9371_v37  ;;  %v17251_v37 = vld [vmem:[#allocation110_spill] sm:$0xff] }
 0xd5a   :  { %v9327_v48 = vpop.f32.mrf.mxu3  ;;  %v7161_v42 = vadd.f32 %v7111_v18, %v4919_v0 }
 0xd5b   :  { %v9439_v5 = vmax.f32 %v9407_v55, 0.0  ;;  %v9383_v23 = vadd.f32 %v9327_v48, %v7158_v60  ;;  %v4886_v60 = vadd.f32 %v17252_v45, %v17251_v37 }
 0xd5d   :  { %9471 = vst.msk [vmem:[%s16323_s7 + $0x40] sm:$0xff] %vm98_vm0, %v9439_v5  ;;  %v9419_v56 = vadd.f32 %v16055_v58, %v9383_v23  ;;  %v7150_v48 = vadd.f32 %v16035_v38, %v4886_v60  ;;  %v7117_v52 = vpop.f32.mrf.mxu0 }
 0xd5e   :  { %v9294_v15 = vpop.f32.mrf.mxu1 }
 0xd5f   :  { %v9451_v49 = vmax.f32 %v9419_v56, 0.0  ;;  %v9372_v54 = vadd.f32 %v9294_v15, %v7147_v46  ;;  %v17254_v56 = vld [vmem:[#allocation86_spill] sm:$0xff] }
 0xd60   :  { %v4922_v15 = vadd.f32 %v17254_v56, %v17253_v14 }
 0xd61   :  { %9483 = vst.msk [vmem:[%s16323_s7 + $0xa0] sm:$0xff] %vm98_vm0, %v9451_v49  ;;  %v9408_v1 = vadd.f32 %v16055_v58, %v9372_v54  ;;  %v17255_v54 = vld [vmem:[#allocation109_spill] sm:$0xff] }
 0xd62   :  { %v9330_v12 = vpop.f32.mrf.mxu3  ;;  %v7162_v4 = vadd.f32 %v7114_v9, %v4922_v15 }
 0xd63   :  { %v9440_v32 = vmax.f32 %v9408_v1, 0.0  ;;  %v9384_v59 = vadd.f32 %v9330_v12, %v7159_v33  ;;  %v17256_v1 = vld [vmem:[#allocation52_spill] sm:$0xff] }
 0xd64   :  { %v4889_v38 = vadd.f32 %v17256_v1, %v17255_v54 }
 0xd65   :  { %9472 = vst.msk [vmem:[%s16323_s7 + $0x48] sm:$0xff] %vm98_vm0, %v9440_v32  ;;  %v9420_v21 = vadd.f32 %v16055_v58, %v9384_v59  ;;  %v17257_v59 = vld [vmem:[#allocation90_spill] sm:$0xff] }
 0xd66   :  { %v9297_v19 = vpop.f32.mrf.mxu1  ;;  %v7151_v11 = vadd.f32 %v16041_v53, %v4889_v38 }
 0xd67   :  { %v9373_v27 = vadd.f32 %v9297_v19, %v7148_v29  ;;  %v9452_v31 = vmax.f32 %v9420_v21, 0.0  ;;  %v17258_v19 = vld [vmem:[#allocation68_spill] sm:$0xff]  ;;  %v17259_v21 = vld [vmem:[#allocation105_spill] sm:$0xff] }
 0xd68   :  { %v4925_v18 = vadd.f32 %v17258_v19, %v17257_v59 }
 0xd69   :  { %v9409_v22 = vadd.f32 %v16055_v58, %v9373_v27  ;;  %9484 = vst.msk [vmem:[%s16323_s7 + $0xa8] sm:$0xff] %vm98_vm0, %v9452_v31  ;;  %v7120_v31 = vpop.f32.mrf.mxu0 }
 0xd6a   :  { %v9333_v43 = vpop.f32.mrf.mxu3  ;;  %v7163_v50 = vadd.f32 %v7117_v52, %v4925_v18 }
 0xd6b   :  { %v9441_v16 = vmax.f32 %v9409_v22, 0.0  ;;  %v9385_v62 = vadd.f32 %v9333_v43, %v7160_v6  ;;  %v17260_v22 = vld [vmem:[#allocation50_spill] sm:$0xff]  ;;  %v17261_v43 = vld [vmem:[#allocation76_spill] sm:$0xff] }
 0xd6c   :  { %v4892_v53 = vadd.f32 %v17260_v22, %v17259_v21 }
 0xd6d   :  { %9473 = vst.msk [vmem:[%s16323_s7 + $0x50] sm:$0xff] %vm98_vm0, %v9441_v16  ;;  %v9421_v8 = vadd.f32 %v16055_v58, %v9385_v62  ;;  %v17262_v62 = vld [vmem:[#allocation115_spill] sm:$0xff] }
 0xd6e   :  { %v9300_v7 = vpop.f32.mrf.mxu1  ;;  %v7152_v40 = vadd.f32 %v16045_v24, %v4892_v53  ;;  %v17264_v24 = vld [vmem:[#allocation38_spill] sm:$0xff] }
 0xd6f   :  { %v9374_v26 = vadd.f32 %v9300_v7, %v7149_v47  ;;  %v9453_v34 = vmax.f32 %v9421_v8, 0.0  ;;  %v4928_v7 = vadd.f32 %v17262_v62, %v17261_v43  ;;  %v17263_v8 = vld [vmem:[#allocation81_spill] sm:$0xff] }
 0xd70   :  { %v4895_v9 = vadd.f32 %v17264_v24, %v17263_v8 }
 0xd71   :  { %v9410_v2 = vadd.f32 %v16055_v58, %v9374_v26  ;;  %9485 = vst.msk [vmem:[%s16323_s7 + $0xb0] sm:$0xff] %vm98_vm0, %v9453_v34  ;;  %v7164_v51 = vadd.f32 %v7120_v31, %v4928_v7  ;;  %v7123_v0 = vpop.f32.mrf.mxu0 }
 0xd72   :  { %v9336_v36 = vpop.f32.mrf.mxu3  ;;  %v7153_v28 = vadd.f32 %v16057_v17, %v4895_v9  ;;  %v17268_v17 = vld [vmem:[#allocation73_spill] sm:$0xff] }
 0xd73   :  { %v9442_v55 = vmax.f32 %v9410_v2, 0.0  ;;  %v9386_v10 = vadd.f32 %v9336_v36, %v7161_v42  ;;  %v17266_v36 = vld [vmem:[#allocation93_spill] sm:$0xff] }
 0xd75   :  { %9474 = vst.msk [vmem:[%s16323_s7 + $0x58] sm:$0xff] %vm98_vm0, %v9442_v55  ;;  %v9422_v23 = vadd.f32 %v16055_v58, %v9386_v10 }
 0xd76   :  { %v9303_v30 = vpop.f32.mrf.mxu1 }
 0xd77   :  { %v9375_v5 = vadd.f32 %v9303_v30, %v7150_v48  ;;  %v9454_v49 = vmax.f32 %v9422_v23, 0.0  ;;  %v17265_v48 = vld [vmem:[#allocation24_spill] sm:$0xff] }
 0xd78   :  { %v4931_v10 = vadd.f32 %v17266_v36, %v17265_v48  ;;  %v17280_v48 = vld [vmem:[#allocation82_spill] sm:$0xff] }
 0xd79   :  { %v9411_v46 = vadd.f32 %v16055_v58, %v9375_v5  ;;  %9486 = vst.msk [vmem:[%s16323_s7 + $0xb8] sm:$0xff] %vm98_vm0, %v9454_v49  ;;  %v17267_v5 = vld [vmem:[#allocation113_spill] sm:$0xff]  ;;  %v7126_v1 = vpop.f32.mrf.mxu0 }
 0xd7a   :  { %v9339_v57 = vpop.f32.mrf.mxu3  ;;  %v4898_v23 = vadd.f32 %v17268_v17, %v17267_v5  ;;  %v7165_v14 = vadd.f32 %v7123_v0, %v4931_v10 }
 0xd7b   :  { %v9443_v63 = vmax.f32 %v9411_v46, 0.0  ;;  %v9387_v61 = vadd.f32 %v9339_v57, %v7162_v4  ;;  %v17269_v4 = vld [vmem:[#allocation4_spill] sm:$0xff] }
 0xd7c   :  { %v7154_v56 = vadd.f32 %v16069_v44, %v4898_v23  ;;  %v17272_v44 = vld [vmem:[#allocation19_spill] sm:$0xff] }
 0xd7d   :  { %9475 = vst.msk [vmem:[%s16323_s7 + $0x60] sm:$0xff] %vm98_vm0, %v9443_v63  ;;  %v9423_v29 = vadd.f32 %v16055_v58, %v9387_v61 }
 0xd7e   :  { %v9306_v32 = vpop.f32.mrf.mxu1 }
 0xd7f   :  { %v9376_v33 = vadd.f32 %v9306_v32, %v7151_v11  ;;  %v9455_v27 = vmax.f32 %v9423_v29, 0.0  ;;  %v17270_v11 = vld [vmem:[#allocation23_spill] sm:$0xff]  ;;  %v17271_v32 = vld [vmem:[#allocation112_spill] sm:$0xff] }
 0xd80   :  { %v4934_v57 = vadd.f32 %v17270_v11, %v17269_v4 }
 0xd81   :  { %v9412_v12 = vadd.f32 %v16055_v58, %v9376_v33  ;;  %9487 = vst.msk [vmem:[%s16323_s7 + $0xc0] sm:$0xff] %vm98_vm0, %v9455_v27  ;;  %v4901_v33 = vadd.f32 %v17272_v44, %v17271_v32  ;;  %v7129_v53 = vpop.f32.mrf.mxu0 }
 0xd82   :  { %v9342_v3 = vpop.f32.mrf.mxu3 }
 0xd83   :  { %v9444_v41 = vmax.f32 %v9412_v12, 0.0  ;;  %v9388_v35 = vadd.f32 %v9342_v3, %v7163_v50  ;;  %v7166_v12 = vadd.f32 %v7126_v1, %v4934_v57  ;;  %v7155_v59 = vadd.f32 %v16085_v25, %v4901_v33  ;;  %v17273_v50 = vld [vmem:[#allocation54_spill] sm:$0xff] }
 0xd84   :  { %v17276_v25 = vld [vmem:[#allocation74_spill] sm:$0xff] }
 0xd85   :  { %9476 = vst.msk [vmem:[%s16323_s7 + $0x68] sm:$0xff] %vm98_vm0, %v9444_v41  ;;  %v9424_v6 = vadd.f32 %v16055_v58, %v9388_v35  ;;  %v17275_v35 = vld [vmem:[#allocation106_spill] sm:$0xff] }
 0xd86   :  { %v9309_v39 = vpop.f32.mrf.mxu1 }
 0xd87   :  { %v9377_v16 = vadd.f32 %v9309_v39, %v7152_v40  ;;  %v9456_v26 = vmax.f32 %v9424_v6, 0.0  ;;  %v17274_v40 = vld [vmem:[#allocation70_spill] sm:$0xff]  ;;  %v4904_v39 = vadd.f32 %v17276_v25, %v17275_v35 }
 0xd88   :  { %v4937_v31 = vadd.f32 %v17274_v40, %v17273_v50 }
 0xd89   :  { %v9413_v47 = vadd.f32 %v16055_v58, %v9377_v16  ;;  %9488 = vst.msk [vmem:[%s16323_s7 + $0xc8] sm:$0xff] %vm98_vm0, %v9456_v26 }
 0xd8a   :  { %v9345_v34 = vpop.f32.mrf.mxu3  ;;  %v7167_v6 = vadd.f32 %v7129_v53, %v4937_v31 }
 0xd8b   :  { %v9445_v2 = vmax.f32 %v9413_v47, 0.0  ;;  %v9389_v37 = vadd.f32 %v9345_v34, %v7164_v51  ;;  %v7156_v47 = vadd.f32 %v16097_v20, %v4904_v39  ;;  %v17278_v51 = vld [vmem:[#allocation37_spill] sm:$0xff] }
 0xd8d   :  { %9477 = vst.msk [vmem:[%s16323_s7 + $0x70] sm:$0xff] %vm98_vm0, %v9445_v2  ;;  %v9425_v55 = vadd.f32 %v16055_v58, %v9389_v37  ;;  %v17277_v2 = vld [vmem:[#allocation32_spill] sm:$0xff] }
 0xd8e   :  { %v9312_v45 = vpop.f32.mrf.mxu1 }
 0xd8f   :  { %v9378_v60 = vadd.f32 %v9312_v45, %v7153_v28  ;;  %v9457_v30 = vmax.f32 %v9425_v55, 0.0  ;;  %v4907_v28 = vadd.f32 %v17278_v51, %v17277_v2  ;;  %v7132_v55 = vpop.f32.mrf.mxu0 }
 0xd91   :  { %v9414_v42 = vadd.f32 %v16055_v58, %v9378_v60  ;;  %9489 = vst.msk [vmem:[%s16323_s7 + $0xd0] sm:$0xff] %vm98_vm0, %v9457_v30  ;;  %v7157_v20 = vadd.f32 %v16112_v13, %v4907_v28 }
 0xd92   :  { %v9348_v15 = vpop.f32.mrf.mxu3 }
 0xd93   :  { %v9446_v46 = vmax.f32 %v9414_v42, 0.0  ;;  %v9390_v49 = vadd.f32 %v9348_v15, %v7165_v14  ;;  %v17279_v42 = vld [vmem:[#allocation126_spill] sm:$0xff]  ;;  %v17282_v14 = vld [vmem:[#allocation44_spill] sm:$0xff] }
 0xd94   :  { %v4940_v36 = vadd.f32 %v17280_v48, %v17279_v42 }
 0xd95   :  { %9478 = vst.msk [vmem:[%s16323_s7 + $0x78] sm:$0xff] %vm98_vm0, %v9446_v46  ;;  %v9426_v52 = vadd.f32 %v16055_v58, %v9390_v49  ;;  %v17281_v46 = vld [vmem:[#allocation75_spill] sm:$0xff] }
 0xd96   :  { %v9315_v54 = vpop.f32.mrf.mxu1  ;;  %v7168_v13 = vadd.f32 %v7132_v55, %v4940_v36 }
 0xd97   :  { %v9379_v38 = vadd.f32 %v9315_v54, %v7154_v56  ;;  %v9458_v61 = vmax.f32 %v9426_v52, 0.0  ;;  %v7135_v23 = vpop.f32.mrf.mxu0  ;;  %v4943_v56 = vadd.f32 %v17282_v14, %v17281_v46 }
 0xd99   :  { %v9415_v63 = vadd.f32 %v16055_v58, %v9379_v38  ;;  %9490 = vst.msk [vmem:[%s16323_s7 + $0xd8] sm:$0xff] %vm98_vm0, %v9458_v61  ;;  %v7169_v15 = vadd.f32 %v7135_v23, %v4943_v56 }
 0xd9a   :  { %v9351_v19 = vpop.f32.mrf.mxu3 }
 0xd9b   :  { %v9447_v29 = vmax.f32 %v9415_v63, 0.0  ;;  %v9391_v18 = vadd.f32 %v9351_v19, %v7166_v12 }
 0xd9d   :  { %9479 = vst.msk [vmem:[%s16323_s7 + $0x80] sm:$0xff] %vm98_vm0, %v9447_v29  ;;  %v9427_v22 = vadd.f32 %v16055_v58, %v9391_v18 }
 0xd9e   :  { %v9318_v27 = vpop.f32.mrf.mxu1 }
 0xd9f   :  { %v9380_v21 = vadd.f32 %v9318_v27, %v7155_v59  ;;  %v9459_v3 = vmax.f32 %v9427_v22, 0.0 }
 0xda1   :  { %v9416_v41 = vadd.f32 %v16055_v58, %v9380_v21  ;;  %9491 = vst.msk [vmem:[%s16323_s7 + $0xe0] sm:$0xff] %vm98_vm0, %v9459_v3 }
 0xda2   :  { %v9354_v43 = vpop.f32.mrf.mxu3 }
 0xda3   :  { %v9448_v16 = vmax.f32 %v9416_v41, 0.0  ;;  %v9392_v62 = vadd.f32 %v9354_v43, %v7167_v6 }
 0xda5   :  { %9480 = vst.msk [vmem:[%s16323_s7 + $0x88] sm:$0xff] %vm98_vm0, %v9448_v16  ;;  %v9428_v8 = vadd.f32 %v16055_v58, %v9392_v62 }
 0xda6   :  { %v9321_v7 = vpop.f32.mrf.mxu1 }
 0xda7   :  { %v9381_v26 = vadd.f32 %v9321_v7, %v7156_v47  ;;  %v9460_v9 = vmax.f32 %v9428_v8, 0.0 }
 0xda9   :  { %v9417_v24 = vadd.f32 %v16055_v58, %v9381_v26  ;;  %9492 = vst.msk [vmem:[%s16323_s7 + $0xe8] sm:$0xff] %vm98_vm0, %v9460_v9 }
 0xdab   :  { %v9449_v0 = vmax.f32 %v9417_v24, 0.0 }
 0xdad   :  { %9481 = vst.msk [vmem:[%s16323_s7 + $0x90] sm:$0xff] %vm98_vm0, %v9449_v0 }
 0xdae   :  { %v9324_v34 = vpop.f32.mrf.mxu1 }
 0xdaf   :  { %v9382_v37 = vadd.f32 %v9324_v34, %v7157_v20 }
 0xdb1   :  { %v9418_v45 = vadd.f32 %v16055_v58, %v9382_v37 }
 0xdb3   :  { %v9450_v60 = vmax.f32 %v9418_v45, 0.0 }
 0xdb5   :  { %9482 = vst.msk [vmem:[%s16323_s7 + $0x98] sm:$0xff] %vm98_vm0, %v9450_v60 }
 0xdbd   :  { %v9357_v10 = vpop.f32.mrf.mxu3 }
 0xdbe   :  { %v9393_v30 = vadd.f32 %v9357_v10, %v7168_v13 }
 0xdc0   :  { %v9429_v5 = vadd.f32 %v16055_v58, %v9393_v30 }
 0xdc2   :  { %v9461_v17 = vmax.f32 %v9429_v5, 0.0 }
 0xdc4   :  { %9493 = vst.msk [vmem:[%s16323_s7 + $0xf0] sm:$0xff] %vm98_vm0, %v9461_v17 }
 0xddb   :  { %v9360_v49 = vpop.f32.mrf.mxu3 }
 0xddc   :  { %v9394_v54 = vadd.f32 %v9360_v49, %v7169_v15 }
 0xdde   :  { %v9430_v1 = vadd.f32 %v16055_v58, %v9394_v54 }
 0xde0   :  { %v9462_v38 = vmax.f32 %v9430_v1, 0.0 }
 0xde2   :  { %9494 = vst.msk [vmem:[%s16323_s7 + $0xf8] sm:$0xff] %vm98_vm0, %v9462_v38 }

</bundles_post_ra>
